<compile_context>
chip_gen: v5e
topology: v5e:2x2
jax: 0.10.0
libtpu: 0.0.40
codegen_flags: <defaults>
</compile_context>

<pallas_src>
import jax
import jax.numpy as jnp
from jax import lax
from jax.experimental import pallas as pl
from jax.experimental.pallas import tpu as pltpu


# ----------------------------------------------------------------------------
# Pallas kernels
# ----------------------------------------------------------------------------
def _branch_conv_kernel(x_ref, w_ref, b_ref, o1_ref, o2_ref):
    """Merged 3x3 conv for all 8 branch convs (BN folded), phase-space layout.

    x_ref : (1, H+2, W+2, Cin)  bf16, input padded by 1 on every side.
    w_ref : (3, 3, Cin, 8*C)    bf16, channels = [branch1 | branch2] x phase x C.
    b_ref : (1, 8*C)            f32 folded bias (conv_b * bn_scale + bn_shift).
    o1_ref: (1, H, W, 4*C)      bf16 = relu(bn1_1(branch1))  -> conv3 input.
    o2_ref: (1, H, W, 4*C)      f32  = bn1_2(branch2)        -> final residual.
    """
    _, _, _, cin = x_ref.shape
    _, h, w, c4 = o1_ref.shape
    c8 = 2 * c4
    acc = jnp.zeros((h * w, c8), jnp.float32)
    for kh in range(3):
        for kw in range(3):
            xs = x_ref[0, kh:kh + h, kw:kw + w, :].reshape(h * w, cin)
            acc = acc + jnp.dot(xs, w_ref[kh, kw],
                                preferred_element_type=jnp.float32)
    acc = acc + b_ref[0]
    o1_ref[0] = jnp.maximum(acc[:, :c4], 0.0).reshape(h, w, c4).astype(o1_ref.dtype)
    o2_ref[0] = acc[:, c4:].reshape(h, w, c4)


def _phase_conv3_kernel(y_ref, r_ref, w_ref, b_ref, o_ref):
    """conv3 (3x3, pad 1 on the 2x-upsampled grid) expressed as an equivalent
    3x3 conv in low-res phase space, with bn2 folded, fused residual add + ReLU.

    y_ref: (1, H+2, W+2, 4*C) bf16 padded relu'd branch1 (phase layout).
    r_ref: (1, H, W, 4*C)     f32  branch2 residual (bn1_2 folded).
    w_ref: (3, 3, 4*C, 4*C)   bf16 phase-space conv3 weights (bn2 folded).
    b_ref: (1, 4*C)           f32  folded conv3 bias (tiled per phase).
    o_ref: (1, H, W, 4*C)     f32  final output, phase layout.
    """
    _, h, w, c4 = o_ref.shape
    acc = jnp.zeros((h * w, c4), jnp.float32)
    for kh in range(3):
        for kw in range(3):
            ys = y_ref[0, kh:kh + h, kw:kw + w, :].reshape(h * w, c4)
            acc = acc + jnp.dot(ys, w_ref[kh, kw],
                                preferred_element_type=jnp.float32)
    acc = acc + b_ref[0] + r_ref[0].reshape(h * w, c4)
    o_ref[0] = jnp.maximum(acc, 0.0).reshape(h, w, c4)


# ----------------------------------------------------------------------------
# pallas_call wrappers
# ----------------------------------------------------------------------------
_PARALLEL = pltpu.CompilerParams(dimension_semantics=("parallel",))


def _branch_conv(xp, wm, bm):
    B, Hp, Wp, Cin = xp.shape
    H, W = Hp - 2, Wp - 2
    C8 = wm.shape[-1]
    C4 = C8 // 2
    return pl.pallas_call(
        _branch_conv_kernel,
        out_shape=(jax.ShapeDtypeStruct((B, H, W, C4), jnp.bfloat16),
                   jax.ShapeDtypeStruct((B, H, W, C4), jnp.float32)),
        grid=(B,),
        in_specs=[
            pl.BlockSpec((1, Hp, Wp, Cin), lambda b: (b, 0, 0, 0)),
            pl.BlockSpec((3, 3, Cin, C8), lambda b: (0, 0, 0, 0)),
            pl.BlockSpec((1, C8), lambda b: (0, 0)),
        ],
        out_specs=(pl.BlockSpec((1, H, W, C4), lambda b: (b, 0, 0, 0)),
                   pl.BlockSpec((1, H, W, C4), lambda b: (b, 0, 0, 0))),
        compiler_params=_PARALLEL,
    )(xp, wm, bm)


def _phase_conv3(y_pad, resid, w3p, b3p):
    B, Hp, Wp, C4 = y_pad.shape
    H, W = Hp - 2, Wp - 2
    return pl.pallas_call(
        _phase_conv3_kernel,
        out_shape=jax.ShapeDtypeStruct((B, H, W, C4), jnp.float32),
        grid=(B,),
        in_specs=[
            pl.BlockSpec((1, Hp, Wp, C4), lambda b: (b, 0, 0, 0)),
            pl.BlockSpec((1, H, W, C4), lambda b: (b, 0, 0, 0)),
            pl.BlockSpec((3, 3, C4, C4), lambda b: (0, 0, 0, 0)),
            pl.BlockSpec((1, C4), lambda b: (0, 0)),
        ],
        out_specs=pl.BlockSpec((1, H, W, C4), lambda b: (b, 0, 0, 0)),
        compiler_params=_PARALLEL,
    )(y_pad, resid, w3p, b3p)


# ----------------------------------------------------------------------------
# Forward pass (wrapper: layout plumbing only)
# ----------------------------------------------------------------------------
@jax.jit
def up_project_forward(folded, x_nchw):
    """x_nchw: (B, in_ch, H, W) f32 (PyTorch layout) -> (B, out_ch, 2H, 2W)."""
    wm, bm = folded['wm'], folded['bm']
    w3p, b3p = folded['w3p'], folded['b3p']
    C = b3p.shape[-1] // 4

    x = jnp.transpose(x_nchw, (0, 2, 3, 1))                         # NHWC
    xp = jnp.pad(x, ((0, 0), (1, 1), (1, 1), (0, 0))).astype(jnp.bfloat16)

    b1, b2 = _branch_conv(xp, wm, bm)                               # phase space
    b1p = jnp.pad(b1, ((0, 0), (1, 1), (1, 1), (0, 0)))
    ph = _phase_conv3(b1p, b2, w3p, b3p)                            # (B,H,W,4C)

    # pixel shuffle: phase k = 2*dh + dw  ->  out[2h+dh, 2w+dw]  (free reshape)
    B, H, W, _ = ph.shape
    y = ph.reshape(B, H, W, 2, 2, C)
    y = jnp.transpose(y, (0, 1, 3, 2, 4, 5)).reshape(B, 2 * H, 2 * W, C)
    return jnp.transpose(y, (0, 3, 1, 2))                           # NCHW


# ----------------------------------------------------------------------------
# Parameter construction and offline folding
# ----------------------------------------------------------------------------
_KSIZES = {1: (3, 3), 2: (2, 3), 3: (3, 2), 4: (2, 2)}
# torch F.pad(x, (l, r, t, b)) per branch conv, as ((top, bottom), (left, right))
_PADS = {1: ((1, 1), (1, 1)), 2: ((1, 0), (1, 1)),
         3: ((1, 1), (1, 0)), 4: ((1, 0), (1, 0))}


def make_params(key, in_ch, out_ch, eps=1e-5):
    keys = iter(jax.random.split(key, 64))
    params = {}

    def conv_init(kh, kw, cin, cout):
        fan_in = kh * kw * cin
        w = jax.random.normal(next(keys), (kh, kw, cin, cout),
                              jnp.float32) / jnp.sqrt(float(fan_in))
        b = 0.01 * jax.random.normal(next(keys), (cout,), jnp.float32)
        return w, b

    for prefix in ('conv1', 'conv2'):
        for k, (kh, kw) in _KSIZES.items():
            w, b = conv_init(kh, kw, in_ch, out_ch)
            params[f'{prefix}_{k}_w'] = w
            params[f'{prefix}_{k}_b'] = b
    params['conv3_w'], params['conv3_b'] = conv_init(3, 3, out_ch, out_ch)

    def bn_init(cout):
        gamma = 1.0 + 0.1 * jax.random.normal(next(keys), (cout,), jnp.float32)
        beta = 0.1 * jax.random.normal(next(keys), (cout,), jnp.float32)
        mean = 0.1 * jax.random.normal(next(keys), (cout,), jnp.float32)
        var = 1.0 + 0.5 * jax.random.uniform(next(keys), (cout,), jnp.float32)
        scale = gamma / jnp.sqrt(var + eps)
        shift = beta - mean * scale
        return scale, shift

    for name in ('bn1_1', 'bn1_2', 'bn2'):
        s, t = bn_init(out_ch)
        params[f'{name}_scale'] = s
        params[f'{name}_shift'] = t
    return params


def fold_params(params, in_ch, out_ch):
    """Fold eval-mode BNs into conv weights and build the two fused conv tensors."""
    C = out_ch

    # --- stage 1: merge conv{1,2}_{1..4} into one 3x3 conv with Cout = 8*C ----
    # Smaller kernels are placed at the top-left of the 3x3 grid (their custom
    # asymmetric pads are exactly reproduced by the shared (1,1,1,1) pad).
    wm = jnp.zeros((3, 3, in_ch, 8 * C), jnp.float32)
    bm = jnp.zeros((8 * C,), jnp.float32)
    for bi, (prefix, bn) in enumerate((('conv1', 'bn1_1'), ('conv2', 'bn1_2'))):
        scale = params[f'{bn}_scale']
        shift = params[f'{bn}_shift']
        for k in range(1, 5):
            kh, kw = _KSIZES[k]
            w = params[f'{prefix}_{k}_w'] * scale[None, None, None, :]
            bias = params[f'{prefix}_{k}_b'] * scale + shift
            base = bi * 4 * C + (k - 1) * C            # phase k-1 = 2*dh + dw
            wm = wm.at[:kh, :kw, :, base:base + C].set(w)
            bm = bm.at[base:base + C].set(bias)

    # --- stage 2: conv3 (3x3, pad 1 on the 2x grid) as a 3x3 phase-space conv -
    # For output phase (dh,dw) and high-res tap (a,b), the touched pixel maps to
    # low-res row h + (dh+a)//2 (tap A = (dh+a)//2 + 1 on the pad-1 input) with
    # input phase (dh+a)%2; columns analogously.
    w3 = params['conv3_w'] * params['bn2_scale'][None, None, None, :]
    b3 = params['conv3_b'] * params['bn2_scale'] + params['bn2_shift']
    w3p = jnp.zeros((3, 3, 4 * C, 4 * C), jnp.float32)
    for dh in range(2):
        for dw in range(2):
            op = 2 * dh + dw
            for a in (-1, 0, 1):
                rA = (dh + a) // 2 + 1
                ph = (dh + a) % 2
                for bb in (-1, 0, 1):
                    cB = (dw + bb) // 2 + 1
                    pw = (dw + bb) % 2
                    ip = 2 * ph + pw
                    w3p = w3p.at[rA, cB, ip * C:(ip + 1) * C,
                                 op * C:(op + 1) * C].set(w3[a + 1, bb + 1])
    b3p = jnp.tile(b3, 4)

    return {
        'wm': wm.astype(jnp.bfloat16),
        'bm': bm.reshape(1, 8 * C),
        'w3p': w3p.astype(jnp.bfloat16),
        'b3p': b3p.reshape(1, 4 * C),
    }


# ----------------------------------------------------------------------------
# Pure-JAX f32 reference faithful to the original PyTorch module (eval-mode BN)
# ----------------------------------------------------------------------------
@jax.jit
def reference_forward(params, x_nchw):
    x = jnp.transpose(x_nchw, (0, 2, 3, 1))  # NHWC

    def conv(xp, w, b):
        return lax.conv_general_dilated(
            xp, w, window_strides=(1, 1), padding='VALID',
            dimension_numbers=('NHWC', 'HWIO', 'NHWC')) + b

    def branch(prefix):
        outs = []
        for k in range(1, 5):
            (pt, pb), (pleft, pright) = _PADS[k]
            xp = jnp.pad(x, ((0, 0), (pt, pb), (pleft, pright), (0, 0)))
            outs.append(conv(xp, params[f'{prefix}_{k}_w'],
                             params[f'{prefix}_{k}_b']))
        o1, o2, o3, o4 = outs
        B, H, W, C = o1.shape
        top = jnp.stack([o1, o2], axis=3).reshape(B, H, 2 * W, C)
        bot = jnp.stack([o3, o4], axis=3).reshape(B, H, 2 * W, C)
        return jnp.stack([top, bot], axis=2).reshape(B, 2 * H, 2 * W, C)

    def bn(t, name):
        return t * params[f'{name}_scale'] + params[f'{name}_shift']

    out1 = branch('conv1')
    out2 = branch('conv2')
    y = jnp.maximum(bn(out1, 'bn1_1'), 0.0)
    y = conv(jnp.pad(y, ((0, 0), (1, 1), (1, 1), (0, 0))),
             params['conv3_w'], params['conv3_b'])
    out = jnp.maximum(bn(y, 'bn2') + bn(out2, 'bn1_2'), 0.0)
    return jnp.transpose(out, (0, 3, 1, 2))


# ----------------------------------------------------------------------------
if __name__ == "__main__":
    key = jax.random.PRNGKey(0)
    in_ch, out_ch = 4, 8
    B, H, W = 2, 16, 16

    kp, kx = jax.random.split(key)
    params = make_params(kp, in_ch, out_ch)
    folded = fold_params(params, in_ch, out_ch)
    x = jax.random.normal(kx, (B, in_ch, H, W), jnp.float32)  # NCHW like torch

    out = jax.block_until_ready(up_project_forward(folded, x))
    ref = jax.block_until_ready(reference_forward(params, x))

    assert out.shape == (B, out_ch, 2 * H, 2 * W), out.shape
    assert out.dtype == jnp.float32
    assert bool(jnp.all(jnp.isfinite(out)))
    assert bool(jnp.all(out >= 0.0))  # final ReLU
    # bf16 MXU operands (f32 accumulate) vs f32 XLA reference -> loose bound;
    # a structural bug would produce O(1) errors, bf16 rounding stays << 0.3.
    max_err = float(jnp.max(jnp.abs(out - ref)))
    assert max_err < 0.3, f"kernel/ref mismatch: max abs err = {max_err}"

    print("KERNEL_OK")
</pallas_src>

<mosaic_0001>
module attributes {stable_mosaic.version = 11 : i64} {
  func.func @_branch_conv_kernel(%arg0: i32, %arg1: memref<1x18x18x4xbf16, #tpu.memory_space<vmem>>, %arg2: memref<3x3x4x64xbf16, #tpu.memory_space<vmem>>, %arg3: memref<1x64xf32, #tpu.memory_space<vmem>>, %arg4: memref<1x16x16x32xbf16, #tpu.memory_space<vmem>>, %arg5: memref<1x16x16x32xf32, #tpu.memory_space<vmem>>) attributes {dimension_semantics = [#tpu.dimension_semantics<parallel>], iteration_bounds = array<i64: 2>, scalar_prefetch = 0 : i64, scratch_operands = 0 : i64, tpu.core_type = #tpu.core_type<tc>, window_params = [{transform_indices = @transform_0, window_bounds = array<i64: 1, 18, 18, 4>}, {pipeline_mode = #tpu.pipeline_mode<synchronous>, transform_indices = @transform_1, window_bounds = array<i64: 3, 3, 4, 64>}, {pipeline_mode = #tpu.pipeline_mode<synchronous>, transform_indices = @transform_2, window_bounds = array<i64: 1, 64>}, {transform_indices = @transform_3, window_bounds = array<i64: 1, 16, 16, 32>}, {transform_indices = @transform_4, window_bounds = array<i64: 1, 16, 16, 32>}]} {
    %cst = arith.constant 0.000000e+00 : f32
    %0 = vector.broadcast %cst : f32 to vector<256x64xf32>
    %c0 = arith.constant 0 : index
    %c0_0 = arith.constant 0 : index
    %c0_1 = arith.constant 0 : index
    %c0_2 = arith.constant 0 : index
    %1 = vector.load %arg1[%c0, %c0_0, %c0_1, %c0_2] : memref<1x18x18x4xbf16, #tpu.memory_space<vmem>>, vector<1x16x16x4xbf16>
    %2 = vector.shape_cast %1 : vector<1x16x16x4xbf16> to vector<16x16x4xbf16>
    %3 = vector.shape_cast %2 : vector<16x16x4xbf16> to vector<256x4xbf16>
    %c0_3 = arith.constant 0 : index
    %c0_4 = arith.constant 0 : index
    %c0_5 = arith.constant 0 : index
    %c0_6 = arith.constant 0 : index
    %4 = vector.load %arg2[%c0_3, %c0_4, %c0_5, %c0_6] : memref<3x3x4x64xbf16, #tpu.memory_space<vmem>>, vector<1x1x4x64xbf16>
    %5 = vector.shape_cast %4 : vector<1x1x4x64xbf16> to vector<4x64xbf16>
    %cst_7 = arith.constant dense<0.000000e+00> : vector<256x64xf32>
    %6 = tpu.matmul %3, %5, %cst_7 {dimension_numbers = #tpu.dot_dimension_numbers<[1], [0], [0], [1], [0, 0, 1, 1], [], []>} : vector<256x4xbf16>, vector<4x64xbf16>, vector<256x64xf32> -> vector<256x64xf32>
    %7 = arith.addf %0, %6 : vector<256x64xf32>
    %c0_8 = arith.constant 0 : index
    %c0_9 = arith.constant 0 : index
    %c1 = arith.constant 1 : index
    %c0_10 = arith.constant 0 : index
    %8 = vector.load %arg1[%c0_8, %c0_9, %c1, %c0_10] : memref<1x18x18x4xbf16, #tpu.memory_space<vmem>>, vector<1x16x16x4xbf16>
    %9 = vector.shape_cast %8 : vector<1x16x16x4xbf16> to vector<16x16x4xbf16>
    %10 = vector.shape_cast %9 : vector<16x16x4xbf16> to vector<256x4xbf16>
    %c0_11 = arith.constant 0 : index
    %c1_12 = arith.constant 1 : index
    %c0_13 = arith.constant 0 : index
    %c0_14 = arith.constant 0 : index
    %11 = vector.load %arg2[%c0_11, %c1_12, %c0_13, %c0_14] : memref<3x3x4x64xbf16, #tpu.memory_space<vmem>>, vector<1x1x4x64xbf16>
    %12 = vector.shape_cast %11 : vector<1x1x4x64xbf16> to vector<4x64xbf16>
    %cst_15 = arith.constant dense<0.000000e+00> : vector<256x64xf32>
    %13 = tpu.matmul %10, %12, %cst_15 {dimension_numbers = #tpu.dot_dimension_numbers<[1], [0], [0], [1], [0, 0, 1, 1], [], []>} : vector<256x4xbf16>, vector<4x64xbf16>, vector<256x64xf32> -> vector<256x64xf32>
    %14 = arith.addf %7, %13 : vector<256x64xf32>
    %c0_16 = arith.constant 0 : index
    %c0_17 = arith.constant 0 : index
    %c2 = arith.constant 2 : index
    %c0_18 = arith.constant 0 : index
    %15 = vector.load %arg1[%c0_16, %c0_17, %c2, %c0_18] : memref<1x18x18x4xbf16, #tpu.memory_space<vmem>>, vector<1x16x16x4xbf16>
    %16 = vector.shape_cast %15 : vector<1x16x16x4xbf16> to vector<16x16x4xbf16>
    %17 = vector.shape_cast %16 : vector<16x16x4xbf16> to vector<256x4xbf16>
    %c0_19 = arith.constant 0 : index
    %c2_20 = arith.constant 2 : index
    %c0_21 = arith.constant 0 : index
    %c0_22 = arith.constant 0 : index
    %18 = vector.load %arg2[%c0_19, %c2_20, %c0_21, %c0_22] : memref<3x3x4x64xbf16, #tpu.memory_space<vmem>>, vector<1x1x4x64xbf16>
    %19 = vector.shape_cast %18 : vector<1x1x4x64xbf16> to vector<4x64xbf16>
    %cst_23 = arith.constant dense<0.000000e+00> : vector<256x64xf32>
    %20 = tpu.matmul %17, %19, %cst_23 {dimension_numbers = #tpu.dot_dimension_numbers<[1], [0], [0], [1], [0, 0, 1, 1], [], []>} : vector<256x4xbf16>, vector<4x64xbf16>, vector<256x64xf32> -> vector<256x64xf32>
    %21 = arith.addf %14, %20 : vector<256x64xf32>
    %c0_24 = arith.constant 0 : index
    %c1_25 = arith.constant 1 : index
    %c0_26 = arith.constant 0 : index
    %c0_27 = arith.constant 0 : index
    %22 = vector.load %arg1[%c0_24, %c1_25, %c0_26, %c0_27] : memref<1x18x18x4xbf16, #tpu.memory_space<vmem>>, vector<1x16x16x4xbf16>
    %23 = vector.shape_cast %22 : vector<1x16x16x4xbf16> to vector<16x16x4xbf16>
    %24 = vector.shape_cast %23 : vector<16x16x4xbf16> to vector<256x4xbf16>
    %c1_28 = arith.constant 1 : index
    %c0_29 = arith.constant 0 : index
    %c0_30 = arith.constant 0 : index
    %c0_31 = arith.constant 0 : index
    %25 = vector.load %arg2[%c1_28, %c0_29, %c0_30, %c0_31] : memref<3x3x4x64xbf16, #tpu.memory_space<vmem>>, vector<1x1x4x64xbf16>
    %26 = vector.shape_cast %25 : vector<1x1x4x64xbf16> to vector<4x64xbf16>
    %cst_32 = arith.constant dense<0.000000e+00> : vector<256x64xf32>
    %27 = tpu.matmul %24, %26, %cst_32 {dimension_numbers = #tpu.dot_dimension_numbers<[1], [0], [0], [1], [0, 0, 1, 1], [], []>} : vector<256x4xbf16>, vector<4x64xbf16>, vector<256x64xf32> -> vector<256x64xf32>
    %28 = arith.addf %21, %27 : vector<256x64xf32>
    %c0_33 = arith.constant 0 : index
    %c1_34 = arith.constant 1 : index
    %c1_35 = arith.constant 1 : index
    %c0_36 = arith.constant 0 : index
    %29 = vector.load %arg1[%c0_33, %c1_34, %c1_35, %c0_36] : memref<1x18x18x4xbf16, #tpu.memory_space<vmem>>, vector<1x16x16x4xbf16>
    %30 = vector.shape_cast %29 : vector<1x16x16x4xbf16> to vector<16x16x4xbf16>
    %31 = vector.shape_cast %30 : vector<16x16x4xbf16> to vector<256x4xbf16>
    %c1_37 = arith.constant 1 : index
    %c1_38 = arith.constant 1 : index
    %c0_39 = arith.constant 0 : index
    %c0_40 = arith.constant 0 : index
    %32 = vector.load %arg2[%c1_37, %c1_38, %c0_39, %c0_40] : memref<3x3x4x64xbf16, #tpu.memory_space<vmem>>, vector<1x1x4x64xbf16>
    %33 = vector.shape_cast %32 : vector<1x1x4x64xbf16> to vector<4x64xbf16>
    %cst_41 = arith.constant dense<0.000000e+00> : vector<256x64xf32>
    %34 = tpu.matmul %31, %33, %cst_41 {dimension_numbers = #tpu.dot_dimension_numbers<[1], [0], [0], [1], [0, 0, 1, 1], [], []>} : vector<256x4xbf16>, vector<4x64xbf16>, vector<256x64xf32> -> vector<256x64xf32>
    %35 = arith.addf %28, %34 : vector<256x64xf32>
    %c0_42 = arith.constant 0 : index
    %c1_43 = arith.constant 1 : index
    %c2_44 = arith.constant 2 : index
    %c0_45 = arith.constant 0 : index
    %36 = vector.load %arg1[%c0_42, %c1_43, %c2_44, %c0_45] : memref<1x18x18x4xbf16, #tpu.memory_space<vmem>>, vector<1x16x16x4xbf16>
    %37 = vector.shape_cast %36 : vector<1x16x16x4xbf16> to vector<16x16x4xbf16>
    %38 = vector.shape_cast %37 : vector<16x16x4xbf16> to vector<256x4xbf16>
    %c1_46 = arith.constant 1 : index
    %c2_47 = arith.constant 2 : index
    %c0_48 = arith.constant 0 : index
    %c0_49 = arith.constant 0 : index
    %39 = vector.load %arg2[%c1_46, %c2_47, %c0_48, %c0_49] : memref<3x3x4x64xbf16, #tpu.memory_space<vmem>>, vector<1x1x4x64xbf16>
    %40 = vector.shape_cast %39 : vector<1x1x4x64xbf16> to vector<4x64xbf16>
    %cst_50 = arith.constant dense<0.000000e+00> : vector<256x64xf32>
    %41 = tpu.matmul %38, %40, %cst_50 {dimension_numbers = #tpu.dot_dimension_numbers<[1], [0], [0], [1], [0, 0, 1, 1], [], []>} : vector<256x4xbf16>, vector<4x64xbf16>, vector<256x64xf32> -> vector<256x64xf32>
    %42 = arith.addf %35, %41 : vector<256x64xf32>
    %c0_51 = arith.constant 0 : index
    %c2_52 = arith.constant 2 : index
    %c0_53 = arith.constant 0 : index
    %c0_54 = arith.constant 0 : index
    %43 = vector.load %arg1[%c0_51, %c2_52, %c0_53, %c0_54] : memref<1x18x18x4xbf16, #tpu.memory_space<vmem>>, vector<1x16x16x4xbf16>
    %44 = vector.shape_cast %43 : vector<1x16x16x4xbf16> to vector<16x16x4xbf16>
    %45 = vector.shape_cast %44 : vector<16x16x4xbf16> to vector<256x4xbf16>
    %c2_55 = arith.constant 2 : index
    %c0_56 = arith.constant 0 : index
    %c0_57 = arith.constant 0 : index
    %c0_58 = arith.constant 0 : index
    %46 = vector.load %arg2[%c2_55, %c0_56, %c0_57, %c0_58] : memref<3x3x4x64xbf16, #tpu.memory_space<vmem>>, vector<1x1x4x64xbf16>
    %47 = vector.shape_cast %46 : vector<1x1x4x64xbf16> to vector<4x64xbf16>
    %cst_59 = arith.constant dense<0.000000e+00> : vector<256x64xf32>
    %48 = tpu.matmul %45, %47, %cst_59 {dimension_numbers = #tpu.dot_dimension_numbers<[1], [0], [0], [1], [0, 0, 1, 1], [], []>} : vector<256x4xbf16>, vector<4x64xbf16>, vector<256x64xf32> -> vector<256x64xf32>
    %49 = arith.addf %42, %48 : vector<256x64xf32>
    %c0_60 = arith.constant 0 : index
    %c2_61 = arith.constant 2 : index
    %c1_62 = arith.constant 1 : index
    %c0_63 = arith.constant 0 : index
    %50 = vector.load %arg1[%c0_60, %c2_61, %c1_62, %c0_63] : memref<1x18x18x4xbf16, #tpu.memory_space<vmem>>, vector<1x16x16x4xbf16>
    %51 = vector.shape_cast %50 : vector<1x16x16x4xbf16> to vector<16x16x4xbf16>
    %52 = vector.shape_cast %51 : vector<16x16x4xbf16> to vector<256x4xbf16>
    %c2_64 = arith.constant 2 : index
    %c1_65 = arith.constant 1 : index
    %c0_66 = arith.constant 0 : index
    %c0_67 = arith.constant 0 : index
    %53 = vector.load %arg2[%c2_64, %c1_65, %c0_66, %c0_67] : memref<3x3x4x64xbf16, #tpu.memory_space<vmem>>, vector<1x1x4x64xbf16>
    %54 = vector.shape_cast %53 : vector<1x1x4x64xbf16> to vector<4x64xbf16>
    %cst_68 = arith.constant dense<0.000000e+00> : vector<256x64xf32>
    %55 = tpu.matmul %52, %54, %cst_68 {dimension_numbers = #tpu.dot_dimension_numbers<[1], [0], [0], [1], [0, 0, 1, 1], [], []>} : vector<256x4xbf16>, vector<4x64xbf16>, vector<256x64xf32> -> vector<256x64xf32>
    %56 = arith.addf %49, %55 : vector<256x64xf32>
    %c0_69 = arith.constant 0 : index
    %c2_70 = arith.constant 2 : index
    %c2_71 = arith.constant 2 : index
    %c0_72 = arith.constant 0 : index
    %57 = vector.load %arg1[%c0_69, %c2_70, %c2_71, %c0_72] : memref<1x18x18x4xbf16, #tpu.memory_space<vmem>>, vector<1x16x16x4xbf16>
    %58 = vector.shape_cast %57 : vector<1x16x16x4xbf16> to vector<16x16x4xbf16>
    %59 = vector.shape_cast %58 : vector<16x16x4xbf16> to vector<256x4xbf16>
    %c2_73 = arith.constant 2 : index
    %c2_74 = arith.constant 2 : index
    %c0_75 = arith.constant 0 : index
    %c0_76 = arith.constant 0 : index
    %60 = vector.load %arg2[%c2_73, %c2_74, %c0_75, %c0_76] : memref<3x3x4x64xbf16, #tpu.memory_space<vmem>>, vector<1x1x4x64xbf16>
    %61 = vector.shape_cast %60 : vector<1x1x4x64xbf16> to vector<4x64xbf16>
    %cst_77 = arith.constant dense<0.000000e+00> : vector<256x64xf32>
    %62 = tpu.matmul %59, %61, %cst_77 {dimension_numbers = #tpu.dot_dimension_numbers<[1], [0], [0], [1], [0, 0, 1, 1], [], []>} : vector<256x4xbf16>, vector<4x64xbf16>, vector<256x64xf32> -> vector<256x64xf32>
    %63 = arith.addf %56, %62 : vector<256x64xf32>
    %c0_78 = arith.constant 0 : index
    %c0_79 = arith.constant 0 : index
    %64 = vector.load %arg3[%c0_78, %c0_79] : memref<1x64xf32, #tpu.memory_space<vmem>>, vector<1x64xf32>
    %65 = vector.shape_cast %64 : vector<1x64xf32> to vector<64xf32>
    %66 = vector.shape_cast %65 : vector<64xf32> to vector<1x64xf32>
    %67 = vector.broadcast %66 : vector<1x64xf32> to vector<256x64xf32>
    %68 = arith.addf %63, %67 : vector<256x64xf32>
    %69 = vector.extract_strided_slice %68 {offsets = [0, 0], sizes = [256, 32], strides = [1, 1]} : vector<256x64xf32> to vector<256x32xf32>
    %cst_80 = arith.constant 0.000000e+00 : f32
    %70 = vector.broadcast %cst_80 : f32 to vector<256x32xf32>
    %71 = arith.maximumf %69, %70 : vector<256x32xf32>
    %72 = vector.shape_cast %71 : vector<256x32xf32> to vector<16x16x32xf32>
    %73 = arith.truncf %72 : vector<16x16x32xf32> to vector<16x16x32xbf16>
    %c0_81 = arith.constant 0 : index
    %c0_82 = arith.constant 0 : index
    %c0_83 = arith.constant 0 : index
    %c0_84 = arith.constant 0 : index
    %74 = vector.load %arg4[%c0_81, %c0_82, %c0_83, %c0_84] : memref<1x16x16x32xbf16, #tpu.memory_space<vmem>>, vector<1x16x16x32xbf16>
    %75 = vector.shape_cast %74 : vector<1x16x16x32xbf16> to vector<16x16x32xbf16>
    %76 = vector.shape_cast %73 : vector<16x16x32xbf16> to vector<1x16x16x32xbf16>
    tpu.vector_store %arg4[%c0_81, %c0_82, %c0_83, %c0_84], %76 {strides = array<i32>} : memref<1x16x16x32xbf16, #tpu.memory_space<vmem>>, vector<1x16x16x32xbf16>,
    %77 = vector.extract_strided_slice %68 {offsets = [0, 32], sizes = [256, 32], strides = [1, 1]} : vector<256x64xf32> to vector<256x32xf32>
    %78 = vector.shape_cast %77 : vector<256x32xf32> to vector<16x16x32xf32>
    %c0_85 = arith.constant 0 : index
    %c0_86 = arith.constant 0 : index
    %c0_87 = arith.constant 0 : index
    %c0_88 = arith.constant 0 : index
    %79 = vector.load %arg5[%c0_85, %c0_86, %c0_87, %c0_88] : memref<1x16x16x32xf32, #tpu.memory_space<vmem>>, vector<1x16x16x32xf32>
    %80 = vector.shape_cast %79 : vector<1x16x16x32xf32> to vector<16x16x32xf32>
    %81 = vector.shape_cast %78 : vector<16x16x32xf32> to vector<1x16x16x32xf32>
    tpu.vector_store %arg5[%c0_85, %c0_86, %c0_87, %c0_88], %81 {strides = array<i32>} : memref<1x16x16x32xf32, #tpu.memory_space<vmem>>, vector<1x16x16x32xf32>,
    return
  }
  func.func @transform_0(%arg0: i32) -> (i32, i32, i32, i32) {
    %c0_i32 = arith.constant 0 : i32
    %c0_i32_0 = arith.constant 0 : i32
    %c0_i32_1 = arith.constant 0 : i32
    %c0_i32_2 = arith.constant 0 : i32
    return %arg0, %c0_i32, %c0_i32_0, %c0_i32_1 : i32, i32, i32, i32
  }
  func.func @transform_1(%arg0: i32) -> (i32, i32, i32, i32) {
    %c0_i32 = arith.constant 0 : i32
    %c0_i32_0 = arith.constant 0 : i32
    %c0_i32_1 = arith.constant 0 : i32
    %c0_i32_2 = arith.constant 0 : i32
    %c0_i32_3 = arith.constant 0 : i32
    return %c0_i32, %c0_i32_0, %c0_i32_1, %c0_i32_2 : i32, i32, i32, i32
  }
  func.func @transform_2(%arg0: i32) -> (i32, i32) {
    %c0_i32 = arith.constant 0 : i32
    %c0_i32_0 = arith.constant 0 : i32
    %c0_i32_1 = arith.constant 0 : i32
    return %c0_i32, %c0_i32_0 : i32, i32
  }
  func.func @transform_3(%arg0: i32) -> (i32, i32, i32, i32) {
    %c0_i32 = arith.constant 0 : i32
    %c0_i32_0 = arith.constant 0 : i32
    %c0_i32_1 = arith.constant 0 : i32
    %c0_i32_2 = arith.constant 0 : i32
    return %arg0, %c0_i32, %c0_i32_0, %c0_i32_1 : i32, i32, i32, i32
  }
  func.func @transform_4(%arg0: i32) -> (i32, i32, i32, i32) {
    %c0_i32 = arith.constant 0 : i32
    %c0_i32_0 = arith.constant 0 : i32
    %c0_i32_1 = arith.constant 0 : i32
    %c0_i32_2 = arith.constant 0 : i32
    return %arg0, %c0_i32, %c0_i32_0, %c0_i32_1 : i32, i32, i32, i32
  }
}

module attributes {stable_mosaic.version = 11 : i64} {
  func.func @_phase_conv3_kernel(%arg0: i32, %arg1: memref<1x18x18x32xbf16, #tpu.memory_space<vmem>>, %arg2: memref<1x16x16x32xf32, #tpu.memory_space<vmem>>, %arg3: memref<3x3x32x32xbf16, #tpu.memory_space<vmem>>, %arg4: memref<1x32xf32, #tpu.memory_space<vmem>>, %arg5: memref<1x16x16x32xf32, #tpu.memory_space<vmem>>) attributes {dimension_semantics = [#tpu.dimension_semantics<parallel>], iteration_bounds = array<i64: 2>, scalar_prefetch = 0 : i64, scratch_operands = 0 : i64, tpu.core_type = #tpu.core_type<tc>, window_params = [{transform_indices = @transform_0, window_bounds = array<i64: 1, 18, 18, 32>}, {transform_indices = @transform_1, window_bounds = array<i64: 1, 16, 16, 32>}, {pipeline_mode = #tpu.pipeline_mode<synchronous>, transform_indices = @transform_2, window_bounds = array<i64: 3, 3, 32, 32>}, {pipeline_mode = #tpu.pipeline_mode<synchronous>, transform_indices = @transform_3, window_bounds = array<i64: 1, 32>}, {transform_indices = @transform_4, window_bounds = array<i64: 1, 16, 16, 32>}]} {
    %cst = arith.constant 0.000000e+00 : f32
    %0 = vector.broadcast %cst : f32 to vector<256x32xf32>
    %c0 = arith.constant 0 : index
    %c0_0 = arith.constant 0 : index
    %c0_1 = arith.constant 0 : index
    %c0_2 = arith.constant 0 : index
    %1 = vector.load %arg1[%c0, %c0_0, %c0_1, %c0_2] : memref<1x18x18x32xbf16, #tpu.memory_space<vmem>>, vector<1x16x16x32xbf16>
    %2 = vector.shape_cast %1 : vector<1x16x16x32xbf16> to vector<16x16x32xbf16>
    %3 = vector.shape_cast %2 : vector<16x16x32xbf16> to vector<256x32xbf16>
    %c0_3 = arith.constant 0 : index
    %c0_4 = arith.constant 0 : index
    %c0_5 = arith.constant 0 : index
    %c0_6 = arith.constant 0 : index
    %4 = vector.load %arg3[%c0_3, %c0_4, %c0_5, %c0_6] : memref<3x3x32x32xbf16, #tpu.memory_space<vmem>>, vector<1x1x32x32xbf16>
    %5 = vector.shape_cast %4 : vector<1x1x32x32xbf16> to vector<32x32xbf16>
    %cst_7 = arith.constant dense<0.000000e+00> : vector<256x32xf32>
    %6 = tpu.matmul %3, %5, %cst_7 {dimension_numbers = #tpu.dot_dimension_numbers<[1], [0], [0], [1], [0, 0, 1, 1], [], []>} : vector<256x32xbf16>, vector<32x32xbf16>, vector<256x32xf32> -> vector<256x32xf32>
    %7 = arith.addf %0, %6 : vector<256x32xf32>
    %c0_8 = arith.constant 0 : index
    %c0_9 = arith.constant 0 : index
    %c1 = arith.constant 1 : index
    %c0_10 = arith.constant 0 : index
    %8 = vector.load %arg1[%c0_8, %c0_9, %c1, %c0_10] : memref<1x18x18x32xbf16, #tpu.memory_space<vmem>>, vector<1x16x16x32xbf16>
    %9 = vector.shape_cast %8 : vector<1x16x16x32xbf16> to vector<16x16x32xbf16>
    %10 = vector.shape_cast %9 : vector<16x16x32xbf16> to vector<256x32xbf16>
    %c0_11 = arith.constant 0 : index
    %c1_12 = arith.constant 1 : index
    %c0_13 = arith.constant 0 : index
    %c0_14 = arith.constant 0 : index
    %11 = vector.load %arg3[%c0_11, %c1_12, %c0_13, %c0_14] : memref<3x3x32x32xbf16, #tpu.memory_space<vmem>>, vector<1x1x32x32xbf16>
    %12 = vector.shape_cast %11 : vector<1x1x32x32xbf16> to vector<32x32xbf16>
    %cst_15 = arith.constant dense<0.000000e+00> : vector<256x32xf32>
    %13 = tpu.matmul %10, %12, %cst_15 {dimension_numbers = #tpu.dot_dimension_numbers<[1], [0], [0], [1], [0, 0, 1, 1], [], []>} : vector<256x32xbf16>, vector<32x32xbf16>, vector<256x32xf32> -> vector<256x32xf32>
    %14 = arith.addf %7, %13 : vector<256x32xf32>
    %c0_16 = arith.constant 0 : index
    %c0_17 = arith.constant 0 : index
    %c2 = arith.constant 2 : index
    %c0_18 = arith.constant 0 : index
    %15 = vector.load %arg1[%c0_16, %c0_17, %c2, %c0_18] : memref<1x18x18x32xbf16, #tpu.memory_space<vmem>>, vector<1x16x16x32xbf16>
    %16 = vector.shape_cast %15 : vector<1x16x16x32xbf16> to vector<16x16x32xbf16>
    %17 = vector.shape_cast %16 : vector<16x16x32xbf16> to vector<256x32xbf16>
    %c0_19 = arith.constant 0 : index
    %c2_20 = arith.constant 2 : index
    %c0_21 = arith.constant 0 : index
    %c0_22 = arith.constant 0 : index
    %18 = vector.load %arg3[%c0_19, %c2_20, %c0_21, %c0_22] : memref<3x3x32x32xbf16, #tpu.memory_space<vmem>>, vector<1x1x32x32xbf16>
    %19 = vector.shape_cast %18 : vector<1x1x32x32xbf16> to vector<32x32xbf16>
    %cst_23 = arith.constant dense<0.000000e+00> : vector<256x32xf32>
    %20 = tpu.matmul %17, %19, %cst_23 {dimension_numbers = #tpu.dot_dimension_numbers<[1], [0], [0], [1], [0, 0, 1, 1], [], []>} : vector<256x32xbf16>, vector<32x32xbf16>, vector<256x32xf32> -> vector<256x32xf32>
    %21 = arith.addf %14, %20 : vector<256x32xf32>
    %c0_24 = arith.constant 0 : index
    %c1_25 = arith.constant 1 : index
    %c0_26 = arith.constant 0 : index
    %c0_27 = arith.constant 0 : index
    %22 = vector.load %arg1[%c0_24, %c1_25, %c0_26, %c0_27] : memref<1x18x18x32xbf16, #tpu.memory_space<vmem>>, vector<1x16x16x32xbf16>
    %23 = vector.shape_cast %22 : vector<1x16x16x32xbf16> to vector<16x16x32xbf16>
    %24 = vector.shape_cast %23 : vector<16x16x32xbf16> to vector<256x32xbf16>
    %c1_28 = arith.constant 1 : index
    %c0_29 = arith.constant 0 : index
    %c0_30 = arith.constant 0 : index
    %c0_31 = arith.constant 0 : index
    %25 = vector.load %arg3[%c1_28, %c0_29, %c0_30, %c0_31] : memref<3x3x32x32xbf16, #tpu.memory_space<vmem>>, vector<1x1x32x32xbf16>
    %26 = vector.shape_cast %25 : vector<1x1x32x32xbf16> to vector<32x32xbf16>
    %cst_32 = arith.constant dense<0.000000e+00> : vector<256x32xf32>
    %27 = tpu.matmul %24, %26, %cst_32 {dimension_numbers = #tpu.dot_dimension_numbers<[1], [0], [0], [1], [0, 0, 1, 1], [], []>} : vector<256x32xbf16>, vector<32x32xbf16>, vector<256x32xf32> -> vector<256x32xf32>
    %28 = arith.addf %21, %27 : vector<256x32xf32>
    %c0_33 = arith.constant 0 : index
    %c1_34 = arith.constant 1 : index
    %c1_35 = arith.constant 1 : index
    %c0_36 = arith.constant 0 : index
    %29 = vector.load %arg1[%c0_33, %c1_34, %c1_35, %c0_36] : memref<1x18x18x32xbf16, #tpu.memory_space<vmem>>, vector<1x16x16x32xbf16>
    %30 = vector.shape_cast %29 : vector<1x16x16x32xbf16> to vector<16x16x32xbf16>
    %31 = vector.shape_cast %30 : vector<16x16x32xbf16> to vector<256x32xbf16>
    %c1_37 = arith.constant 1 : index
    %c1_38 = arith.constant 1 : index
    %c0_39 = arith.constant 0 : index
    %c0_40 = arith.constant 0 : index
    %32 = vector.load %arg3[%c1_37, %c1_38, %c0_39, %c0_40] : memref<3x3x32x32xbf16, #tpu.memory_space<vmem>>, vector<1x1x32x32xbf16>
    %33 = vector.shape_cast %32 : vector<1x1x32x32xbf16> to vector<32x32xbf16>
    %cst_41 = arith.constant dense<0.000000e+00> : vector<256x32xf32>
    %34 = tpu.matmul %31, %33, %cst_41 {dimension_numbers = #tpu.dot_dimension_numbers<[1], [0], [0], [1], [0, 0, 1, 1], [], []>} : vector<256x32xbf16>, vector<32x32xbf16>, vector<256x32xf32> -> vector<256x32xf32>
    %35 = arith.addf %28, %34 : vector<256x32xf32>
    %c0_42 = arith.constant 0 : index
    %c1_43 = arith.constant 1 : index
    %c2_44 = arith.constant 2 : index
    %c0_45 = arith.constant 0 : index
    %36 = vector.load %arg1[%c0_42, %c1_43, %c2_44, %c0_45] : memref<1x18x18x32xbf16, #tpu.memory_space<vmem>>, vector<1x16x16x32xbf16>
    %37 = vector.shape_cast %36 : vector<1x16x16x32xbf16> to vector<16x16x32xbf16>
    %38 = vector.shape_cast %37 : vector<16x16x32xbf16> to vector<256x32xbf16>
    %c1_46 = arith.constant 1 : index
    %c2_47 = arith.constant 2 : index
    %c0_48 = arith.constant 0 : index
    %c0_49 = arith.constant 0 : index
    %39 = vector.load %arg3[%c1_46, %c2_47, %c0_48, %c0_49] : memref<3x3x32x32xbf16, #tpu.memory_space<vmem>>, vector<1x1x32x32xbf16>
    %40 = vector.shape_cast %39 : vector<1x1x32x32xbf16> to vector<32x32xbf16>
    %cst_50 = arith.constant dense<0.000000e+00> : vector<256x32xf32>
    %41 = tpu.matmul %38, %40, %cst_50 {dimension_numbers = #tpu.dot_dimension_numbers<[1], [0], [0], [1], [0, 0, 1, 1], [], []>} : vector<256x32xbf16>, vector<32x32xbf16>, vector<256x32xf32> -> vector<256x32xf32>
    %42 = arith.addf %35, %41 : vector<256x32xf32>
    %c0_51 = arith.constant 0 : index
    %c2_52 = arith.constant 2 : index
    %c0_53 = arith.constant 0 : index
    %c0_54 = arith.constant 0 : index
    %43 = vector.load %arg1[%c0_51, %c2_52, %c0_53, %c0_54] : memref<1x18x18x32xbf16, #tpu.memory_space<vmem>>, vector<1x16x16x32xbf16>
    %44 = vector.shape_cast %43 : vector<1x16x16x32xbf16> to vector<16x16x32xbf16>
    %45 = vector.shape_cast %44 : vector<16x16x32xbf16> to vector<256x32xbf16>
    %c2_55 = arith.constant 2 : index
    %c0_56 = arith.constant 0 : index
    %c0_57 = arith.constant 0 : index
    %c0_58 = arith.constant 0 : index
    %46 = vector.load %arg3[%c2_55, %c0_56, %c0_57, %c0_58] : memref<3x3x32x32xbf16, #tpu.memory_space<vmem>>, vector<1x1x32x32xbf16>
    %47 = vector.shape_cast %46 : vector<1x1x32x32xbf16> to vector<32x32xbf16>
    %cst_59 = arith.constant dense<0.000000e+00> : vector<256x32xf32>
    %48 = tpu.matmul %45, %47, %cst_59 {dimension_numbers = #tpu.dot_dimension_numbers<[1], [0], [0], [1], [0, 0, 1, 1], [], []>} : vector<256x32xbf16>, vector<32x32xbf16>, vector<256x32xf32> -> vector<256x32xf32>
    %49 = arith.addf %42, %48 : vector<256x32xf32>
    %c0_60 = arith.constant 0 : index
    %c2_61 = arith.constant 2 : index
    %c1_62 = arith.constant 1 : index
    %c0_63 = arith.constant 0 : index
    %50 = vector.load %arg1[%c0_60, %c2_61, %c1_62, %c0_63] : memref<1x18x18x32xbf16, #tpu.memory_space<vmem>>, vector<1x16x16x32xbf16>
    %51 = vector.shape_cast %50 : vector<1x16x16x32xbf16> to vector<16x16x32xbf16>
    %52 = vector.shape_cast %51 : vector<16x16x32xbf16> to vector<256x32xbf16>
    %c2_64 = arith.constant 2 : index
    %c1_65 = arith.constant 1 : index
    %c0_66 = arith.constant 0 : index
    %c0_67 = arith.constant 0 : index
    %53 = vector.load %arg3[%c2_64, %c1_65, %c0_66, %c0_67] : memref<3x3x32x32xbf16, #tpu.memory_space<vmem>>, vector<1x1x32x32xbf16>
    %54 = vector.shape_cast %53 : vector<1x1x32x32xbf16> to vector<32x32xbf16>
    %cst_68 = arith.constant dense<0.000000e+00> : vector<256x32xf32>
    %55 = tpu.matmul %52, %54, %cst_68 {dimension_numbers = #tpu.dot_dimension_numbers<[1], [0], [0], [1], [0, 0, 1, 1], [], []>} : vector<256x32xbf16>, vector<32x32xbf16>, vector<256x32xf32> -> vector<256x32xf32>
    %56 = arith.addf %49, %55 : vector<256x32xf32>
    %c0_69 = arith.constant 0 : index
    %c2_70 = arith.constant 2 : index
    %c2_71 = arith.constant 2 : index
    %c0_72 = arith.constant 0 : index
    %57 = vector.load %arg1[%c0_69, %c2_70, %c2_71, %c0_72] : memref<1x18x18x32xbf16, #tpu.memory_space<vmem>>, vector<1x16x16x32xbf16>
    %58 = vector.shape_cast %57 : vector<1x16x16x32xbf16> to vector<16x16x32xbf16>
    %59 = vector.shape_cast %58 : vector<16x16x32xbf16> to vector<256x32xbf16>
    %c2_73 = arith.constant 2 : index
    %c2_74 = arith.constant 2 : index
    %c0_75 = arith.constant 0 : index
    %c0_76 = arith.constant 0 : index
    %60 = vector.load %arg3[%c2_73, %c2_74, %c0_75, %c0_76] : memref<3x3x32x32xbf16, #tpu.memory_space<vmem>>, vector<1x1x32x32xbf16>
    %61 = vector.shape_cast %60 : vector<1x1x32x32xbf16> to vector<32x32xbf16>
    %cst_77 = arith.constant dense<0.000000e+00> : vector<256x32xf32>
    %62 = tpu.matmul %59, %61, %cst_77 {dimension_numbers = #tpu.dot_dimension_numbers<[1], [0], [0], [1], [0, 0, 1, 1], [], []>} : vector<256x32xbf16>, vector<32x32xbf16>, vector<256x32xf32> -> vector<256x32xf32>
    %63 = arith.addf %56, %62 : vector<256x32xf32>
    %c0_78 = arith.constant 0 : index
    %c0_79 = arith.constant 0 : index
    %64 = vector.load %arg4[%c0_78, %c0_79] : memref<1x32xf32, #tpu.memory_space<vmem>>, vector<1x32xf32>
    %65 = vector.shape_cast %64 : vector<1x32xf32> to vector<32xf32>
    %66 = vector.shape_cast %65 : vector<32xf32> to vector<1x32xf32>
    %67 = vector.broadcast %66 : vector<1x32xf32> to vector<256x32xf32>
    %68 = arith.addf %63, %67 : vector<256x32xf32>
    %c0_80 = arith.constant 0 : index
    %c0_81 = arith.constant 0 : index
    %c0_82 = arith.constant 0 : index
    %c0_83 = arith.constant 0 : index
    %69 = vector.load %arg2[%c0_80, %c0_81, %c0_82, %c0_83] : memref<1x16x16x32xf32, #tpu.memory_space<vmem>>, vector<1x16x16x32xf32>
    %70 = vector.shape_cast %69 : vector<1x16x16x32xf32> to vector<16x16x32xf32>
    %71 = vector.shape_cast %70 : vector<16x16x32xf32> to vector<256x32xf32>
    %72 = arith.addf %68, %71 : vector<256x32xf32>
    %cst_84 = arith.constant 0.000000e+00 : f32
    %73 = vector.broadcast %cst_84 : f32 to vector<256x32xf32>
    %74 = arith.maximumf %72, %73 : vector<256x32xf32>
    %75 = vector.shape_cast %74 : vector<256x32xf32> to vector<16x16x32xf32>
    %c0_85 = arith.constant 0 : index
    %c0_86 = arith.constant 0 : index
    %c0_87 = arith.constant 0 : index
    %c0_88 = arith.constant 0 : index
    %76 = vector.load %arg5[%c0_85, %c0_86, %c0_87, %c0_88] : memref<1x16x16x32xf32, #tpu.memory_space<vmem>>, vector<1x16x16x32xf32>
    %77 = vector.shape_cast %76 : vector<1x16x16x32xf32> to vector<16x16x32xf32>
    %78 = vector.shape_cast %75 : vector<16x16x32xf32> to vector<1x16x16x32xf32>
    tpu.vector_store %arg5[%c0_85, %c0_86, %c0_87, %c0_88], %78 {strides = array<i32>} : memref<1x16x16x32xf32, #tpu.memory_space<vmem>>, vector<1x16x16x32xf32>,
    return
  }
  func.func @transform_0(%arg0: i32) -> (i32, i32, i32, i32) {
    %c0_i32 = arith.constant 0 : i32
    %c0_i32_0 = arith.constant 0 : i32
    %c0_i32_1 = arith.constant 0 : i32
    %c0_i32_2 = arith.constant 0 : i32
    return %arg0, %c0_i32, %c0_i32_0, %c0_i32_1 : i32, i32, i32, i32
  }
  func.func @transform_1(%arg0: i32) -> (i32, i32, i32, i32) {
    %c0_i32 = arith.constant 0 : i32
    %c0_i32_0 = arith.constant 0 : i32
    %c0_i32_1 = arith.constant 0 : i32
    %c0_i32_2 = arith.constant 0 : i32
    return %arg0, %c0_i32, %c0_i32_0, %c0_i32_1 : i32, i32, i32, i32
  }
  func.func @transform_2(%arg0: i32) -> (i32, i32, i32, i32) {
    %c0_i32 = arith.constant 0 : i32
    %c0_i32_0 = arith.constant 0 : i32
    %c0_i32_1 = arith.constant 0 : i32
    %c0_i32_2 = arith.constant 0 : i32
    %c0_i32_3 = arith.constant 0 : i32
    return %c0_i32, %c0_i32_0, %c0_i32_1, %c0_i32_2 : i32, i32, i32, i32
  }
  func.func @transform_3(%arg0: i32) -> (i32, i32) {
    %c0_i32 = arith.constant 0 : i32
    %c0_i32_0 = arith.constant 0 : i32
    %c0_i32_1 = arith.constant 0 : i32
    return %c0_i32, %c0_i32_0 : i32, i32
  }
  func.func @transform_4(%arg0: i32) -> (i32, i32, i32, i32) {
    %c0_i32 = arith.constant 0 : i32
    %c0_i32_0 = arith.constant 0 : i32
    %c0_i32_1 = arith.constant 0 : i32
    %c0_i32_2 = arith.constant 0 : i32
    return %arg0, %c0_i32, %c0_i32_0, %c0_i32_1 : i32, i32, i32, i32
  }
}

</mosaic_0001>

<bundles_post_ra>
// kernel: up_project_forward.2
= control target key start
LH: loop header
LB: loop body
LE: loop exit
PB: predicated region body
PF: predicated region fallthrough
CT: control target
= control target key end

     0   :  { %s5250_s15 = smov 0   ;;  %s6769_s0 = inlined_call_operand.vmem [shape: bf16[2,18,18,4], index: 0, kind: input, shape index: {}]   ;;  %s6770_s1 = inlined_call_operand.vmem [shape: bf16[3,3,4,64], index: 1, kind: input, shape index: {}]   ;;  %s6771_s2 = inlined_call_operand.vmem [shape: f32[1,64], index: 2, kind: input, shape index: {}]   ;;  %s6772_s3 = inlined_call_operand.vmem [shape: bf16[2,16,16,32], index: 3, kind: output, shape index: {0}]   ;;  %s6773_s4 = inlined_call_operand.vmem [shape: f32[2,16,16,32], index: 4, kind: output, shape index: {1}]  }
   0x1 LB: > { %s4505_s16 = sadd.s32 4294967295, %s5222_s15   ;;  %p4509_p0 = scmp.ge.s32.totalorder %s5222_s15, 1  ;;  %s5222_s15 = sphi %s5250_s15, %s15_s15  }
   0x2   : > { %p165_p1 = scmp.lt.s32.totalorder %s5222_s15, 3 }
   0x4   : > { %p166_p2 = pnand %p4509_p0, %p165_p1 }
   0x6   : > { %169 = sbr.rel (%p166_p2) target bundleno = 871 (0x367), region = 32 }
   0xb   : > { %v4515_v0 = vld [vmem:[%s6770_s1 + $0x2] sm:$0x3]  ;;  %vm747_vm0 = vcmask 1041408   ;;  %p196_p3 = scmp.lt.s32.totalorder %s4505_s16, 1  ;;  %v4628_v2 = vld [vmem:[%s6770_s1 + $0x4] sm:$0x3] }
   0xc   : > { %v749_v1 = vsel %vm747_vm0, %v4515_v0, 0  ;;  %v1322_v3 = vsel %vm747_vm0, %v4628_v2, 0  ;;  %v4677_v4 = vld [vmem:[%s6770_s1 + $0x6] sm:$0x3]  ;;  %v244_v5 = vld [vmem:[%s6770_s1] sm:$0x3] }
   0xd   : > { %5151 = vmatpush.bf16.msra.mxu1 %v749_v1  ;;  %5152 = vmatpush.bf16.msra.mxu2 %v749_v1  ;;  %s6785_s16 = smov (!%p196_p3, %s4505_s16), 1  ;;  %v4806_v6 = vld [vmem:[%s6770_s1 + $0x8] sm:$0x3]  ;;  %v1609_v7 = vsel %vm747_vm0, %v4677_v4, 0  ;;  %v969_v8 = vsel %vm747_vm0, %v244_v5, 0  ;;  %vm698_vm4 = vcmask 31744  }
   0xe   : > { %5153 = vmatpush.bf16.msra.mxu3 %v749_v1  ;;  %758 = vmatpush.bf16.msra.mxu0 %v749_v1  ;;  %s5154_s27 = smul.u32 216, %s6785_s16  ;;  %v2263_v9 = vsel %vm747_vm0, %v4806_v6, 0  ;;  %vm261_vm1 = vsmask.f32 3328  ;;  %vm262_vm2 = vsmask.f32 7440 }
   0xf   : > { %vm5296_vm3 = vmor %vm261_vm1, %vm262_vm2  ;;  %vm1108_vm5 = vcmask 1042432   ;;  %vm1109_vm6 = vcmask 1046532   ;;  %s5101_s17 = sshll.u32 %s6785_s16, 7  ;;  %vm4223_vm8 = vcmask 257024   ;;  %s5224_s18 = smov 96   ;;  %vm4384_vm9 = vcmask 261120  }
  0x10   : > { %s5284_s30 = scalar_lea.vmem %s6769_s0, %s5154_s27  ;;  %vm5470_vm7 = vmor %vm1108_vm5, %vm1109_vm6  ;;  %s6330_s21 = scalar_lea.vmem %s6772_s3, %s5101_s17 }
  0x11   : > { %1331 = vmatpush.bf16.msrb.mxu2 %v1322_v3  ;;  %978 = vmatpush.bf16.msrb.mxu1 %v969_v8  ;;  %v220_v10 = vld [vmem:[%s5284_s30 + $0x30] sm:$0xf]  ;;  %v221_v11 = vld [vmem:[%s5284_s30 + $0x34] sm:$0xf]  ;;  %v249_v12 = vld [vmem:[%s5284_s30 + $0x38] sm:$0x1] }
  0x12   : > { %1618 = vmatpush.bf16.msrb.mxu3 %v1609_v7  ;;  %2272 = vmatpush.bf16.msrb.mxu0 %v2263_v9  ;;  %v361_v13 = vshrl.u32 %v220_v10, 16  ;;  %v364_v14 = vshll.u32 %v220_v10, 16  ;;  %v370_v15 = vshll.u32 %v221_v11, 16  ;;  %v374_v16 = vshrl.u32 %v221_v11, 16  ;;  %v228_v17 = vld [vmem:[%s5284_s30 + $0x60] sm:$0xf] }
  0x13   : > { %v380_v18 = vshll.u32 %v249_v12, 16  ;;  %v229_v19 = vld [vmem:[%s5284_s30 + $0x64] sm:$0xf]  ;;  %v253_v20 = vld [vmem:[%s5284_s30 + $0x68] sm:$0x1]  ;;  %v457_v21 = vshrl.u32 %v228_v17, 16 }
  0x14   : > { %v363_v22 = vrot.slane %v361_v13, 4  ;;  %v366_v23 = vrot.slane %v364_v14, 5  ;;  %v372_v24 = vrot.slane %v370_v15, 5  ;;  %v376_v25 = vrot.slane %v374_v16, 4  ;;  %v236_v26 = vld [vmem:[%s5284_s30 + $0x90] sm:$0xf] }
  0x15   : > { %v382_v27 = vrot.slane %v380_v18, 5  ;;  %v459_v28 = vrot.slane %v457_v21, 4  ;;  %v460_v29 = vshll.u32 %v228_v17, 16  ;;  %v466_v30 = vshll.u32 %v229_v19, 16  ;;  %v237_v35 = vld [vmem:[%s5284_s30 + $0x94] sm:$0xf] }
  0x16   : > { %v367_v31 = vor.u32 %v366_v23, %v363_v22  ;;  %v377_v32 = vor.u32 %v376_v25, %v372_v24  ;;  %v470_v33 = vshrl.u32 %v229_v19, 16  ;;  %v476_v34 = vshll.u32 %v253_v20, 16  ;;  %v257_v45 = vld [vmem:[%s5284_s30 + $0x98] sm:$0x1]  ;;  %v212_v61 = vld [vmem:[%s5284_s30] sm:$0xf] }
  0x17   : > { %v462_v37 = vrot.slane %v460_v29, 5  ;;  %v468_v38 = vrot.slane %v466_v30, 5  ;;  %v553_v39 = vshrl.u32 %v236_v26, 16  ;;  %v556_v47 = vshll.u32 %v236_v26, 16  ;;  %v5309_v1 = vld [vmem:[%s5284_s30 + $0x4] sm:$0xf] }
  0x18   : > { %v368_v40 = vrot.slane %v367_v31, 4  ;;  %v378_v41 = vrot.slane %v377_v32, 4  ;;  %v472_v42 = vrot.slane %v470_v33, 4  ;;  %v478_v43 = vrot.slane %v476_v34, 5  ;;  %v5312_v2 = vld [vmem:[%s5284_s30 + $0x8] sm:$0x1] }
  0x19   : > { %v463_v44 = vor.u32 %v462_v37, %v459_v28  ;;  %v555_v46 = vrot.slane %v553_v39, 4  ;;  %v562_v48 = vshll.u32 %v237_v35, 16  ;;  %v566_v52 = vshrl.u32 %v237_v35, 16  ;;  %v222_v19 = vld [vmem:[%s5284_s30 + $0x3c] sm:$0xf]  ;;  %s5102_s22 = sshll.u32 %s6785_s16, 8 }
  0x1a   : > { %v373_v49 = vsel %vm5296_vm3, %v368_v40, %v372_v24  ;;  %v383_v50 = vsel %vm5296_vm3, %v378_v41, %v382_v27  ;;  %v473_v51 = vor.u32 %v472_v42, %v468_v38  ;;  %v558_v56 = vrot.slane %v556_v47, 5  ;;  %v5324_v20 = vld [vmem:[%s5284_s30 + $0x40] sm:$0xf]  ;;  %v5329_v25 = vld [vmem:[%s5284_s30 + $0x44] sm:$0x1]  ;;  %s6609_s25 = scalar_lea.vmem %s6773_s4, %s5102_s22 }
  0x1b   : > { %v658_v53 = vunpack.c.l.b16 %v373_v49  ;;  %v659_v54 = vunpack.c.l.b16 %v383_v50  ;;  %v464_v55 = vrot.slane %v463_v44, 4  ;;  %v564_v58 = vrot.slane %v562_v48, 5  ;;  %v230_v33 = vld [vmem:[%s5284_s30 + $0x6c] sm:$0xf]  ;;  %v254_v47 = vld [vmem:[%s5284_s30 + $0x74] sm:$0x1] }
  0x1c   : > { %v474_v57 = vrot.slane %v473_v51, 4  ;;  %v568_v59 = vrot.slane %v566_v52, 4  ;;  %v572_v60 = vshll.u32 %v257_v45, 16  ;;  %v559_v0 = vor.u32 %v558_v56, %v555_v46 }
  0x1d   : > { %v686_v62 = vpack.c.b16 %v659_v54, %v658_v53  ;;  %v469_v63 = vsel %vm5296_vm3, %v464_v55, %v468_v38  ;;  %v265_v9 = vshrl.u32 %v212_v61, 16  ;;  %v268_v10 = vshll.u32 %v212_v61, 16  ;;  %v238_v61 = vld [vmem:[%s5284_s30 + $0x9c] sm:$0xf] }
  0x1e   : > { %v479_v3 = vsel %vm5296_vm3, %v474_v57, %v478_v43  ;;  %v666_v4 = vunpack.c.l.b16 %v469_v63  ;;  %v569_v5 = vor.u32 %v568_v59, %v564_v58  ;;  %v574_v6 = vrot.slane %v572_v60, 5  ;;  %v231_v43 = vld [vmem:[%s5284_s30 + $0x70] sm:$0xf] }
  0x1f   : > { %4520 = vmatmul.msk.bf16.vlgmr.msra.gmra.mxu1 %vm698_vm4, %v686_v62  ;;  %v667_v7 = vunpack.c.l.b16 %v479_v3  ;;  %v560_v8 = vrot.slane %v559_v0, 4  ;;  %v274_v12 = vshll.u32 %v5309_v1, 16  ;;  %v278_v13 = vshrl.u32 %v5309_v1, 16  ;;  %v239_v3 = vld [vmem:[%s5284_s30 + $0xa0] sm:$0xf] }
  0x20   : > { %v570_v11 = vrot.slane %v569_v5, 4  ;;  %v284_v14 = vshll.u32 %v5312_v2, 16  ;;  %v267_v17 = vrot.slane %v265_v9, 4  ;;  %v270_v18 = vrot.slane %v268_v10, 5 }
  0x21   : > { %v690_v15 = vpack.c.b16 %v667_v7, %v666_v4  ;;  %v565_v16 = vsel %vm5296_vm3, %v560_v8, %v564_v58  ;;  %v276_v23 = vrot.slane %v274_v12, 5  ;;  %v280_v24 = vrot.slane %v278_v13, 4  ;;  %v258_v8 = vld [vmem:[%s5284_s30 + $0xa4] sm:$0x1] }
  0x22   : > { %v575_v21 = vsel %vm5296_vm3, %v570_v11, %v574_v6  ;;  %v674_v22 = vunpack.c.l.b16 %v565_v16  ;;  %v271_v27 = vor.u32 %v270_v18, %v267_v17  ;;  %v286_v28 = vrot.slane %v284_v14, 5 }
  0x23   : > { %4524 = vmatmul.msk.bf16.vlgmr.msra.gmra.mxu2 %vm698_vm4, %v690_v15  ;;  %v675_v26 = vunpack.c.l.b16 %v575_v21  ;;  %v281_v29 = vor.u32 %v280_v24, %v276_v23  ;;  %v385_v30 = vshrl.u32 %v222_v19, 16  ;;  %v388_v31 = vshll.u32 %v222_v19, 16 }
  0x24   : > { %v394_v32 = vshll.u32 %v5324_v20, 16  ;;  %v272_v35 = vrot.slane %v271_v27, 4  ;;  %v398_v37 = vshrl.u32 %v5324_v20, 16  ;;  %v404_v38 = vshll.u32 %v5329_v25, 16 }
  0x25   : > { %v694_v34 = vpack.c.b16 %v675_v26, %v674_v22  ;;  %v282_v39 = vrot.slane %v281_v29, 4  ;;  %v387_v40 = vrot.slane %v385_v30, 4  ;;  %v390_v41 = vrot.slane %v388_v31, 5  ;;  %v214_v22 = vld [vmem:[%s5284_s30 + $0xc] sm:$0xf] }
  0x26   : > { %v396_v42 = vrot.slane %v394_v32, 5  ;;  %v277_v44 = vsel %vm5296_vm3, %v272_v35, %v276_v23  ;;  %v400_v45 = vrot.slane %v398_v37, 4  ;;  %v406_v46 = vrot.slane %v404_v38, 5  ;;  %v5358_v32 = vld [vmem:[%s5284_s30 + $0x14] sm:$0x1] }
  0x27   : > { %4528 = vmatmul.msk.bf16.vlgmr.msra.gmra.mxu3 %vm698_vm4, %v694_v34  ;;  %v481_v48 = vshrl.u32 %v230_v33, 16  ;;  %v287_v49 = vsel %vm5296_vm3, %v282_v39, %v286_v28  ;;  %v650_v50 = vunpack.c.l.b16 %v277_v44  ;;  %v391_v51 = vor.u32 %v390_v41, %v387_v40  ;;  %v5355_v28 = vld [vmem:[%s5284_s30 + $0x10] sm:$0xf] }
  0x28   : > { %v484_v52 = vshll.u32 %v230_v33, 16  ;;  %v651_v53 = vunpack.c.l.b16 %v287_v49  ;;  %v401_v54 = vor.u32 %v400_v45, %v396_v42  ;;  %v490_v56 = vshll.u32 %v231_v43, 16 }
  0x29   : > { %v483_v55 = vrot.slane %v481_v48, 4  ;;  %v392_v57 = vrot.slane %v391_v51, 4  ;;  %v494_v59 = vshrl.u32 %v231_v43, 16  ;;  %v500_v60 = vshll.u32 %v254_v47, 16  ;;  %v5368_v47 = vld [vmem:[%s5284_s30 + $0x4c] sm:$0xf] }
  0x2a   : > { %v486_v58 = vrot.slane %v484_v52, 5  ;;  %v682_v62 = vpack.c.b16 %v651_v53, %v650_v50  ;;  %v402_v63 = vrot.slane %v401_v54, 4  ;;  %v492_v0 = vrot.slane %v490_v56, 5  ;;  %v5373_v56 = vld [vmem:[%s5284_s30 + $0x50] sm:$0x1] }
  0x2b   : > { %v397_v4 = vsel %vm5296_vm3, %v392_v57, %v396_v42  ;;  %v496_v6 = vrot.slane %v494_v59, 4  ;;  %v502_v7 = vrot.slane %v500_v60, 5  ;;  %v577_v11 = vshrl.u32 %v238_v61, 16  ;;  %v224_v42 = vld [vmem:[%s5284_s30 + $0x48] sm:$0xf] }
  0x2c   : > { %v487_v5 = vor.u32 %v486_v58, %v483_v55  ;;  %4516 = vmatmul.msk.bf16.vlgmr.msra.gmra.mxu0 %vm698_vm4, %v682_v62  ;;  %v407_v9 = vsel %vm5296_vm3, %v402_v63, %v406_v46  ;;  %v660_v10 = vunpack.c.l.b16 %v397_v4  ;;  %v580_v12 = vshll.u32 %v238_v61, 16 }
  0x2d   : > { %v661_v13 = vunpack.c.l.b16 %v407_v9  ;;  %v497_v15 = vor.u32 %v496_v6, %v492_v0  ;;  %v586_v16 = vshll.u32 %v239_v3, 16  ;;  %v579_v17 = vrot.slane %v577_v11, 4 }
  0x2e   : > { %v488_v14 = vrot.slane %v487_v5, 4  ;;  %v582_v18 = vrot.slane %v580_v12, 5  ;;  %v590_v19 = vshrl.u32 %v239_v3, 16  ;;  %v596_v21 = vshll.u32 %v258_v8, 16  ;;  %v232_v3 = vld [vmem:[%s5284_s30 + $0x78] sm:$0xf] }
  0x2f   : > { %v687_v23 = vpack.c.b16 %v661_v13, %v660_v10  ;;  %v498_v26 = vrot.slane %v497_v15, 4  ;;  %v588_v27 = vrot.slane %v586_v16, 5  ;;  %v289_v35 = vshrl.u32 %v214_v22, 16  ;;  %v233_v8 = vld [vmem:[%s5284_s30 + $0x7c] sm:$0xf] }
  0x30   : > { %v493_v24 = vsel %vm5296_vm3, %v488_v14, %v492_v0  ;;  %v583_v30 = vor.u32 %v582_v18, %v579_v17  ;;  %v592_v31 = vrot.slane %v590_v19, 4  ;;  %v598_v34 = vrot.slane %v596_v21, 5  ;;  %v255_v16 = vld [vmem:[%s5284_s30 + $0x80] sm:$0x1] }
  0x31   : > { %v668_v29 = vunpack.c.l.b16 %v493_v24  ;;  %4521 = vmatmul.msk.bf16.gmra.mxu1 %vm698_vm4, %v687_v23  ;;  %v503_v33 = vsel %vm5296_vm3, %v498_v26, %v502_v7  ;;  %v292_v37 = vshll.u32 %v214_v22, 16  ;;  %v298_v41 = vshll.u32 %v5355_v28, 16 }
  0x32   : > { %v669_v38 = vunpack.c.l.b16 %v503_v33  ;;  %v584_v39 = vrot.slane %v583_v30, 4  ;;  %v593_v40 = vor.u32 %v592_v31, %v588_v27  ;;  %v291_v43 = vrot.slane %v289_v35, 4 }
  0x33   : > { %v294_v44 = vrot.slane %v292_v37, 5  ;;  %v302_v45 = vshrl.u32 %v5355_v28, 16  ;;  %v308_v46 = vshll.u32 %v5358_v32, 16  ;;  %v300_v51 = vrot.slane %v298_v41, 5 }
  0x34   : > { %v691_v48 = vpack.c.b16 %v669_v38, %v668_v29  ;;  %v589_v49 = vsel %vm5296_vm3, %v584_v39, %v588_v27  ;;  %v594_v50 = vrot.slane %v593_v40, 4  ;;  %v409_v58 = vshrl.u32 %v224_v42, 16  ;;  %v241_v39 = vld [vmem:[%s5284_s30 + $0xac] sm:$0xf]  ;;  %v259_v40 = vld [vmem:[%s5284_s30 + $0xb0] sm:$0x1] }
  0x35   : > { %v676_v52 = vunpack.c.l.b16 %v589_v49  ;;  %v295_v53 = vor.u32 %v294_v44, %v291_v43  ;;  %v304_v54 = vrot.slane %v302_v45, 4  ;;  %v310_v55 = vrot.slane %v308_v46, 5 }
  0x36   : > { %4525 = vmatmul.msk.bf16.gmra.mxu2 %vm698_vm4, %v691_v48  ;;  %v599_v57 = vsel %vm5296_vm3, %v594_v50, %v598_v34  ;;  %v412_v59 = vshll.u32 %v224_v42, 16  ;;  %v418_v60 = vshll.u32 %v5368_v47, 16  ;;  %v422_v0 = vshrl.u32 %v5368_v47, 16  ;;  %v240_v34 = vld [vmem:[%s5284_s30 + $0xa8] sm:$0xf] }
  0x37   : > { %v677_v61 = vunpack.c.l.b16 %v599_v57  ;;  %v296_v62 = vrot.slane %v295_v53, 4  ;;  %v305_v63 = vor.u32 %v304_v54, %v300_v51  ;;  %v411_v4 = vrot.slane %v409_v58, 4 }
  0x38   : > { %v414_v5 = vrot.slane %v412_v59, 5  ;;  %v420_v6 = vrot.slane %v418_v60, 5  ;;  %v428_v7 = vshll.u32 %v5373_v56, 16  ;;  %v424_v12 = vrot.slane %v422_v0, 4  ;;  %v216_v59 = vld [vmem:[%s5284_s30 + $0x18] sm:$0xf] }
  0x39   : > { %v695_v9 = vpack.c.b16 %v677_v61, %v676_v52  ;;  %v301_v10 = vsel %vm5296_vm3, %v296_v62, %v300_v51  ;;  %v306_v11 = vrot.slane %v305_v63, 4  ;;  %v505_v17 = vshrl.u32 %v232_v3, 16  ;;  %v5401_v63 = vld [vmem:[%s5284_s30 + $0x1c] sm:$0xf]  ;;  %v5404_v0 = vld [vmem:[%s5284_s30 + $0x20] sm:$0x1] }
  0x3a   : > { %v652_v13 = vunpack.c.l.b16 %v301_v10  ;;  %v415_v14 = vor.u32 %v414_v5, %v411_v4  ;;  %v430_v15 = vrot.slane %v428_v7, 5  ;;  %v425_v19 = vor.u32 %v424_v12, %v420_v6 }
  0x3b   : > { %4529 = vmatmul.msk.bf16.gmra.mxu3 %vm698_vm4, %v695_v9  ;;  %v311_v18 = vsel %vm5296_vm3, %v306_v11, %v310_v55  ;;  %v508_v21 = vshll.u32 %v232_v3, 16  ;;  %v514_v22 = vshll.u32 %v233_v8, 16  ;;  %v507_v26 = vrot.slane %v505_v17, 4 }
  0x3c   : > { %v653_v23 = vunpack.c.l.b16 %v311_v18  ;;  %v416_v24 = vrot.slane %v415_v14, 4  ;;  %v518_v27 = vshrl.u32 %v233_v8, 16  ;;  %v426_v29 = vrot.slane %v425_v19, 4 }
  0x3d   : > { %v510_v30 = vrot.slane %v508_v21, 5  ;;  %v516_v31 = vrot.slane %v514_v22, 5  ;;  %v524_v33 = vshll.u32 %v255_v16, 16  ;;  %v601_v48 = vshrl.u32 %v240_v34, 16  ;;  %v5414_v21 = vld [vmem:[%s5284_s30 + $0x58] sm:$0xf] }
  0x3e   : > { %v683_v35 = vpack.c.b16 %v653_v23, %v652_v13  ;;  %v421_v37 = vsel %vm5296_vm3, %v416_v24, %v420_v6  ;;  %v520_v38 = vrot.slane %v518_v27, 4  ;;  %v431_v41 = vsel %vm5296_vm3, %v426_v29, %v430_v15  ;;  %v226_v15 = vld [vmem:[%s5284_s30 + $0x54] sm:$0xf]  ;;  %v5419_v27 = vld [vmem:[%s5284_s30 + $0x5c] sm:$0x1] }
  0x3f   : > { %v662_v42 = vunpack.c.l.b16 %v421_v37  ;;  %v511_v43 = vor.u32 %v510_v30, %v507_v26  ;;  %v526_v44 = vrot.slane %v524_v33, 5  ;;  %v663_v45 = vunpack.c.l.b16 %v431_v41 }
  0x40   : > { %4517 = vmatmul.msk.bf16.gmra.mxu0 %vm698_vm4, %v683_v35  ;;  %v521_v46 = vor.u32 %v520_v38, %v516_v31  ;;  %v604_v49 = vshll.u32 %v240_v34, 16  ;;  %v610_v51 = vshll.u32 %v241_v39, 16  ;;  %v614_v52 = vshrl.u32 %v241_v39, 16  ;;  %v234_v39 = vld [vmem:[%s5284_s30 + $0x84] sm:$0xf] }
  0x41   : > { %v512_v50 = vrot.slane %v511_v43, 4  ;;  %v620_v53 = vshll.u32 %v259_v40, 16  ;;  %v688_v54 = vpack.c.b16 %v663_v45, %v662_v42  ;;  %v603_v57 = vrot.slane %v601_v48, 4 }
  0x42   : > { %v522_v55 = vrot.slane %v521_v46, 4  ;;  %v606_v58 = vrot.slane %v604_v49, 5  ;;  %v612_v61 = vrot.slane %v610_v51, 5  ;;  %v616_v62 = vrot.slane %v614_v52, 4  ;;  %v235_v49 = vld [vmem:[%s5284_s30 + $0x88] sm:$0xf] }
  0x43   : > { %v517_v60 = vsel %vm5296_vm3, %v512_v50, %v516_v31  ;;  %4522 = vmatmul.msk.bf16.gmra.mxu1 %vm698_vm4, %v688_v54  ;;  %v622_v6 = vrot.slane %v620_v53, 5  ;;  %v313_v9 = vshrl.u32 %v216_v59, 16  ;;  %v316_v10 = vshll.u32 %v216_v59, 16  ;;  %v256_v53 = vld [vmem:[%s5284_s30 + $0x8c] sm:$0x1] }
  0x44   : > { %v527_v3 = vsel %vm5296_vm3, %v522_v55, %v526_v44  ;;  %v670_v4 = vunpack.c.l.b16 %v517_v60  ;;  %v607_v5 = vor.u32 %v606_v58, %v603_v57  ;;  %v617_v8 = vor.u32 %v616_v62, %v612_v61 }
  0x45   : > { %v671_v7 = vunpack.c.l.b16 %v527_v3  ;;  %v322_v12 = vshll.u32 %v5401_v63, 16  ;;  %v326_v13 = vshrl.u32 %v5401_v63, 16  ;;  %v332_v14 = vshll.u32 %v5404_v0, 16 }
  0x46   : > { %v608_v11 = vrot.slane %v607_v5, 4  ;;  %v618_v17 = vrot.slane %v617_v8, 4  ;;  %v315_v18 = vrot.slane %v313_v9, 4  ;;  %v318_v19 = vrot.slane %v316_v10, 5  ;;  %v242_v8 = vld [vmem:[%s5284_s30 + $0xb4] sm:$0xf] }
  0x47   : > { %v692_v16 = vpack.c.b16 %v671_v7, %v670_v4  ;;  %v324_v23 = vrot.slane %v322_v12, 5  ;;  %v328_v24 = vrot.slane %v326_v13, 4  ;;  %v334_v26 = vrot.slane %v332_v14, 5  ;;  %v243_v12 = vld [vmem:[%s5284_s30 + $0xb8] sm:$0xf] }
  0x48   : > { %v613_v22 = vsel %vm5296_vm3, %v608_v11, %v612_v61  ;;  %v623_v29 = vsel %vm5296_vm3, %v618_v17, %v622_v6  ;;  %v319_v31 = vor.u32 %v318_v19, %v315_v18  ;;  %v433_v33 = vshrl.u32 %v226_v15, 16  ;;  %v260_v17 = vld [vmem:[%s5284_s30 + $0xbc] sm:$0x1] }
  0x49   : > { %4526 = vmatmul.msk.bf16.gmra.mxu2 %vm698_vm4, %v692_v16  ;;  %v678_v30 = vunpack.c.l.b16 %v613_v22  ;;  %v679_v34 = vunpack.c.l.b16 %v623_v29  ;;  %v329_v35 = vor.u32 %v328_v24, %v324_v23  ;;  %v436_v37 = vshll.u32 %v226_v15, 16 }
  0x4a   : > { %v442_v38 = vshll.u32 %v5414_v21, 16  ;;  %v320_v40 = vrot.slane %v319_v31, 4  ;;  %v435_v41 = vrot.slane %v433_v33, 4  ;;  %v446_v42 = vshrl.u32 %v5414_v21, 16 }
  0x4b   : > { %v452_v43 = vshll.u32 %v5419_v27, 16  ;;  %v696_v44 = vpack.c.b16 %v679_v34, %v678_v30  ;;  %v330_v45 = vrot.slane %v329_v35, 4  ;;  %v438_v46 = vrot.slane %v436_v37, 5  ;;  %v218_v37 = vld [vmem:[%s5284_s30 + $0x24] sm:$0xf] }
  0x4c   : > { %v444_v48 = vrot.slane %v442_v38, 5  ;;  %v325_v50 = vsel %vm5296_vm3, %v320_v40, %v324_v23  ;;  %v448_v51 = vrot.slane %v446_v42, 4  ;;  %v529_v54 = vshrl.u32 %v234_v39, 16  ;;  %v5447_v42 = vld [vmem:[%s5284_s30 + $0x28] sm:$0xf] }
  0x4d   : > { %v454_v52 = vrot.slane %v452_v43, 5  ;;  %4530 = vmatmul.msk.bf16.gmra.mxu3 %vm698_vm4, %v696_v44  ;;  %v335_v55 = vsel %vm5296_vm3, %v330_v45, %v334_v26  ;;  %v654_v57 = vunpack.c.l.b16 %v325_v50  ;;  %v439_v58 = vor.u32 %v438_v46, %v435_v41 }
  0x4e   : > { %v532_v59 = vshll.u32 %v234_v39, 16  ;;  %v655_v60 = vunpack.c.l.b16 %v335_v55  ;;  %v449_v61 = vor.u32 %v448_v51, %v444_v48  ;;  %v531_v62 = vrot.slane %v529_v54, 4 }
  0x4f   : > { %v538_v3 = vshll.u32 %v235_v49, 16  ;;  %v440_v4 = vrot.slane %v439_v58, 4  ;;  %v542_v6 = vshrl.u32 %v235_v49, 16  ;;  %v548_v7 = vshll.u32 %v256_v53, 16 }
  0x50   : > { %v534_v5 = vrot.slane %v532_v59, 5  ;;  %v684_v9 = vpack.c.b16 %v655_v60, %v654_v57  ;;  %v450_v10 = vrot.slane %v449_v61, 4  ;;  %v625_v22 = vshrl.u32 %v242_v8, 16  ;;  %v1060_v61 = vld [vmem:[%s5284_s30] sm:$0xe] }
  0x51   : > { %v540_v11 = vrot.slane %v538_v3, 5  ;;  %v445_v13 = vsel %vm5296_vm3, %v440_v4, %v444_v48  ;;  %v544_v15 = vrot.slane %v542_v6, 4  ;;  %v550_v16 = vrot.slane %v548_v7, 5  ;;  %v5451_v48 = vld [vmem:[%s5284_s30 + $0x2c] sm:$0x1] }
  0x52   : > { %v535_v14 = vor.u32 %v534_v5, %v531_v62  ;;  %4518 = vmatmul.msk.bf16.gmra.mxu0 %vm698_vm4, %v684_v9  ;;  %v455_v18 = vsel %vm5296_vm3, %v450_v10, %v454_v52  ;;  %v664_v19 = vunpack.c.l.b16 %v445_v13  ;;  %v628_v23 = vshll.u32 %v242_v8, 16  ;;  %v4758_v6 = vld [vmem:[%s5284_s30 + $0xc] sm:$0xf] }
  0x53   : > { %v665_v24 = vunpack.c.l.b16 %v455_v18  ;;  %v545_v29 = vor.u32 %v544_v15, %v540_v11  ;;  %v634_v30 = vshll.u32 %v243_v12, 16  ;;  %v627_v31 = vrot.slane %v625_v22, 4 }
  0x54   : > { %v536_v26 = vrot.slane %v535_v14, 4  ;;  %v630_v33 = vrot.slane %v628_v23, 5  ;;  %v638_v34 = vshrl.u32 %v243_v12, 16  ;;  %v644_v35 = vshll.u32 %v260_v17, 16  ;;  %v4759_v12 = vld [vmem:[%s5284_s30 + $0x10] sm:$0xf] }
  0x55   : > { %v689_v38 = vpack.c.b16 %v665_v24, %v664_v19  ;;  %v546_v40 = vrot.slane %v545_v29, 4  ;;  %v636_v41 = vrot.slane %v634_v30, 5  ;;  %v1116_v43 = vrot.slane %v5312_v2, 5 }
  0x56   : > { %v541_v39 = vsel %vm5296_vm3, %v536_v26, %v540_v11  ;;  %v631_v45 = vor.u32 %v630_v33, %v627_v31  ;;  %v640_v46 = vrot.slane %v638_v34, 4  ;;  %v646_v50 = vrot.slane %v644_v35, 5  ;;  %v4904_v11 = vld [vmem:[%s6770_s1 + $0xc] sm:$0x3] }
  0x57   : > { %v672_v44 = vunpack.c.l.b16 %v541_v39  ;;  %4523 = vmatmul.msk.bf16.gmra.mxu1 %vm698_vm4, %v689_v38  ;;  %v551_v49 = vsel %vm5296_vm3, %v546_v40, %v550_v16  ;;  %v337_v51 = vshrl.u32 %v218_v37, 16  ;;  %v340_v52 = vshll.u32 %v218_v37, 16  ;;  %v4760_v38 = vld [vmem:[%s5284_s30 + $0x14] sm:$0x1] }
  0x58   : > { %v673_v53 = vunpack.c.l.b16 %v551_v49  ;;  %v632_v54 = vrot.slane %v631_v45, 4  ;;  %v641_v55 = vor.u32 %v640_v46, %v636_v41  ;;  %v346_v2 = vshll.u32 %v5447_v42, 16  ;;  %v5033_v45 = vld [vmem:[%s6770_s1 + $0xe] sm:$0x3] }
  0x59   : > { %v339_v57 = vrot.slane %v337_v51, 4  ;;  %v342_v58 = vrot.slane %v340_v52, 5  ;;  %v350_v59 = vshrl.u32 %v5447_v42, 16  ;;  %v356_v60 = vshll.u32 %v5451_v48, 16  ;;  %v5103_v51 = vld [vmem:[%s5284_s30] sm:$0xff] }
  0x5a   : > { %v693_v62 = vpack.c.b16 %v673_v53, %v672_v44  ;;  %v637_v3 = vsel %vm5296_vm3, %v632_v54, %v636_v41  ;;  %v642_v4 = vrot.slane %v641_v55, 4  ;;  %v348_v5 = vrot.slane %v346_v2, 5  ;;  %v5082_v2 = vld [vmem:[%s6770_s1 + $0x10] sm:$0x3] }
  0x5b   : > { %v680_v7 = vunpack.c.l.b16 %v637_v3  ;;  %v343_v8 = vor.u32 %v342_v58, %v339_v57  ;;  %v352_v9 = vrot.slane %v350_v59, 4  ;;  %v358_v10 = vrot.slane %v356_v60, 5 }
  0x5c   : > { %4527 = vmatmul.msk.bf16.gmra.mxu2 %vm698_vm4, %v693_v62  ;;  %v647_v13 = vsel %vm5296_vm3, %v642_v4, %v646_v50  ;;  %v4612_v14 = vrot.slane %v1060_v61, 9  ;;  %v1113_v19 = vrot.slane %v5309_v1, 5  ;;  %v2948_v22 = vsel %vm747_vm0, %v4904_v11, 0  ;;  %v4855_v50 = vld [vmem:[%s6770_s1 + $0xa] sm:$0x3] }
  0x5d   : > { %v681_v15 = vunpack.c.l.b16 %v647_v13  ;;  %v344_v16 = vrot.slane %v343_v8, 4  ;;  %v353_v17 = vor.u32 %v352_v9, %v348_v5  ;;  %v1781_v23 = vshrl.u32 %v4758_v6, 16  ;;  %2957 = vmatpush.bf16.msra.mxu2 %v2948_v22  ;;  %v1061_v8 = vld [vmem:[%s5284_s30 + $0xc] sm:$0xe] }
  0x5e   : > { %v1784_v24 = vshll.u32 %v4758_v6, 16  ;;  %v1790_v26 = vshll.u32 %v4759_v12, 16  ;;  %v1114_v33 = vsel %vm5470_vm7, %v4612_v14, %v1113_v19  ;;  %v1115_v35 = vrot.slane %v1113_v19, 4  ;;  %v4762_v6 = vld [vmem:[%s5284_s30 + $0x1c] sm:$0xf] }
  0x5f   : > { %v697_v29 = vpack.c.b16 %v681_v15, %v680_v7  ;;  %v349_v30 = vsel %vm5296_vm3, %v344_v16, %v348_v5  ;;  %v354_v31 = vrot.slane %v353_v17, 4  ;;  %v1225_v37 = vunpack.c.l.b16 %v1114_v33  ;;  %v4761_v5 = vld [vmem:[%s5284_s30 + $0x18] sm:$0xf]  ;;  %v5119_v15 = vld [vmem:[%s5284_s30 + $0xc] sm:$0xff] }
  0x60   : > { %v656_v34 = vunpack.c.l.b16 %v349_v30  ;;  %v1783_v1 = vrot.slane %v1781_v23, 4  ;;  %v1786_v40 = vrot.slane %v1784_v24, 5  ;;  %v1792_v41 = vrot.slane %v1790_v26, 5  ;;  %v4763_v30 = vld [vmem:[%s5284_s30 + $0x20] sm:$0x1] }
  0x61   : > { %4531 = vmatmul.msk.bf16.gmra.mxu3 %vm698_vm4, %v697_v29  ;;  %v359_v39 = vsel %vm5296_vm3, %v354_v31, %v358_v10  ;;  %v1794_v44 = vshrl.u32 %v4759_v12, 16  ;;  %v1117_v49 = vsel %vm5470_vm7, %v1115_v35, %v1116_v43  ;;  %v1800_v55 = vshll.u32 %v4760_v38, 16  ;;  %v5104_v35 = vld [vmem:[%s5284_s30 + $0xc] sm:$0xff] }
  0x62   : > { %v657_v46 = vunpack.c.l.b16 %v359_v39  ;;  %v1226_v52 = vunpack.c.l.b16 %v1117_v49  ;;  %v1787_v53 = vor.u32 %v1786_v40, %v1783_v1  ;;  %v3602_v58 = vsel %vm747_vm0, %v5033_v45, 0 }
  0x63   : > { %v1796_v54 = vrot.slane %v1794_v44, 4  ;;  %3611 = vmatpush.bf16.msra.mxu3 %v3602_v58  ;;  %v2661_v60 = vsel %vm747_vm0, %v4855_v50, 0  ;;  %v4000_v61 = vsel %vm747_vm0, %v5082_v2, 0  ;;  %v1802_v4 = vrot.slane %v1800_v55, 5  ;;  %v1062_v50 = vld [vmem:[%s5284_s30 + $0x18] sm:$0xe] }
  0x64   : > { %v685_v57 = vpack.c.b16 %v657_v46, %v656_v34  ;;  %v1257_v43 = vpack.c.b16 %v1226_v52, %v1225_v37  ;;  %2670 = vmatpush.bf16.msra.mxu1 %v2661_v60  ;;  %v1788_v62 = vrot.slane %v1787_v53, 4  ;;  %4009 = vmatpush.bf16.msra.mxu0 %v4000_v61  ;;  %v1120_v7 = vrot.slane %v5355_v28, 5  ;;  %v4765_v46 = vld [vmem:[%s5284_s30 + $0x28] sm:$0xf] }
  0x65   : > { %v1797_v59 = vor.u32 %v1796_v54, %v1792_v41  ;;  %v1805_v9 = vshrl.u32 %v4761_v5, 16  ;;  %v1808_v10 = vshll.u32 %v4761_v5, 16  ;;  %v1814_v13 = vshll.u32 %v4762_v6, 16 }
  0x66   : > { %4519 = vmatmul.msk.bf16.gmra.mxu0 %vm698_vm4, %v685_v57  ;;  %v1793_v11 = vsel %vm5296_vm3, %v1788_v62, %v1792_v41  ;;  %v1818_v14 = vshrl.u32 %v4762_v6, 16  ;;  %v4613_v16 = vrot.slane %v1061_v8, 9  ;;  %v1122_v17 = vrot.slane %v1120_v7, 4  ;;  %v4764_v41 = vld [vmem:[%s5284_s30 + $0x24] sm:$0xf] }
  0x67   : > { %4596 = vmatmul.msk.bf16.vlgmr.msrb.gmra.mxu1 %vm698_vm4, %v5103_v51  ;;  %v1798_v3 = vrot.slane %v1797_v59, 4  ;;  %v1123_v28 = vrot.slane %v5358_v32, 5  ;;  %v2166_v19 = vunpack.c.l.b16 %v1793_v11  ;;  %v1807_v23 = vrot.slane %v1805_v9, 4  ;;  %v4766_v6 = vld [vmem:[%s5284_s30 + $0x2c] sm:$0x1] }
  0x68   : > { %v1810_v24 = vrot.slane %v1808_v10, 5  ;;  %v1816_v26 = vrot.slane %v1814_v13, 5  ;;  %v1820_v29 = vrot.slane %v1818_v14, 4  ;;  %v1121_v31 = vsel %vm5470_vm7, %v4613_v16, %v1120_v7 }
  0x69   : > { %v1803_v12 = vsel %vm5296_vm3, %v1798_v3, %v1802_v4  ;;  %v1124_v33 = vsel %vm5470_vm7, %v1122_v17, %v1123_v28  ;;  %v1824_v38 = vshll.u32 %v4763_v30, 16  ;;  %v1227_v1 = vunpack.c.l.b16 %v1121_v31 }
  0x6a   : > { %v2167_v22 = vunpack.c.l.b16 %v1803_v12  ;;  %v1811_v32 = vor.u32 %v1810_v24, %v1807_v23  ;;  %v1821_v37 = vor.u32 %v1820_v29, %v1816_v26  ;;  %v1228_v39 = vunpack.c.l.b16 %v1124_v33  ;;  %v5105_v12 = vld [vmem:[%s5284_s30 + $0x18] sm:$0xff]  ;;  %v1063_v29 = vld [vmem:[%s5284_s30 + $0x24] sm:$0xe] }
  0x6b   : > { %v1826_v45 = vrot.slane %v1824_v38, 5  ;;  %v1127_v51 = vrot.slane %v5401_v63, 5  ;;  %v1829_v52 = vshrl.u32 %v4764_v41, 16  ;;  %v1832_v54 = vshll.u32 %v4764_v41, 16 }
  0x6c   : > { %4629 = vmatmul.msk.bf16.vlgmr.msrb.gmra.mxu2 %vm698_vm4, %v1257_v43  ;;  %v2198_v34 = vpack.c.b16 %v2167_v22, %v2166_v19  ;;  %v1812_v40 = vrot.slane %v1811_v32, 4  ;;  %v1822_v44 = vrot.slane %v1821_v37, 4  ;;  %v1258_v49 = vpack.c.b16 %v1228_v39, %v1227_v1  ;;  %v5120_v43 = vld [vmem:[%s5284_s30 + $0x18] sm:$0xff]  ;;  %v4767_v19 = vld [vmem:[%s5284_s30 + $0x30] sm:$0xf]  ;;  %v5121_v32 = vld [vmem:[%s5284_s30 + $0x24] sm:$0xff] }
  0x6d   : > { %v1838_v55 = vshll.u32 %v4765_v46, 16  ;;  %v1842_v2 = vshrl.u32 %v4765_v46, 16  ;;  %v4614_v58 = vrot.slane %v1062_v50, 9  ;;  %v1129_v60 = vrot.slane %v1127_v51, 4  ;;  %v4768_v22 = vld [vmem:[%s5284_s30 + $0x34] sm:$0xf] }
  0x6e   : > { %v1817_v53 = vsel %vm5296_vm3, %v1812_v40, %v1816_v26  ;;  %v1827_v57 = vsel %vm5296_vm3, %v1822_v44, %v1826_v45  ;;  %v1130_v63 = vrot.slane %v5404_v0, 5  ;;  %v1831_v61 = vrot.slane %v1829_v52, 4  ;;  %v4769_v45 = vld [vmem:[%s5284_s30 + $0x38] sm:$0x1] }
  0x6f   : > { %v2168_v59 = vunpack.c.l.b16 %v1817_v53  ;;  %v2169_v62 = vunpack.c.l.b16 %v1827_v57  ;;  %v1834_v3 = vrot.slane %v1832_v54, 5  ;;  %v1840_v4 = vrot.slane %v1838_v55, 5  ;;  %v4771_v57 = vld [vmem:[%s5284_s30 + $0x40] sm:$0xf] }
  0x70   : > { %v1844_v5 = vrot.slane %v1842_v2, 4  ;;  %v1128_v7 = vsel %vm5470_vm7, %v4614_v58, %v1127_v51  ;;  %v1131_v8 = vsel %vm5470_vm7, %v1129_v60, %v1130_v63  ;;  %v1848_v0 = vshll.u32 %v4766_v6, 16  ;;  %v4770_v2 = vld [vmem:[%s5284_s30 + $0x3c] sm:$0xf]  ;;  %v5165_v63 = vld [vmem:[%s5284_s30 + $0x34] sm:$0xf] }
  0x71   : > { %4742 = vmatmul.msk.bf16.vlgmr.msrb.gmra.mxu3 %vm698_vm4, %v5119_v15  ;;  %v2199_v9 = vpack.c.b16 %v2169_v62, %v2168_v59  ;;  %v1835_v10 = vor.u32 %v1834_v3, %v1831_v61  ;;  %v1229_v13 = vunpack.c.l.b16 %v1128_v7  ;;  %v1230_v14 = vunpack.c.l.b16 %v1131_v8  ;;  %v1064_v62 = vld [vmem:[%s5284_s30 + $0x30] sm:$0xe] }
  0x72   : > { %v1845_v11 = vor.u32 %v1844_v5, %v1840_v4  ;;  %v1850_v17 = vrot.slane %v1848_v0, 5  ;;  %v1134_v23 = vrot.slane %v5447_v42, 5  ;;  %v1853_v30 = vshrl.u32 %v4767_v19, 16  ;;  %v5166_v0 = vld [vmem:[%s5284_s30 + $0x38] sm:$0x1] }
  0x73   : > { %v1836_v15 = vrot.slane %v1835_v10, 4  ;;  %v1259_v28 = vpack.c.b16 %v1230_v14, %v1229_v13  ;;  %v1856_v31 = vshll.u32 %v4767_v19, 16  ;;  %v1862_v33 = vshll.u32 %v4768_v22, 16  ;;  %v5122_v13 = vld [vmem:[%s5284_s30 + $0x30] sm:$0xff] }
  0x74   : > { %v1846_v16 = vrot.slane %v1845_v11, 4  ;;  %v1136_v37 = vrot.slane %v1134_v23, 4  ;;  %v1137_v42 = vrot.slane %v5451_v48, 5  ;;  %v1855_v39 = vrot.slane %v1853_v30, 4  ;;  %v5106_v48 = vld [vmem:[%s5284_s30 + $0x24] sm:$0xff] }
  0x75   : > { %v1841_v24 = vsel %vm5296_vm3, %v1836_v15, %v1840_v4  ;;  %v1858_v40 = vrot.slane %v1856_v31, 5  ;;  %v1864_v41 = vrot.slane %v1862_v33, 5  ;;  %v1872_v53 = vshll.u32 %v4769_v45, 16  ;;  %v5107_v33 = vld [vmem:[%s5284_s30 + $0x30] sm:$0xff] }
  0x76   : > { %4807 = vmatmul.msk.bf16.vlgmr.msrb.gmra.mxu0 %vm698_vm4, %v2198_v34  ;;  %v1851_v26 = vsel %vm5296_vm3, %v1846_v16, %v1850_v17  ;;  %v1866_v34 = vshrl.u32 %v4768_v22, 16  ;;  %v2170_v38 = vunpack.c.l.b16 %v1841_v24  ;;  %v1141_v61 = vrot.slane %v5165_v63, 5  ;;  %v4772_v22 = vld [vmem:[%s5284_s30 + $0x44] sm:$0x1] }
  0x77   : > { %4597 = vmatmul.msk.bf16.gmra.mxu1 %vm698_vm4, %v5104_v35  ;;  %v4615_v35 = vrot.slane %v1063_v29, 9  ;;  %v2171_v1 = vunpack.c.l.b16 %v1851_v26  ;;  %v1859_v51 = vor.u32 %v1858_v40, %v1855_v39  ;;  %v1874_v59 = vrot.slane %v1872_v53, 5  ;;  %v4773_v39 = vld [vmem:[%s5284_s30 + $0x48] sm:$0xf]  ;;  %v4774_v40 = vld [vmem:[%s5284_s30 + $0x4c] sm:$0xf] }
  0x78   : > { %v1868_v44 = vrot.slane %v1866_v34, 4  ;;  %v1877_v3 = vshrl.u32 %v4770_v2, 16  ;;  %v1880_v4 = vshll.u32 %v4770_v2, 16  ;;  %v1886_v5 = vshll.u32 %v4771_v57, 16  ;;  %v5123_v2 = vld [vmem:[%s5284_s30 + $0x3c] sm:$0xff] }
  0x79   : > { %v1135_v46 = vsel %vm5470_vm7, %v4615_v35, %v1134_v23  ;;  %v2200_v50 = vpack.c.b16 %v2171_v1, %v2170_v38  ;;  %v1860_v58 = vrot.slane %v1859_v51, 4  ;;  %v1890_v6 = vshrl.u32 %v4771_v57, 16 }
  0x7a   : > { %v1869_v52 = vor.u32 %v1868_v44, %v1864_v41  ;;  %v1231_v54 = vunpack.c.l.b16 %v1135_v46  ;;  %v4616_v10 = vrot.slane %v1064_v62, 9  ;;  %v1143_v11 = vrot.slane %v1141_v61, 4 }
  0x7b   : > { %v1865_v8 = vsel %vm5296_vm3, %v1860_v58, %v1864_v41  ;;  %v1879_v14 = vrot.slane %v1877_v3, 4  ;;  %v1882_v15 = vrot.slane %v1880_v4, 5  ;;  %v1888_v16 = vrot.slane %v1886_v5, 5  ;;  %v4775_v4 = vld [vmem:[%s5284_s30 + $0x50] sm:$0x1] }
  0x7c   : > { %4630 = vmatmul.msk.bf16.gmra.mxu2 %vm698_vm4, %v1258_v49  ;;  %v1138_v49 = vsel %vm5470_vm7, %v1136_v37, %v1137_v42  ;;  %v1892_v17 = vrot.slane %v1890_v6, 4  ;;  %v1142_v23 = vsel %vm5470_vm7, %v4616_v10, %v1141_v61  ;;  %v1896_v30 = vshll.u32 %v4772_v22, 16 }
  0x7d   : > { %v1232_v55 = vunpack.c.l.b16 %v1138_v49  ;;  %v1883_v26 = vor.u32 %v1882_v15, %v1879_v14  ;;  %v1901_v51 = vshrl.u32 %v4773_v39, 16  ;;  %v1910_v53 = vshll.u32 %v4774_v40, 16 }
  0x7e   : > { %v1893_v29 = vor.u32 %v1892_v17, %v1888_v16  ;;  %v1898_v1 = vrot.slane %v1896_v30, 5 }
  0x7f   : > { %v1260_v60 = vpack.c.b16 %v1232_v55, %v1231_v54  ;;  %v1884_v42 = vrot.slane %v1883_v26, 4  ;;  %v1914_v54 = vshrl.u32 %v4774_v40, 16  ;;  %v1912_v62 = vrot.slane %v1910_v53, 5 }
  0x80   : > { %v1894_v38 = vrot.slane %v1893_v29, 4  ;;  %v1155_v26 = vrot.slane %v5368_v47, 5 }
  0x81   : > { %4743 = vmatmul.msk.bf16.gmra.mxu3 %vm698_vm4, %v5120_v43  ;;  %v1870_v43 = vrot.slane %v1869_v52, 4  ;;  %v1889_v45 = vsel %vm5296_vm3, %v1884_v42, %v1888_v16  ;;  %v1904_v52 = vshll.u32 %v4773_v39, 16  ;;  %v1916_v3 = vrot.slane %v1914_v54, 4  ;;  %v4778_v54 = vld [vmem:[%s5284_s30 + $0x5c] sm:$0x1] }
  0x82   : > { %v1899_v46 = vsel %vm5296_vm3, %v1894_v38, %v1898_v1  ;;  %v2174_v55 = vunpack.c.l.b16 %v1889_v45  ;;  %v5124_v1 = vld [vmem:[%s5284_s30 + $0x48] sm:$0xff]  ;;  %v1157_v40 = vrot.slane %v1155_v26, 4 }
  0x83   : > { %v2175_v57 = vunpack.c.l.b16 %v1899_v46  ;;  %v1906_v61 = vrot.slane %v1904_v52, 5  ;;  %v1917_v10 = vor.u32 %v1916_v3, %v1912_v62 }
  0x85   : > { %v1918_v16 = vrot.slane %v1917_v10, 4 }
  0x86   : > { %4808 = vmatmul.msk.bf16.gmra.mxu0 %vm698_vm4, %v2199_v9  ;;  %v1875_v9 = vsel %vm5296_vm3, %v1870_v43, %v1874_v59 }
  0x87   : > { %4598 = vmatmul.msk.bf16.gmra.mxu1 %vm698_vm4, %v5105_v12  ;;  %v1144_v12 = vrot.slane %v5166_v0, 5  ;;  %v2173_v19 = vunpack.c.l.b16 %v1875_v9 }
  0x89   : > { %v1145_v24 = vsel %vm5470_vm7, %v1143_v11, %v1144_v12  ;;  %v1920_v11 = vshll.u32 %v4775_v4, 16  ;;  %v5108_v12 = vld [vmem:[%s5284_s30 + $0x3c] sm:$0xff] }
  0x8a   : > { %v1234_v35 = vunpack.c.l.b16 %v1145_v24  ;;  %v4777_v24 = vld [vmem:[%s5284_s30 + $0x58] sm:$0xf]  ;;  %v4779_v4 = vld [vmem:[%s5284_s30 + $0x60] sm:$0xf] }
  0x8b   : > { %v1922_v17 = vrot.slane %v1920_v11, 5  ;;  %v1938_v42 = vshrl.u32 %v4777_v24, 16 }
  0x8c   : > { %4631 = vmatmul.msk.bf16.gmra.mxu2 %vm698_vm4, %v1259_v28  ;;  %v2172_v28 = vunpack.c.l.b16 %v1865_v8  ;;  %v2202_v8 = vpack.c.b16 %v2175_v57, %v2174_v55 }
  0x8d   : > { %v1923_v30 = vsel %vm5296_vm3, %v1918_v16, %v1922_v17  ;;  %v1940_v52 = vrot.slane %v1938_v42, 4 }
  0x8e   : > { %v2201_v31 = vpack.c.b16 %v2173_v19, %v2172_v28  ;;  %v2177_v46 = vunpack.c.l.b16 %v1923_v30 }
  0x91   : > { %4744 = vmatmul.msk.bf16.gmra.mxu3 %vm698_vm4, %v5121_v32  ;;  %v1233_v32 = vunpack.c.l.b16 %v1142_v23  ;;  %v4776_v23 = vld [vmem:[%s5284_s30 + $0x54] sm:$0xf] }
  0x93   : > { %v1261_v44 = vpack.c.b16 %v1234_v35, %v1233_v32  ;;  %v1928_v32 = vshll.u32 %v4776_v23, 16  ;;  %v1934_v35 = vshll.u32 %v4777_v24, 16 }
  0x96   : > { %4809 = vmatmul.msk.bf16.gmra.mxu0 %vm698_vm4, %v2200_v50  ;;  %v1148_v50 = vrot.slane %v5324_v20, 5  ;;  %v1903_v20 = vrot.slane %v1901_v51, 4  ;;  %v1936_v51 = vrot.slane %v1934_v35, 5  ;;  %v1165_v35 = vrot.slane %v5419_v27, 5 }
  0x97   : > { %4599 = vmatmul.msk.bf16.gmra.mxu1 %vm698_vm4, %v5106_v48  ;;  %v1065_v48 = vld [vmem:[%s5284_s30 + $0x3c] sm:$0xe] }
  0x98   : > { %v4617_v43 = vrot.slane %v1065_v48, 9  ;;  %v1150_v59 = vrot.slane %v1148_v50, 4  ;;  %v1930_v48 = vrot.slane %v1928_v32, 5 }
  0x9a   : > { %v1149_v5 = vsel %vm5470_vm7, %v4617_v43, %v1148_v50  ;;  %v5109_v43 = vld [vmem:[%s5284_s30 + $0x48] sm:$0xff] }
  0x9c   : > { %v5565_v7 = vpop.f32.mrf.mxu1  ;;  %4632 = vmatmul.msk.bf16.gmra.mxu2 %vm698_vm4, %v1260_v60  ;;  %v1151_v60 = vrot.slane %v5329_v25, 5  ;;  %v1907_v25 = vor.u32 %v1906_v61, %v1903_v20  ;;  %v1944_v20 = vshll.u32 %v4778_v54, 16  ;;  %v5110_v54 = vld [vmem:[%s5284_s30 + $0x54] sm:$0xff] }
  0x9e   : > { %v1152_v6 = vsel %vm5470_vm7, %v1150_v59, %v1151_v60  ;;  %v1908_v15 = vrot.slane %v1907_v25, 4  ;;  %v1941_v60 = vor.u32 %v1940_v52, %v1936_v51  ;;  %v1946_v10 = vrot.slane %v1944_v20, 5 }
  0x9f   : > { %v1236_v14 = vunpack.c.l.b16 %v1152_v6 }
  0xa0   : > { %v1913_v29 = vsel %vm5296_vm3, %v1908_v15, %v1912_v62  ;;  %v1942_v25 = vrot.slane %v1941_v60, 4  ;;  %v1162_v15 = vrot.slane %v5414_v21, 5 }
  0xa1   : > { %4745 = vmatmul.msk.bf16.gmra.mxu3 %vm698_vm4, %v5122_v13  ;;  %v1235_v13 = vunpack.c.l.b16 %v1149_v5  ;;  %v2176_v45 = vunpack.c.l.b16 %v1913_v29  ;;  %v4780_v5 = vld [vmem:[%s5284_s30 + $0x64] sm:$0xf] }
  0xa2   : > { %v1962_v16 = vshrl.u32 %v4780_v5, 16  ;;  %v1947_v24 = vsel %vm5296_vm3, %v1942_v25, %v1946_v10  ;;  %v1164_v32 = vrot.slane %v1162_v15, 4  ;;  %v5167_v10 = vld [vmem:[%s5284_s30 + $0x64] sm:$0xf] }
  0xa3   : > { %v1262_v19 = vpack.c.b16 %v1236_v14, %v1235_v13  ;;  %v2203_v57 = vpack.c.b16 %v2177_v46, %v2176_v45  ;;  %v1952_v13 = vshll.u32 %v4779_v4, 16  ;;  %v1958_v14 = vshll.u32 %v4780_v5, 16 }
  0xa4   : > { %v5581_v34 = vpop.f32.mrf.mxu1  ;;  %v1964_v42 = vrot.slane %v1962_v16, 4 }
  0xa5   : > { %v1954_v30 = vrot.slane %v1952_v13, 5  ;;  %v1068_v13 = vld [vmem:[%s5284_s30 + $0x60] sm:$0xe] }
  0xa6   : > { %v5583_v37 = vpop.f32.mrf.mxu2  ;;  %4810 = vmatmul.msk.bf16.gmra.mxu0 %vm698_vm4, %v2201_v31  ;;  %v1066_v31 = vld [vmem:[%s5284_s30 + $0x48] sm:$0xe] }
  0xa7   : > { %4600 = vmatmul.msk.bf16.gmra.mxu1 %vm698_vm4, %v5107_v33  ;;  %v1925_v33 = vshrl.u32 %v4776_v23, 16  ;;  %v4618_v47 = vrot.slane %v1066_v31, 9  ;;  %v1960_v31 = vrot.slane %v1958_v14, 5 }
  0xa9   : > { %v5589_v41 = vpop.f32.mrf.mxu0  ;;  %v1927_v50 = vrot.slane %v1925_v33, 4  ;;  %v5125_v33 = vld [vmem:[%s5284_s30 + $0x54] sm:$0xff]  ;;  %v1965_v27 = vor.u32 %v1964_v42, %v1960_v31 }
  0xaa   : > { %v5595_v49 = vpop.f32.mrf.mxu3 }
  0xab   : > { %v1931_v59 = vor.u32 %v1930_v48, %v1927_v50  ;;  %v1166_v48 = vsel %vm5470_vm7, %v1164_v32, %v1165_v35  ;;  %v1966_v60 = vrot.slane %v1965_v27, 4 }
  0xac   : > { %4633 = vmatmul.msk.bf16.gmra.mxu2 %vm698_vm4, %v1261_v44  ;;  %v1158_v44 = vrot.slane %v5373_v56, 5 }
  0xae   : > { %v5601_v58 = vpop.f32.mrf.mxu1  ;;  %v5604_v63 = vpop.f32.mrf.mxu2  ;;  %v1159_v56 = vsel %vm5470_vm7, %v1157_v40, %v1158_v44  ;;  %v4781_v40 = vld [vmem:[%s5284_s30 + $0x68] sm:$0x1] }
  0xaf   : > { %v1238_v62 = vunpack.c.l.b16 %v1159_v56 }
  0xb1   : > { %4746 = vmatmul.msk.bf16.gmra.mxu3 %vm698_vm4, %v5123_v2  ;;  %v5612_v9 = vpop.f32.mrf.mxu0  ;;  %v1156_v2 = vsel %vm5470_vm7, %v4618_v47, %v1155_v26  ;;  %v2179_v47 = vunpack.c.l.b16 %v1947_v24 }
  0xb2   : > { %v5614_v0 = vpop.f32.mrf.mxu3  ;;  %v1237_v61 = vunpack.c.l.b16 %v1156_v2 }
  0xb4   : > { %v1263_v11 = vpack.c.b16 %v1238_v62, %v1237_v61  ;;  %v4782_v61 = vld [vmem:[%s5284_s30 + $0x6c] sm:$0xf]  ;;  %v4783_v62 = vld [vmem:[%s5284_s30 + $0x70] sm:$0xf] }
  0xb5   : > { %v1973_v14 = vshrl.u32 %v4782_v61, 16  ;;  %v1982_v16 = vshll.u32 %v4783_v62, 16 }
  0xb6   : > { %4811 = vmatmul.msk.bf16.gmra.mxu0 %vm698_vm4, %v2202_v8  ;;  %v5618_v28 = vpop.f32.mrf.mxu1  ;;  %v1932_v8 = vrot.slane %v1931_v59, 4 }
  0xb7   : > { %4601 = vmatmul.msk.bf16.gmra.mxu1 %vm698_vm4, %v5108_v12  ;;  %v1949_v12 = vshrl.u32 %v4779_v4, 16  ;;  %v1975_v35 = vrot.slane %v1973_v14, 4  ;;  %v4786_v14 = vld [vmem:[%s5284_s30 + $0x7c] sm:$0xf] }
  0xb8   : > { %v1937_v23 = vsel %vm5296_vm3, %v1932_v8, %v1936_v51  ;;  %v1968_v51 = vshll.u32 %v4781_v40, 16 }
  0xb9   : > { %v5621_v22 = vpop.f32.mrf.mxu2  ;;  %v1951_v29 = vrot.slane %v1949_v12, 4 }
  0xba   : > { %v1970_v20 = vrot.slane %v1968_v51, 5 }
  0xbb   : > { %v1955_v46 = vor.u32 %v1954_v30, %v1951_v29  ;;  %v5126_v30 = vld [vmem:[%s5284_s30 + $0x60] sm:$0xff] }
  0xbc   : > { %4634 = vmatmul.msk.bf16.gmra.mxu2 %vm698_vm4, %v1262_v19  ;;  %v1067_v19 = vld [vmem:[%s5284_s30 + $0x54] sm:$0xe]  ;;  %v1971_v25 = vsel %vm5296_vm3, %v1966_v60, %v1970_v20 }
  0xbd   : > { %v5631_v38 = vpop.f32.mrf.mxu0  ;;  %v4619_v21 = vrot.slane %v1067_v19, 9  ;;  %v1956_v59 = vrot.slane %v1955_v46, 4  ;;  %v1986_v19 = vshrl.u32 %v4783_v62, 16  ;;  %v4784_v46 = vld [vmem:[%s5284_s30 + $0x74] sm:$0x1] }
  0xbe   : > { %v5635_v39 = vpop.f32.mrf.mxu3 }
  0xbf   : > { %v1163_v50 = vsel %vm5470_vm7, %v4619_v21, %v1162_v15  ;;  %v1961_v8 = vsel %vm5296_vm3, %v1956_v59, %v1960_v31  ;;  %v1976_v15 = vshll.u32 %v4782_v61, 16  ;;  %v4620_v21 = vrot.slane %v1068_v13, 9  ;;  %v4785_v13 = vld [vmem:[%s5284_s30 + $0x78] sm:$0xf] }
  0xc0   : > { %v5638_v53 = vpop.f32.mrf.mxu1  ;;  %v1239_v56 = vunpack.c.l.b16 %v1163_v50  ;;  %v2180_v31 = vunpack.c.l.b16 %v1961_v8 }
  0xc1   : > { %4747 = vmatmul.msk.bf16.gmra.mxu3 %vm698_vm4, %v5124_v1  ;;  %v5642_v55 = vpop.f32.mrf.mxu2  ;;  %v2178_v1 = vunpack.c.l.b16 %v1937_v23  ;;  %v5168_v23 = vld [vmem:[%s5284_s30 + $0x68] sm:$0x1]  ;;  %v1978_v42 = vrot.slane %v1976_v15, 5  ;;  %v5169_v15 = vld [vmem:[%s5284_s30 + $0x70] sm:$0xf] }
  0xc2   : > { %v1172_v24 = vrot.slane %v5168_v23, 5  ;;  %v1069_v23 = vld [vmem:[%s5284_s30 + $0x6c] sm:$0xe] }
  0xc3   : > { %v2204_v52 = vpack.c.b16 %v2179_v47, %v2178_v1  ;;  %v1984_v1 = vrot.slane %v1982_v16, 5  ;;  %v1988_v47 = vrot.slane %v1986_v19, 4  ;;  %v1979_v51 = vor.u32 %v1978_v42, %v1975_v35  ;;  %v5170_v42 = vld [vmem:[%s5284_s30 + $0x74] sm:$0x1] }
  0xc4   : > { %v1176_v16 = vrot.slane %v5169_v15, 5 }
  0xc5   : > { %v5649_v3 = vpop.f32.mrf.mxu0 }
  0xc6   : > { %4812 = vmatmul.msk.bf16.gmra.mxu0 %vm698_vm4, %v2203_v57  ;;  %v5654_v6 = vpop.f32.mrf.mxu3  ;;  %v1240_v57 = vunpack.c.l.b16 %v1166_v48 }
  0xc7   : > { %4602 = vmatmul.msk.bf16.gmra.mxu1 %vm698_vm4, %v5109_v43 }
  0xc8   : > { %v5658_v17 = vpop.f32.mrf.mxu1  ;;  %v1264_v4 = vpack.c.b16 %v1240_v57, %v1239_v56  ;;  %v5111_v57 = vld [vmem:[%s5284_s30 + $0x60] sm:$0xff] }
  0xcc   : > { %v5665_v26 = vpop.f32.mrf.mxu2  ;;  %4635 = vmatmul.msk.bf16.gmra.mxu2 %vm698_vm4, %v1263_v11  ;;  %v1169_v11 = vrot.slane %v5167_v10, 5 }
  0xce   : > { %v1171_v32 = vrot.slane %v1169_v11, 4  ;;  %v1170_v50 = vsel %vm5470_vm7, %v4620_v21, %v1169_v11  ;;  %v2010_v21 = vshrl.u32 %v4786_v14, 16 }
  0xcf   : > { %v5671_v44 = vpop.f32.mrf.mxu0  ;;  %v1241_v20 = vunpack.c.l.b16 %v1170_v50  ;;  %v4621_v50 = vrot.slane %v1069_v23, 9 }
  0xd0   : > { %v5673_v45 = vpop.f32.mrf.mxu3  ;;  %v1173_v48 = vsel %vm5470_vm7, %v1171_v32, %v1172_v24 }
  0xd1   : > { %4748 = vmatmul.msk.bf16.gmra.mxu3 %vm698_vm4, %v5125_v33  ;;  %v2181_v33 = vunpack.c.l.b16 %v1971_v25  ;;  %v1242_v61 = vunpack.c.l.b16 %v1173_v48  ;;  %v1178_v48 = vrot.slane %v1176_v16, 4 }
  0xd3   : > { %v2205_v27 = vpack.c.b16 %v2181_v33, %v2180_v31  ;;  %v1265_v11 = vpack.c.b16 %v1242_v61, %v1241_v20  ;;  %v2000_v31 = vshll.u32 %v4785_v13, 16  ;;  %v2006_v33 = vshll.u32 %v4786_v14, 16 }
  0xd4   : > { %v5681_v2 = vpop.f32.mrf.mxu1  ;;  %v5683_v43 = vpop.f32.mrf.mxu2  ;;  %v2012_v20 = vrot.slane %v2010_v21, 4 }
  0xd6   : > { %4813 = vmatmul.msk.bf16.gmra.mxu0 %vm698_vm4, %v2204_v52  ;;  %v1989_v52 = vor.u32 %v1988_v47, %v1984_v1  ;;  %v1179_v47 = vrot.slane %v5170_v42, 5 }
  0xd7   : > { %4603 = vmatmul.msk.bf16.gmra.mxu1 %vm698_vm4, %v5110_v54  ;;  %v5689_v5 = vpop.f32.mrf.mxu0  ;;  %v1992_v54 = vshll.u32 %v4784_v46, 16  ;;  %v5127_v46 = vld [vmem:[%s5284_s30 + $0x6c] sm:$0xff] }
  0xd8   : > { %v5696_v12 = vpop.f32.mrf.mxu3  ;;  %v1990_v8 = vrot.slane %v1989_v52, 4 }
  0xd9   : > { %v1994_v25 = vrot.slane %v1992_v54, 5 }
  0xdc   : > { %4636 = vmatmul.msk.bf16.gmra.mxu2 %vm698_vm4, %v1264_v4  ;;  %v5701_v29 = vpop.f32.mrf.mxu1  ;;  %v1980_v4 = vrot.slane %v1979_v51, 4 }
  0xde   : > { %v1985_v19 = vsel %vm5296_vm3, %v1980_v4, %v1984_v1  ;;  %v4787_v4 = vld [vmem:[%s5284_s30 + $0x80] sm:$0x1] }
  0xdf   : > { %v5704_v40 = vpop.f32.mrf.mxu2 }
  0xe1   : > { %4749 = vmatmul.msk.bf16.gmra.mxu3 %vm698_vm4, %v5126_v30  ;;  %v1997_v30 = vshrl.u32 %v4785_v13, 16  ;;  %v5112_v13 = vld [vmem:[%s5284_s30 + $0x6c] sm:$0xff] }
  0xe3   : > { %v5712_v56 = vpop.f32.mrf.mxu0  ;;  %v1999_v54 = vrot.slane %v1997_v30, 4 }
  0xe4   : > { %v5715_v59 = vpop.f32.mrf.mxu3  ;;  %v980_v60 = vpop.f32.mrf.mxu1 }
  0xe5   : > { %v981_v62 = vadd.f32 %v980_v60, %v5589_v41  ;;  %v1995_v41 = vsel %vm5296_vm3, %v1990_v8, %v1994_v25  ;;  %v2008_v60 = vrot.slane %v2006_v33, 5  ;;  %v1177_v8 = vsel %vm5470_vm7, %v4621_v50, %v1176_v16 }
  0xe6   : > { %4814 = vmatmul.msk.bf16.gmra.mxu0 %vm698_vm4, %v2205_v27  ;;  %v2182_v27 = vunpack.c.l.b16 %v1985_v19  ;;  %v2183_v51 = vunpack.c.l.b16 %v1995_v41  ;;  %v2016_v19 = vshll.u32 %v4787_v4, 16 }
  0xe7   : > { %v5719_v10 = vpop.f32.mrf.mxu2  ;;  %4604 = vmatmul.msk.bf16.gmra.mxu1 %vm698_vm4, %v5111_v57  ;;  %v2002_v57 = vrot.slane %v2000_v31, 5  ;;  %v2013_v15 = vor.u32 %v2012_v20, %v2008_v60 }
  0xe8   : > { %v2206_v25 = vpack.c.b16 %v2183_v51, %v2182_v27  ;;  %v2018_v42 = vrot.slane %v2016_v19, 5  ;;  %v4789_v27 = vld [vmem:[%s5284_s30 + $0x88] sm:$0xf]  ;;  %v5171_v51 = vld [vmem:[%s5284_s30 + $0x7c] sm:$0xf] }
  0xe9   : > { %v2003_v14 = vor.u32 %v2002_v57, %v1999_v54  ;;  %v1070_v54 = vld [vmem:[%s5284_s30 + $0x78] sm:$0xe] }
  0xeb   : > { %v5730_v24 = vpop.f32.mrf.mxu0  ;;  %v2004_v21 = vrot.slane %v2003_v14, 4 }
  0xec   : > { %v5732_v32 = vpop.f32.mrf.mxu3  ;;  %4637 = vmatmul.msk.bf16.gmra.mxu2 %vm698_vm4, %v1265_v11  ;;  %v982_v35 = vpop.f32.mrf.mxu1 }
  0xed   : > { %v983_v1 = vadd.f32 %v982_v35, %v5612_v9  ;;  %v1180_v9 = vsel %vm5470_vm7, %v1178_v48, %v1179_v47  ;;  %v2014_v35 = vrot.slane %v2013_v15, 4  ;;  %v4788_v47 = vld [vmem:[%s5284_s30 + $0x84] sm:$0xf]  ;;  %v5128_v15 = vld [vmem:[%s5284_s30 + $0x78] sm:$0xff] }
  0xee   : > { %v1244_v30 = vunpack.c.l.b16 %v1180_v9  ;;  %v2024_v57 = vshll.u32 %v4788_v47, 16  ;;  %v2034_v9 = vshrl.u32 %v4789_v27, 16 }
  0xef   : > { %v1333_v52 = vpop.f32.mrf.mxu2  ;;  %v2019_v4 = vsel %vm5296_vm3, %v2014_v35, %v2018_v42 }
  0xf0   : > { %v1413_v61 = vadd.f32 %v1333_v52, %v981_v62  ;;  %v1243_v62 = vunpack.c.l.b16 %v1177_v8  ;;  %v1183_v52 = vrot.slane %v5171_v51, 5  ;;  %v2030_v8 = vshll.u32 %v4789_v27, 16 }
  0xf1   : > { %4750 = vmatmul.msk.bf16.gmra.mxu3 %vm698_vm4, %v5127_v46  ;;  %v2036_v35 = vrot.slane %v2034_v9, 4 }
  0xf2   : > { %v1266_v48 = vpack.c.b16 %v1244_v30, %v1243_v62 }
  0xf3   : > { %v2274_v11 = vpop.f32.mrf.mxu0 }
  0xf4   : > { %v1620_v41 = vpop.f32.mrf.mxu3  ;;  %v985_v23 = vpop.f32.mrf.mxu1 }
  0xf5   : > { %v1700_v31 = vadd.f32 %v1620_v41, %v1413_v61  ;;  %v986_v16 = vadd.f32 %v985_v23, %v5631_v38  ;;  %v2021_v38 = vshrl.u32 %v4788_v47, 16  ;;  %v2009_v61 = vsel %vm5296_vm3, %v2004_v21, %v2008_v60 }
  0xf6   : > { %4815 = vmatmul.msk.bf16.gmra.mxu0 %vm698_vm4, %v2206_v25  ;;  %v5172_v25 = vld [vmem:[%s5284_s30 + $0x80] sm:$0x1]  ;;  %v4622_v41 = vrot.slane %v1070_v54, 9  ;;  %v1185_v23 = vrot.slane %v1183_v52, 4  ;;  %v2184_v62 = vunpack.c.l.b16 %v2009_v61  ;;  %v2185_v60 = vunpack.c.l.b16 %v2019_v4 }
  0xf7   : > { %v1335_v33 = vpop.f32.mrf.mxu2  ;;  %4605 = vmatmul.msk.bf16.gmra.mxu1 %vm698_vm4, %v5112_v13  ;;  %v5749_v46 = vadd.f32 %v2274_v11, %v1700_v31  ;;  %v1186_v11 = vrot.slane %v5172_v25, 5  ;;  %v2023_v30 = vrot.slane %v2021_v38, 4  ;;  %v2026_v31 = vrot.slane %v2024_v57, 5  ;;  %v5113_v38 = vld [vmem:[%s5284_s30 + $0x78] sm:$0xff] }
  0xf8   : > { %v1414_v50 = vadd.f32 %v1335_v33, %v983_v1  ;;  %v2032_v21 = vrot.slane %v2030_v8, 5  ;;  %v2207_v27 = vpack.c.b16 %v2185_v60, %v2184_v62  ;;  %v4792_v62 = vld [vmem:[%s5284_s30 + $0x94] sm:$0xf]  ;;  %v5173_v60 = vld [vmem:[%s5284_s30 + $0x88] sm:$0xf] }
  0xf9   : > { %v2027_v51 = vor.u32 %v2026_v31, %v2023_v30  ;;  %v1190_v30 = vrot.slane %v5173_v60, 5  ;;  %v1071_v31 = vld [vmem:[%s5284_s30 + $0x84] sm:$0xe] }
  0xfa   : > { %v2037_v57 = vor.u32 %v2036_v35, %v2032_v21 }
  0xfb   : > { %v2276_v20 = vpop.f32.mrf.mxu0  ;;  %v2028_v25 = vrot.slane %v2027_v51, 4 }
  0xfc   : > { %v1622_v1 = vpop.f32.mrf.mxu3  ;;  %4638 = vmatmul.msk.bf16.gmra.mxu2 %vm698_vm4, %v1266_v48  ;;  %v987_v13 = vpop.f32.mrf.mxu1  ;;  %v4790_v48 = vld [vmem:[%s5284_s30 + $0x8c] sm:$0x1] }
  0xfd   : > { %v1701_v14 = vadd.f32 %v1622_v1, %v1414_v50  ;;  %v988_v19 = vadd.f32 %v987_v13, %v5649_v3  ;;  %v1184_v50 = vsel %vm5470_vm7, %v4622_v41, %v1183_v52  ;;  %v1187_v3 = vsel %vm5470_vm7, %v1185_v23, %v1186_v11 }
  0xfe   : > { %v2040_v61 = vshll.u32 %v4790_v48, 16  ;;  %v1246_v8 = vunpack.c.l.b16 %v1187_v3  ;;  %v2038_v1 = vrot.slane %v2037_v57, 4  ;;  %v2058_v3 = vshrl.u32 %v4792_v62, 16  ;;  %v5129_v57 = vld [vmem:[%s5284_s30 + $0x84] sm:$0xff] }
  0xff   : > { %v1338_v33 = vpop.f32.mrf.mxu2  ;;  %v5762_v42 = vadd.f32 %v2276_v20, %v1701_v14  ;;  %v4791_v14 = vld [vmem:[%s5284_s30 + $0x90] sm:$0xf] }
 0x100   : > { %v1415_v47 = vadd.f32 %v1338_v33, %v986_v16  ;;  %v1245_v16 = vunpack.c.l.b16 %v1184_v50  ;;  %v2042_v13 = vrot.slane %v2040_v61, 5  ;;  %v2045_v33 = vshrl.u32 %v4791_v14, 16 }
 0x101   : > { %4751 = vmatmul.msk.bf16.gmra.mxu3 %vm698_vm4, %v5128_v15  ;;  %v2048_v48 = vshll.u32 %v4791_v14, 16  ;;  %v2054_v50 = vshll.u32 %v4792_v62, 16  ;;  %v4623_v61 = vrot.slane %v1071_v31, 9 }
 0x102   : > { %v1267_v23 = vpack.c.b16 %v1246_v8, %v1245_v16  ;;  %v2047_v8 = vrot.slane %v2045_v33, 4 }
 0x103   : > { %v2279_v54 = vpop.f32.mrf.mxu0 }
 0x104   : > { %v1625_v4 = vpop.f32.mrf.mxu3  ;;  %v990_v20 = vpop.f32.mrf.mxu1 }
 0x105   : > { %v1702_v9 = vadd.f32 %v1625_v4, %v1415_v47  ;;  %v991_v52 = vadd.f32 %v990_v20, %v5671_v44  ;;  %v2033_v44 = vsel %vm5296_vm3, %v2028_v25, %v2032_v21  ;;  %v2043_v47 = vsel %vm5296_vm3, %v2038_v1, %v2042_v13 }
 0x106   : > { %4816 = vmatmul.msk.bf16.gmra.mxu0 %vm698_vm4, %v2207_v27  ;;  %v5174_v27 = vld [vmem:[%s5284_s30 + $0x8c] sm:$0x1]  ;;  %v1192_v4 = vrot.slane %v1190_v30, 4  ;;  %v2186_v20 = vunpack.c.l.b16 %v2033_v44  ;;  %v2187_v16 = vunpack.c.l.b16 %v2043_v47  ;;  %v2050_v25 = vrot.slane %v2048_v48, 5  ;;  %v5114_v44 = vld [vmem:[%s5284_s30 + $0x84] sm:$0xff] }
 0x107   : > { %v1340_v11 = vpop.f32.mrf.mxu2  ;;  %4606 = vmatmul.msk.bf16.gmra.mxu1 %vm698_vm4, %v5113_v38  ;;  %v5775_v15 = vadd.f32 %v2279_v54, %v1702_v9  ;;  %v1193_v51 = vrot.slane %v5174_v27, 5  ;;  %v2060_v1 = vrot.slane %v2058_v3, 4 }
 0x108   : > { %v1416_v41 = vadd.f32 %v1340_v11, %v988_v19  ;;  %v2056_v11 = vrot.slane %v2054_v50, 5  ;;  %v2208_v62 = vpack.c.b16 %v2187_v16, %v2186_v20  ;;  %v2051_v31 = vor.u32 %v2050_v25, %v2047_v8  ;;  %v4795_v20 = vld [vmem:[%s5284_s30 + $0xa0] sm:$0xf]  ;;  %v1072_v25 = vld [vmem:[%s5284_s30 + $0x90] sm:$0xe] }
 0x10a   : > { %v2061_v33 = vor.u32 %v2060_v1, %v2056_v11 }
 0x10b   : > { %v2281_v35 = vpop.f32.mrf.mxu0 }
 0x10c   : > { %v1627_v19 = vpop.f32.mrf.mxu3  ;;  %4639 = vmatmul.msk.bf16.gmra.mxu2 %vm698_vm4, %v1267_v23  ;;  %v992_v54 = vpop.f32.mrf.mxu1  ;;  %v4793_v23 = vld [vmem:[%s5284_s30 + $0x98] sm:$0x1] }
 0x10d   : > { %v1703_v38 = vadd.f32 %v1627_v19, %v1416_v41  ;;  %v993_v21 = vadd.f32 %v992_v54, %v5689_v5  ;;  %v1191_v5 = vsel %vm5470_vm7, %v4623_v61, %v1190_v30  ;;  %v1194_v41 = vsel %vm5470_vm7, %v1192_v4, %v1193_v51  ;;  %v4794_v30 = vld [vmem:[%s5284_s30 + $0x9c] sm:$0xf] }
 0x10e   : > { %v2064_v47 = vshll.u32 %v4793_v23, 16  ;;  %v1248_v50 = vunpack.c.l.b16 %v1194_v41  ;;  %v2052_v19 = vrot.slane %v2051_v31, 4  ;;  %v2062_v54 = vrot.slane %v2061_v33, 4 }
 0x10f   : > { %v1343_v9 = vpop.f32.mrf.mxu2  ;;  %v5788_v13 = vadd.f32 %v2281_v35, %v1703_v38  ;;  %v2069_v16 = vshrl.u32 %v4794_v30, 16  ;;  %v2072_v8 = vshll.u32 %v4794_v30, 16  ;;  %v2082_v41 = vshrl.u32 %v4795_v20, 16 }
 0x110   : > { %v1417_v14 = vadd.f32 %v1343_v9, %v991_v52  ;;  %v1247_v52 = vunpack.c.l.b16 %v1191_v5  ;;  %v2066_v38 = vrot.slane %v2064_v47, 5  ;;  %v5175_v9 = vld [vmem:[%s5284_s30 + $0x94] sm:$0xf]  ;;  %v2078_v5 = vshll.u32 %v4795_v20, 16 }
 0x111   : > { %4752 = vmatmul.msk.bf16.gmra.mxu3 %vm698_vm4, %v5129_v57  ;;  %v2071_v31 = vrot.slane %v2069_v16, 4  ;;  %v2074_v33 = vrot.slane %v2072_v8, 5 }
 0x112   : > { %v1268_v4 = vpack.c.b16 %v1248_v50, %v1247_v52  ;;  %v2067_v23 = vsel %vm5296_vm3, %v2062_v54, %v2066_v38  ;;  %v4624_v52 = vrot.slane %v1072_v25, 9 }
 0x113   : > { %v2284_v60 = vpop.f32.mrf.mxu0  ;;  %v2075_v20 = vor.u32 %v2074_v33, %v2071_v31  ;;  %v4798_v31 = vld [vmem:[%s5284_s30 + $0xac] sm:$0xf] }
 0x114   : > { %v1630_v48 = vpop.f32.mrf.mxu3  ;;  %v995_v35 = vpop.f32.mrf.mxu1 }
 0x115   : > { %v1704_v3 = vadd.f32 %v1630_v48, %v1417_v14  ;;  %v996_v27 = vadd.f32 %v995_v35, %v5712_v56  ;;  %v1197_v56 = vrot.slane %v5175_v9, 5  ;;  %v2057_v14 = vsel %vm5296_vm3, %v2052_v19, %v2056_v11  ;;  %v5130_v48 = vld [vmem:[%s5284_s30 + $0x90] sm:$0xff] }
 0x116   : > { %4817 = vmatmul.msk.bf16.gmra.mxu0 %vm698_vm4, %v2208_v62  ;;  %v5176_v62 = vld [vmem:[%s5284_s30 + $0x98] sm:$0x1]  ;;  %v2188_v50 = vunpack.c.l.b16 %v2057_v14  ;;  %v2084_v19 = vrot.slane %v2082_v41, 4  ;;  %v5115_v9 = vld [vmem:[%s5284_s30 + $0x90] sm:$0xff] }
 0x117   : > { %v1345_v51 = vpop.f32.mrf.mxu2  ;;  %4607 = vmatmul.msk.bf16.gmra.mxu1 %vm698_vm4, %v5114_v44  ;;  %v5801_v57 = vadd.f32 %v2284_v60, %v1704_v3  ;;  %v1200_v60 = vrot.slane %v5176_v62, 5  ;;  %v1199_v11 = vrot.slane %v1197_v56, 4  ;;  %v2189_v3 = vunpack.c.l.b16 %v2067_v23 }
 0x118   : > { %v1418_v61 = vadd.f32 %v1345_v51, %v993_v21  ;;  %v2080_v51 = vrot.slane %v2078_v5, 5  ;;  %v2076_v62 = vrot.slane %v2075_v20, 4  ;;  %v5178_v20 = vld [vmem:[%s5284_s30 + $0xa4] sm:$0x1] }
 0x119   : > { %v2209_v16 = vpack.c.b16 %v2189_v3, %v2188_v50  ;;  %v5177_v50 = vld [vmem:[%s5284_s30 + $0xa0] sm:$0xf] }
 0x11a   : > { %v2085_v25 = vor.u32 %v2084_v19, %v2080_v51  ;;  %v1204_v3 = vrot.slane %v5177_v50, 5  ;;  %v1073_v19 = vld [vmem:[%s5284_s30 + $0x9c] sm:$0xe] }
 0x11b   : > { %v2286_v1 = vpop.f32.mrf.mxu0 }
 0x11c   : > { %v1632_v21 = vpop.f32.mrf.mxu3  ;;  %4640 = vmatmul.msk.bf16.gmra.mxu2 %vm698_vm4, %v1268_v4  ;;  %v997_v44 = vpop.f32.mrf.mxu1  ;;  %v4796_v4 = vld [vmem:[%s5284_s30 + $0xa4] sm:$0x1] }
 0x11d   : > { %v1705_v47 = vadd.f32 %v1632_v21, %v1418_v61  ;;  %v998_v35 = vadd.f32 %v997_v44, %v5730_v24  ;;  %v1198_v61 = vsel %vm5470_vm7, %v4624_v52, %v1197_v56  ;;  %v1201_v24 = vsel %vm5470_vm7, %v1199_v11, %v1200_v60  ;;  %v4797_v21 = vld [vmem:[%s5284_s30 + $0xa8] sm:$0xf] }
 0x11e   : > { %v2088_v14 = vshll.u32 %v4796_v4, 16  ;;  %v1250_v5 = vunpack.c.l.b16 %v1201_v24  ;;  %v2086_v60 = vrot.slane %v2085_v25, 4  ;;  %v2093_v52 = vshrl.u32 %v4797_v21, 16 }
 0x11f   : > { %v1348_v30 = vpop.f32.mrf.mxu2  ;;  %v5814_v54 = vadd.f32 %v2286_v1, %v1705_v47  ;;  %v2081_v11 = vsel %vm5296_vm3, %v2076_v62, %v2080_v51  ;;  %v2106_v4 = vshrl.u32 %v4798_v31, 16 }
 0x120   : > { %v1419_v38 = vadd.f32 %v1348_v30, %v996_v27  ;;  %v1249_v27 = vunpack.c.l.b16 %v1198_v61  ;;  %v2090_v44 = vrot.slane %v2088_v14, 5  ;;  %v2096_v30 = vshll.u32 %v4797_v21, 16  ;;  %v5131_v14 = vld [vmem:[%s5284_s30 + $0x9c] sm:$0xff] }
 0x121   : > { %4753 = vmatmul.msk.bf16.gmra.mxu3 %vm698_vm4, %v5130_v48  ;;  %v2095_v51 = vrot.slane %v2093_v52, 4 }
 0x122   : > { %v1269_v48 = vpack.c.b16 %v1250_v5, %v1249_v27  ;;  %v2091_v24 = vsel %vm5296_vm3, %v2086_v60, %v2090_v44  ;;  %v1206_v27 = vrot.slane %v1204_v3, 4  ;;  %v2098_v5 = vrot.slane %v2096_v30, 5  ;;  %v4799_v44 = vld [vmem:[%s5284_s30 + $0xb0] sm:$0x1] }
 0x123   : > { %v2289_v8 = vpop.f32.mrf.mxu0  ;;  %v2191_v62 = vunpack.c.l.b16 %v2091_v24 }
 0x124   : > { %v1635_v1 = vpop.f32.mrf.mxu3  ;;  %v1000_v23 = vpop.f32.mrf.mxu1  ;;  %v2099_v52 = vor.u32 %v2098_v5, %v2095_v51 }
 0x125   : > { %v1706_v41 = vadd.f32 %v1635_v1, %v1419_v38  ;;  %v2102_v38 = vshll.u32 %v4798_v31, 16  ;;  %v4625_v1 = vrot.slane %v1073_v19, 9  ;;  %v5116_v19 = vld [vmem:[%s5284_s30 + $0x9c] sm:$0xff] }
 0x126   : > { %4818 = vmatmul.msk.bf16.gmra.mxu0 %vm698_vm4, %v2209_v16  ;;  %v1207_v16 = vrot.slane %v5178_v20, 5 }
 0x127   : > { %v1350_v56 = vpop.f32.mrf.mxu2  ;;  %4608 = vmatmul.msk.bf16.gmra.mxu1 %vm698_vm4, %v5115_v9  ;;  %v5827_v33 = vadd.f32 %v2289_v8, %v1706_v41  ;;  %v2190_v8 = vunpack.c.l.b16 %v2081_v11  ;;  %v1001_v41 = vadd.f32 %v1000_v23, %v5565_v7  ;;  %v2104_v21 = vrot.slane %v2102_v38, 5 }
 0x128   : > { %v1420_v47 = vadd.f32 %v1350_v56, %v998_v35  ;;  %v2108_v56 = vrot.slane %v2106_v4, 4  ;;  %v2112_v11 = vshll.u32 %v4799_v44, 16 }
 0x129   : > { %v2210_v7 = vpack.c.b16 %v2191_v62, %v2190_v8  ;;  %v4800_v8 = vld [vmem:[%s5284_s30 + $0xb4] sm:$0xf] }
 0x12a   : > { %v2109_v23 = vor.u32 %v2108_v56, %v2104_v21  ;;  %v2114_v51 = vrot.slane %v2112_v11, 5  ;;  %v2120_v44 = vshll.u32 %v4800_v8, 16 }
 0x12b   : > { %v2291_v61 = vpop.f32.mrf.mxu0 }
 0x12c   : > { %v1637_v35 = vpop.f32.mrf.mxu3  ;;  %4641 = vmatmul.msk.bf16.gmra.mxu2 %vm698_vm4, %v1269_v48  ;;  %v1002_v9 = vpop.f32.mrf.mxu1  ;;  %v1208_v48 = vsel %vm5470_vm7, %v1206_v27, %v1207_v16  ;;  %v2110_v16 = vrot.slane %v2109_v23, 4 }
 0x12d   : > { %v1707_v25 = vadd.f32 %v1637_v35, %v1420_v47  ;;  %v1205_v47 = vsel %vm5470_vm7, %v4625_v1, %v1204_v3  ;;  %v1252_v24 = vunpack.c.l.b16 %v1208_v48  ;;  %v2100_v35 = vrot.slane %v2099_v52, 4  ;;  %v5180_v52 = vld [vmem:[%s5284_s30 + $0xb0] sm:$0x1] }
 0x12e   : > { %v1003_v3 = vadd.f32 %v1002_v9, %v5581_v34  ;;  %v2117_v34 = vshrl.u32 %v4800_v8, 16  ;;  %v2115_v9 = vsel %vm5296_vm3, %v2110_v16, %v2114_v51 }
 0x12f   : > { %v1353_v60 = vpop.f32.mrf.mxu2  ;;  %v5840_v31 = vadd.f32 %v2291_v61, %v1707_v25  ;;  %v1251_v61 = vunpack.c.l.b16 %v1205_v47  ;;  %v2105_v56 = vsel %vm5296_vm3, %v2100_v35, %v2104_v21 }
 0x130   : > { %v1421_v50 = vadd.f32 %v1353_v60, %v1001_v41  ;;  %v5179_v41 = vld [vmem:[%s5284_s30 + $0xac] sm:$0xf]  ;;  %v1074_v60 = vld [vmem:[%s5284_s30 + $0xa8] sm:$0xe] }
 0x131   : > { %4754 = vmatmul.msk.bf16.gmra.mxu3 %vm698_vm4, %v5131_v14  ;;  %v4801_v14 = vld [vmem:[%s5284_s30 + $0xb8] sm:$0xf]  ;;  %v1270_v5 = vpack.c.b16 %v1252_v24, %v1251_v61  ;;  %v1211_v62 = vrot.slane %v5179_v41, 5  ;;  %v2192_v61 = vunpack.c.l.b16 %v2105_v56  ;;  %v2193_v24 = vunpack.c.l.b16 %v2115_v9  ;;  %v4802_v41 = vld [vmem:[%s5284_s30 + $0xbc] sm:$0x1] }
 0x132   : > { %v2130_v47 = vshrl.u32 %v4801_v14, 16 }
 0x133   : > { %v2294_v30 = vpop.f32.mrf.mxu0 }
 0x134   : > { %v1640_v38 = vpop.f32.mrf.mxu3  ;;  %v1005_v4 = vpop.f32.mrf.mxu1  ;;  %v2132_v51 = vrot.slane %v2130_v47, 4 }
 0x135   : > { %v1708_v20 = vadd.f32 %v1640_v38, %v1421_v50  ;;  %v2126_v50 = vshll.u32 %v4801_v14, 16  ;;  %v5132_v38 = vld [vmem:[%s5284_s30 + $0xa8] sm:$0xff]  ;;  %v1006_v35 = vadd.f32 %v1005_v4, %v5601_v58  ;;  %v2211_v58 = vpack.c.b16 %v2193_v24, %v2192_v61 }
 0x136   : > { %4819 = vmatmul.msk.bf16.gmra.mxu0 %vm698_vm4, %v2210_v7  ;;  %v1214_v7 = vrot.slane %v5180_v52, 5 }
 0x137   : > { %v1355_v25 = vpop.f32.mrf.mxu2  ;;  %4609 = vmatmul.msk.bf16.gmra.mxu1 %vm698_vm4, %v5116_v19  ;;  %v5853_v1 = vadd.f32 %v2294_v30, %v1708_v20  ;;  %v4626_v30 = vrot.slane %v1074_v60, 9  ;;  %v1213_v19 = vrot.slane %v1211_v62, 4  ;;  %v2119_v20 = vrot.slane %v2117_v34, 4  ;;  %v5117_v34 = vld [vmem:[%s5284_s30 + $0xa8] sm:$0xff] }
 0x138   : > { %v1422_v27 = vadd.f32 %v1355_v25, %v1003_v3  ;;  %v2122_v3 = vrot.slane %v2120_v44, 5  ;;  %v5865_v16 = vrot.slane %v2126_v50, 5  ;;  %v2136_v50 = vshll.u32 %v4802_v41, 16 }
 0x13a   : > { %v2123_v4 = vor.u32 %v2122_v3, %v2119_v20  ;;  %v2133_v56 = vor.u32 %v2132_v51, %v5865_v16  ;;  %v2138_v20 = vrot.slane %v2136_v50, 5 }
 0x13b   : > { %v2296_v48 = vpop.f32.mrf.mxu0 }
 0x13c   : > { %v1642_v23 = vpop.f32.mrf.mxu3  ;;  %4642 = vmatmul.msk.bf16.gmra.mxu2 %vm698_vm4, %v1270_v5  ;;  %v1007_v11 = vpop.f32.mrf.mxu1  ;;  %v1212_v5 = vsel %vm5470_vm7, %v4626_v30, %v1211_v62  ;;  %v4803_v62 = vld [vmem:[%s5284_s30 + $0xc0] sm:$0xf]  ;;  %v5181_v30 = vld [vmem:[%s5284_s30 + $0x10] sm:$0xf] }
 0x13d   : > { %v1709_v21 = vadd.f32 %v1642_v23, %v1422_v27  ;;  %v1215_v27 = vsel %vm5470_vm7, %v1213_v19, %v1214_v7  ;;  %v1253_v9 = vunpack.c.l.b16 %v1212_v5  ;;  %v4804_v23 = vld [vmem:[%s5284_s30 + $0xc4] sm:$0xf]  ;;  %v2452_v7 = vrot.slane %v5181_v30, 5 }
 0x13e   : > { %v1254_v44 = vunpack.c.l.b16 %v1215_v27  ;;  %v1008_v19 = vadd.f32 %v1007_v11, %v5618_v28  ;;  %v2144_v3 = vshll.u32 %v4803_v62, 16  ;;  %v5182_v27 = vld [vmem:[%s5284_s30 + $0xb8] sm:$0xf]  ;;  %v1075_v11 = vld [vmem:[%s5284_s30 + $0xb4] sm:$0xe] }
 0x13f   : > { %v1358_v8 = vpop.f32.mrf.mxu2  ;;  %v5867_v25 = vadd.f32 %v2296_v48, %v1709_v21  ;;  %v2124_v21 = vrot.slane %v2123_v4, 4  ;;  %v1218_v41 = vrot.slane %v5182_v27, 5  ;;  %v2454_v4 = vrot.slane %v2452_v7, 4  ;;  %v5133_v27 = vld [vmem:[%s5284_s30 + $0xb4] sm:$0xff] }
 0x140   : > { %v1423_v14 = vadd.f32 %v1358_v8, %v1006_v35  ;;  %v1271_v24 = vpack.c.b16 %v1254_v44, %v1253_v9  ;;  %v2141_v35 = vshrl.u32 %v4803_v62, 16  ;;  %v2150_v8 = vshll.u32 %v4804_v23, 16 }
 0x141   : > { %6778 = vst [vmem:[#allocation2_spill] sm:$0xff] %v5867_v25  ;;  %4755 = vmatmul.msk.bf16.gmra.mxu3 %vm698_vm4, %v5132_v38  ;;  %v2134_v38 = vrot.slane %v2133_v56, 4  ;;  %v5184_v56 = vld [vmem:[%s5284_s30 + $0x14] sm:$0x1]  ;;  %v2129_v9 = vsel %vm5296_vm3, %v2124_v21, %v5865_v16 }
 0x142   : > { %v2143_v62 = vrot.slane %v2141_v35, 4  ;;  %v2194_v21 = vunpack.c.l.b16 %v2129_v9 }
 0x143   : > { %v2299_v60 = vpop.f32.mrf.mxu0  ;;  %v2139_v44 = vsel %vm5296_vm3, %v2134_v38, %v2138_v20  ;;  %v4805_v20 = vld [vmem:[%s5284_s30 + $0xc8] sm:$0x1] }
 0x144   : > { %v1645_v47 = vpop.f32.mrf.mxu3  ;;  %v1010_v48 = vpop.f32.mrf.mxu1  ;;  %v2195_v38 = vunpack.c.l.b16 %v2139_v44  ;;  %v5118_v44 = vld [vmem:[%s5284_s30 + $0xb4] sm:$0xff] }
 0x145   : > { %v1710_v52 = vadd.f32 %v1645_v47, %v1423_v14  ;;  %v2154_v14 = vshrl.u32 %v4804_v23, 16  ;;  %v2455_v47 = vrot.slane %v5184_v56, 5  ;;  %v5895_v23 = vrot.slane %v2150_v8, 5 }
 0x146   : > { %4820 = vmatmul.msk.bf16.gmra.mxu0 %vm698_vm4, %v2211_v58  ;;  %v5183_v58 = vld [vmem:[%s5284_s30 + $0xbc] sm:$0x1]  ;;  %v1220_v56 = vrot.slane %v1218_v41, 4  ;;  %v1011_v16 = vadd.f32 %v1010_v48, %v5638_v53 }
 0x147   : > { %v1360_v61 = vpop.f32.mrf.mxu2  ;;  %4610 = vmatmul.msk.bf16.gmra.mxu1 %vm698_vm4, %v5117_v34  ;;  %v5883_v5 = vadd.f32 %v2299_v60, %v1710_v52  ;;  %v1221_v28 = vrot.slane %v5183_v58, 5  ;;  %v2146_v52 = vrot.slane %v2144_v3, 5  ;;  %v2156_v30 = vrot.slane %v2154_v14, 4 }
 0x148   : > { %v1424_v51 = vadd.f32 %v1360_v61, %v1008_v19  ;;  %v4823_v19 = vld [vmem:[%s5284_s30 + $0xc] sm:$0xe]  ;;  %v4627_v58 = vrot.slane %v1075_v11, 9  ;;  %v2456_v35 = vsel %vm5470_vm7, %v2454_v4, %v2455_v47  ;;  %v4985_v4 = vld [vmem:[%s5284_s30 + $0x18] sm:$0xf] }
 0x149   : > { %6779 = vst [vmem:[#allocation3_spill] sm:$0xff] %v5883_v5  ;;  %v4839_v5 = vrot.slane %v4823_v19, 9  ;;  %v2565_v14 = vunpack.c.l.b16 %v2456_v35  ;;  %v1222_v48 = vsel %vm5470_vm7, %v1220_v56, %v1221_v28  ;;  %v2157_v11 = vor.u32 %v2156_v30, %v5895_v23 }
 0x14a   : > { %v1219_v53 = vsel %vm5470_vm7, %v4627_v58, %v1218_v41  ;;  %v1256_v41 = vunpack.c.l.b16 %v1222_v48  ;;  %v3120_v30 = vshrl.u32 %v4985_v4, 16  ;;  %v4987_v48 = vld [vmem:[%s5284_s30 + $0x20] sm:$0x1] }
 0x14b   : > { %v2301_v34 = vpop.f32.mrf.mxu0  ;;  %v1255_v19 = vunpack.c.l.b16 %v1219_v53  ;;  %v2158_v28 = vrot.slane %v2157_v11, 4 }
 0x14c   : > { %v1647_v60 = vpop.f32.mrf.mxu3  ;;  %4643 = vmatmul.msk.bf16.gmra.mxu2 %vm698_vm4, %v1271_v24  ;;  %v1012_v50 = vpop.f32.mrf.mxu1  ;;  %v2453_v24 = vsel %vm5470_vm7, %v4839_v5, %v2452_v7  ;;  %v2160_v7 = vshll.u32 %v4805_v20, 16  ;;  %v2212_v5 = vpack.c.b16 %v2195_v38, %v2194_v21 }
 0x14d   : > { %v1711_v61 = vadd.f32 %v1647_v60, %v1424_v51  ;;  %v2147_v51 = vor.u32 %v2146_v52, %v2143_v62  ;;  %v2564_v8 = vunpack.c.l.b16 %v2453_v24  ;;  %v5918_v60 = vld [vmem:[%s5284_s30 + $0x1c] sm:$0xf]  ;;  %v1272_v24 = vpack.c.b16 %v1256_v41, %v1255_v19 }
 0x14e   : > { %v2162_v56 = vrot.slane %v2160_v7, 5  ;;  %v3133_v21 = vshrl.u32 %v5918_v60, 16  ;;  %v3139_v41 = vshll.u32 %v4987_v48, 16 }
 0x14f   : > { %v1363_v25 = vpop.f32.mrf.mxu2  ;;  %v5911_v9 = vpack.c.b16 %v2565_v14, %v2564_v8  ;;  %v5914_v47 = vadd.f32 %v2301_v34, %v1711_v61  ;;  %v3123_v34 = vshll.u32 %v4985_v4, 16  ;;  %v3129_v61 = vshll.u32 %v5918_v60, 16  ;;  %v5134_v4 = vld [vmem:[%s5284_s30 + $0xc0] sm:$0xff] }
 0x150   : > { %v1425_v3 = vadd.f32 %v1363_v25, %v1011_v16  ;;  %v1013_v16 = vadd.f32 %v1012_v50, %v5658_v17  ;;  %v2163_v17 = vsel %vm5296_vm3, %v2158_v28, %v2162_v56  ;;  %v3122_v50 = vrot.slane %v3120_v30, 4  ;;  %v4988_v28 = vld [vmem:[%s5284_s30 + $0x24] sm:$0xf] }
 0x151   : > { %4756 = vmatmul.msk.bf16.gmra.mxu3 %vm698_vm4, %v5133_v27  ;;  %v2148_v27 = vrot.slane %v2147_v51, 4  ;;  %v3125_v51 = vrot.slane %v3123_v34, 5  ;;  %v3131_v8 = vrot.slane %v3129_v61, 5  ;;  %v3135_v14 = vrot.slane %v3133_v21, 4  ;;  %v5939_v61 = vld [vmem:[%s5284_s30 + $0x28] sm:$0xf] }
 0x152   : > { %v3141_v34 = vrot.slane %v3139_v41, 5 }
 0x153   : > { %v2304_v25 = vpop.f32.mrf.mxu0  ;;  %v3136_v19 = vor.u32 %v3135_v14, %v3131_v8  ;;  %v5186_v14 = vld [vmem:[%s5284_s30 + $0x20] sm:$0x1] }
 0x154   : > { %v1650_v62 = vpop.f32.mrf.mxu3  ;;  %v1015_v52 = vpop.f32.mrf.mxu1 }
 0x155   : > { %v1712_v58 = vadd.f32 %v1650_v62, %v1425_v3  ;;  %v2153_v3 = vsel %vm5296_vm3, %v2148_v27, %v5895_v23  ;;  %v1016_v23 = vadd.f32 %v1015_v52, %v5681_v2  ;;  %v3126_v62 = vor.u32 %v3125_v51, %v3122_v50  ;;  %v5050_v52 = vld [vmem:[%s5284_s30 + $0x18] sm:$0xe]  ;;  %v5185_v50 = vld [vmem:[%s5284_s30 + $0x1c] sm:$0xf] }
 0x156   : > { %4821 = vmatmul.msk.bf16.gmra.mxu0 %vm698_vm4, %v2212_v5  ;;  %v2459_v51 = vrot.slane %v5185_v50, 5 }
 0x157   : > { %v1365_v38 = vpop.f32.mrf.mxu2  ;;  %4611 = vmatmul.msk.bf16.gmra.mxu1 %vm698_vm4, %v5118_v44  ;;  %v5925_v35 = vadd.f32 %v2304_v25, %v1712_v58  ;;  %v2196_v25 = vunpack.c.l.b16 %v2153_v3  ;;  %v2197_v44 = vunpack.c.l.b16 %v2163_v17  ;;  %v3127_v30 = vrot.slane %v3126_v62, 4 }
 0x158   : > { %v1426_v20 = vadd.f32 %v1365_v38, %v1013_v16  ;;  %v3137_v16 = vrot.slane %v3136_v19, 4  ;;  %v3791_v38 = vrot.slane %v5918_v60, 5  ;;  %v5066_v62 = vrot.slane %v5050_v52, 9 }
 0x159   : > { %v2213_v56 = vpack.c.b16 %v2197_v44, %v2196_v25  ;;  %v4824_v25 = vld [vmem:[%s5284_s30 + $0x18] sm:$0xe]  ;;  %v3153_v44 = vshll.u32 %v5939_v61, 16  ;;  %v3132_v60 = vsel %vm5296_vm3, %v3127_v30, %v3131_v8 }
 0x15a   : > { %v3793_v41 = vrot.slane %v3791_v38, 4  ;;  %v4840_v50 = vrot.slane %v4824_v25, 9  ;;  %v3505_v8 = vunpack.c.l.b16 %v3132_v60 }
 0x15b   : > { %v2306_v53 = vpop.f32.mrf.mxu0 }
 0x15c   : > { %v1652_v11 = vpop.f32.mrf.mxu3  ;;  %4644 = vmatmul.msk.bf16.gmra.mxu2 %vm698_vm4, %v1272_v24  ;;  %v1017_v7 = vpop.f32.mrf.mxu1  ;;  %v3147_v24 = vshll.u32 %v4988_v28, 16 }
 0x15d   : > { %v1713_v5 = vadd.f32 %v1652_v11, %v1426_v20  ;;  %v3144_v20 = vshrl.u32 %v4988_v28, 16  ;;  %v2462_v11 = vrot.slane %v5186_v14, 5  ;;  %v3155_v14 = vrot.slane %v3153_v44, 5 }
 0x15e   : > { %v3149_v28 = vrot.slane %v3147_v24, 5 }
 0x15f   : > { %v1368_v27 = vpop.f32.mrf.mxu2  ;;  %v5941_v21 = vadd.f32 %v2306_v53, %v1713_v5  ;;  %v3157_v53 = vshrl.u32 %v5939_v61, 16  ;;  %v1018_v5 = vadd.f32 %v1017_v7, %v5701_v29  ;;  %v2461_v29 = vrot.slane %v2459_v51, 4 }
 0x160   : > { %v1427_v58 = vadd.f32 %v1368_v27, %v1016_v23  ;;  %v3142_v23 = vsel %vm5296_vm3, %v3137_v16, %v3141_v34  ;;  %v3794_v27 = vrot.slane %v4987_v48, 5  ;;  %v5962_v34 = vld [vmem:[%s5284_s30 + $0x2c] sm:$0x1] }
 0x161   : > { %4757 = vmatmul.msk.bf16.gmra.mxu3 %vm698_vm4, %v5134_v4  ;;  %v3506_v30 = vunpack.c.l.b16 %v3142_v23  ;;  %v3159_v16 = vrot.slane %v3157_v53, 4 }
 0x162   : > { %v3795_v48 = vsel %vm5470_vm7, %v3793_v41, %v3794_v27 }
 0x163   : > { %v2309_v2 = vpop.f32.mrf.mxu0  ;;  %v3537_v53 = vpack.c.b16 %v3506_v30, %v3505_v8  ;;  %v5982_v30 = vld [vmem:[%s5284_s30 + $0x34] sm:$0xf] }
 0x164   : > { %v1655_v3 = vpop.f32.mrf.mxu3  ;;  %v1020_v17 = vpop.f32.mrf.mxu1 }
 0x165   : > { %v1714_v4 = vadd.f32 %v1655_v3, %v1427_v58  ;;  %v3146_v58 = vrot.slane %v3144_v20, 4  ;;  %v1021_v60 = vadd.f32 %v1020_v17, %v5583_v37 }
 0x166   : > { %4822 = vmatmul.msk.bf16.gmra.mxu0 %vm698_vm4, %v2213_v56  ;;  %v5135_v56 = vld [vmem:[%s5284_s30 + $0x18] sm:$0xff] }
 0x167   : > { %v1370_v19 = vpop.f32.mrf.mxu2  ;;  %4856 = vmatmul.msk.bf16.vlgmr.msra.gmra.mxu1 %vm698_vm4, %v5911_v9  ;;  %v5959_v7 = vadd.f32 %v2309_v2, %v1714_v4  ;;  %v3792_v9 = vsel %vm5470_vm7, %v5066_v62, %v3791_v38  ;;  %v2460_v2 = vsel %vm5470_vm7, %v4840_v50, %v2459_v51  ;;  %v2463_v4 = vsel %vm5470_vm7, %v2461_v29, %v2462_v11  ;;  %v4991_v29 = vld [vmem:[%s5284_s30 + $0x30] sm:$0xf] }
 0x168   : > { %v1428_v3 = vadd.f32 %v1370_v19, %v1018_v5  ;;  %v3150_v25 = vor.u32 %v3149_v28, %v3146_v58  ;;  %v3160_v5 = vor.u32 %v3159_v16, %v3155_v14  ;;  %v3163_v38 = vshll.u32 %v5962_v34, 16  ;;  %v5051_v28 = vld [vmem:[%s5284_s30 + $0x24] sm:$0xe] }
 0x169   : > { %v3903_v23 = vunpack.c.l.b16 %v3792_v9  ;;  %v3904_v62 = vunpack.c.l.b16 %v3795_v48  ;;  %v2566_v41 = vunpack.c.l.b16 %v2460_v2  ;;  %v2567_v27 = vunpack.c.l.b16 %v2463_v4  ;;  %v5187_v4 = vld [vmem:[%s5284_s30 + $0x28] sm:$0xf] }
 0x16a   : > { %v3161_v11 = vrot.slane %v3160_v5, 4  ;;  %v3165_v58 = vrot.slane %v3163_v38, 5  ;;  %v3801_v2 = vrot.slane %v5962_v34, 5  ;;  %v3168_v5 = vshrl.u32 %v4991_v29, 16  ;;  %v5188_v34 = vld [vmem:[%s5284_s30 + $0x2c] sm:$0x1] }
 0x16b   : > { %v2311_v52 = vpop.f32.mrf.mxu0  ;;  %v3935_v50 = vpack.c.b16 %v3904_v62, %v3903_v23  ;;  %v2597_v8 = vpack.c.b16 %v2567_v27, %v2566_v41  ;;  %v3181_v23 = vshrl.u32 %v5982_v30, 16  ;;  %v2469_v62 = vrot.slane %v5188_v34, 5  ;;  %v5136_v27 = vld [vmem:[%s5284_s30 + $0x24] sm:$0xff] }
 0x16c   : > { %v1657_v20 = vpop.f32.mrf.mxu3  ;;  %4969 = vmatmul.msk.bf16.vlgmr.msra.gmra.mxu2 %vm698_vm4, %v5135_v56  ;;  %v1022_v24 = vpop.f32.mrf.mxu1  ;;  %v3151_v56 = vrot.slane %v3150_v25, 4 }
 0x16d   : > { %v1715_v44 = vadd.f32 %v1657_v20, %v1428_v3  ;;  %v3798_v3 = vrot.slane %v5939_v61, 5  ;;  %v5067_v20 = vrot.slane %v5051_v28, 9  ;;  %v2466_v61 = vrot.slane %v5187_v4, 5 }
 0x16e   : > { %v3156_v48 = vsel %vm5296_vm3, %v3151_v56, %v3155_v14  ;;  %v1023_v38 = vadd.f32 %v1022_v24, %v5604_v63  ;;  %v3177_v14 = vshll.u32 %v5982_v30, 16  ;;  %v3183_v4 = vrot.slane %v3181_v23, 4 }
 0x16f   : > { %v1373_v19 = vpop.f32.mrf.mxu2  ;;  %v5979_v37 = vadd.f32 %v2311_v52, %v1715_v44  ;;  %v3166_v52 = vsel %vm5296_vm3, %v3161_v11, %v3165_v58  ;;  %v3800_v44 = vrot.slane %v3798_v3, 4  ;;  %v2468_v56 = vrot.slane %v2466_v61, 4 }
 0x170   : > { %v1429_v51 = vadd.f32 %v1373_v19, %v1021_v60  ;;  %v3171_v60 = vshll.u32 %v4991_v29, 16  ;;  %v3507_v58 = vunpack.c.l.b16 %v3156_v48  ;;  %v3508_v28 = vunpack.c.l.b16 %v3166_v52 }
 0x171   : > { %5034 = vmatmul.msk.bf16.vlgmr.msra.gmra.mxu3 %vm698_vm4, %v3537_v53  ;;  %v4825_v53 = vld [vmem:[%s5284_s30 + $0x24] sm:$0xe]  ;;  %v3799_v63 = vsel %vm5470_vm7, %v5067_v20, %v3798_v3  ;;  %v3802_v24 = vsel %vm5470_vm7, %v3800_v44, %v3801_v2  ;;  %v2470_v3 = vsel %vm5470_vm7, %v2468_v56, %v2469_v62 }
 0x172   : > { %v3173_v29 = vrot.slane %v3171_v60, 5  ;;  %v3538_v2 = vpack.c.b16 %v3508_v28, %v3507_v58  ;;  %v3906_v52 = vunpack.c.l.b16 %v3802_v24  ;;  %v3805_v24 = vrot.slane %v5982_v30, 5 }
 0x173   : > { %v2314_v17 = vpop.f32.mrf.mxu0 }
 0x174   : > { %v1660_v16 = vpop.f32.mrf.mxu3  ;;  %v1025_v9 = vpop.f32.mrf.mxu1 }
 0x175   : > { %v1716_v25 = vadd.f32 %v1660_v16, %v1429_v51  ;;  %v4841_v51 = vrot.slane %v4825_v53, 9  ;;  %v3179_v16 = vrot.slane %v3177_v14, 5  ;;  %v1026_v44 = vadd.f32 %v1025_v9, %v5621_v22  ;;  %v6017_v22 = vld [vmem:[%s5284_s30 + $0x40] sm:$0xf] }
 0x176   : > { %5083 = vmatmul.msk.bf16.vlgmr.msra.gmra.mxu0 %vm698_vm4, %v3935_v50  ;;  %v3170_v50 = vrot.slane %v3168_v5, 4 }
 0x177   : > { %v1375_v19 = vpop.f32.mrf.mxu2  ;;  %4857 = vmatmul.msk.bf16.gmra.mxu1 %vm698_vm4, %v2597_v8  ;;  %v5998_v11 = vadd.f32 %v2314_v17, %v1716_v25  ;;  %v6005_v8 = vld [vmem:[%s5284_s30 + $0x38] sm:$0x1]  ;;  %v2467_v48 = vsel %vm5470_vm7, %v4841_v51, %v2466_v61  ;;  %v3905_v25 = vunpack.c.l.b16 %v3799_v63  ;;  %v3184_v5 = vor.u32 %v3183_v4, %v3179_v16  ;;  %v4994_v61 = vld [vmem:[%s5284_s30 + $0x3c] sm:$0xf]  ;;  %v5052_v63 = vld [vmem:[%s5284_s30 + $0x30] sm:$0xe] }
 0x178   : > { %v1430_v41 = vadd.f32 %v1375_v19, %v1023_v38  ;;  %v3174_v53 = vor.u32 %v3173_v29, %v3170_v50  ;;  %v3187_v60 = vshll.u32 %v6005_v8, 16  ;;  %v2568_v23 = vunpack.c.l.b16 %v2467_v48  ;;  %v5189_v48 = vld [vmem:[%s5284_s30 + $0x34] sm:$0xf] }
 0x179   : > { %v2569_v19 = vunpack.c.l.b16 %v2470_v3  ;;  %v3936_v62 = vpack.c.b16 %v3906_v52, %v3905_v25  ;;  %v3185_v51 = vrot.slane %v3184_v5, 4  ;;  %v3192_v50 = vshrl.u32 %v4994_v61, 16 }
 0x17a   : > { %v3189_v56 = vrot.slane %v3187_v60, 5  ;;  %v3195_v29 = vshll.u32 %v4994_v61, 16  ;;  %v2473_v3 = vrot.slane %v5189_v48, 5  ;;  %v5068_v60 = vrot.slane %v5052_v63, 9 }
 0x17b   : > { %v2316_v34 = vpop.f32.mrf.mxu0  ;;  %v2598_v28 = vpack.c.b16 %v2569_v19, %v2568_v23  ;;  %v3807_v23 = vrot.slane %v3805_v24, 4  ;;  %v3808_v19 = vrot.slane %v6005_v8, 5 }
 0x17c   : > { %v1662_v38 = vpop.f32.mrf.mxu3  ;;  %4970 = vmatmul.msk.bf16.gmra.mxu2 %vm698_vm4, %v5136_v27  ;;  %v1027_v17 = vpop.f32.mrf.mxu1  ;;  %v3190_v5 = vsel %vm5296_vm3, %v3185_v51, %v3189_v56  ;;  %v3197_v61 = vrot.slane %v3195_v29, 5  ;;  %v6040_v56 = vld [vmem:[%s5284_s30 + $0x44] sm:$0x1] }
 0x17d   : > { %v1717_v20 = vadd.f32 %v1662_v38, %v1430_v41  ;;  %v3175_v41 = vrot.slane %v3174_v53, 4  ;;  %v3201_v53 = vshll.u32 %v6017_v22, 16  ;;  %v3809_v8 = vsel %vm5470_vm7, %v3807_v23, %v3808_v19 }
 0x17f   : > { %v1378_v14 = vpop.f32.mrf.mxu2  ;;  %v6019_v9 = vadd.f32 %v2316_v34, %v1717_v20  ;;  %v3205_v34 = vshrl.u32 %v6017_v22, 16  ;;  %v1028_v20 = vadd.f32 %v1027_v17, %v5642_v55  ;;  %v3180_v30 = vsel %vm5296_vm3, %v3175_v41, %v3179_v16 }
 0x180   : > { %v1431_v27 = vadd.f32 %v1378_v14, %v1026_v44  ;;  %v4826_v44 = vld [vmem:[%s5284_s30 + $0x30] sm:$0xe]  ;;  %v2475_v55 = vrot.slane %v2473_v3, 4  ;;  %v3509_v16 = vunpack.c.l.b16 %v3180_v30  ;;  %v3510_v41 = vunpack.c.l.b16 %v3190_v5 }
 0x181   : > { %5035 = vmatmul.msk.bf16.gmra.mxu3 %vm698_vm4, %v3538_v2  ;;  %v5190_v2 = vld [vmem:[%s5284_s30 + $0x38] sm:$0x1]  ;;  %v4842_v48 = vrot.slane %v4826_v44, 9  ;;  %v3207_v51 = vrot.slane %v3205_v34, 4 }
 0x182   : > { %v2476_v25 = vrot.slane %v5190_v2, 5  ;;  %v3203_v2 = vrot.slane %v3201_v53, 5  ;;  %v3539_v34 = vpack.c.b16 %v3510_v41, %v3509_v16  ;;  %v6060_v41 = vld [vmem:[%s5284_s30 + $0x4c] sm:$0xf] }
 0x183   : > { %v2319_v58 = vpop.f32.mrf.mxu0 }
 0x184   : > { %v1665_v4 = vpop.f32.mrf.mxu3  ;;  %v1030_v38 = vpop.f32.mrf.mxu1 }
 0x185   : > { %v1718_v52 = vadd.f32 %v1665_v4, %v1431_v27  ;;  %v3194_v27 = vrot.slane %v3192_v50, 4  ;;  %v1031_v30 = vadd.f32 %v1030_v38, %v5665_v26 }
 0x186   : > { %5084 = vmatmul.msk.bf16.gmra.mxu0 %vm698_vm4, %v3936_v62  ;;  %v5137_v62 = vld [vmem:[%s5284_s30 + $0x30] sm:$0xff] }
 0x187   : > { %v1380_v14 = vpop.f32.mrf.mxu2  ;;  %4858 = vmatmul.msk.bf16.gmra.mxu1 %vm698_vm4, %v2598_v28  ;;  %v6037_v17 = vadd.f32 %v2319_v58, %v1718_v52  ;;  %v3806_v28 = vsel %vm5470_vm7, %v5068_v60, %v3805_v24  ;;  %v2474_v58 = vsel %vm5470_vm7, %v4842_v48, %v2473_v3  ;;  %v2477_v52 = vsel %vm5470_vm7, %v2475_v55, %v2476_v25  ;;  %v4997_v55 = vld [vmem:[%s5284_s30 + $0x48] sm:$0xf] }
 0x188   : > { %v1432_v4 = vadd.f32 %v1380_v14, %v1028_v20  ;;  %v3198_v44 = vor.u32 %v3197_v61, %v3194_v27  ;;  %v3208_v20 = vor.u32 %v3207_v51, %v3203_v2  ;;  %v3211_v24 = vshll.u32 %v6040_v56, 16  ;;  %v5053_v61 = vld [vmem:[%s5284_s30 + $0x3c] sm:$0xe] }
 0x189   : > { %v3907_v5 = vunpack.c.l.b16 %v3806_v28  ;;  %v3908_v60 = vunpack.c.l.b16 %v3809_v8  ;;  %v2570_v23 = vunpack.c.l.b16 %v2474_v58  ;;  %v2571_v19 = vunpack.c.l.b16 %v2477_v52  ;;  %v5191_v52 = vld [vmem:[%s5284_s30 + $0x40] sm:$0xf] }
 0x18a   : > { %v3209_v25 = vrot.slane %v3208_v20, 4  ;;  %v3213_v27 = vrot.slane %v3211_v24, 5  ;;  %v3815_v58 = vrot.slane %v6040_v56, 5  ;;  %v3216_v20 = vshrl.u32 %v4997_v55, 16  ;;  %v5192_v56 = vld [vmem:[%s5284_s30 + $0x44] sm:$0x1] }
 0x18b   : > { %v2321_v63 = vpop.f32.mrf.mxu0  ;;  %v3937_v48 = vpack.c.b16 %v3908_v60, %v3907_v5  ;;  %v2599_v16 = vpack.c.b16 %v2571_v19, %v2570_v23  ;;  %v3229_v5 = vshrl.u32 %v6060_v41, 16  ;;  %v2483_v60 = vrot.slane %v5192_v56, 5  ;;  %v5138_v19 = vld [vmem:[%s5284_s30 + $0x3c] sm:$0xff] }
 0x18c   : > { %v1667_v50 = vpop.f32.mrf.mxu3  ;;  %4971 = vmatmul.msk.bf16.gmra.mxu2 %vm698_vm4, %v5137_v62  ;;  %v1032_v29 = vpop.f32.mrf.mxu1  ;;  %v3199_v62 = vrot.slane %v3198_v44, 4 }
 0x18d   : > { %v1719_v53 = vadd.f32 %v1667_v50, %v1432_v4  ;;  %v3812_v4 = vrot.slane %v6017_v22, 5  ;;  %v5069_v50 = vrot.slane %v5053_v61, 9  ;;  %v2480_v22 = vrot.slane %v5191_v52, 5 }
 0x18e   : > { %v3204_v8 = vsel %vm5296_vm3, %v3199_v62, %v3203_v2  ;;  %v1033_v24 = vadd.f32 %v1032_v29, %v5683_v43  ;;  %v3225_v2 = vshll.u32 %v6060_v41, 16  ;;  %v3231_v52 = vrot.slane %v3229_v5, 4 }
 0x18f   : > { %v1383_v14 = vpop.f32.mrf.mxu2  ;;  %v6057_v26 = vadd.f32 %v2321_v63, %v1719_v53  ;;  %v3214_v63 = vsel %vm5296_vm3, %v3209_v25, %v3213_v27  ;;  %v3814_v53 = vrot.slane %v3812_v4, 4  ;;  %v2482_v62 = vrot.slane %v2480_v22, 4 }
 0x190   : > { %v1433_v3 = vadd.f32 %v1383_v14, %v1031_v30  ;;  %v3219_v30 = vshll.u32 %v4997_v55, 16  ;;  %v3511_v27 = vunpack.c.l.b16 %v3204_v8  ;;  %v3512_v61 = vunpack.c.l.b16 %v3214_v63 }
 0x191   : > { %5036 = vmatmul.msk.bf16.gmra.mxu3 %vm698_vm4, %v3539_v34  ;;  %v4827_v34 = vld [vmem:[%s5284_s30 + $0x3c] sm:$0xe]  ;;  %v3813_v43 = vsel %vm5470_vm7, %v5069_v50, %v3812_v4  ;;  %v3816_v29 = vsel %vm5470_vm7, %v3814_v53, %v3815_v58  ;;  %v2484_v4 = vsel %vm5470_vm7, %v2482_v62, %v2483_v60 }
 0x192   : > { %v3221_v55 = vrot.slane %v3219_v30, 5  ;;  %v3540_v58 = vpack.c.b16 %v3512_v61, %v3511_v27  ;;  %v3910_v63 = vunpack.c.l.b16 %v3816_v29  ;;  %v3819_v29 = vrot.slane %v6060_v41, 5 }
 0x193   : > { %v2324_v38 = vpop.f32.mrf.mxu0 }
 0x194   : > { %v1670_v51 = vpop.f32.mrf.mxu3  ;;  %v1035_v28 = vpop.f32.mrf.mxu1 }
 0x195   : > { %v1720_v44 = vadd.f32 %v1670_v51, %v1433_v3  ;;  %v4843_v3 = vrot.slane %v4827_v34, 9  ;;  %v3227_v51 = vrot.slane %v3225_v2, 5  ;;  %v1036_v53 = vadd.f32 %v1035_v28, %v5704_v40  ;;  %v6095_v40 = vld [vmem:[%s5284_s30 + $0x58] sm:$0xf] }
 0x196   : > { %5085 = vmatmul.msk.bf16.gmra.mxu0 %vm698_vm4, %v3937_v48  ;;  %v3218_v48 = vrot.slane %v3216_v20, 4 }
 0x197   : > { %v1385_v14 = vpop.f32.mrf.mxu2  ;;  %4859 = vmatmul.msk.bf16.gmra.mxu1 %vm698_vm4, %v2599_v16  ;;  %v6076_v25 = vadd.f32 %v2324_v38, %v1720_v44  ;;  %v6083_v16 = vld [vmem:[%s5284_s30 + $0x50] sm:$0x1]  ;;  %v2481_v8 = vsel %vm5470_vm7, %v4843_v3, %v2480_v22  ;;  %v3909_v44 = vunpack.c.l.b16 %v3813_v43  ;;  %v3232_v20 = vor.u32 %v3231_v52, %v3227_v51  ;;  %v5000_v22 = vld [vmem:[%s5284_s30 + $0x54] sm:$0xf]  ;;  %v5054_v43 = vld [vmem:[%s5284_s30 + $0x48] sm:$0xe] }
 0x198   : > { %v1434_v23 = vadd.f32 %v1385_v14, %v1033_v24  ;;  %v3222_v34 = vor.u32 %v3221_v55, %v3218_v48  ;;  %v3235_v30 = vshll.u32 %v6083_v16, 16  ;;  %v2572_v5 = vunpack.c.l.b16 %v2481_v8  ;;  %v5193_v8 = vld [vmem:[%s5284_s30 + $0x4c] sm:$0xf] }
 0x199   : > { %v2573_v14 = vunpack.c.l.b16 %v2484_v4  ;;  %v3938_v60 = vpack.c.b16 %v3910_v63, %v3909_v44  ;;  %v3233_v3 = vrot.slane %v3232_v20, 4  ;;  %v3240_v48 = vshrl.u32 %v5000_v22, 16 }
 0x19a   : > { %v3237_v62 = vrot.slane %v3235_v30, 5  ;;  %v3243_v55 = vshll.u32 %v5000_v22, 16  ;;  %v2487_v4 = vrot.slane %v5193_v8, 5  ;;  %v5070_v30 = vrot.slane %v5054_v43, 9 }
 0x19b   : > { %v2326_v56 = vpop.f32.mrf.mxu0  ;;  %v2600_v61 = vpack.c.b16 %v2573_v14, %v2572_v5  ;;  %v3821_v5 = vrot.slane %v3819_v29, 4  ;;  %v3822_v14 = vrot.slane %v6083_v16, 5 }
 0x19c   : > { %v1672_v24 = vpop.f32.mrf.mxu3  ;;  %4972 = vmatmul.msk.bf16.gmra.mxu2 %vm698_vm4, %v5138_v19  ;;  %v1037_v38 = vpop.f32.mrf.mxu1  ;;  %v3238_v20 = vsel %vm5296_vm3, %v3233_v3, %v3237_v62  ;;  %v3245_v22 = vrot.slane %v3243_v55, 5  ;;  %v6118_v62 = vld [vmem:[%s5284_s30 + $0x5c] sm:$0x1] }
 0x19d   : > { %v1721_v50 = vadd.f32 %v1672_v24, %v1434_v23  ;;  %v3223_v23 = vrot.slane %v3222_v34, 4  ;;  %v3249_v34 = vshll.u32 %v6095_v40, 16  ;;  %v3823_v16 = vsel %vm5470_vm7, %v3821_v5, %v3822_v14 }
 0x19f   : > { %v1388_v2 = vpop.f32.mrf.mxu2  ;;  %v6097_v28 = vadd.f32 %v2326_v56, %v1721_v50  ;;  %v3253_v56 = vshrl.u32 %v6095_v40, 16  ;;  %v1038_v50 = vadd.f32 %v1037_v38, %v5719_v10  ;;  %v3228_v41 = vsel %vm5296_vm3, %v3223_v23, %v3227_v51 }
 0x1a0   : > { %v1435_v19 = vadd.f32 %v1388_v2, %v1036_v53  ;;  %v4828_v53 = vld [vmem:[%s5284_s30 + $0x48] sm:$0xe]  ;;  %v2489_v10 = vrot.slane %v2487_v4, 4  ;;  %v3513_v51 = vunpack.c.l.b16 %v3228_v41  ;;  %v3514_v23 = vunpack.c.l.b16 %v3238_v20 }
 0x1a1   : > { %5037 = vmatmul.msk.bf16.gmra.mxu3 %vm698_vm4, %v3540_v58  ;;  %v5194_v58 = vld [vmem:[%s5284_s30 + $0x50] sm:$0x1]  ;;  %v4844_v8 = vrot.slane %v4828_v53, 9  ;;  %v3255_v3 = vrot.slane %v3253_v56, 4 }
 0x1a2   : > { %v2490_v44 = vrot.slane %v5194_v58, 5  ;;  %v3251_v58 = vrot.slane %v3249_v34, 5  ;;  %v3541_v56 = vpack.c.b16 %v3514_v23, %v3513_v51  ;;  %v6138_v23 = vld [vmem:[%s5284_s30 + $0x64] sm:$0xf] }
 0x1a3   : > { %v2329_v27 = vpop.f32.mrf.mxu0 }
 0x1a4   : > { %v1675_v52 = vpop.f32.mrf.mxu3  ;;  %v1040_v24 = vpop.f32.mrf.mxu1 }
 0x1a5   : > { %v1722_v63 = vadd.f32 %v1675_v52, %v1435_v19  ;;  %v3242_v19 = vrot.slane %v3240_v48, 4  ;;  %v1041_v41 = vadd.f32 %v1040_v24, %v5595_v49 }
 0x1a6   : > { %5086 = vmatmul.msk.bf16.gmra.mxu0 %vm698_vm4, %v3938_v60  ;;  %v5139_v60 = vld [vmem:[%s5284_s30 + $0x48] sm:$0xff] }
 0x1a7   : > { %v1390_v2 = vpop.f32.mrf.mxu2  ;;  %4860 = vmatmul.msk.bf16.gmra.mxu1 %vm698_vm4, %v2600_v61  ;;  %v6115_v38 = vadd.f32 %v2329_v27, %v1722_v63  ;;  %v3820_v61 = vsel %vm5470_vm7, %v5070_v30, %v3819_v29  ;;  %v2488_v27 = vsel %vm5470_vm7, %v4844_v8, %v2487_v4  ;;  %v2491_v63 = vsel %vm5470_vm7, %v2489_v10, %v2490_v44  ;;  %v5003_v10 = vld [vmem:[%s5284_s30 + $0x60] sm:$0xf] }
 0x1a8   : > { %v1436_v52 = vadd.f32 %v1390_v2, %v1038_v50  ;;  %v3246_v53 = vor.u32 %v3245_v22, %v3242_v19  ;;  %v3256_v50 = vor.u32 %v3255_v3, %v3251_v58  ;;  %v3259_v29 = vshll.u32 %v6118_v62, 16  ;;  %v5055_v22 = vld [vmem:[%s5284_s30 + $0x54] sm:$0xe] }
 0x1a9   : > { %v3911_v20 = vunpack.c.l.b16 %v3820_v61  ;;  %v3912_v30 = vunpack.c.l.b16 %v3823_v16  ;;  %v2574_v5 = vunpack.c.l.b16 %v2488_v27  ;;  %v2575_v14 = vunpack.c.l.b16 %v2491_v63  ;;  %v5195_v63 = vld [vmem:[%s5284_s30 + $0x58] sm:$0xf] }
 0x1aa   : > { %v3257_v44 = vrot.slane %v3256_v50, 4  ;;  %v3261_v19 = vrot.slane %v3259_v29, 5  ;;  %v3829_v27 = vrot.slane %v6118_v62, 5  ;;  %v3264_v50 = vshrl.u32 %v5003_v10, 16  ;;  %v5196_v62 = vld [vmem:[%s5284_s30 + $0x5c] sm:$0x1] }
 0x1ab   : > { %v2331_v43 = vpop.f32.mrf.mxu0  ;;  %v3939_v8 = vpack.c.b16 %v3912_v30, %v3911_v20  ;;  %v2601_v51 = vpack.c.b16 %v2575_v14, %v2574_v5  ;;  %v3277_v20 = vshrl.u32 %v6138_v23, 16  ;;  %v2497_v30 = vrot.slane %v5196_v62, 5  ;;  %v5140_v14 = vld [vmem:[%s5284_s30 + $0x54] sm:$0xff] }
 0x1ac   : > { %v1677_v48 = vpop.f32.mrf.mxu3  ;;  %4973 = vmatmul.msk.bf16.gmra.mxu2 %vm698_vm4, %v5139_v60  ;;  %v1042_v55 = vpop.f32.mrf.mxu1  ;;  %v3247_v60 = vrot.slane %v3246_v53, 4 }
 0x1ad   : > { %v1723_v34 = vadd.f32 %v1677_v48, %v1436_v52  ;;  %v3826_v52 = vrot.slane %v6095_v40, 5  ;;  %v5071_v48 = vrot.slane %v5055_v22, 9  ;;  %v2494_v40 = vrot.slane %v5195_v63, 5 }
 0x1ae   : > { %v3252_v16 = vsel %vm5296_vm3, %v3247_v60, %v3251_v58  ;;  %v1043_v29 = vadd.f32 %v1042_v55, %v5614_v0  ;;  %v3273_v58 = vshll.u32 %v6138_v23, 16  ;;  %v3279_v63 = vrot.slane %v3277_v20, 4 }
 0x1af   : > { %v1393_v2 = vpop.f32.mrf.mxu2  ;;  %v6135_v49 = vadd.f32 %v2331_v43, %v1723_v34  ;;  %v3262_v43 = vsel %vm5296_vm3, %v3257_v44, %v3261_v19  ;;  %v3828_v34 = vrot.slane %v3826_v52, 4  ;;  %v2496_v60 = vrot.slane %v2494_v40, 4 }
 0x1b0   : > { %v1437_v4 = vadd.f32 %v1393_v2, %v1041_v41  ;;  %v3267_v41 = vshll.u32 %v5003_v10, 16  ;;  %v3515_v19 = vunpack.c.l.b16 %v3252_v16  ;;  %v3516_v22 = vunpack.c.l.b16 %v3262_v43 }
 0x1b1   : > { %5038 = vmatmul.msk.bf16.gmra.mxu3 %vm698_vm4, %v3541_v56  ;;  %v4829_v56 = vld [vmem:[%s5284_s30 + $0x54] sm:$0xe]  ;;  %v3827_v0 = vsel %vm5470_vm7, %v5071_v48, %v3826_v52  ;;  %v3830_v55 = vsel %vm5470_vm7, %v3828_v34, %v3829_v27  ;;  %v2498_v52 = vsel %vm5470_vm7, %v2496_v60, %v2497_v30 }
 0x1b2   : > { %v3269_v10 = vrot.slane %v3267_v41, 5  ;;  %v3542_v27 = vpack.c.b16 %v3516_v22, %v3515_v19  ;;  %v3914_v43 = vunpack.c.l.b16 %v3830_v55  ;;  %v3833_v55 = vrot.slane %v6138_v23, 5 }
 0x1b3   : > { %v2334_v24 = vpop.f32.mrf.mxu0 }
 0x1b4   : > { %v1680_v3 = vpop.f32.mrf.mxu3  ;;  %v1045_v61 = vpop.f32.mrf.mxu1 }
 0x1b5   : > { %v1724_v53 = vadd.f32 %v1680_v3, %v1437_v4  ;;  %v4845_v4 = vrot.slane %v4829_v56, 9  ;;  %v3275_v3 = vrot.slane %v3273_v58, 5  ;;  %v1046_v34 = vadd.f32 %v1045_v61, %v5635_v39  ;;  %v6173_v39 = vld [vmem:[%s5284_s30 + $0x70] sm:$0xf] }
 0x1b6   : > { %5087 = vmatmul.msk.bf16.gmra.mxu0 %vm698_vm4, %v3939_v8  ;;  %v3266_v8 = vrot.slane %v3264_v50, 4 }
 0x1b7   : > { %v1395_v2 = vpop.f32.mrf.mxu2  ;;  %4861 = vmatmul.msk.bf16.gmra.mxu1 %vm698_vm4, %v2601_v51  ;;  %v6154_v44 = vadd.f32 %v2334_v24, %v1724_v53  ;;  %v6161_v51 = vld [vmem:[%s5284_s30 + $0x68] sm:$0x1]  ;;  %v2495_v16 = vsel %vm5470_vm7, %v4845_v4, %v2494_v40  ;;  %v3913_v53 = vunpack.c.l.b16 %v3827_v0  ;;  %v3280_v50 = vor.u32 %v3279_v63, %v3275_v3  ;;  %v5006_v40 = vld [vmem:[%s5284_s30 + $0x6c] sm:$0xf]  ;;  %v5056_v0 = vld [vmem:[%s5284_s30 + $0x60] sm:$0xe] }
 0x1b8   : > { %v1438_v5 = vadd.f32 %v1395_v2, %v1043_v29  ;;  %v3270_v56 = vor.u32 %v3269_v10, %v3266_v8  ;;  %v3283_v41 = vshll.u32 %v6161_v51, 16  ;;  %v2576_v20 = vunpack.c.l.b16 %v2495_v16  ;;  %v5197_v16 = vld [vmem:[%s5284_s30 + $0x64] sm:$0xf] }
 0x1b9   : > { %v2577_v2 = vunpack.c.l.b16 %v2498_v52  ;;  %v3940_v30 = vpack.c.b16 %v3914_v43, %v3913_v53  ;;  %v3281_v4 = vrot.slane %v3280_v50, 4  ;;  %v3288_v8 = vshrl.u32 %v5006_v40, 16 }
 0x1ba   : > { %v3285_v60 = vrot.slane %v3283_v41, 5  ;;  %v3291_v10 = vshll.u32 %v5006_v40, 16  ;;  %v2501_v52 = vrot.slane %v5197_v16, 5  ;;  %v5072_v41 = vrot.slane %v5056_v0, 9 }
 0x1bb   : > { %v2336_v62 = vpop.f32.mrf.mxu0  ;;  %v2602_v22 = vpack.c.b16 %v2577_v2, %v2576_v20  ;;  %v3835_v20 = vrot.slane %v3833_v55, 4  ;;  %v3836_v2 = vrot.slane %v6161_v51, 5 }
 0x1bc   : > { %v1682_v29 = vpop.f32.mrf.mxu3  ;;  %4974 = vmatmul.msk.bf16.gmra.mxu2 %vm698_vm4, %v5140_v14  ;;  %v1047_v24 = vpop.f32.mrf.mxu1  ;;  %v3286_v50 = vsel %vm5296_vm3, %v3281_v4, %v3285_v60  ;;  %v3293_v40 = vrot.slane %v3291_v10, 5  ;;  %v6198_v60 = vld [vmem:[%s5284_s30 + $0x74] sm:$0x1] }
 0x1bd   : > { %v1725_v48 = vadd.f32 %v1682_v29, %v1438_v5  ;;  %v3271_v5 = vrot.slane %v3270_v56, 4  ;;  %v3297_v56 = vshll.u32 %v6173_v39, 16  ;;  %v3837_v51 = vsel %vm5470_vm7, %v3835_v20, %v3836_v2 }
 0x1bf   : > { %v1398_v58 = vpop.f32.mrf.mxu2  ;;  %v6175_v61 = vadd.f32 %v2336_v62, %v1725_v48  ;;  %v3301_v62 = vshrl.u32 %v6173_v39, 16  ;;  %v1048_v48 = vadd.f32 %v1047_v24, %v5654_v6  ;;  %v3276_v23 = vsel %vm5296_vm3, %v3271_v5, %v3275_v3 }
 0x1c0   : > { %v1439_v14 = vadd.f32 %v1398_v58, %v1046_v34  ;;  %v4830_v34 = vld [vmem:[%s5284_s30 + $0x60] sm:$0xe]  ;;  %v2503_v6 = vrot.slane %v2501_v52, 4  ;;  %v3517_v3 = vunpack.c.l.b16 %v3276_v23  ;;  %v3518_v5 = vunpack.c.l.b16 %v3286_v50 }
 0x1c1   : > { %5039 = vmatmul.msk.bf16.gmra.mxu3 %vm698_vm4, %v3542_v27  ;;  %v5198_v27 = vld [vmem:[%s5284_s30 + $0x68] sm:$0x1]  ;;  %v4846_v16 = vrot.slane %v4830_v34, 9  ;;  %v3303_v4 = vrot.slane %v3301_v62, 4 }
 0x1c2   : > { %v2504_v53 = vrot.slane %v5198_v27, 5  ;;  %v6195_v27 = vrot.slane %v3297_v56, 5  ;;  %v3543_v62 = vpack.c.b16 %v3518_v5, %v3517_v3  ;;  %v6217_v3 = vld [vmem:[%s5284_s30 + $0x7c] sm:$0xf] }
 0x1c3   : > { %v2339_v19 = vpop.f32.mrf.mxu0  ;;  %v2502_v10 = vsel %vm5470_vm7, %v4846_v16, %v2501_v52  ;;  %v5009_v52 = vld [vmem:[%s5284_s30 + $0x78] sm:$0xf] }
 0x1c4   : > { %v1685_v63 = vpop.f32.mrf.mxu3  ;;  %v1050_v29 = vpop.f32.mrf.mxu1  ;;  %v2578_v20 = vunpack.c.l.b16 %v2502_v10 }
 0x1c5   : > { %v1726_v43 = vadd.f32 %v1685_v63, %v1439_v14  ;;  %v3290_v14 = vrot.slane %v3288_v8, 4  ;;  %v1051_v23 = vadd.f32 %v1050_v29, %v5673_v45  ;;  %v3312_v45 = vshrl.u32 %v5009_v52, 16 }
 0x1c6   : > { %5088 = vmatmul.msk.bf16.gmra.mxu0 %vm698_vm4, %v3940_v30  ;;  %v5141_v30 = vld [vmem:[%s5284_s30 + $0x60] sm:$0xff]  ;;  %v3315_v29 = vshll.u32 %v5009_v52, 16  ;;  %v5142_v52 = vld [vmem:[%s5284_s30 + $0x6c] sm:$0xff] }
 0x1c7   : > { %v1400_v58 = vpop.f32.mrf.mxu2  ;;  %4862 = vmatmul.msk.bf16.gmra.mxu1 %vm698_vm4, %v2602_v22  ;;  %v6193_v24 = vadd.f32 %v2339_v19, %v1726_v43  ;;  %v3834_v22 = vsel %vm5470_vm7, %v5072_v41, %v3833_v55  ;;  %v2505_v43 = vsel %vm5470_vm7, %v2503_v6, %v2504_v53  ;;  %v3294_v34 = vor.u32 %v3293_v40, %v3290_v14  ;;  %v5057_v40 = vld [vmem:[%s5284_s30 + $0x6c] sm:$0xe] }
 0x1c8   : > { %v1440_v63 = vadd.f32 %v1400_v58, %v1048_v48  ;;  %v3304_v55 = vor.u32 %v3303_v4, %v6195_v27  ;;  %v3307_v48 = vshll.u32 %v6198_v60, 16  ;;  %v3915_v50 = vunpack.c.l.b16 %v3834_v22 }
 0x1c9   : > { %v3916_v41 = vunpack.c.l.b16 %v3837_v51  ;;  %v2579_v2 = vunpack.c.l.b16 %v2505_v43  ;;  %v3295_v16 = vrot.slane %v3294_v34, 4  ;;  %v5073_v43 = vrot.slane %v5057_v40, 9 }
 0x1ca   : > { %v3305_v53 = vrot.slane %v3304_v55, 4  ;;  %v3309_v14 = vrot.slane %v3307_v48, 5  ;;  %v3843_v34 = vrot.slane %v6198_v60, 5  ;;  %v3325_v60 = vshrl.u32 %v6217_v3, 16 }
 0x1cb   : > { %v2341_v0 = vpop.f32.mrf.mxu0  ;;  %v3941_v6 = vpack.c.b16 %v3916_v41, %v3915_v50  ;;  %v2603_v22 = vpack.c.b16 %v2579_v2, %v2578_v20  ;;  %v3300_v10 = vsel %vm5296_vm3, %v3295_v16, %v6195_v27  ;;  %v3314_v27 = vrot.slane %v3312_v45, 4  ;;  %v5200_v16 = vld [vmem:[%s5284_s30 + $0x74] sm:$0x1] }
 0x1cc   : > { %v1687_v8 = vpop.f32.mrf.mxu3  ;;  %4975 = vmatmul.msk.bf16.gmra.mxu2 %vm698_vm4, %v5141_v30  ;;  %v1052_v19 = vpop.f32.mrf.mxu1  ;;  %v3317_v41 = vrot.slane %v3315_v29, 5  ;;  %v3519_v40 = vunpack.c.l.b16 %v3300_v10 }
 0x1cd   : > { %v1727_v56 = vadd.f32 %v1687_v8, %v1440_v63  ;;  %v3840_v63 = vrot.slane %v6173_v39, 5  ;;  %v5199_v39 = vld [vmem:[%s5284_s30 + $0x70] sm:$0xf]  ;;  %v1053_v50 = vadd.f32 %v1052_v19, %v5696_v12 }
 0x1ce   : > { %v2508_v55 = vrot.slane %v5199_v39, 5  ;;  %v3318_v45 = vor.u32 %v3317_v41, %v3314_v27 }
 0x1cf   : > { %v1403_v58 = vpop.f32.mrf.mxu2  ;;  %v6219_v5 = vadd.f32 %v2341_v0, %v1727_v56  ;;  %v3310_v0 = vsel %vm5296_vm3, %v3305_v53, %v3309_v14  ;;  %v3842_v56 = vrot.slane %v3840_v63, 4  ;;  %v2511_v53 = vrot.slane %v5200_v16, 5 }
 0x1d0   : > { %v1441_v30 = vadd.f32 %v1403_v58, %v1051_v23  ;;  %v3321_v23 = vshll.u32 %v6217_v3, 16  ;;  %v3841_v12 = vsel %vm5470_vm7, %v5073_v43, %v3840_v63 }
 0x1d1   : > { %5040 = vmatmul.msk.bf16.gmra.mxu3 %vm698_vm4, %v3543_v62  ;;  %v4831_v62 = vld [vmem:[%s5284_s30 + $0x6c] sm:$0xe]  ;;  %v3844_v19 = vsel %vm5470_vm7, %v3842_v56, %v3843_v34  ;;  %v3917_v34 = vunpack.c.l.b16 %v3841_v12  ;;  %v3319_v56 = vrot.slane %v3318_v45, 4 }
 0x1d2   : > { %v4847_v20 = vrot.slane %v4831_v62, 9  ;;  %v3323_v29 = vrot.slane %v3321_v23, 5  ;;  %v5011_v62 = vld [vmem:[%s5284_s30 + $0x80] sm:$0x1] }
 0x1d3   : > { %v2344_v4 = vpop.f32.mrf.mxu0  ;;  %v3331_v27 = vshll.u32 %v5011_v62, 16 }
 0x1d4   : > { %v1690_v51 = vpop.f32.mrf.mxu3  ;;  %v1055_v8 = vpop.f32.mrf.mxu1 }
 0x1d5   : > { %v1728_v48 = vadd.f32 %v1690_v51, %v1441_v30  ;;  %v2510_v30 = vrot.slane %v2508_v55, 4 }
 0x1d6   : > { %5089 = vmatmul.msk.bf16.gmra.mxu0 %vm698_vm4, %v3941_v6  ;;  %v3520_v6 = vunpack.c.l.b16 %v3310_v0  ;;  %v1056_v0 = vadd.f32 %v1055_v8, %v5715_v59  ;;  %v3324_v59 = vsel %vm5296_vm3, %v3319_v56, %v3323_v29 }
 0x1d7   : > { %v1405_v58 = vpop.f32.mrf.mxu2  ;;  %4863 = vmatmul.msk.bf16.gmra.mxu1 %vm698_vm4, %v2603_v22  ;;  %v6236_v14 = vadd.f32 %v2344_v4, %v1728_v48  ;;  %v3327_v22 = vrot.slane %v3325_v60, 4  ;;  %v2509_v4 = vsel %vm5470_vm7, %v4847_v20, %v2508_v55  ;;  %v2512_v63 = vsel %vm5470_vm7, %v2510_v30, %v2511_v53  ;;  %v6256_v53 = vld [vmem:[%s5284_s30 + $0x88] sm:$0xf] }
 0x1d8   : > { %v1442_v2 = vadd.f32 %v1405_v58, %v1053_v50  ;;  %v3544_v43 = vpack.c.b16 %v3520_v6, %v3519_v40  ;;  %v3918_v48 = vunpack.c.l.b16 %v3844_v19  ;;  %v2580_v60 = vunpack.c.l.b16 %v2509_v4 }
 0x1d9   : > { %6780 = vst [vmem:[#allocation4_spill] sm:$0xff] %v6236_v14  ;;  %v3328_v23 = vor.u32 %v3327_v22, %v3323_v29  ;;  %v2581_v58 = vunpack.c.l.b16 %v2512_v63  ;;  %v5012_v14 = vld [vmem:[%s5284_s30 + $0x84] sm:$0xf]  ;;  %v3847_v20 = vrot.slane %v6217_v3, 5  ;;  %v3850_v4 = vrot.slane %v5011_v62, 5 }
 0x1da   : > { %v3942_v55 = vpack.c.b16 %v3918_v48, %v3917_v34  ;;  %v3336_v12 = vshrl.u32 %v5012_v14, 16  ;;  %v3339_v19 = vshll.u32 %v5012_v14, 16  ;;  %v4832_v63 = vld [vmem:[%s5284_s30 + $0x78] sm:$0xe]  ;;  %v3345_v48 = vshll.u32 %v6256_v53, 16 }
 0x1db   : > { %v2346_v51 = vpop.f32.mrf.mxu0  ;;  %v3329_v8 = vrot.slane %v3328_v23, 4  ;;  %v2604_v6 = vpack.c.b16 %v2581_v58, %v2580_v60  ;;  %v3849_v29 = vrot.slane %v3847_v20, 4  ;;  %v4848_v23 = vrot.slane %v4832_v63, 9  ;;  %v5143_v58 = vld [vmem:[%s5284_s30 + $0x78] sm:$0xff] }
 0x1dc   : > { %v1692_v39 = vpop.f32.mrf.mxu3  ;;  %4976 = vmatmul.msk.bf16.gmra.mxu2 %vm698_vm4, %v5142_v52  ;;  %v1057_v50 = vpop.f32.mrf.mxu1  ;;  %v5058_v52 = vld [vmem:[%s5284_s30 + $0x78] sm:$0xe] }
 0x1dd   : > { %v1729_v10 = vadd.f32 %v1692_v39, %v1442_v2  ;;  %v3333_v2 = vrot.slane %v3331_v27, 5  ;;  %v5074_v30 = vrot.slane %v5058_v52, 9  ;;  %v1058_v14 = vadd.f32 %v1057_v50, %v5732_v32 }
 0x1de   : > { %v3338_v27 = vrot.slane %v3336_v12, 4 }
 0x1df   : > { %v1408_v41 = vpop.f32.mrf.mxu2  ;;  %v6258_v45 = vadd.f32 %v2346_v51, %v1729_v10  ;;  %v3334_v51 = vsel %vm5296_vm3, %v3329_v8, %v3333_v2  ;;  %v3521_v10 = vunpack.c.l.b16 %v3324_v59  ;;  %v3848_v56 = vsel %vm5470_vm7, %v5074_v30, %v3847_v20 }
 0x1e0   : > { %v1443_v16 = vadd.f32 %v1408_v41, %v1056_v0  ;;  %v3349_v0 = vshrl.u32 %v6256_v53, 16  ;;  %v3341_v41 = vrot.slane %v3339_v19, 5  ;;  %v3522_v50 = vunpack.c.l.b16 %v3334_v51 }
 0x1e1   : > { %5041 = vmatmul.msk.bf16.gmra.mxu3 %vm698_vm4, %v3544_v43  ;;  %v5201_v43 = vld [vmem:[%s5284_s30 + $0x7c] sm:$0xf]  ;;  %v3851_v59 = vsel %vm5470_vm7, %v3849_v29, %v3850_v4  ;;  %v6277_v8 = vrot.slane %v3345_v48, 5  ;;  %v3919_v30 = vunpack.c.l.b16 %v3848_v56 }
 0x1e2   : > { %v2515_v3 = vrot.slane %v5201_v43, 5  ;;  %v3351_v2 = vrot.slane %v3349_v0, 4  ;;  %v3920_v19 = vunpack.c.l.b16 %v3851_v59  ;;  %v3342_v63 = vor.u32 %v3341_v41, %v3338_v27  ;;  %v5059_v0 = vld [vmem:[%s5284_s30 + $0x84] sm:$0xe]  ;;  %v6291_v59 = vld [vmem:[%s5284_s30 + $0x94] sm:$0xf] }
 0x1e3   : > { %v2349_v40 = vpop.f32.mrf.mxu0 }
 0x1e4   : > { %v1695_v22 = vpop.f32.mrf.mxu3  ;;  %v2672_v39 = vpop.f32.mrf.mxu1  ;;  %v2517_v52 = vrot.slane %v2515_v3, 4  ;;  %v3352_v29 = vor.u32 %v3351_v2, %v6277_v8 }
 0x1e5   : > { %v1730_v34 = vadd.f32 %v1695_v22, %v1443_v16  ;;  %v5202_v16 = vld [vmem:[%s5284_s30 + $0x80] sm:$0x1]  ;;  %v2752_v51 = vadd.f32 %v2672_v39, %v5749_v46 }
 0x1e6   : > { %5090 = vmatmul.msk.bf16.gmra.mxu0 %vm698_vm4, %v3942_v55  ;;  %v2518_v55 = vrot.slane %v5202_v16, 5  ;;  %v5015_v16 = vld [vmem:[%s5284_s30 + $0x90] sm:$0xf]  ;;  %v3353_v27 = vrot.slane %v3352_v29, 4 }
 0x1e7   : > { %v1410_v62 = vpop.f32.mrf.mxu2  ;;  %4864 = vmatmul.msk.bf16.gmra.mxu1 %vm698_vm4, %v2604_v6  ;;  %v6273_v32 = vadd.f32 %v2349_v40, %v1730_v34  ;;  %v5014_v6 = vld [vmem:[%s5284_s30 + $0x8c] sm:$0x1]  ;;  %v2516_v40 = vsel %vm5470_vm7, %v4848_v23, %v2515_v3  ;;  %v3545_v34 = vpack.c.b16 %v3522_v50, %v3521_v10  ;;  %v3943_v3 = vpack.c.b16 %v3920_v19, %v3919_v30 }
 0x1e8   : > { %v1444_v60 = vadd.f32 %v1410_v62, %v1058_v14  ;;  %v2519_v4 = vsel %vm5470_vm7, %v2517_v52, %v2518_v55  ;;  %v3355_v48 = vshll.u32 %v5014_v6, 16  ;;  %v3854_v14 = vrot.slane %v6256_v53, 5 }
 0x1e9   : > { %v2582_v56 = vunpack.c.l.b16 %v2516_v40  ;;  %v3343_v23 = vrot.slane %v3342_v63, 4  ;;  %v3857_v53 = vrot.slane %v5014_v6, 5  ;;  %v3360_v55 = vshrl.u32 %v5015_v16, 16  ;;  %v5203_v40 = vld [vmem:[%s5284_s30 + $0x88] sm:$0xf] }
 0x1ea   : > { %v3357_v41 = vrot.slane %v3355_v48, 5  ;;  %v3856_v52 = vrot.slane %v3854_v14, 4  ;;  %v3363_v2 = vshll.u32 %v5015_v16, 16  ;;  %v3369_v30 = vshll.u32 %v6291_v59, 16  ;;  %v6302_v6 = vld [vmem:[%s6771_s2] ss:$0 sm:$0xff] }
 0x1eb   : > { %v2351_v20 = vpop.f32.mrf.mxu0  ;;  %v3373_v63 = vshrl.u32 %v6291_v59, 16 }
 0x1ec   : > { %v1697_v12 = vpop.f32.mrf.mxu3  ;;  %4977 = vmatmul.msk.bf16.gmra.mxu2 %vm698_vm4, %v5143_v58  ;;  %v2674_v22 = vpop.f32.mrf.mxu1  ;;  %v2583_v58 = vunpack.c.l.b16 %v2519_v4  ;;  %v2522_v4 = vrot.slane %v5203_v40, 5  ;;  %v3358_v29 = vsel %vm5296_vm3, %v3353_v27, %v3357_v41  ;;  %v6317_v16 = vrot.slane %v3369_v30, 5  ;;  %v5204_v27 = vld [vmem:[%s5284_s30 + $0x8c] sm:$0x1] }
 0x1ed   : > { %v1731_v43 = vadd.f32 %v1697_v12, %v1444_v60  ;;  %v5075_v60 = vrot.slane %v5059_v0, 9  ;;  %v3858_v0 = vsel %vm5470_vm7, %v3856_v52, %v3857_v53  ;;  %v3375_v41 = vrot.slane %v3373_v63, 4 }
 0x1ee   : > { %v2605_v50 = vpack.c.b16 %v2583_v58, %v2582_v56  ;;  %v2753_v56 = vadd.f32 %v2674_v22, %v5762_v42  ;;  %v3365_v58 = vrot.slane %v3363_v2, 5  ;;  %v6324_v42 = vld [vmem:[%s5284_s30 + $0x98] sm:$0x1]  ;;  %v3922_v2 = vunpack.c.l.b16 %v3858_v0 }
 0x1ef   : > { %v2959_v62 = vpop.f32.mrf.mxu2  ;;  %v6294_v46 = vadd.f32 %v2351_v20, %v1731_v43  ;;  %v3348_v20 = vsel %vm5296_vm3, %v3343_v23, %v6277_v8  ;;  %v4833_v43 = vld [vmem:[%s5284_s30 + $0x84] sm:$0xe]  ;;  %v3855_v48 = vsel %vm5470_vm7, %v5075_v60, %v3854_v14  ;;  %v2525_v14 = vrot.slane %v5204_v27, 5  ;;  %v6344_v27 = vld [vmem:[%s5284_s30 + $0xa0] sm:$0xf] }
 0x1f0   : > { %v3039_v10 = vadd.f32 %v2959_v62, %v2752_v51  ;;  %v3362_v51 = vrot.slane %v3360_v55, 4  ;;  %v4849_v23 = vrot.slane %v4833_v43, 9  ;;  %v3523_v53 = vunpack.c.l.b16 %v3348_v20 }
 0x1f1   : > { %5042 = vmatmul.msk.bf16.gmra.mxu3 %vm698_vm4, %v3545_v34  ;;  %v3524_v55 = vunpack.c.l.b16 %v3358_v29  ;;  %v3376_v20 = vor.u32 %v3375_v41, %v6317_v16  ;;  %v3379_v0 = vshll.u32 %v6324_v42, 16 }
 0x1f2   : > { %v2523_v40 = vsel %vm5470_vm7, %v4849_v23, %v2522_v4  ;;  %v5018_v23 = vld [vmem:[%s5284_s30 + $0x9c] sm:$0xf] }
 0x1f3   : > { %v4011_v39 = vpop.f32.mrf.mxu0 }
 0x1f4   : > { %v3613_v12 = vpop.f32.mrf.mxu3  ;;  %v2677_v19 = vpop.f32.mrf.mxu1 }
 0x1f5   : > { %v3693_v34 = vadd.f32 %v3613_v12, %v3039_v10  ;;  %v2524_v10 = vrot.slane %v2522_v4, 4 }
 0x1f6   : > { %5091 = vmatmul.msk.bf16.gmra.mxu0 %vm698_vm4, %v3943_v3  ;;  %v5144_v3 = vld [vmem:[%s5284_s30 + $0x84] sm:$0xff] }
 0x1f7   : > { %v4091_v62 = vadd.f32 %v4011_v39, %v3693_v34  ;;  %v2961_v8 = vpop.f32.mrf.mxu2  ;;  %4865 = vmatmul.msk.bf16.gmra.mxu1 %vm698_vm4, %v2605_v50  ;;  %v3921_v50 = vunpack.c.l.b16 %v3855_v48  ;;  %v2526_v63 = vsel %vm5470_vm7, %v2524_v10, %v2525_v14  ;;  %v3366_v34 = vor.u32 %v3365_v58, %v3362_v51 }
 0x1f8   : > { %v3040_v60 = vadd.f32 %v2961_v8, %v2753_v56  ;;  %v3546_v48 = vpack.c.b16 %v3524_v55, %v3523_v53  ;;  %v2754_v56 = vadd.f32 %v2677_v19, %v5775_v15  ;;  %v2585_v4 = vunpack.c.l.b16 %v2526_v63 }
 0x1f9   : > { %v4127_v52 = vadd.f32 %v6302_v6, %v4091_v62  ;;  %v3944_v51 = vpack.c.b16 %v3922_v2, %v3921_v50  ;;  %v3367_v58 = vrot.slane %v3366_v34, 4  ;;  %v3377_v10 = vrot.slane %v3376_v20, 4  ;;  %v4834_v20 = vld [vmem:[%s5284_s30 + $0x90] sm:$0xe] }
 0x1fa   : > { %v3861_v15 = vrot.slane %v6291_v59, 5  ;;  %v3384_v19 = vshrl.u32 %v5018_v23, 16  ;;  %v3387_v53 = vshll.u32 %v5018_v23, 16  ;;  %v3393_v55 = vshll.u32 %v6344_v27, 16 }
 0x1fb   : > { %v4013_v22 = vpop.f32.mrf.mxu0  ;;  %4288 = vrot.lane.b32.xlu0 %v4127_v52, %s5224_s18  ;;  %v4159_v39 = vmax.f32 %v4127_v52, 0.0  ;;  %v5060_v52 = vld [vmem:[%s5284_s30 + $0x90] sm:$0xe]  ;;  %v3372_v63 = vsel %vm5296_vm3, %v3367_v58, %v6317_v16  ;;  %v3864_v59 = vrot.slane %v6324_v42, 5 }
 0x1fc   : > { %v3615_v30 = vpop.f32.mrf.mxu3  ;;  %4978 = vmatmul.msk.bf16.gmra.mxu2 %vm698_vm4, %v5144_v3  ;;  %v2679_v12 = vpop.f32.mrf.mxu1  ;;  %v2584_v3 = vunpack.c.l.b16 %v2523_v40  ;;  %v5076_v34 = vrot.slane %v5060_v52, 9  ;;  %v3389_v16 = vrot.slane %v3387_v53, 5 }
 0x1fd   : > { %v3694_v43 = vadd.f32 %v3615_v30, %v3040_v60  ;;  %v4191_v29 = vpack.c.bf16 %v4159_v39, %v4159_v39  ;;  %v3381_v60 = vrot.slane %v3379_v0, 5  ;;  %v2755_v23 = vadd.f32 %v2679_v12, %v5788_v13 }
 0x1fe   : > { %v2606_v2 = vpack.c.b16 %v2585_v4, %v2584_v3  ;;  %v6362_v3 = vrot.slane %v3393_v55, 5 }
 0x1ff   : > { %v4092_v62 = vadd.f32 %v4013_v22, %v3694_v43  ;;  %4224 = vst.msk [vmem:[%s6330_s21] sm:$0xf] %vm4223_vm8, %v4191_v29  ;;  %v2964_v8 = vpop.f32.mrf.mxu2  ;;  %v3397_v22 = vshrl.u32 %v6344_v27, 16  ;;  %v5205_v43 = vld [vmem:[%s5284_s30 + $0x94] sm:$0xf] }
 0x200   : > { %v3041_v14 = vadd.f32 %v2964_v8, %v2754_v56  ;;  %v2529_v29 = vrot.slane %v5205_v43, 5  ;;  %v3863_v56 = vrot.slane %v3861_v15, 4  ;;  %v3386_v8 = vrot.slane %v3384_v19, 4 }
 0x201   : > { %5043 = vmatmul.msk.bf16.gmra.mxu3 %vm698_vm4, %v3546_v48  ;;  %v4128_v41 = vadd.f32 %v6302_v6, %v4092_v62  ;;  %v3382_v62 = vsel %vm5296_vm3, %v3377_v10, %v3381_v60  ;;  %v3399_v4 = vrot.slane %v3397_v22, 4  ;;  %v5145_v10 = vld [vmem:[%s5284_s30 + $0x90] sm:$0xff]  ;;  %v3525_v60 = vunpack.c.l.b16 %v3372_v63 }
 0x202   : > { %v2531_v52 = vrot.slane %v2529_v29, 4  ;;  %v3526_v22 = vunpack.c.l.b16 %v3382_v62  ;;  %v3865_v13 = vsel %vm5470_vm7, %v3863_v56, %v3864_v59  ;;  %v3390_v12 = vor.u32 %v3389_v16, %v3386_v8 }
 0x203   : > { %v4016_v39 = vpop.f32.mrf.mxu0  ;;  %4290 = vrot.lane.b32.xlu0 %v4128_v41, %s5224_s18  ;;  %v4160_v50 = vmax.f32 %v4128_v41, 0.0  ;;  %v6369_v41 = vld [vmem:[%s5284_s30 + $0xa4] sm:$0x1]  ;;  %v3924_v56 = vunpack.c.l.b16 %v3865_v13 }
 0x204   : > { %v3618_v30 = vpop.f32.mrf.mxu3  ;;  %v2682_v40 = vpop.f32.mrf.mxu1  ;;  %v3547_v62 = vpack.c.b16 %v3526_v22, %v3525_v60  ;;  %v3391_v16 = vrot.slane %v3390_v12, 4  ;;  %v3871_v22 = vrot.slane %v6369_v41, 5 }
 0x205   : > { %v3695_v48 = vadd.f32 %v3618_v30, %v3041_v14  ;;  %v4192_v0 = vpack.c.bf16 %v4160_v50, %v4160_v50  ;;  %v4850_v14 = vrot.slane %v4834_v20, 9  ;;  %v3400_v50 = vor.u32 %v3399_v4, %v6362_v3 }
 0x206   : > { %5092 = vmatmul.msk.bf16.gmra.mxu0 %vm698_vm4, %v3944_v51  ;;  %v5206_v51 = vld [vmem:[%s5284_s30 + $0x98] sm:$0x1] }
 0x207   : > { %v4093_v42 = vadd.f32 %v4016_v39, %v3695_v48  ;;  %4225 = vst.msk [vmem:[%s6330_s21 + $0x4] sm:$0xf] %vm4223_vm8, %v4192_v0  ;;  %v2966_v58 = vpop.f32.mrf.mxu2  ;;  %4866 = vmatmul.msk.bf16.gmra.mxu1 %vm698_vm4, %v2606_v2  ;;  %v2532_v19 = vrot.slane %v5206_v51, 5  ;;  %v3862_v39 = vsel %vm5470_vm7, %v5076_v34, %v3861_v15  ;;  %v3403_v2 = vshll.u32 %v6369_v41, 16  ;;  %v5021_v51 = vld [vmem:[%s5284_s30 + $0xa8] sm:$0xf] }
 0x208   : > { %v3042_v53 = vadd.f32 %v2966_v58, %v2755_v23  ;;  %v2530_v20 = vsel %vm5470_vm7, %v4850_v14, %v2529_v29  ;;  %v3923_v15 = vunpack.c.l.b16 %v3862_v39  ;;  %v3401_v4 = vrot.slane %v3400_v50, 4 }
 0x209   : > { %v4129_v55 = vadd.f32 %v6302_v6, %v4093_v42  ;;  %v2533_v59 = vsel %vm5470_vm7, %v2531_v52, %v2532_v19  ;;  %v2586_v8 = vunpack.c.l.b16 %v2530_v20  ;;  %v3405_v42 = vrot.slane %v3403_v2, 5 }
 0x20a   : > { %v2756_v29 = vadd.f32 %v2682_v40, %v5801_v57  ;;  %v2587_v14 = vunpack.c.l.b16 %v2533_v59  ;;  %v3868_v52 = vrot.slane %v6344_v27, 5  ;;  %v3945_v60 = vpack.c.b16 %v3924_v56, %v3923_v15  ;;  %v6401_v27 = vld [vmem:[%s5284_s30 + $0xac] sm:$0xf] }
 0x20b   : > { %v4018_v30 = vpop.f32.mrf.mxu0  ;;  %4292 = vrot.lane.b32.xlu1 %v4129_v55, %s5224_s18  ;;  %v4161_v63 = vmax.f32 %v4129_v55, 0.0  ;;  %v3396_v55 = vsel %vm5296_vm3, %v3391_v16, %v6362_v3  ;;  %v3406_v57 = vsel %vm5296_vm3, %v3401_v4, %v3405_v42  ;;  %v3408_v2 = vshrl.u32 %v5021_v51, 16  ;;  %v5207_v3 = vld [vmem:[%s5284_s30 + $0xa0] sm:$0xf] }
 0x20c   : > { %v3620_v43 = vpop.f32.mrf.mxu3  ;;  %4979 = vmatmul.msk.bf16.gmra.mxu2 %vm698_vm4, %v5145_v10  ;;  %v2684_v34 = vpop.f32.mrf.mxu1  ;;  %v5061_v10 = vld [vmem:[%s5284_s30 + $0x9c] sm:$0xe]  ;;  %v2607_v12 = vpack.c.b16 %v2587_v14, %v2586_v8  ;;  %v3870_v50 = vrot.slane %v3868_v52, 4  ;;  %v2536_v20 = vrot.slane %v5207_v3, 5  ;;  %v3417_v41 = vshll.u32 %v6401_v27, 16 }
 0x20d   : > { %v3696_v48 = vadd.f32 %v3620_v43, %v3042_v53  ;;  %v4193_v0 = vpack.c.bf16 %v4161_v63, %v4161_v63  ;;  %v5077_v40 = vrot.slane %v5061_v10, 9  ;;  %v3411_v43 = vshll.u32 %v5021_v51, 16  ;;  %v5208_v51 = vld [vmem:[%s5284_s30 + $0xa4] sm:$0x1] }
 0x20e   : > { %v3528_v56 = vunpack.c.l.b16 %v3406_v57  ;;  %v2757_v4 = vadd.f32 %v2684_v34, %v5814_v54  ;;  %v2538_v10 = vrot.slane %v2536_v20, 4  ;;  %v6423_v54 = vld [vmem:[%s5284_s30 + $0xb0] sm:$0x1] }
 0x20f   : > { %v4094_v23 = vadd.f32 %v4018_v30, %v3696_v48  ;;  %4226 = vst.msk [vmem:[%s6330_s21 + $0x8] sm:$0xf] %vm4223_vm8, %v4193_v0  ;;  %v2969_v58 = vpop.f32.mrf.mxu2  ;;  %v4835_v48 = vld [vmem:[%s5284_s30 + $0x9c] sm:$0xe]  ;;  %v3421_v0 = vshrl.u32 %v6401_v27, 16  ;;  %v3869_v8 = vsel %vm5470_vm7, %v5077_v40, %v3868_v52 }
 0x210   : > { %v3043_v19 = vadd.f32 %v2969_v58, %v2756_v29  ;;  %v3410_v29 = vrot.slane %v3408_v2, 4  ;;  %v5146_v58 = vld [vmem:[%s5284_s30 + $0x9c] sm:$0xff]  ;;  %v4851_v14 = vrot.slane %v4835_v48, 9  ;;  %v3427_v48 = vshll.u32 %v6423_v54, 16 }
 0x211   : > { %5044 = vmatmul.msk.bf16.gmra.mxu3 %vm698_vm4, %v3547_v62  ;;  %v4130_v53 = vadd.f32 %v6302_v6, %v4094_v23  ;;  %v3527_v62 = vunpack.c.l.b16 %v3396_v55  ;;  %v3872_v23 = vsel %vm5470_vm7, %v3870_v50, %v3871_v22  ;;  %v6420_v55 = vrot.slane %v3417_v41, 5 }
 0x212   : > { %v3423_v57 = vrot.slane %v3421_v0, 4  ;;  %v2537_v2 = vsel %vm5470_vm7, %v4851_v14, %v2536_v20  ;;  %v5024_v20 = vld [vmem:[%s5284_s30 + $0xb4] sm:$0xf]  ;;  %v3429_v14 = vrot.slane %v3427_v48, 5 }
 0x213   : > { %v4021_v39 = vpop.f32.mrf.mxu0  ;;  %4294 = vrot.lane.b32.xlu1 %v4130_v53, %s5224_s18  ;;  %v4162_v13 = vmax.f32 %v4130_v53, 0.0  ;;  %v3548_v22 = vpack.c.b16 %v3528_v56, %v3527_v62  ;;  %v2588_v56 = vunpack.c.l.b16 %v2537_v2 }
 0x214   : > { %v3623_v30 = vpop.f32.mrf.mxu3  ;;  %v2687_v63 = vpop.f32.mrf.mxu1 }
 0x215   : > { %v3697_v15 = vadd.f32 %v3623_v30, %v3043_v19  ;;  %v4194_v59 = vpack.c.bf16 %v4162_v13, %v4162_v13  ;;  %v3413_v19 = vrot.slane %v3411_v43, 5  ;;  %v2758_v0 = vadd.f32 %v2687_v63, %v5827_v33 }
 0x216   : > { %5093 = vmatmul.msk.bf16.gmra.mxu0 %vm698_vm4, %v3945_v60  ;;  %v2539_v60 = vrot.slane %v5208_v51, 5  ;;  %v3432_v51 = vshrl.u32 %v5024_v20, 16 }
 0x217   : > { %v4095_v16 = vadd.f32 %v4021_v39, %v3697_v15  ;;  %4227 = vst.msk [vmem:[%s6330_s21 + $0xc] sm:$0xf] %vm4223_vm8, %v4194_v59  ;;  %v2971_v42 = vpop.f32.mrf.mxu2  ;;  %4867 = vmatmul.msk.bf16.gmra.mxu1 %vm698_vm4, %v2607_v12  ;;  %v3925_v39 = vunpack.c.l.b16 %v3869_v8  ;;  %v3926_v12 = vunpack.c.l.b16 %v3872_v23  ;;  %v3414_v3 = vor.u32 %v3413_v19, %v3410_v29 }
 0x218   : > { %v3044_v52 = vadd.f32 %v2971_v42, %v2757_v4  ;;  %v2540_v30 = vsel %vm5470_vm7, %v2538_v10, %v2539_v60  ;;  %v3424_v59 = vor.u32 %v3423_v57, %v6420_v55  ;;  %v5062_v10 = vld [vmem:[%s5284_s30 + $0xa8] sm:$0xe]  ;;  %v3435_v60 = vshll.u32 %v5024_v20, 16 }
 0x219   : > { %v4131_v53 = vadd.f32 %v6302_v6, %v4095_v16  ;;  %v2589_v8 = vunpack.c.l.b16 %v2540_v30  ;;  %v6438_v16 = vld [vmem:[%s5284_s30 + $0xb8] sm:$0xf]  ;;  %v3946_v4 = vpack.c.b16 %v3926_v12, %v3925_v39  ;;  %v3415_v42 = vrot.slane %v3414_v3, 4  ;;  %v5209_v39 = vld [vmem:[%s5284_s30 + $0xac] sm:$0xf] }
 0x21a   : > { %v3441_v33 = vshll.u32 %v6438_v16, 16  ;;  %v3445_v63 = vshrl.u32 %v6438_v16, 16  ;;  %v3875_v57 = vrot.slane %v6401_v27, 5  ;;  %v3434_v27 = vrot.slane %v3432_v51, 4  ;;  %v5147_v20 = vld [vmem:[%s5284_s30 + $0xa8] sm:$0xff] }
 0x21b   : > { %v4023_v34 = vpop.f32.mrf.mxu0  ;;  %4296 = vrot.lane.b32.xlu2 %v4131_v53, %s5224_s18  ;;  %v4163_v40 = vmax.f32 %v4131_v53, 0.0  ;;  %v2608_v53 = vpack.c.b16 %v2589_v8, %v2588_v56  ;;  %v3420_v30 = vsel %vm5296_vm3, %v3415_v42, %v6420_v55  ;;  %v3878_v56 = vrot.slane %v6423_v54, 5  ;;  %v6463_v8 = vld [vmem:[%s5284_s30 + $0xbc] sm:$0x1] }
 0x21c   : > { %v3625_v13 = vpop.f32.mrf.mxu3  ;;  %4980 = vmatmul.msk.bf16.gmra.mxu2 %vm698_vm4, %v5146_v58  ;;  %v2689_v50 = vpop.f32.mrf.mxu1  ;;  %v3425_v58 = vrot.slane %v3424_v59, 4  ;;  %v6455_v59 = vrot.slane %v3441_v33, 5  ;;  %v3447_v48 = vrot.slane %v3445_v63, 4  ;;  %v3877_v55 = vrot.slane %v3875_v57, 4 }
 0x21d   : > { %v3698_v43 = vadd.f32 %v3625_v13, %v3044_v52  ;;  %v4195_v15 = vpack.c.bf16 %v4163_v40, %v4163_v40  ;;  %v2543_v13 = vrot.slane %v5209_v39, 5  ;;  %v3451_v54 = vshll.u32 %v6463_v8, 16 }
 0x21e   : > { %v3430_v3 = vsel %vm5296_vm3, %v3425_v58, %v3429_v14 }
 0x21f   : > { %v4096_v41 = vadd.f32 %v4023_v34, %v3698_v43  ;;  %4228 = vst.msk [vmem:[%s6330_s21 + $0x10] sm:$0xf] %vm4223_vm8, %v4195_v15  ;;  %v2974_v62 = vpop.f32.mrf.mxu2  ;;  %v4836_v43 = vld [vmem:[%s5284_s30 + $0xa8] sm:$0xe]  ;;  %v3437_v15 = vrot.slane %v3435_v60, 5  ;;  %v2545_v42 = vrot.slane %v2543_v13, 4  ;;  %v3530_v51 = vunpack.c.l.b16 %v3430_v3 }
 0x220   : > { %v3045_v23 = vadd.f32 %v2974_v62, %v2758_v0  ;;  %v2759_v0 = vadd.f32 %v2689_v50, %v5840_v31  ;;  %v3448_v60 = vor.u32 %v3447_v48, %v6455_v59 }
 0x221   : > { %5045 = vmatmul.msk.bf16.gmra.mxu3 %vm698_vm4, %v3548_v22  ;;  %v4132_v29 = vadd.f32 %v6302_v6, %v4096_v41  ;;  %v5078_v22 = vrot.slane %v5062_v10, 9  ;;  %v3529_v10 = vunpack.c.l.b16 %v3420_v30  ;;  %v3438_v50 = vor.u32 %v3437_v15, %v3434_v27 }
 0x222   : > { %v3453_v27 = vrot.slane %v3451_v54, 5 }
 0x223   : > { %v4026_v19 = vpop.f32.mrf.mxu0  ;;  %4298 = vrot.lane.b32.xlu2 %v4132_v29, %s5224_s18  ;;  %v4164_v52 = vmax.f32 %v4132_v29, 0.0  ;;  %v3876_v31 = vsel %vm5470_vm7, %v5078_v22, %v3875_v57  ;;  %v3439_v3 = vrot.slane %v3438_v50, 4  ;;  %v5211_v50 = vld [vmem:[%s5284_s30 + $0xb8] sm:$0xf] }
 0x224   : > { %v3628_v34 = vpop.f32.mrf.mxu3  ;;  %v2692_v40 = vpop.f32.mrf.mxu1 }
 0x225   : > { %v3699_v12 = vadd.f32 %v3628_v34, %v3045_v23  ;;  %v4196_v2 = vpack.c.bf16 %v4164_v52, %v4164_v52  ;;  %v5210_v23 = vld [vmem:[%s5284_s30 + $0xb0] sm:$0x1]  ;;  %v2760_v48 = vadd.f32 %v2692_v40, %v5853_v1  ;;  %v6492_v1 = vld [vmem:[%s5284_s30 + $0xc4] sm:$0xf] }
 0x226   : > { %5094 = vmatmul.msk.bf16.gmra.mxu0 %vm698_vm4, %v3946_v4  ;;  %v4852_v4 = vrot.slane %v4836_v43, 9  ;;  %v2546_v29 = vrot.slane %v5210_v23, 5  ;;  %v3449_v43 = vrot.slane %v3448_v60, 4 }
 0x227   : > { %v4097_v41 = vadd.f32 %v4026_v19, %v3699_v12  ;;  %4229 = vst.msk [vmem:[%s6330_s21 + $0x14] sm:$0xf] %vm4223_vm8, %v4196_v2  ;;  %v2976_v62 = vpop.f32.mrf.mxu2  ;;  %4868 = vmatmul.msk.bf16.gmra.mxu1 %vm698_vm4, %v2608_v53  ;;  %v3879_v19 = vsel %vm5470_vm7, %v3877_v55, %v3878_v56  ;;  %v3549_v12 = vpack.c.b16 %v3530_v51, %v3529_v10  ;;  %v3927_v2 = vunpack.c.l.b16 %v3876_v31 }
 0x228   : > { %v3046_v58 = vadd.f32 %v2976_v62, %v2759_v0  ;;  %v2544_v57 = vsel %vm5470_vm7, %v4852_v4, %v2543_v13  ;;  %v2547_v34 = vsel %vm5470_vm7, %v2545_v42, %v2546_v29  ;;  %v3928_v30 = vunpack.c.l.b16 %v3879_v19  ;;  %v5027_v62 = vld [vmem:[%s5284_s30 + $0xc0] sm:$0xf] }
 0x229   : > { %v4133_v14 = vadd.f32 %v6302_v6, %v4097_v41  ;;  %v2590_v41 = vunpack.c.l.b16 %v2544_v57  ;;  %v2591_v0 = vunpack.c.l.b16 %v2547_v34  ;;  %v3444_v4 = vsel %vm5296_vm3, %v3439_v3, %v6455_v59 }
 0x22a   : > { %v3454_v42 = vsel %vm5296_vm3, %v3449_v43, %v3453_v27  ;;  %v3456_v10 = vshrl.u32 %v5027_v62, 16  ;;  %v2550_v59 = vrot.slane %v5211_v50, 5  ;;  %v3459_v60 = vshll.u32 %v5027_v62, 16  ;;  %v5148_v27 = vld [vmem:[%s5284_s30 + $0xb4] sm:$0xff] }
 0x22b   : > { %v4028_v33 = vpop.f32.mrf.mxu0  ;;  %4300 = vrot.lane.b32.xlu0 %v4133_v14, %s5224_s18  ;;  %v4165_v63 = vmax.f32 %v4133_v14, 0.0  ;;  %v2609_v29 = vpack.c.b16 %v2591_v0, %v2590_v41  ;;  %v3882_v14 = vrot.slane %v6438_v16, 5  ;;  %v3465_v19 = vshll.u32 %v6492_v1, 16 }
 0x22c   : > { %v3630_v52 = vpop.f32.mrf.mxu3  ;;  %4981 = vmatmul.msk.bf16.gmra.mxu2 %vm698_vm4, %v5147_v20  ;;  %v2694_v53 = vpop.f32.mrf.mxu1  ;;  %v3947_v20 = vpack.c.b16 %v3928_v30, %v3927_v2  ;;  %v3531_v57 = vunpack.c.l.b16 %v3444_v4  ;;  %v3532_v16 = vunpack.c.l.b16 %v3454_v42  ;;  %v3458_v43 = vrot.slane %v3456_v10, 4 }
 0x22d   : > { %v3700_v22 = vadd.f32 %v3630_v52, %v3046_v58  ;;  %v4197_v39 = vpack.c.bf16 %v4165_v63, %v4165_v63  ;;  %v5063_v58 = vld [vmem:[%s5284_s30 + $0xb4] sm:$0xe]  ;;  %v3469_v52 = vshrl.u32 %v6492_v1, 16  ;;  %v3884_v3 = vrot.slane %v3882_v14, 4 }
 0x22e   : > { %v4837_v63 = vld [vmem:[%s5284_s30 + $0xb4] sm:$0xe]  ;;  %v5079_v34 = vrot.slane %v5063_v58, 9  ;;  %v3461_v0 = vrot.slane %v3459_v60, 5 }
 0x22f   : > { %v4098_v15 = vadd.f32 %v4028_v33, %v3700_v22  ;;  %4230 = vst.msk [vmem:[%s6330_s21 + $0x18] sm:$0xf] %vm4223_vm8, %v4197_v39  ;;  %v2979_v13 = vpop.f32.mrf.mxu2  ;;  %v3885_v22 = vrot.slane %v6463_v8, 5 }
 0x230   : > { %v3047_v55 = vadd.f32 %v2979_v13, %v2760_v48  ;;  %v2552_v48 = vrot.slane %v2550_v59, 4  ;;  %v5212_v13 = vld [vmem:[%s5284_s30 + $0xbc] sm:$0x1]  ;;  %v3883_v42 = vsel %vm5470_vm7, %v5079_v34, %v3882_v14  ;;  %v3462_v50 = vor.u32 %v3461_v0, %v3458_v43  ;;  %v5064_v43 = vld [vmem:[%s5284_s30 + $0xc0] sm:$0xe] }
 0x231   : > { %5046 = vmatmul.msk.bf16.gmra.mxu3 %vm698_vm4, %v3549_v12  ;;  %v4134_v56 = vadd.f32 %v6302_v6, %v4098_v15  ;;  %v6781_v12 = vld [vmem:[#allocation2_spill] sm:$0xff]  ;;  %v4853_v15 = vrot.slane %v4837_v63, 9  ;;  %v2553_v41 = vrot.slane %v5212_v13, 5  ;;  %v3929_v63 = vunpack.c.l.b16 %v3883_v42  ;;  %v6537_v0 = vld [vmem:[%s5284_s30 + $0xd0] sm:$0xf] }
 0x232   : > { %v2761_v2 = vadd.f32 %v2694_v53, %v6781_v12  ;;  %v3889_v13 = vrot.slane %v6492_v1, 5  ;;  %v4838_v1 = vld [vmem:[%s5284_s30 + $0xc0] sm:$0xe] }
 0x233   : > { %v4031_v40 = vpop.f32.mrf.mxu0  ;;  %4302 = vrot.lane.b32.xlu1 %v4134_v56, %s5224_s18  ;;  %v4166_v23 = vmax.f32 %v4134_v56, 0.0  ;;  %v3471_v56 = vrot.slane %v3469_v52, 4  ;;  %v2551_v10 = vsel %vm5470_vm7, %v4853_v15, %v2550_v59 }
 0x234   : > { %v3633_v51 = vpop.f32.mrf.mxu3  ;;  %v2697_v31 = vpop.f32.mrf.mxu1  ;;  %v2592_v59 = vunpack.c.l.b16 %v2551_v10 }
 0x235   : > { %v3701_v54 = vadd.f32 %v3633_v51, %v3047_v55  ;;  %v4198_v33 = vpack.c.bf16 %v4166_v23, %v4166_v23  ;;  %v6510_v55 = vrot.slane %v3465_v19, 5  ;;  %v2554_v51 = vsel %vm5470_vm7, %v2552_v48, %v2553_v41  ;;  %v5030_v41 = vld [vmem:[%s5284_s30 + $0xcc] sm:$0xf] }
 0x236   : > { %5095 = vmatmul.msk.bf16.gmra.mxu0 %vm698_vm4, %v3947_v20  ;;  %v6513_v20 = vld [vmem:[%s5284_s30 + $0xc8] sm:$0x1]  ;;  %v3480_v10 = vshrl.u32 %v5030_v41, 16 }
 0x237   : > { %v4099_v39 = vadd.f32 %v4031_v40, %v3701_v54  ;;  %4231 = vst.msk [vmem:[%s6330_s21 + $0x1c] sm:$0xf] %vm4223_vm8, %v4198_v33  ;;  %v2981_v30 = vpop.f32.mrf.mxu2  ;;  %4869 = vmatmul.msk.bf16.gmra.mxu1 %vm698_vm4, %v2609_v29  ;;  %v3886_v40 = vsel %vm5470_vm7, %v3884_v3, %v3885_v22  ;;  %v3550_v29 = vpack.c.b16 %v3532_v16, %v3531_v57  ;;  %v3475_v33 = vshll.u32 %v6513_v20, 16  ;;  %v6782_v57 = vld [vmem:[#allocation3_spill] sm:$0xff] }
 0x238   : > { %v3048_v62 = vadd.f32 %v2981_v30, %v2761_v2  ;;  %v3472_v14 = vor.u32 %v3471_v56, %v6510_v55  ;;  %v3930_v19 = vunpack.c.l.b16 %v3886_v40  ;;  %v2762_v16 = vadd.f32 %v2697_v31, %v6782_v57 }
 0x239   : > { %v4135_v8 = vadd.f32 %v6302_v6, %v4099_v39  ;;  %v2593_v22 = vunpack.c.l.b16 %v2554_v51  ;;  %v3463_v39 = vrot.slane %v3462_v50, 4  ;;  %v3477_v3 = vrot.slane %v3475_v33, 5 }
 0x23a   : > { %v3473_v30 = vrot.slane %v3472_v14, 4  ;;  %v5080_v56 = vrot.slane %v5064_v43, 9  ;;  %v3483_v51 = vshll.u32 %v5030_v41, 16  ;;  %v3489_v50 = vshll.u32 %v6537_v0, 16 }
 0x23b   : > { %v4033_v53 = vpop.f32.mrf.mxu0  ;;  %4304 = vrot.lane.b32.xlu2 %v4135_v8, %s5224_s18  ;;  %v4167_v4 = vmax.f32 %v4135_v8, 0.0  ;;  %v2610_v48 = vpack.c.b16 %v2593_v22, %v2592_v59  ;;  %v4854_v57 = vrot.slane %v4838_v1, 9 }
 0x23c   : > { %v3635_v23 = vpop.f32.mrf.mxu3  ;;  %4982 = vmatmul.msk.bf16.gmra.mxu2 %vm698_vm4, %v5148_v27  ;;  %v2699_v58 = vpop.f32.mrf.mxu1  ;;  %v3948_v27 = vpack.c.b16 %v3930_v19, %v3929_v63  ;;  %v3892_v63 = vrot.slane %v6513_v20, 5  ;;  %v5149_v19 = vld [vmem:[%s5284_s30 + $0xc0] sm:$0xff] }
 0x23d   : > { %v3702_v60 = vadd.f32 %v3635_v23, %v3048_v62  ;;  %v4199_v54 = vpack.c.bf16 %v4167_v4, %v4167_v4  ;;  %v3468_v23 = vsel %vm5296_vm3, %v3463_v39, %v6510_v55  ;;  %v2763_v14 = vadd.f32 %v2699_v58, %v5914_v47 }
 0x23e   : > { %v3891_v55 = vrot.slane %v3889_v13, 4  ;;  %v3890_v47 = vsel %vm5470_vm7, %v5080_v56, %v3889_v13  ;;  %v3482_v58 = vrot.slane %v3480_v10, 4 }
 0x23f   : > { %v4100_v52 = vadd.f32 %v4033_v53, %v3702_v60  ;;  %4232 = vst.msk [vmem:[%s6330_s21 + $0x20] sm:$0xf] %vm4223_vm8, %v4199_v54  ;;  %v2984_v34 = vpop.f32.mrf.mxu2  ;;  %v5213_v53 = vld [vmem:[%s5284_s30 + $0xc4] sm:$0xf]  ;;  %v3493_v60 = vshrl.u32 %v6537_v0, 16 }
 0x240   : > { %v3049_v12 = vadd.f32 %v2984_v34, %v2762_v16  ;;  %v2557_v4 = vrot.slane %v5213_v53, 5  ;;  %v5214_v34 = vld [vmem:[%s5284_s30 + $0xc8] sm:$0x1] }
 0x241   : > { %5047 = vmatmul.msk.bf16.gmra.mxu3 %vm698_vm4, %v3550_v29  ;;  %v4136_v2 = vadd.f32 %v6302_v6, %v4100_v52  ;;  %v3478_v29 = vsel %vm5296_vm3, %v3473_v30, %v3477_v3  ;;  %v3533_v52 = vunpack.c.l.b16 %v3468_v23  ;;  %v2560_v59 = vrot.slane %v5214_v34, 5  ;;  %v5065_v34 = vld [vmem:[%s5284_s30 + $0xcc] sm:$0xe] }
 0x242   : > { %v2559_v16 = vrot.slane %v2557_v4, 4  ;;  %v3491_v30 = vrot.slane %v3489_v50, 5  ;;  %v3495_v3 = vrot.slane %v3493_v60, 4  ;;  %v2558_v13 = vsel %vm5470_vm7, %v4854_v57, %v2557_v4 }
 0x243   : > { %v4036_v15 = vpop.f32.mrf.mxu0  ;;  %4306 = vrot.lane.b32.xlu0 %v4136_v2, %s5224_s18  ;;  %v4168_v31 = vmax.f32 %v4136_v2, 0.0  ;;  %v3485_v2 = vrot.slane %v3483_v51, 5  ;;  %v2594_v60 = vunpack.c.l.b16 %v2558_v13 }
 0x244   : > { %v3638_v62 = vpop.f32.mrf.mxu3  ;;  %v2702_v8 = vpop.f32.mrf.mxu1  ;;  %v2561_v41 = vsel %vm5470_vm7, %v2559_v16, %v2560_v59 }
 0x245   : > { %v3703_v42 = vadd.f32 %v3638_v62, %v3049_v12  ;;  %v4200_v40 = vpack.c.bf16 %v4168_v31, %v4168_v31  ;;  %v3534_v12 = vunpack.c.l.b16 %v3478_v29  ;;  %v3486_v23 = vor.u32 %v3485_v2, %v3482_v58 }
 0x246   : > { %5096 = vmatmul.msk.bf16.gmra.mxu0 %vm698_vm4, %v3948_v27  ;;  %v3893_v27 = vsel %vm5470_vm7, %v3891_v55, %v3892_v63  ;;  %v3496_v29 = vor.u32 %v3495_v3, %v3491_v30  ;;  %v2764_v51 = vadd.f32 %v2702_v8, %v5925_v35  ;;  %v2595_v4 = vunpack.c.l.b16 %v2561_v41 }
 0x247   : > { %v4101_v54 = vadd.f32 %v4036_v15, %v3703_v42  ;;  %4233 = vst.msk [vmem:[%s6330_s21 + $0x24] sm:$0xf] %vm4223_vm8, %v4200_v40  ;;  %v2986_v33 = vpop.f32.mrf.mxu2  ;;  %4870 = vmatmul.msk.bf16.gmra.mxu1 %vm698_vm4, %v2610_v48  ;;  %v5032_v15 = vld [vmem:[%s5284_s30 + $0xd4] sm:$0x1]  ;;  %v3551_v53 = vpack.c.b16 %v3534_v12, %v3533_v52  ;;  %v3931_v42 = vunpack.c.l.b16 %v3890_v47  ;;  %v3932_v40 = vunpack.c.l.b16 %v3893_v27  ;;  %v5150_v27 = vld [vmem:[%s5284_s30 + $0xcc] sm:$0xff] }
 0x248   : > { %v3050_v22 = vadd.f32 %v2986_v33, %v2763_v14  ;;  %v3499_v1 = vshll.u32 %v5032_v15, 16  ;;  %v3487_v55 = vrot.slane %v3486_v23, 4  ;;  %v3497_v63 = vrot.slane %v3496_v29, 4 }
 0x249   : > { %v4137_v39 = vadd.f32 %v6302_v6, %v4101_v54  ;;  %v3949_v33 = vpack.c.b16 %v3932_v40, %v3931_v42  ;;  %v2611_v16 = vpack.c.b16 %v2595_v4, %v2594_v60  ;;  %v3896_v35 = vrot.slane %v6537_v0, 5 }
 0x24a   : > { %v3492_v12 = vsel %vm5296_vm3, %v3487_v55, %v3491_v30  ;;  %v5081_v58 = vrot.slane %v5065_v34, 9 }
 0x24b   : > { %v4038_v43 = vpop.f32.mrf.mxu0  ;;  %v4169_v20 = vmax.f32 %v4137_v39, 0.0  ;;  %4308 = vrot.lane.b32.xlu1 %v4137_v39, %s5224_s18  ;;  %v3535_v41 = vunpack.c.l.b16 %v3492_v12 }
 0x24c   : > { %v3640_v31 = vpop.f32.mrf.mxu3  ;;  %4983 = vmatmul.msk.bf16.gmra.mxu2 %vm698_vm4, %v5149_v19  ;;  %v2704_v48 = vpop.f32.mrf.mxu1  ;;  %v3501_v19 = vrot.slane %v3499_v1, 5 }
 0x24d   : > { %v3704_v62 = vadd.f32 %v3640_v31, %v3050_v22  ;;  %v4201_v56 = vpack.c.bf16 %v4169_v20, %v4169_v20  ;;  %v2765_v3 = vadd.f32 %v2704_v48, %v5941_v21  ;;  %v3899_v20 = vrot.slane %v5032_v15, 5 }
 0x24e   : > { %v3502_v47 = vsel %vm5296_vm3, %v3497_v63, %v3501_v19 }
 0x24f   : > { %v4102_v10 = vadd.f32 %v4038_v43, %v3704_v62  ;;  %4234 = vst.msk [vmem:[%s6330_s21 + $0x28] sm:$0xf] %vm4223_vm8, %v4201_v56  ;;  %v2989_v50 = vpop.f32.mrf.mxu2  ;;  %v3898_v43 = vrot.slane %v3896_v35, 4  ;;  %v3536_v30 = vunpack.c.l.b16 %v3502_v47  ;;  %v3897_v56 = vsel %vm5470_vm7, %v5081_v58, %v3896_v35 }
 0x250   : > { %v3051_v54 = vadd.f32 %v2989_v50, %v2764_v51  ;;  %v3933_v23 = vunpack.c.l.b16 %v3897_v56  ;;  %v6628_v56 = vld [vmem:[%s6771_s2] ss:$0 sm:$0xff] }
 0x251   : > { %5048 = vmatmul.msk.bf16.gmra.mxu3 %vm698_vm4, %v3551_v53  ;;  %v4138_v14 = vadd.f32 %v6302_v6, %v4102_v10  ;;  %v3900_v21 = vsel %vm5470_vm7, %v3898_v43, %v3899_v20  ;;  %v3552_v40 = vpack.c.b16 %v3536_v30, %v3535_v41 }
 0x252   : > { %v3934_v29 = vunpack.c.l.b16 %v3900_v21 }
 0x253   : > { %v4041_v52 = vpop.f32.mrf.mxu0  ;;  %4310 = vrot.lane.b32.xlu2 %v4138_v14, %s5224_s18  ;;  %v4170_v57 = vmax.f32 %v4138_v14, 0.0 }
 0x254   : > { %v3643_v8 = vpop.f32.mrf.mxu3  ;;  %v2707_v59 = vpop.f32.mrf.mxu1  ;;  %v3950_v60 = vpack.c.b16 %v3934_v29, %v3933_v23 }
 0x255   : > { %v3705_v22 = vadd.f32 %v3643_v8, %v3051_v54  ;;  %v4202_v39 = vpack.c.bf16 %v4170_v57, %v4170_v57  ;;  %v2766_v10 = vadd.f32 %v2707_v59, %v5959_v7 }
 0x256   : > { %5097 = vmatmul.msk.bf16.gmra.mxu0 %vm698_vm4, %v3949_v33 }
 0x257   : > { %v4103_v2 = vadd.f32 %v4041_v52, %v3705_v22  ;;  %4235 = vst.msk [vmem:[%s6330_s21 + $0x2c] sm:$0xf] %vm4223_vm8, %v4202_v39  ;;  %v2991_v0 = vpop.f32.mrf.mxu2  ;;  %4871 = vmatmul.msk.bf16.gmra.mxu1 %vm698_vm4, %v2611_v16 }
 0x258   : > { %v3052_v31 = vadd.f32 %v2991_v0, %v2765_v3 }
 0x259   : > { %v4139_v13 = vadd.f32 %v6302_v6, %v4103_v2 }
 0x25b   : > { %v4043_v36 = vpop.f32.mrf.mxu0  ;;  %4312 = vrot.lane.b32.xlu0 %v4139_v13, %s5224_s18  ;;  %v4171_v62 = vmax.f32 %v4139_v13, 0.0 }
 0x25c   : > { %v3645_v48 = vpop.f32.mrf.mxu3  ;;  %4984 = vmatmul.msk.bf16.gmra.mxu2 %vm698_vm4, %v5150_v27  ;;  %v2709_v15 = vpop.f32.mrf.mxu1 }
 0x25d   : > { %v3706_v53 = vadd.f32 %v3645_v48, %v3052_v31  ;;  %v4203_v42 = vpack.c.bf16 %v4171_v62, %v4171_v62  ;;  %v2767_v7 = vadd.f32 %v2709_v15, %v5979_v37 }
 0x25f   : > { %v4104_v1 = vadd.f32 %v4043_v36, %v3706_v53  ;;  %4236 = vst.msk [vmem:[%s6330_s21 + $0x30] sm:$0xf] %vm4223_vm8, %v4203_v42  ;;  %v2994_v51 = vpop.f32.mrf.mxu2 }
 0x260   : > { %v3053_v18 = vadd.f32 %v2994_v51, %v2766_v10 }
 0x261   : > { %5049 = vmatmul.msk.bf16.gmra.mxu3 %vm698_vm4, %v3552_v40  ;;  %v4140_v50 = vadd.f32 %v6302_v6, %v4104_v1 }
 0x263   : > { %v4046_v4 = vpop.f32.mrf.mxu0  ;;  %v4172_v54 = vmax.f32 %v4140_v50, 0.0  ;;  %4314 = vrot.lane.b32.xlu1 %v4140_v50, %s5224_s18 }
 0x264   : > { %v3648_v14 = vpop.f32.mrf.mxu3  ;;  %v2712_v33 = vpop.f32.mrf.mxu1 }
 0x265   : > { %v3707_v55 = vadd.f32 %v3648_v14, %v3053_v18  ;;  %v4204_v63 = vpack.c.bf16 %v4172_v54, %v4172_v54  ;;  %v2768_v47 = vadd.f32 %v2712_v33, %v5998_v11 }
 0x266   : > { %5098 = vmatmul.msk.bf16.gmra.mxu0 %vm698_vm4, %v3950_v60 }
 0x267   : > { %v4105_v19 = vadd.f32 %v4046_v4, %v3707_v55  ;;  %4237 = vst.msk [vmem:[%s6330_s21 + $0x34] sm:$0xf] %vm4223_vm8, %v4204_v63  ;;  %v2996_v52 = vpop.f32.mrf.mxu2 }
 0x268   : > { %v3054_v57 = vadd.f32 %v2996_v52, %v2767_v7 }
 0x269   : > { %v4141_v16 = vadd.f32 %v6302_v6, %v4105_v19 }
 0x26b   : > { %v4048_v34 = vpop.f32.mrf.mxu0  ;;  %4316 = vrot.lane.b32.xlu2 %v4141_v16, %s5224_s18  ;;  %v4173_v35 = vmax.f32 %v4141_v16, 0.0 }
 0x26c   : > { %v3650_v8 = vpop.f32.mrf.mxu3  ;;  %v2714_v59 = vpop.f32.mrf.mxu1 }
 0x26d   : > { %v3708_v37 = vadd.f32 %v3650_v8, %v3054_v57  ;;  %v4205_v22 = vpack.c.bf16 %v4173_v35, %v4173_v35  ;;  %v4289_v39 = vpop.permute.xlu0 %4288  ;;  %v2769_v11 = vadd.f32 %v2714_v59, %v6019_v9 }
 0x26e   : > { %4385 = vst.msk [vmem:[%s6609_s25] sm:$0xff] %vm4384_vm9, %v4289_v39 }
 0x26f   : > { %v4106_v12 = vadd.f32 %v4048_v34, %v3708_v37  ;;  %4238 = vst.msk [vmem:[%s6330_s21 + $0x38] sm:$0xf] %vm4223_vm8, %v4205_v22  ;;  %v2999_v58 = vpop.f32.mrf.mxu2 }
 0x270   : > { %v3055_v2 = vadd.f32 %v2999_v58, %v2768_v47 }
 0x271   : > { %v4142_v3 = vadd.f32 %v6302_v6, %v4106_v12 }
 0x273   : > { %v4051_v0 = vpop.f32.mrf.mxu0  ;;  %4318 = vrot.lane.b32.xlu0 %v4142_v3, %s5224_s18  ;;  %v4174_v43 = vmax.f32 %v4142_v3, 0.0 }
 0x274   : > { %v3653_v20 = vpop.f32.mrf.mxu3  ;;  %v2717_v27 = vpop.f32.mrf.mxu1 }
 0x275   : > { %v3709_v31 = vadd.f32 %v3653_v20, %v3055_v2  ;;  %v4206_v13 = vpack.c.bf16 %v4174_v43, %v4174_v43  ;;  %v4291_v41 = vpop.permute.xlu0 %4290  ;;  %v4297_v30 = vpop.permute.xlu2 %4296  ;;  %v2770_v10 = vadd.f32 %v2717_v27, %v6037_v17 }
 0x276   : > { %4386 = vst.msk [vmem:[%s6609_s25 + $0x8] sm:$0xff] %vm4384_vm9, %v4291_v41 }
 0x277   : > { %v4107_v36 = vadd.f32 %v4051_v0, %v3709_v31  ;;  %4239 = vst.msk [vmem:[%s6330_s21 + $0x3c] sm:$0xf] %vm4223_vm8, %v4206_v13  ;;  %v3001_v62 = vpop.f32.mrf.mxu2 }
 0x278   : > { %4389 = vst.msk [vmem:[%s6609_s25 + $0x20] sm:$0xff] %vm4384_vm9, %v4297_v30  ;;  %v3056_v6 = vadd.f32 %v3001_v62, %v2769_v11 }
 0x279   : > { %v4143_v21 = vadd.f32 %v6628_v56, %v4107_v36 }
 0x27b   : > { %v4053_v48 = vpop.f32.mrf.mxu0  ;;  %v4175_v15 = vmax.f32 %v4143_v21, 0.0  ;;  %4320 = vrot.lane.b32.xlu1 %v4143_v21, %s5224_s18 }
 0x27c   : > { %v3655_v53 = vpop.f32.mrf.mxu3  ;;  %v2719_v42 = vpop.f32.mrf.mxu1 }
 0x27d   : > { %v3710_v9 = vadd.f32 %v3655_v53, %v3056_v6  ;;  %v4207_v40 = vpack.c.bf16 %v4175_v15, %v4175_v15  ;;  %v4293_v23 = vpop.permute.xlu1 %4292  ;;  %v4299_v29 = vpop.permute.xlu2 %4298  ;;  %v2771_v17 = vadd.f32 %v2719_v42, %v6057_v26 }
 0x27e   : > { %4387 = vst.msk [vmem:[%s6609_s25 + $0x10] sm:$0xff] %vm4384_vm9, %v4293_v23 }
 0x27f   : > { %v4108_v1 = vadd.f32 %v4053_v48, %v3710_v9  ;;  %4240 = vst.msk [vmem:[%s6330_s21 + $0x40] sm:$0xf] %vm4223_vm8, %v4207_v40  ;;  %v3004_v51 = vpop.f32.mrf.mxu2 }
 0x280   : > { %4390 = vst.msk [vmem:[%s6609_s25 + $0x28] sm:$0xff] %vm4384_vm9, %v4299_v29  ;;  %v3057_v18 = vadd.f32 %v3004_v51, %v2770_v10 }
 0x281   : > { %v4144_v50 = vadd.f32 %v6628_v56, %v4108_v1 }
 0x283   : > { %v4056_v60 = vpop.f32.mrf.mxu0  ;;  %4322 = vrot.lane.b32.xlu2 %v4144_v50, %s5224_s18  ;;  %v4176_v4 = vmax.f32 %v4144_v50, 0.0 }
 0x284   : > { %v3658_v54 = vpop.f32.mrf.mxu3  ;;  %v2722_v14 = vpop.f32.mrf.mxu1 }
 0x285   : > { %v3711_v33 = vadd.f32 %v3658_v54, %v3057_v18  ;;  %v4208_v55 = vpack.c.bf16 %v4176_v4, %v4176_v4  ;;  %v4295_v63 = vpop.permute.xlu1 %4294  ;;  %v2772_v39 = vadd.f32 %v2722_v14, %v6076_v25 }
 0x286   : > { %4388 = vst.msk [vmem:[%s6609_s25 + $0x18] sm:$0xff] %vm4384_vm9, %v4295_v63 }
 0x287   : > { %v4109_v19 = vadd.f32 %v4056_v60, %v3711_v33  ;;  %4241 = vst.msk [vmem:[%s6330_s21 + $0x44] sm:$0xf] %vm4223_vm8, %v4208_v55  ;;  %v3006_v7 = vpop.f32.mrf.mxu2 }
 0x288   : > { %v3058_v52 = vadd.f32 %v3006_v7, %v2771_v17 }
 0x289   : > { %v4145_v57 = vadd.f32 %v6628_v56, %v4109_v19 }
 0x28b   : > { %v4058_v16 = vpop.f32.mrf.mxu0  ;;  %4324 = vrot.lane.b32.xlu0 %v4145_v57, %s5224_s18  ;;  %v4177_v34 = vmax.f32 %v4145_v57, 0.0 }
 0x28c   : > { %v3660_v35 = vpop.f32.mrf.mxu3  ;;  %v2724_v8 = vpop.f32.mrf.mxu1 }
 0x28d   : > { %v3712_v59 = vadd.f32 %v3660_v35, %v3058_v52  ;;  %v4209_v37 = vpack.c.bf16 %v4177_v34, %v4177_v34  ;;  %v2773_v25 = vadd.f32 %v2724_v8, %v6097_v28 }
 0x28f   : > { %v4110_v22 = vadd.f32 %v4058_v16, %v3712_v59  ;;  %4242 = vst.msk [vmem:[%s6330_s21 + $0x48] sm:$0xf] %vm4223_vm8, %v4209_v37  ;;  %v3009_v26 = vpop.f32.mrf.mxu2 }
 0x290   : > { %v3059_v12 = vadd.f32 %v3009_v26, %v2772_v39 }
 0x291   : > { %v4146_v47 = vadd.f32 %v6628_v56, %v4110_v22 }
 0x293   : > { %v4061_v58 = vpop.f32.mrf.mxu0  ;;  %v4178_v2 = vmax.f32 %v4146_v47, 0.0  ;;  %4326 = vrot.lane.b32.xlu1 %v4146_v47, %s5224_s18 }
 0x294   : > { %v3663_v3 = vpop.f32.mrf.mxu3  ;;  %v2727_v0 = vpop.f32.mrf.mxu1 }
 0x295   : > { %v3713_v43 = vadd.f32 %v3663_v3, %v3059_v12  ;;  %v4210_v20 = vpack.c.bf16 %v4178_v2, %v4178_v2  ;;  %v4305_v27 = vpop.permute.xlu2 %4304  ;;  %v2774_v28 = vadd.f32 %v2727_v0, %v6115_v38 }
 0x296   : > { %4393 = vst.msk [vmem:[%s6609_s25 + $0x40] sm:$0xff] %vm4384_vm9, %v4305_v27 }
 0x297   : > { %v4111_v31 = vadd.f32 %v4061_v58, %v3713_v43  ;;  %4243 = vst.msk [vmem:[%s6330_s21 + $0x4c] sm:$0xf] %vm4223_vm8, %v4210_v20  ;;  %v3011_v13 = vpop.f32.mrf.mxu2 }
 0x298   : > { %v3060_v41 = vadd.f32 %v3011_v13, %v2773_v25 }
 0x299   : > { %v4147_v30 = vadd.f32 %v6628_v56, %v4111_v31 }
 0x29b   : > { %v4063_v36 = vpop.f32.mrf.mxu0  ;;  %4328 = vrot.lane.b32.xlu2 %v4147_v30, %s5224_s18  ;;  %v4179_v11 = vmax.f32 %v4147_v30, 0.0 }
 0x29c   : > { %v3665_v62 = vpop.f32.mrf.mxu3  ;;  %v2729_v6 = vpop.f32.mrf.mxu1 }
 0x29d   : > { %v3714_v21 = vadd.f32 %v3665_v62, %v3060_v41  ;;  %v4211_v48 = vpack.c.bf16 %v4179_v11, %v4179_v11  ;;  %v4301_v15 = vpop.permute.xlu0 %4300  ;;  %v2775_v38 = vadd.f32 %v2729_v6, %v6135_v49 }
 0x29e   : > { %4391 = vst.msk [vmem:[%s6609_s25 + $0x30] sm:$0xff] %vm4384_vm9, %v4301_v15 }
 0x29f   : > { %v4112_v53 = vadd.f32 %v4063_v36, %v3714_v21  ;;  %4244 = vst.msk [vmem:[%s6330_s21 + $0x50] sm:$0xf] %vm4223_vm8, %v4211_v48  ;;  %v3014_v42 = vpop.f32.mrf.mxu2 }
 0x2a0   : > { %v3061_v9 = vadd.f32 %v3014_v42, %v2774_v28 }
 0x2a1   : > { %v4148_v40 = vadd.f32 %v6628_v56, %v4112_v53 }
 0x2a3   : > { %v4066_v23 = vpop.f32.mrf.mxu0  ;;  %4330 = vrot.lane.b32.xlu0 %v4148_v40, %s5224_s18  ;;  %v4180_v29 = vmax.f32 %v4148_v40, 0.0 }
 0x2a4   : > { %v3668_v1 = vpop.f32.mrf.mxu3  ;;  %v2732_v10 = vpop.f32.mrf.mxu1 }
 0x2a5   : > { %v3715_v51 = vadd.f32 %v3668_v1, %v3061_v9  ;;  %v4212_v18 = vpack.c.bf16 %v4180_v29, %v4180_v29  ;;  %v4303_v50 = vpop.permute.xlu1 %4302  ;;  %v2776_v49 = vadd.f32 %v2732_v10, %v6154_v44 }
 0x2a6   : > { %4392 = vst.msk [vmem:[%s6609_s25 + $0x38] sm:$0xff] %vm4384_vm9, %v4303_v50 }
 0x2a7   : > { %v4113_v60 = vadd.f32 %v4066_v23, %v3715_v51  ;;  %4245 = vst.msk [vmem:[%s6330_s21 + $0x54] sm:$0xf] %vm4223_vm8, %v4212_v18  ;;  %v3016_v4 = vpop.f32.mrf.mxu2 }
 0x2a8   : > { %v3062_v54 = vadd.f32 %v3016_v4, %v2775_v38 }
 0x2a9   : > { %v4149_v14 = vadd.f32 %v6628_v56, %v4113_v60 }
 0x2ab   : > { %v4068_v33 = vpop.f32.mrf.mxu0  ;;  %v4181_v55 = vmax.f32 %v4149_v14, 0.0  ;;  %4332 = vrot.lane.b32.xlu1 %v4149_v14, %s5224_s18 }
 0x2ac   : > { %v3670_v63 = vpop.f32.mrf.mxu3  ;;  %v2734_v19 = vpop.f32.mrf.mxu1 }
 0x2ad   : > { %v3716_v17 = vadd.f32 %v3670_v63, %v3062_v54  ;;  %v4213_v7 = vpack.c.bf16 %v4181_v55, %v4181_v55  ;;  %v4311_v52 = vpop.permute.xlu2 %4310  ;;  %v2777_v44 = vadd.f32 %v2734_v19, %v6175_v61 }
 0x2ae   : > { %4396 = vst.msk [vmem:[%s6609_s25 + $0x58] sm:$0xff] %vm4384_vm9, %v4311_v52 }
 0x2af   : > { %v4114_v57 = vadd.f32 %v4068_v33, %v3716_v17  ;;  %4246 = vst.msk [vmem:[%s6330_s21 + $0x58] sm:$0xf] %vm4223_vm8, %v4213_v7  ;;  %v3019_v16 = vpop.f32.mrf.mxu2 }
 0x2b0   : > { %v3063_v34 = vadd.f32 %v3019_v16, %v2776_v49 }
 0x2b1   : > { %v4150_v35 = vadd.f32 %v6628_v56, %v4114_v57 }
 0x2b3   : > { %v4071_v8 = vpop.f32.mrf.mxu0  ;;  %4334 = vrot.lane.b32.xlu2 %v4150_v35, %s5224_s18  ;;  %v4182_v59 = vmax.f32 %v4150_v35, 0.0 }
 0x2b4   : > { %v3673_v37 = vpop.f32.mrf.mxu3  ;;  %v2737_v22 = vpop.f32.mrf.mxu1 }
 0x2b5   : > { %v3717_v39 = vadd.f32 %v3673_v37, %v3063_v34  ;;  %v4214_v26 = vpack.c.bf16 %v4182_v59, %v4182_v59  ;;  %v4307_v12 = vpop.permute.xlu0 %4306  ;;  %v2778_v61 = vadd.f32 %v2737_v22, %v6193_v24 }
 0x2b6   : > { %4394 = vst.msk [vmem:[%s6609_s25 + $0x48] sm:$0xff] %vm4384_vm9, %v4307_v12 }
 0x2b7   : > { %v4115_v47 = vadd.f32 %v4071_v8, %v3717_v39  ;;  %4247 = vst.msk [vmem:[%s6330_s21 + $0x5c] sm:$0xf] %vm4223_vm8, %v4214_v26  ;;  %v3021_v58 = vpop.f32.mrf.mxu2 }
 0x2b8   : > { %v3064_v2 = vadd.f32 %v3021_v58, %v2777_v44 }
 0x2b9   : > { %v4151_v3 = vadd.f32 %v6628_v56, %v4115_v47 }
 0x2bb   : > { %v4073_v0 = vpop.f32.mrf.mxu0  ;;  %4336 = vrot.lane.b32.xlu0 %v4151_v3, %s5224_s18  ;;  %v4183_v43 = vmax.f32 %v4151_v3, 0.0 }
 0x2bc   : > { %v3675_v20 = vpop.f32.mrf.mxu3  ;;  %v2739_v27 = vpop.f32.mrf.mxu1 }
 0x2bd   : > { %v3718_v31 = vadd.f32 %v3675_v20, %v3064_v2  ;;  %v4215_v25 = vpack.c.bf16 %v4183_v43, %v4183_v43  ;;  %v4309_v13 = vpop.permute.xlu1 %4308  ;;  %v2779_v24 = vadd.f32 %v2739_v27, %v6219_v5  ;;  %v6783_v5 = vld [vmem:[#allocation4_spill] sm:$0xff] }
 0x2be   : > { %4395 = vst.msk [vmem:[%s6609_s25 + $0x50] sm:$0xff] %vm4384_vm9, %v4309_v13 }
 0x2bf   : > { %v4116_v41 = vadd.f32 %v4073_v0, %v3718_v31  ;;  %4248 = vst.msk [vmem:[%s6330_s21 + $0x60] sm:$0xf] %vm4223_vm8, %v4215_v25  ;;  %v3024_v30 = vpop.f32.mrf.mxu2 }
 0x2c0   : > { %v3065_v36 = vadd.f32 %v3024_v30, %v2778_v61 }
 0x2c1   : > { %v4152_v11 = vadd.f32 %v6628_v56, %v4116_v41 }
 0x2c3   : > { %v4076_v62 = vpop.f32.mrf.mxu0  ;;  %v4184_v6 = vmax.f32 %v4152_v11, 0.0  ;;  %4338 = vrot.lane.b32.xlu1 %v4152_v11, %s5224_s18 }
 0x2c4   : > { %v3678_v21 = vpop.f32.mrf.mxu3  ;;  %v2742_v28 = vpop.f32.mrf.mxu1 }
 0x2c5   : > { %v3719_v48 = vadd.f32 %v3678_v21, %v3065_v36  ;;  %v4216_v15 = vpack.c.bf16 %v4184_v6, %v4184_v6  ;;  %v4317_v53 = vpop.permute.xlu2 %4316  ;;  %v2780_v38 = vadd.f32 %v2742_v28, %v6783_v5 }
 0x2c6   : > { %4399 = vst.msk [vmem:[%s6609_s25 + $0x70] sm:$0xff] %vm4384_vm9, %v4317_v53 }
 0x2c7   : > { %v4117_v42 = vadd.f32 %v4076_v62, %v3719_v48  ;;  %4249 = vst.msk [vmem:[%s6330_s21 + $0x64] sm:$0xf] %vm4223_vm8, %v4216_v15  ;;  %v3026_v9 = vpop.f32.mrf.mxu2 }
 0x2c8   : > { %v3066_v40 = vadd.f32 %v3026_v9, %v2779_v24 }
 0x2c9   : > { %v4153_v23 = vadd.f32 %v6628_v56, %v4117_v42 }
 0x2cb   : > { %v4078_v29 = vpop.f32.mrf.mxu0  ;;  %4340 = vrot.lane.b32.xlu2 %v4153_v23, %s5224_s18  ;;  %v4185_v1 = vmax.f32 %v4153_v23, 0.0 }
 0x2cc   : > { %v3680_v10 = vpop.f32.mrf.mxu3  ;;  %v2744_v54 = vpop.f32.mrf.mxu1 }
 0x2cd   : > { %v3720_v51 = vadd.f32 %v3680_v10, %v3066_v40  ;;  %v4217_v18 = vpack.c.bf16 %v4185_v1, %v4185_v1  ;;  %v4313_v50 = vpop.permute.xlu0 %4312  ;;  %v2781_v49 = vadd.f32 %v2744_v54, %v6258_v45 }
 0x2ce   : > { %4397 = vst.msk [vmem:[%s6609_s25 + $0x60] sm:$0xff] %vm4384_vm9, %v4313_v50 }
 0x2cf   : > { %v4118_v60 = vadd.f32 %v4078_v29, %v3720_v51  ;;  %4250 = vst.msk [vmem:[%s6330_s21 + $0x68] sm:$0xf] %vm4223_vm8, %v4217_v18  ;;  %v3029_v4 = vpop.f32.mrf.mxu2 }
 0x2d0   : > { %v3067_v14 = vadd.f32 %v3029_v4, %v2780_v38 }
 0x2d1   : > { %v4154_v33 = vadd.f32 %v6628_v56, %v4118_v60 }
 0x2d3   : > { %v4081_v55 = vpop.f32.mrf.mxu0  ;;  %4342 = vrot.lane.b32.xlu0 %v4154_v33, %s5224_s18  ;;  %v4186_v63 = vmax.f32 %v4154_v33, 0.0 }
 0x2d4   : > { %v3683_v19 = vpop.f32.mrf.mxu3  ;;  %v2747_v8 = vpop.f32.mrf.mxu1 }
 0x2d5   : > { %v3721_v17 = vadd.f32 %v3683_v19, %v3067_v14  ;;  %v4218_v7 = vpack.c.bf16 %v4186_v63, %v4186_v63  ;;  %v4315_v52 = vpop.permute.xlu1 %4314  ;;  %v2782_v45 = vadd.f32 %v2747_v8, %v6273_v32 }
 0x2d6   : > { %4398 = vst.msk [vmem:[%s6609_s25 + $0x68] sm:$0xff] %vm4384_vm9, %v4315_v52 }
 0x2d7   : > { %v4119_v57 = vadd.f32 %v4081_v55, %v3721_v17  ;;  %4251 = vst.msk [vmem:[%s6330_s21 + $0x6c] sm:$0xf] %vm4223_vm8, %v4218_v7  ;;  %v3031_v16 = vpop.f32.mrf.mxu2 }
 0x2d8   : > { %v3068_v34 = vadd.f32 %v3031_v16, %v2781_v49 }
 0x2d9   : > { %v4155_v35 = vadd.f32 %v6628_v56, %v4119_v57 }
 0x2db   : > { %v4083_v59 = vpop.f32.mrf.mxu0  ;;  %v4187_v37 = vmax.f32 %v4155_v35, 0.0  ;;  %4344 = vrot.lane.b32.xlu1 %v4155_v35, %s5224_s18 }
 0x2dc   : > { %v3685_v22 = vpop.f32.mrf.mxu3  ;;  %v2749_v0 = vpop.f32.mrf.mxu1 }
 0x2dd   : > { %v3722_v39 = vadd.f32 %v3685_v22, %v3068_v34  ;;  %v4219_v26 = vpack.c.bf16 %v4187_v37, %v4187_v37  ;;  %v4323_v12 = vpop.permute.xlu2 %4322  ;;  %v2783_v32 = vadd.f32 %v2749_v0, %v6294_v46 }
 0x2de   : > { %4402 = vst.msk [vmem:[%s6609_s25 + $0x88] sm:$0xff] %vm4384_vm9, %v4323_v12 }
 0x2df   : > { %v4120_v47 = vadd.f32 %v4083_v59, %v3722_v39  ;;  %4252 = vst.msk [vmem:[%s6330_s21 + $0x70] sm:$0xf] %vm4223_vm8, %v4219_v26  ;;  %v3034_v44 = vpop.f32.mrf.mxu2 }
 0x2e0   : > { %v3069_v58 = vadd.f32 %v3034_v44, %v2782_v45 }
 0x2e1   : > { %v4156_v2 = vadd.f32 %v6628_v56, %v4120_v47 }
 0x2e3   : > { %4346 = vrot.lane.b32.xlu2 %v4156_v2, %s5224_s18  ;;  %v4188_v3 = vmax.f32 %v4156_v2, 0.0  ;;  %v4086_v43 = vpop.f32.mrf.mxu0 }
 0x2e4   : > { %v3688_v20 = vpop.f32.mrf.mxu3 }
 0x2e5   : > { %v3723_v27 = vadd.f32 %v3688_v20, %v3069_v58  ;;  %v4220_v31 = vpack.c.bf16 %v4188_v3, %v4188_v3  ;;  %v4319_v25 = vpop.permute.xlu0 %4318 }
 0x2e6   : > { %4400 = vst.msk [vmem:[%s6609_s25 + $0x78] sm:$0xff] %vm4384_vm9, %v4319_v25 }
 0x2e7   : > { %v4121_v13 = vadd.f32 %v4086_v43, %v3723_v27  ;;  %4253 = vst.msk [vmem:[%s6330_s21 + $0x74] sm:$0xf] %vm4223_vm8, %v4220_v31  ;;  %v3036_v41 = vpop.f32.mrf.mxu2 }
 0x2e8   : > { %v3070_v61 = vadd.f32 %v3036_v41, %v2783_v32 }
 0x2e9   : > { %v4157_v30 = vadd.f32 %v6628_v56, %v4121_v13 }
 0x2eb   : > { %4348 = vrot.lane.b32.xlu0 %v4157_v30, %s5224_s18  ;;  %v4189_v36 = vmax.f32 %v4157_v30, 0.0  ;;  %v4088_v48 = vpop.f32.mrf.mxu0 }
 0x2ec   : > { %v3690_v11 = vpop.f32.mrf.mxu3 }
 0x2ed   : > { %v3724_v62 = vadd.f32 %v3690_v11, %v3070_v61  ;;  %v4221_v6 = vpack.c.bf16 %v4189_v36, %v4189_v36  ;;  %v4321_v21 = vpop.permute.xlu1 %4320 }
 0x2ee   : > { %4401 = vst.msk [vmem:[%s6609_s25 + $0x80] sm:$0xff] %vm4384_vm9, %v4321_v21 }
 0x2ef   : > { %v4122_v46 = vadd.f32 %v4088_v48, %v3724_v62  ;;  %4254 = vst.msk [vmem:[%s6330_s21 + $0x78] sm:$0xf] %vm4223_vm8, %v4221_v6 }
 0x2f1   : > { %v4158_v15 = vadd.f32 %v6628_v56, %v4122_v46 }
 0x2f3   : > { %v4190_v53 = vmax.f32 %v4158_v15, 0.0  ;;  %4350 = vrot.lane.b32.xlu1 %v4158_v15, %s5224_s18 }
 0x2f5   : > { %v4222_v28 = vpack.c.bf16 %v4190_v53, %v4190_v53  ;;  %v4329_v42 = vpop.permute.xlu2 %4328 }
 0x2f6   : > { %4405 = vst.msk [vmem:[%s6609_s25 + $0xa0] sm:$0xff] %vm4384_vm9, %v4329_v42 }
 0x2f7   : > { %4255 = vst.msk [vmem:[%s6330_s21 + $0x7c] sm:$0xf] %vm4223_vm8, %v4222_v28 }
 0x2fd   : > { %v4325_v24 = vpop.permute.xlu0 %4324 }
 0x2fe   : > { %4403 = vst.msk [vmem:[%s6609_s25 + $0x90] sm:$0xff] %vm4384_vm9, %v4325_v24 }
 0x305   : > { %v4327_v9 = vpop.permute.xlu1 %4326 }
 0x306   : > { %4404 = vst.msk [vmem:[%s6609_s25 + $0x98] sm:$0xff] %vm4384_vm9, %v4327_v9 }
 0x30d   : > { %v4335_v56 = vpop.permute.xlu2 %4334 }
 0x30e   : > { %4408 = vst.msk [vmem:[%s6609_s25 + $0xb8] sm:$0xff] %vm4384_vm9, %v4335_v56 }
 0x315   : > { %v4331_v40 = vpop.permute.xlu0 %4330 }
 0x316   : > { %4406 = vst.msk [vmem:[%s6609_s25 + $0xa8] sm:$0xff] %vm4384_vm9, %v4331_v40 }
 0x31d   : > { %v4333_v23 = vpop.permute.xlu1 %4332 }
 0x31e   : > { %4407 = vst.msk [vmem:[%s6609_s25 + $0xb0] sm:$0xff] %vm4384_vm9, %v4333_v23 }
 0x325   : > { %v4341_v29 = vpop.permute.xlu2 %4340 }
 0x326   : > { %4411 = vst.msk [vmem:[%s6609_s25 + $0xd0] sm:$0xff] %vm4384_vm9, %v4341_v29 }
 0x32d   : > { %v4337_v1 = vpop.permute.xlu0 %4336 }
 0x32e   : > { %4409 = vst.msk [vmem:[%s6609_s25 + $0xc0] sm:$0xff] %vm4384_vm9, %v4337_v1 }
 0x335   : > { %v4339_v10 = vpop.permute.xlu1 %4338 }
 0x336   : > { %4410 = vst.msk [vmem:[%s6609_s25 + $0xc8] sm:$0xff] %vm4384_vm9, %v4339_v10 }
 0x33d   : > { %v4347_v51 = vpop.permute.xlu2 %4346 }
 0x33e   : > { %4414 = vst.msk [vmem:[%s6609_s25 + $0xe8] sm:$0xff] %vm4384_vm9, %v4347_v51 }
 0x345   : > { %v4343_v18 = vpop.permute.xlu0 %4342 }
 0x346   : > { %4412 = vst.msk [vmem:[%s6609_s25 + $0xd8] sm:$0xff] %vm4384_vm9, %v4343_v18 }
 0x34d   : > { %v4345_v50 = vpop.permute.xlu1 %4344 }
 0x34e   : > { %4413 = vst.msk [vmem:[%s6609_s25 + $0xe0] sm:$0xff] %vm4384_vm9, %v4345_v50 }
 0x35d   : > { %v4349_v60 = vpop.permute.xlu0 %4348 }
 0x35e   : > { %4415 = vst.msk [vmem:[%s6609_s25 + $0xf0] sm:$0xff] %vm4384_vm9, %v4349_v60 }
 0x365   : > { %v4351_v5 = vpop.permute.xlu1 %4350 }
 0x366   : > { %4416 = vst.msk [vmem:[%s6609_s25 + $0xf8] sm:$0xff] %vm4384_vm9, %v4351_v5 }
 0x367 PF: > { %s15_s15 = sadd.s32 1, %s5222_s15  }
 0x368   : > { %p12_p4 = scmp.ge.s32.totalorder %s15_s15, 4  }
 0x36a   :  { %14 = sbr.rel (!%p12_p4) target bundleno = 1 (0x1), region = 84 }

// kernel: up_project_forward.3
= control target key start
LH: loop header
LB: loop body
LE: loop exit
PB: predicated region body
PF: predicated region fallthrough
CT: control target
= control target key end

     0   :  { %s5328_s15 = smov 0   ;;  %s6826_s0 = inlined_call_operand.vmem [shape: bf16[2,18,18,32], index: 0, kind: input, shape index: {}]   ;;  %s6827_s1 = inlined_call_operand.vmem [shape: f32[2,16,16,32], index: 1, kind: input, shape index: {}]   ;;  %s6828_s2 = inlined_call_operand.vmem [shape: bf16[3,3,32,32], index: 2, kind: input, shape index: {}]   ;;  %s6829_s3 = inlined_call_operand.vmem [shape: f32[1,32], index: 3, kind: input, shape index: {}]   ;;  %s6830_s4 = inlined_call_operand.vmem [shape: f32[2,16,16,32], index: 4, kind: output, shape index: {}]  }
   0x1 LB: > { %s4468_s16 = sadd.s32 4294967295, %s5301_s15   ;;  %p4472_p0 = scmp.ge.s32.totalorder %s5301_s15, 1  ;;  %s5301_s15 = sphi %s5328_s15, %s14_s15  }
   0x2   : > { %p172_p1 = scmp.lt.s32.totalorder %s5301_s15, 3 }
   0x4   : > { %p173_p2 = pnand %p4472_p0, %p172_p1 }
   0x6   : > { %176 = sbr.rel (%p173_p2) target bundleno = 760 (0x2f8), region = 36 }
   0xb   : > { %v5181_v0 = vld [vmem:[%s6828_s2 + $0x18] sm:$0xff]  ;;  %p203_p3 = scmp.lt.s32.totalorder %s4468_s16, 1  ;;  %v5180_v1 = vld [vmem:[%s6828_s2 + $0x10] sm:$0xff]  ;;  %v5183_v2 = vld [vmem:[%s6828_s2 + $0x28] sm:$0xff]  ;;  %vm271_vm0 = vsmask.f32 3328 }
   0xc   : > { %5228 = vmatpush.bf16.msra.mxu1 %v5181_v0  ;;  %5229 = vmatpush.bf16.msra.mxu2 %v5181_v0  ;;  %v5201_v3 = vld [vmem:[%s6828_s2 + $0x38] sm:$0xff]  ;;  %v5179_v4 = vld [vmem:[%s6828_s2 + $0x8] sm:$0xff]  ;;  %vm272_vm1 = vsmask.f32 7440  ;;  %vm723_vm3 = vcmask 261120   ;;  %vm1138_vm4 = vcmask 1042432  }
   0xd   : > { %s6842_s16 = smov (!%p203_p3, %s4468_s16), 1  ;;  %5230 = vmatpush.bf16.msra.mxu3 %v5181_v0  ;;  %778 = vmatpush.bf16.msra.mxu0 %v5181_v0  ;;  %v5203_v5 = vld [vmem:[%s6828_s2 + $0x48] sm:$0xff]  ;;  %vm5372_vm2 = vmor %vm271_vm0, %vm272_vm1  ;;  %vm1139_vm5 = vcmask 1046532  }
   0xe   : > { %s5234_s21 = smul.u32 216, %s6842_s16  ;;  %vm5567_vm6 = vmor %vm1138_vm4, %vm1139_vm5  ;;  %s5160_s8 = sshll.u32 %s6842_s16, 8 }
   0xf   : > { %s6423_s11 = scalar_lea.vmem %s6827_s1, %s5160_s8  ;;  %s6457_s18 = scalar_lea.vmem %s6830_s4, %s5160_s8 }
  0x10   : > { %5231 = vmatpush.bf16.msra.mxu1 %v5180_v1  ;;  %5232 = vmatpush.bf16.msra.mxu2 %v5180_v1  ;;  %s5360_s6 = scalar_lea.vmem %s6826_s0, %s5234_s21 }
  0x11   : > { %5233 = vmatpush.bf16.msra.mxu3 %v5180_v1  ;;  %779 = vmatpush.bf16.msra.mxu0 %v5180_v1  ;;  %v227_v6 = vld [vmem:[%s5360_s6 + $0x30] sm:$0xf]  ;;  %v228_v7 = vld [vmem:[%s5360_s6 + $0x34] sm:$0xf]  ;;  %v259_v8 = vld [vmem:[%s5360_s6 + $0x38] sm:$0x1] }
  0x12   : > { %v371_v9 = vshrl.u32 %v227_v6, 16  ;;  %v374_v10 = vshll.u32 %v227_v6, 16  ;;  %v380_v11 = vshll.u32 %v228_v7, 16  ;;  %v384_v12 = vshrl.u32 %v228_v7, 16  ;;  %v235_v13 = vld [vmem:[%s5360_s6 + $0x60] sm:$0xf] }
  0x13   : > { %v390_v14 = vshll.u32 %v259_v8, 16  ;;  %v236_v15 = vld [vmem:[%s5360_s6 + $0x64] sm:$0xf]  ;;  %v263_v16 = vld [vmem:[%s5360_s6 + $0x68] sm:$0x1]  ;;  %v467_v17 = vshrl.u32 %v235_v13, 16 }
  0x14   : > { %1372 = vmatpush.bf16.msrb.mxu2 %v5183_v2  ;;  %1007 = vmatpush.bf16.msrb.mxu1 %v5179_v4  ;;  %v373_v18 = vrot.slane %v371_v9, 4  ;;  %v376_v19 = vrot.slane %v374_v10, 5  ;;  %v382_v20 = vrot.slane %v380_v11, 5  ;;  %v386_v21 = vrot.slane %v384_v12, 4  ;;  %v243_v22 = vld [vmem:[%s5360_s6 + $0x90] sm:$0xf] }
  0x15   : > { %1671 = vmatpush.bf16.msrb.mxu3 %v5201_v3  ;;  %2337 = vmatpush.bf16.msrb.mxu0 %v5203_v5  ;;  %v392_v23 = vrot.slane %v390_v14, 5  ;;  %v469_v24 = vrot.slane %v467_v17, 4  ;;  %v470_v25 = vshll.u32 %v235_v13, 16  ;;  %v476_v26 = vshll.u32 %v236_v15, 16  ;;  %v244_v31 = vld [vmem:[%s5360_s6 + $0x94] sm:$0xf] }
  0x16   : > { %v377_v27 = vor.u32 %v376_v19, %v373_v18  ;;  %v387_v28 = vor.u32 %v386_v21, %v382_v20  ;;  %v480_v29 = vshrl.u32 %v236_v15, 16  ;;  %v486_v30 = vshll.u32 %v263_v16, 16  ;;  %v267_v41 = vld [vmem:[%s5360_s6 + $0x98] sm:$0x1]  ;;  %v219_v57 = vld [vmem:[%s5360_s6] sm:$0xf] }
  0x17   : > { %v472_v33 = vrot.slane %v470_v25, 5  ;;  %v478_v34 = vrot.slane %v476_v26, 5  ;;  %v563_v35 = vshrl.u32 %v243_v22, 16  ;;  %v566_v43 = vshll.u32 %v243_v22, 16  ;;  %v5385_v61 = vld [vmem:[%s5360_s6 + $0x4] sm:$0xf] }
  0x18   : > { %v378_v36 = vrot.slane %v377_v27, 4  ;;  %v388_v37 = vrot.slane %v387_v28, 4  ;;  %v482_v38 = vrot.slane %v480_v29, 4  ;;  %v488_v39 = vrot.slane %v486_v30, 5  ;;  %v5388_v62 = vld [vmem:[%s5360_s6 + $0x8] sm:$0x1] }
  0x19   : > { %v473_v40 = vor.u32 %v472_v33, %v469_v24  ;;  %v565_v42 = vrot.slane %v563_v35, 4  ;;  %v572_v44 = vshll.u32 %v244_v31, 16  ;;  %v576_v48 = vshrl.u32 %v244_v31, 16  ;;  %v229_v15 = vld [vmem:[%s5360_s6 + $0x3c] sm:$0xf] }
  0x1a   : > { %v383_v45 = vsel %vm5372_vm2, %v378_v36, %v382_v20  ;;  %v393_v46 = vsel %vm5372_vm2, %v388_v37, %v392_v23  ;;  %v483_v47 = vor.u32 %v482_v38, %v478_v34  ;;  %v568_v52 = vrot.slane %v566_v43, 5  ;;  %v5400_v16 = vld [vmem:[%s5360_s6 + $0x40] sm:$0xf]  ;;  %v5405_v21 = vld [vmem:[%s5360_s6 + $0x44] sm:$0x1] }
  0x1b   : > { %v671_v49 = vunpack.c.l.b16 %v383_v45  ;;  %v672_v50 = vunpack.c.l.b16 %v393_v46  ;;  %v474_v51 = vrot.slane %v473_v40, 4  ;;  %v574_v54 = vrot.slane %v572_v44, 5  ;;  %v237_v29 = vld [vmem:[%s5360_s6 + $0x6c] sm:$0xf]  ;;  %v264_v43 = vld [vmem:[%s5360_s6 + $0x74] sm:$0x1] }
  0x1c   : > { %v484_v53 = vrot.slane %v483_v47, 4  ;;  %v578_v55 = vrot.slane %v576_v48, 4  ;;  %v582_v56 = vshll.u32 %v267_v41, 16  ;;  %v569_v60 = vor.u32 %v568_v52, %v565_v42 }
  0x1d   : > { %v699_v58 = vpack.c.b16 %v672_v50, %v671_v49  ;;  %v479_v59 = vsel %vm5372_vm2, %v474_v51, %v478_v34  ;;  %v275_v5 = vshrl.u32 %v219_v57, 16  ;;  %v278_v6 = vshll.u32 %v219_v57, 16  ;;  %v245_v57 = vld [vmem:[%s5360_s6 + $0x9c] sm:$0xf] }
  0x1e   : > { %v489_v63 = vsel %vm5372_vm2, %v484_v53, %v488_v39  ;;  %v679_v0 = vunpack.c.l.b16 %v479_v59  ;;  %v579_v1 = vor.u32 %v578_v55, %v574_v54  ;;  %v584_v2 = vrot.slane %v582_v56, 5  ;;  %v238_v39 = vld [vmem:[%s5360_s6 + $0x70] sm:$0xf] }
  0x1f   : > { %4494 = vmatmul.msk.bf16.vlgmr.msra.gmra.mxu1 %vm723_vm3, %v699_v58  ;;  %v680_v3 = vunpack.c.l.b16 %v489_v63  ;;  %v570_v4 = vrot.slane %v569_v60, 4  ;;  %v284_v8 = vshll.u32 %v5385_v61, 16  ;;  %v288_v9 = vshrl.u32 %v5385_v61, 16  ;;  %v246_v63 = vld [vmem:[%s5360_s6 + $0xa0] sm:$0xf] }
  0x20   : > { %v580_v7 = vrot.slane %v579_v1, 4  ;;  %v294_v10 = vshll.u32 %v5388_v62, 16  ;;  %v277_v13 = vrot.slane %v275_v5, 4  ;;  %v280_v14 = vrot.slane %v278_v6, 5 }
  0x21   : > { %v703_v11 = vpack.c.b16 %v680_v3, %v679_v0  ;;  %v575_v12 = vsel %vm5372_vm2, %v570_v4, %v574_v54  ;;  %v286_v19 = vrot.slane %v284_v8, 5  ;;  %v290_v20 = vrot.slane %v288_v9, 4  ;;  %v268_v4 = vld [vmem:[%s5360_s6 + $0xa4] sm:$0x1] }
  0x22   : > { %v585_v17 = vsel %vm5372_vm2, %v580_v7, %v584_v2  ;;  %v687_v18 = vunpack.c.l.b16 %v575_v12  ;;  %v281_v23 = vor.u32 %v280_v14, %v277_v13  ;;  %v296_v24 = vrot.slane %v294_v10, 5  ;;  %v221_v13 = vld [vmem:[%s5360_s6 + $0xc] sm:$0xf] }
  0x23   : > { %4498 = vmatmul.msk.bf16.vlgmr.msra.gmra.mxu2 %vm723_vm3, %v703_v11  ;;  %v688_v22 = vunpack.c.l.b16 %v585_v17  ;;  %v291_v25 = vor.u32 %v290_v20, %v286_v19  ;;  %v395_v26 = vshrl.u32 %v229_v15, 16  ;;  %v398_v27 = vshll.u32 %v229_v15, 16 }
  0x24   : > { %v404_v28 = vshll.u32 %v5400_v16, 16  ;;  %v282_v31 = vrot.slane %v281_v23, 4  ;;  %v408_v33 = vshrl.u32 %v5400_v16, 16  ;;  %v414_v34 = vshll.u32 %v5405_v21, 16 }
  0x25   : > { %v707_v30 = vpack.c.b16 %v688_v22, %v687_v18  ;;  %v292_v35 = vrot.slane %v291_v25, 4  ;;  %v397_v36 = vrot.slane %v395_v26, 4  ;;  %v400_v37 = vrot.slane %v398_v27, 5  ;;  %v5434_v25 = vld [vmem:[%s5360_s6 + $0x10] sm:$0xf] }
  0x26   : > { %v406_v38 = vrot.slane %v404_v28, 5  ;;  %v287_v40 = vsel %vm5372_vm2, %v282_v31, %v286_v19  ;;  %v410_v41 = vrot.slane %v408_v33, 4  ;;  %v416_v42 = vrot.slane %v414_v34, 5  ;;  %v5182_v19 = vld [vmem:[%s6828_s2 + $0x20] sm:$0xff] }
  0x27   : > { %4502 = vmatmul.msk.bf16.vlgmr.msra.gmra.mxu3 %vm723_vm3, %v707_v30  ;;  %v491_v44 = vshrl.u32 %v237_v29, 16  ;;  %v297_v45 = vsel %vm5372_vm2, %v292_v35, %v296_v24  ;;  %v663_v46 = vunpack.c.l.b16 %v287_v40  ;;  %v401_v47 = vor.u32 %v400_v37, %v397_v36  ;;  %1373 = vmatpush.bf16.msrb.mxu2 %v5182_v19  ;;  %v5445_v40 = vld [vmem:[%s5360_s6 + $0x4c] sm:$0xf] }
  0x28   : > { %v494_v48 = vshll.u32 %v237_v29, 16  ;;  %v664_v49 = vunpack.c.l.b16 %v297_v45  ;;  %v411_v50 = vor.u32 %v410_v41, %v406_v38  ;;  %v500_v52 = vshll.u32 %v238_v39, 16  ;;  %v5437_v29 = vld [vmem:[%s5360_s6 + $0x14] sm:$0x1] }
  0x29   : > { %v493_v51 = vrot.slane %v491_v44, 4  ;;  %v402_v53 = vrot.slane %v401_v47, 4  ;;  %v504_v55 = vshrl.u32 %v238_v39, 16  ;;  %v510_v56 = vshll.u32 %v264_v43, 16  ;;  %v231_v39 = vld [vmem:[%s5360_s6 + $0x48] sm:$0xf] }
  0x2a   : > { %v496_v54 = vrot.slane %v494_v48, 5  ;;  %v695_v58 = vpack.c.b16 %v664_v49, %v663_v46  ;;  %v412_v59 = vrot.slane %v411_v50, 4  ;;  %v502_v60 = vrot.slane %v500_v52, 5  ;;  %v5200_v45 = vld [vmem:[%s6828_s2 + $0x30] sm:$0xff]  ;;  %v5178_v46 = vld [vmem:[%s6828_s2] sm:$0xff] }
  0x2b   : > { %v407_v0 = vsel %vm5372_vm2, %v402_v53, %v406_v38  ;;  %v506_v2 = vrot.slane %v504_v55, 4  ;;  %v512_v3 = vrot.slane %v510_v56, 5  ;;  %v587_v7 = vshrl.u32 %v245_v57, 16  ;;  %v5461_v56 = vld [vmem:[%s5360_s6 + $0x50] sm:$0x1]  ;;  %1672 = vmatpush.bf16.msrb.mxu3 %v5200_v45  ;;  %1008 = vmatpush.bf16.msrb.mxu1 %v5178_v46 }
  0x2c   : > { %v497_v1 = vor.u32 %v496_v54, %v493_v51  ;;  %4490 = vmatmul.msk.bf16.vlgmr.msra.gmra.mxu0 %vm723_vm3, %v695_v58  ;;  %v417_v5 = vsel %vm5372_vm2, %v412_v59, %v416_v42  ;;  %v673_v6 = vunpack.c.l.b16 %v407_v0  ;;  %v590_v8 = vshll.u32 %v245_v57, 16  ;;  %v5202_v51 = vld [vmem:[%s6828_s2 + $0x40] sm:$0xff] }
  0x2d   : > { %v674_v9 = vunpack.c.l.b16 %v417_v5  ;;  %v507_v11 = vor.u32 %v506_v2, %v502_v60  ;;  %v596_v12 = vshll.u32 %v246_v63, 16  ;;  %v589_v14 = vrot.slane %v587_v7, 4  ;;  %2338 = vmatpush.bf16.msrb.mxu0 %v5202_v51 }
  0x2e   : > { %v498_v10 = vrot.slane %v497_v1, 4  ;;  %v592_v15 = vrot.slane %v590_v8, 5  ;;  %v600_v17 = vshrl.u32 %v246_v63, 16  ;;  %v606_v18 = vshll.u32 %v268_v4, 16  ;;  %v240_v8 = vld [vmem:[%s5360_s6 + $0x7c] sm:$0xf] }
  0x2f   : > { %v700_v20 = vpack.c.b16 %v674_v9, %v673_v6  ;;  %v508_v23 = vrot.slane %v507_v11, 4  ;;  %v598_v24 = vrot.slane %v596_v12, 5  ;;  %v299_v33 = vshrl.u32 %v221_v13, 16 }
  0x30   : > { %v503_v22 = vsel %vm5372_vm2, %v498_v10, %v502_v60  ;;  %v593_v27 = vor.u32 %v592_v15, %v589_v14  ;;  %v602_v28 = vrot.slane %v600_v17, 4  ;;  %v608_v31 = vrot.slane %v606_v18, 5  ;;  %v265_v17 = vld [vmem:[%s5360_s6 + $0x80] sm:$0x1] }
  0x31   : > { %v681_v26 = vunpack.c.l.b16 %v503_v22  ;;  %4495 = vmatmul.msk.bf16.gmra.mxu1 %vm723_vm3, %v700_v20  ;;  %v513_v30 = vsel %vm5372_vm2, %v508_v23, %v512_v3  ;;  %v302_v34 = vshll.u32 %v221_v13, 16  ;;  %v308_v38 = vshll.u32 %v5434_v25, 16  ;;  %v239_v3 = vld [vmem:[%s5360_s6 + $0x78] sm:$0xf] }
  0x32   : > { %v682_v35 = vunpack.c.l.b16 %v513_v30  ;;  %v594_v36 = vrot.slane %v593_v27, 4  ;;  %v603_v37 = vor.u32 %v602_v28, %v598_v24  ;;  %v301_v41 = vrot.slane %v299_v33, 4 }
  0x33   : > { %v304_v42 = vrot.slane %v302_v34, 5  ;;  %v312_v43 = vshrl.u32 %v5434_v25, 16  ;;  %v318_v44 = vshll.u32 %v5437_v29, 16  ;;  %v310_v50 = vrot.slane %v308_v38, 5 }
  0x34   : > { %v704_v47 = vpack.c.b16 %v682_v35, %v681_v26  ;;  %v599_v48 = vsel %vm5372_vm2, %v594_v36, %v598_v24  ;;  %v604_v49 = vrot.slane %v603_v37, 4  ;;  %v419_v58 = vshrl.u32 %v231_v39, 16  ;;  %v247_v35 = vld [vmem:[%s5360_s6 + $0xa8] sm:$0xf] }
  0x35   : > { %v689_v52 = vunpack.c.l.b16 %v599_v48  ;;  %v305_v53 = vor.u32 %v304_v42, %v301_v41  ;;  %v314_v54 = vrot.slane %v312_v43, 4  ;;  %v320_v55 = vrot.slane %v318_v44, 5  ;;  %v269_v41 = vld [vmem:[%s5360_s6 + $0xb0] sm:$0x1] }
  0x36   : > { %4499 = vmatmul.msk.bf16.gmra.mxu2 %vm723_vm3, %v704_v47  ;;  %v609_v57 = vsel %vm5372_vm2, %v604_v49, %v608_v31  ;;  %v422_v59 = vshll.u32 %v231_v39, 16  ;;  %v428_v60 = vshll.u32 %v5445_v40, 16  ;;  %v432_v2 = vshrl.u32 %v5445_v40, 16  ;;  %v248_v39 = vld [vmem:[%s5360_s6 + $0xac] sm:$0xf] }
  0x37   : > { %v690_v63 = vunpack.c.l.b16 %v609_v57  ;;  %v306_v0 = vrot.slane %v305_v53, 4  ;;  %v315_v1 = vor.u32 %v314_v54, %v310_v50  ;;  %v421_v4 = vrot.slane %v419_v58, 4 }
  0x38   : > { %v424_v5 = vrot.slane %v422_v59, 5  ;;  %v430_v6 = vrot.slane %v428_v60, 5  ;;  %v438_v7 = vshll.u32 %v5461_v56, 16  ;;  %v434_v12 = vrot.slane %v432_v2, 4  ;;  %v223_v59 = vld [vmem:[%s5360_s6 + $0x18] sm:$0xf] }
  0x39   : > { %v708_v9 = vpack.c.b16 %v690_v63, %v689_v52  ;;  %v311_v10 = vsel %vm5372_vm2, %v306_v0, %v310_v50  ;;  %v316_v11 = vrot.slane %v315_v1, 4  ;;  %v515_v18 = vshrl.u32 %v239_v3, 16  ;;  %v5489_v1 = vld [vmem:[%s5360_s6 + $0x1c] sm:$0xf]  ;;  %v5492_v2 = vld [vmem:[%s5360_s6 + $0x20] sm:$0x1] }
  0x3a   : > { %v665_v13 = vunpack.c.l.b16 %v311_v10  ;;  %v425_v14 = vor.u32 %v424_v5, %v421_v4  ;;  %v440_v15 = vrot.slane %v438_v7, 5  ;;  %v435_v20 = vor.u32 %v434_v12, %v430_v6 }
  0x3b   : > { %4503 = vmatmul.msk.bf16.gmra.mxu3 %vm723_vm3, %v708_v9  ;;  %v321_v19 = vsel %vm5372_vm2, %v316_v11, %v320_v55  ;;  %v518_v22 = vshll.u32 %v239_v3, 16  ;;  %v524_v23 = vshll.u32 %v240_v8, 16  ;;  %v517_v27 = vrot.slane %v515_v18, 4 }
  0x3c   : > { %v666_v24 = vunpack.c.l.b16 %v321_v19  ;;  %v426_v26 = vrot.slane %v425_v14, 4  ;;  %v528_v28 = vshrl.u32 %v240_v8, 16  ;;  %v436_v30 = vrot.slane %v435_v20, 4 }
  0x3d   : > { %v520_v31 = vrot.slane %v518_v22, 5  ;;  %v526_v33 = vrot.slane %v524_v23, 5  ;;  %v534_v34 = vshll.u32 %v265_v17, 16  ;;  %v611_v48 = vshrl.u32 %v247_v35, 16  ;;  %v5502_v22 = vld [vmem:[%s5360_s6 + $0x58] sm:$0xf] }
  0x3e   : > { %v696_v36 = vpack.c.b16 %v666_v24, %v665_v13  ;;  %v431_v37 = vsel %vm5372_vm2, %v426_v26, %v430_v6  ;;  %v530_v38 = vrot.slane %v528_v28, 4  ;;  %v441_v42 = vsel %vm5372_vm2, %v436_v30, %v440_v15  ;;  %v233_v15 = vld [vmem:[%s5360_s6 + $0x54] sm:$0xf]  ;;  %v5507_v28 = vld [vmem:[%s5360_s6 + $0x5c] sm:$0x1] }
  0x3f   : > { %v675_v43 = vunpack.c.l.b16 %v431_v37  ;;  %v521_v44 = vor.u32 %v520_v31, %v517_v27  ;;  %v536_v45 = vrot.slane %v534_v34, 5  ;;  %v676_v46 = vunpack.c.l.b16 %v441_v42 }
  0x40   : > { %4491 = vmatmul.msk.bf16.gmra.mxu0 %vm723_vm3, %v696_v36  ;;  %v531_v47 = vor.u32 %v530_v38, %v526_v33  ;;  %v614_v49 = vshll.u32 %v247_v35, 16  ;;  %v620_v51 = vshll.u32 %v248_v39, 16  ;;  %v624_v52 = vshrl.u32 %v248_v39, 16  ;;  %v241_v39 = vld [vmem:[%s5360_s6 + $0x84] sm:$0xf] }
  0x41   : > { %v522_v50 = vrot.slane %v521_v44, 4  ;;  %v630_v53 = vshll.u32 %v269_v41, 16  ;;  %v701_v54 = vpack.c.b16 %v676_v46, %v675_v43  ;;  %v613_v57 = vrot.slane %v611_v48, 4 }
  0x42   : > { %v532_v55 = vrot.slane %v531_v47, 4  ;;  %v616_v58 = vrot.slane %v614_v49, 5  ;;  %v622_v63 = vrot.slane %v620_v51, 5  ;;  %v626_v0 = vrot.slane %v624_v52, 4  ;;  %v242_v49 = vld [vmem:[%s5360_s6 + $0x88] sm:$0xf] }
  0x43   : > { %v527_v60 = vsel %vm5372_vm2, %v522_v50, %v526_v33  ;;  %4496 = vmatmul.msk.bf16.gmra.mxu1 %vm723_vm3, %v701_v54  ;;  %v632_v6 = vrot.slane %v630_v53, 5  ;;  %v323_v9 = vshrl.u32 %v223_v59, 16  ;;  %v326_v10 = vshll.u32 %v223_v59, 16  ;;  %v266_v53 = vld [vmem:[%s5360_s6 + $0x8c] sm:$0x1] }
  0x44   : > { %v537_v3 = vsel %vm5372_vm2, %v532_v55, %v536_v45  ;;  %v683_v4 = vunpack.c.l.b16 %v527_v60  ;;  %v617_v5 = vor.u32 %v616_v58, %v613_v57  ;;  %v627_v8 = vor.u32 %v626_v0, %v622_v63 }
  0x45   : > { %v684_v7 = vunpack.c.l.b16 %v537_v3  ;;  %v332_v12 = vshll.u32 %v5489_v1, 16  ;;  %v336_v13 = vshrl.u32 %v5489_v1, 16  ;;  %v342_v14 = vshll.u32 %v5492_v2, 16 }
  0x46   : > { %v618_v11 = vrot.slane %v617_v5, 4  ;;  %v628_v18 = vrot.slane %v627_v8, 4  ;;  %v325_v19 = vrot.slane %v323_v9, 4  ;;  %v328_v20 = vrot.slane %v326_v10, 5  ;;  %v249_v8 = vld [vmem:[%s5360_s6 + $0xb4] sm:$0xf] }
  0x47   : > { %v705_v17 = vpack.c.b16 %v684_v7, %v683_v4  ;;  %v334_v24 = vrot.slane %v332_v12, 5  ;;  %v338_v26 = vrot.slane %v336_v13, 4  ;;  %v344_v27 = vrot.slane %v342_v14, 5  ;;  %v250_v12 = vld [vmem:[%s5360_s6 + $0xb8] sm:$0xf] }
  0x48   : > { %v623_v23 = vsel %vm5372_vm2, %v618_v11, %v622_v63  ;;  %v633_v30 = vsel %vm5372_vm2, %v628_v18, %v632_v6  ;;  %v329_v33 = vor.u32 %v328_v20, %v325_v19  ;;  %v443_v34 = vshrl.u32 %v233_v15, 16  ;;  %v270_v18 = vld [vmem:[%s5360_s6 + $0xbc] sm:$0x1]  ;;  %v5223_v19 = vld [vmem:[%s6828_s2 + $0x68] sm:$0xff] }
  0x49   : > { %4500 = vmatmul.msk.bf16.gmra.mxu2 %vm723_vm3, %v705_v17  ;;  %v691_v31 = vunpack.c.l.b16 %v623_v23  ;;  %v692_v35 = vunpack.c.l.b16 %v633_v30  ;;  %v339_v36 = vor.u32 %v338_v26, %v334_v24  ;;  %v446_v37 = vshll.u32 %v233_v15, 16 }
  0x4a   : > { %v452_v38 = vshll.u32 %v5502_v22, 16  ;;  %v330_v41 = vrot.slane %v329_v33, 4  ;;  %v445_v42 = vrot.slane %v443_v34, 4  ;;  %v456_v43 = vshrl.u32 %v5502_v22, 16  ;;  %3046 = vmatpush.bf16.msra.mxu2 %v5223_v19 }
  0x4b   : > { %v462_v44 = vshll.u32 %v5507_v28, 16  ;;  %v709_v45 = vpack.c.b16 %v692_v35, %v691_v31  ;;  %v340_v46 = vrot.slane %v339_v36, 4  ;;  %v448_v47 = vrot.slane %v446_v37, 5 }
  0x4c   : > { %v454_v48 = vrot.slane %v452_v38, 5  ;;  %v335_v50 = vsel %vm5372_vm2, %v330_v41, %v334_v24  ;;  %v458_v51 = vrot.slane %v456_v43, 4  ;;  %v539_v54 = vshrl.u32 %v241_v39, 16  ;;  %v225_v38 = vld [vmem:[%s5360_s6 + $0x24] sm:$0xf] }
  0x4d   : > { %v464_v52 = vrot.slane %v462_v44, 5  ;;  %4504 = vmatmul.msk.bf16.gmra.mxu3 %vm723_vm3, %v709_v45  ;;  %v345_v55 = vsel %vm5372_vm2, %v340_v46, %v344_v27  ;;  %v667_v57 = vunpack.c.l.b16 %v335_v50  ;;  %v449_v58 = vor.u32 %v448_v47, %v445_v42  ;;  %v5538_v44 = vld [vmem:[%s5360_s6 + $0x28] sm:$0xf]  ;;  %v5541_v45 = vld [vmem:[%s5360_s6 + $0x2c] sm:$0x1]  ;;  %v5225_v50 = vld [vmem:[%s6828_s2 + $0x78] sm:$0xff] }
  0x4e   : > { %v542_v59 = vshll.u32 %v241_v39, 16  ;;  %v668_v60 = vunpack.c.l.b16 %v345_v55  ;;  %v459_v63 = vor.u32 %v458_v51, %v454_v48  ;;  %v541_v0 = vrot.slane %v539_v54, 4  ;;  %v5205_v51 = vld [vmem:[%s6828_s2 + $0x58] sm:$0xff]  ;;  %3712 = vmatpush.bf16.msra.mxu3 %v5225_v50 }
  0x4f   : > { %v548_v3 = vshll.u32 %v242_v49, 16  ;;  %v450_v4 = vrot.slane %v449_v58, 4  ;;  %v552_v6 = vshrl.u32 %v242_v49, 16  ;;  %v558_v7 = vshll.u32 %v266_v53, 16  ;;  %2747 = vmatpush.bf16.msra.mxu1 %v5205_v51 }
  0x50   : > { %v544_v5 = vrot.slane %v542_v59, 5  ;;  %v697_v9 = vpack.c.b16 %v668_v60, %v667_v57  ;;  %v460_v10 = vrot.slane %v459_v63, 4  ;;  %v635_v24 = vshrl.u32 %v249_v8, 16 }
  0x51   : > { %v550_v11 = vrot.slane %v548_v3, 5  ;;  %v455_v13 = vsel %vm5372_vm2, %v450_v4, %v454_v48  ;;  %v554_v15 = vrot.slane %v552_v6, 4  ;;  %v560_v17 = vrot.slane %v558_v7, 5  ;;  %v1090_v6 = vld [vmem:[%s5360_s6] sm:$0xe] }
  0x52   : > { %v545_v14 = vor.u32 %v544_v5, %v541_v0  ;;  %4492 = vmatmul.msk.bf16.gmra.mxu0 %vm723_vm3, %v697_v9  ;;  %v465_v20 = vsel %vm5372_vm2, %v460_v10, %v464_v52  ;;  %v677_v23 = vunpack.c.l.b16 %v455_v13  ;;  %v638_v26 = vshll.u32 %v249_v8, 16  ;;  %v5227_v52 = vld [vmem:[%s6828_s2 + $0x88] sm:$0xff] }
  0x53   : > { %v678_v27 = vunpack.c.l.b16 %v465_v20  ;;  %v555_v31 = vor.u32 %v554_v15, %v550_v11  ;;  %v644_v33 = vshll.u32 %v250_v12, 16  ;;  %v637_v34 = vrot.slane %v635_v24, 4  ;;  %4122 = vmatpush.bf16.msra.mxu0 %v5227_v52  ;;  %v4762_v15 = vld [vmem:[%s5360_s6 + $0xc] sm:$0xf] }
  0x54   : > { %v546_v30 = vrot.slane %v545_v14, 4  ;;  %v640_v35 = vrot.slane %v638_v26, 5  ;;  %v648_v36 = vshrl.u32 %v250_v12, 16  ;;  %v654_v37 = vshll.u32 %v270_v18, 16 }
  0x55   : > { %v702_v39 = vpack.c.b16 %v678_v27, %v677_v23  ;;  %v556_v42 = vrot.slane %v555_v31, 4  ;;  %v646_v43 = vrot.slane %v644_v33, 5  ;;  %v1146_v46 = vrot.slane %v5388_v62, 5  ;;  %v4765_v62 = vld [vmem:[%s5360_s6 + $0x18] sm:$0xf] }
  0x56   : > { %v551_v41 = vsel %vm5372_vm2, %v546_v30, %v550_v11  ;;  %v641_v48 = vor.u32 %v640_v35, %v637_v34  ;;  %v650_v49 = vrot.slane %v648_v36, 4  ;;  %v656_v54 = vrot.slane %v654_v37, 5 }
  0x57   : > { %v685_v47 = vunpack.c.l.b16 %v551_v41  ;;  %4497 = vmatmul.msk.bf16.gmra.mxu1 %vm723_vm3, %v702_v39  ;;  %v561_v53 = vsel %vm5372_vm2, %v556_v42, %v560_v17  ;;  %v347_v55 = vshrl.u32 %v225_v38, 16  ;;  %v350_v57 = vshll.u32 %v225_v38, 16  ;;  %v4763_v17 = vld [vmem:[%s5360_s6 + $0x10] sm:$0xf] }
  0x58   : > { %v686_v58 = vunpack.c.l.b16 %v561_v53  ;;  %v642_v59 = vrot.slane %v641_v48, 4  ;;  %v651_v60 = vor.u32 %v650_v49, %v646_v43  ;;  %v356_v63 = vshll.u32 %v5538_v44, 16  ;;  %v5162_v53 = vld [vmem:[%s5360_s6] sm:$0xff] }
  0x59   : > { %v349_v0 = vrot.slane %v347_v55, 4  ;;  %v352_v3 = vrot.slane %v350_v57, 5  ;;  %v360_v4 = vshrl.u32 %v5538_v44, 16  ;;  %v366_v5 = vshll.u32 %v5541_v45, 16 }
  0x5a   : > { %v706_v7 = vpack.c.b16 %v686_v58, %v685_v47  ;;  %v647_v8 = vsel %vm5372_vm2, %v642_v59, %v646_v43  ;;  %v652_v9 = vrot.slane %v651_v60, 4  ;;  %v358_v10 = vrot.slane %v356_v63, 5  ;;  %v4764_v43 = vld [vmem:[%s5360_s6 + $0x14] sm:$0x1] }
  0x5b   : > { %v693_v11 = vunpack.c.l.b16 %v647_v8  ;;  %v353_v12 = vor.u32 %v352_v3, %v349_v0  ;;  %v362_v13 = vrot.slane %v360_v4, 4  ;;  %v368_v14 = vrot.slane %v366_v5, 5  ;;  %v4766_v4 = vld [vmem:[%s5360_s6 + $0x1c] sm:$0xf]  ;;  %v1091_v5 = vld [vmem:[%s5360_s6 + $0xc] sm:$0xe] }
  0x5c   : > { %4501 = vmatmul.msk.bf16.gmra.mxu2 %vm723_vm3, %v706_v7  ;;  %v657_v18 = vsel %vm5372_vm2, %v652_v9, %v656_v54  ;;  %v4594_v19 = vrot.slane %v1090_v6, 9  ;;  %v1143_v27 = vrot.slane %v5385_v61, 5  ;;  %v1835_v30 = vshrl.u32 %v4762_v15, 16 }
  0x5d   : > { %v694_v20 = vunpack.c.l.b16 %v657_v18  ;;  %v354_v23 = vrot.slane %v353_v12, 4  ;;  %v363_v24 = vor.u32 %v362_v13, %v358_v10  ;;  %v1838_v31 = vshll.u32 %v4762_v15, 16  ;;  %v5184_v12 = vld [vmem:[%s5360_s6 + $0xc] sm:$0xff] }
  0x5e   : > { %v1844_v33 = vshll.u32 %v4763_v17, 16  ;;  %v1848_v34 = vshrl.u32 %v4763_v17, 16  ;;  %v1144_v38 = vsel %vm5567_vm6, %v4594_v19, %v1143_v27  ;;  %v1145_v41 = vrot.slane %v1143_v27, 4 }
  0x5f   : > { %v710_v35 = vpack.c.b16 %v694_v20, %v693_v11  ;;  %v359_v36 = vsel %vm5372_vm2, %v354_v23, %v358_v10  ;;  %v364_v37 = vrot.slane %v363_v24, 4  ;;  %v1258_v42 = vunpack.c.l.b16 %v1144_v38  ;;  %v4767_v24 = vld [vmem:[%s5360_s6 + $0x20] sm:$0x1] }
  0x60   : > { %v669_v39 = vunpack.c.l.b16 %v359_v36  ;;  %v1837_v47 = vrot.slane %v1835_v30, 4  ;;  %v1840_v48 = vrot.slane %v1838_v31, 5  ;;  %v1846_v49 = vrot.slane %v1844_v33, 5  ;;  %v5163_v33 = vld [vmem:[%s5360_s6 + $0xc] sm:$0xff] }
  0x61   : > { %4505 = vmatmul.msk.bf16.gmra.mxu3 %vm723_vm3, %v710_v35  ;;  %v369_v61 = vsel %vm5372_vm2, %v364_v37, %v368_v14  ;;  %v1850_v50 = vrot.slane %v1848_v34, 4  ;;  %v1147_v52 = vsel %vm5567_vm6, %v1145_v41, %v1146_v46  ;;  %v1854_v58 = vshll.u32 %v4764_v43, 16  ;;  %v4769_v43 = vld [vmem:[%s5360_s6 + $0x28] sm:$0xf] }
  0x62   : > { %v670_v51 = vunpack.c.l.b16 %v369_v61  ;;  %v1259_v54 = vunpack.c.l.b16 %v1147_v52  ;;  %v1841_v55 = vor.u32 %v1840_v48, %v1837_v47  ;;  %v1150_v46 = vrot.slane %v5434_v25, 5  ;;  %v1092_v61 = vld [vmem:[%s5360_s6 + $0x18] sm:$0xe] }
  0x63   : > { %v1851_v57 = vor.u32 %v1850_v50, %v1846_v49  ;;  %v1856_v3 = vrot.slane %v1854_v58, 5  ;;  %v1859_v6 = vshrl.u32 %v4765_v62, 16  ;;  %v1862_v7 = vshll.u32 %v4765_v62, 16 }
  0x64   : > { %v698_v59 = vpack.c.b16 %v670_v51, %v669_v39  ;;  %v1290_v60 = vpack.c.b16 %v1259_v54, %v1258_v42  ;;  %v1842_v63 = vrot.slane %v1841_v55, 4  ;;  %v1868_v10 = vshll.u32 %v4766_v4, 16  ;;  %v4768_v39 = vld [vmem:[%s5360_s6 + $0x24] sm:$0xf] }
  0x65   : > { %v1852_v0 = vrot.slane %v1851_v57, 4  ;;  %v1872_v11 = vshrl.u32 %v4766_v4, 16  ;;  %v4595_v13 = vrot.slane %v1091_v5, 9  ;;  %v1152_v14 = vrot.slane %v1150_v46, 4  ;;  %v5185_v57 = vld [vmem:[%s5360_s6 + $0x18] sm:$0xff] }
  0x66   : > { %4493 = vmatmul.msk.bf16.gmra.mxu0 %vm723_vm3, %v698_v59  ;;  %v1847_v8 = vsel %vm5372_vm2, %v1842_v63, %v1846_v49  ;;  %v1153_v25 = vrot.slane %v5437_v29, 5  ;;  %v1861_v18 = vrot.slane %v1859_v6, 4  ;;  %v1864_v19 = vrot.slane %v1862_v7, 5  ;;  %v4770_v4 = vld [vmem:[%s5360_s6 + $0x2c] sm:$0x1] }
  0x67   : > { %4578 = vmatmul.msk.bf16.vlgmr.msrb.gmra.mxu1 %vm723_vm3, %v5162_v53  ;;  %v1857_v9 = vsel %vm5372_vm2, %v1852_v0, %v1856_v3  ;;  %v2223_v15 = vunpack.c.l.b16 %v1847_v8  ;;  %v1870_v20 = vrot.slane %v1868_v10, 5  ;;  %v1874_v23 = vrot.slane %v1872_v11, 4 }
  0x68   : > { %v2224_v17 = vunpack.c.l.b16 %v1857_v9  ;;  %v1151_v27 = vsel %vm5567_vm6, %v4595_v13, %v1150_v46  ;;  %v1154_v30 = vsel %vm5567_vm6, %v1152_v14, %v1153_v25  ;;  %v1865_v29 = vor.u32 %v1864_v19, %v1861_v18  ;;  %v5164_v9 = vld [vmem:[%s5360_s6 + $0x18] sm:$0xff] }
  0x69   : > { %v1875_v34 = vor.u32 %v1874_v23, %v1870_v20  ;;  %v1878_v35 = vshll.u32 %v4767_v24, 16  ;;  %v1260_v36 = vunpack.c.l.b16 %v1151_v27  ;;  %v1261_v37 = vunpack.c.l.b16 %v1154_v30  ;;  %v1093_v23 = vld [vmem:[%s5360_s6 + $0x24] sm:$0xe] }
  0x6a   : > { %v2255_v31 = vpack.c.b16 %v2224_v17, %v2223_v15  ;;  %v1866_v38 = vrot.slane %v1865_v29, 4  ;;  %v1157_v48 = vrot.slane %v5489_v1, 5  ;;  %v1883_v49 = vshrl.u32 %v4768_v39, 16  ;;  %v4771_v15 = vld [vmem:[%s5360_s6 + $0x30] sm:$0xf]  ;;  %v5186_v29 = vld [vmem:[%s5360_s6 + $0x24] sm:$0xff] }
  0x6b   : > { %v1876_v41 = vrot.slane %v1875_v34, 4  ;;  %v1880_v42 = vrot.slane %v1878_v35, 5  ;;  %v1291_v47 = vpack.c.b16 %v1261_v37, %v1260_v36  ;;  %v1886_v51 = vshll.u32 %v4768_v39, 16  ;;  %v4772_v17 = vld [vmem:[%s5360_s6 + $0x34] sm:$0xf] }
  0x6c   : > { %4622 = vmatmul.msk.bf16.vlgmr.msrb.gmra.mxu2 %vm723_vm3, %v1290_v60  ;;  %v1871_v50 = vsel %vm5372_vm2, %v1866_v38, %v1870_v20  ;;  %v1892_v52 = vshll.u32 %v4769_v43, 16  ;;  %v1896_v53 = vshrl.u32 %v4769_v43, 16  ;;  %v4596_v55 = vrot.slane %v1092_v61, 9 }
  0x6d   : > { %v1881_v54 = vsel %vm5372_vm2, %v1876_v41, %v1880_v42  ;;  %v2225_v58 = vunpack.c.l.b16 %v1871_v50  ;;  %v1159_v59 = vrot.slane %v1157_v48, 4  ;;  %v1160_v1 = vrot.slane %v5492_v2, 5  ;;  %v4773_v42 = vld [vmem:[%s5360_s6 + $0x38] sm:$0x1] }
  0x6e   : > { %v1885_v60 = vrot.slane %v1883_v49, 4  ;;  %v2226_v63 = vunpack.c.l.b16 %v1881_v54  ;;  %v1888_v0 = vrot.slane %v1886_v51, 5  ;;  %v1894_v3 = vrot.slane %v1892_v52, 5  ;;  %v4775_v54 = vld [vmem:[%s5360_s6 + $0x40] sm:$0xf] }
  0x6f   : > { %v1898_v62 = vrot.slane %v1896_v53, 4  ;;  %v1158_v46 = vsel %vm5567_vm6, %v4596_v55, %v1157_v48  ;;  %v1161_v5 = vsel %vm5567_vm6, %v1159_v59, %v1160_v1  ;;  %v1902_v2 = vshll.u32 %v4770_v4, 16  ;;  %v4774_v53 = vld [vmem:[%s5360_s6 + $0x3c] sm:$0xf]  ;;  %v5244_v1 = vld [vmem:[%s5360_s6 + $0x34] sm:$0xf] }
  0x70   : > { %v2256_v6 = vpack.c.b16 %v2226_v63, %v2225_v58  ;;  %v1889_v7 = vor.u32 %v1888_v0, %v1885_v60  ;;  %v1262_v10 = vunpack.c.l.b16 %v1158_v46  ;;  %v1263_v11 = vunpack.c.l.b16 %v1161_v5  ;;  %v1094_v63 = vld [vmem:[%s5360_s6 + $0x30] sm:$0xe] }
  0x71   : > { %4746 = vmatmul.msk.bf16.vlgmr.msrb.gmra.mxu3 %vm723_vm3, %v5184_v12  ;;  %v1899_v8 = vor.u32 %v1898_v62, %v1894_v3  ;;  %v1904_v14 = vrot.slane %v1902_v2, 5  ;;  %v1164_v18 = vrot.slane %v5538_v44, 5  ;;  %v1907_v24 = vshrl.u32 %v4771_v15, 16  ;;  %v5245_v2 = vld [vmem:[%s5360_s6 + $0x38] sm:$0x1] }
  0x72   : > { %v1890_v12 = vrot.slane %v1889_v7, 4  ;;  %v1292_v25 = vpack.c.b16 %v1263_v11, %v1262_v10  ;;  %v1910_v27 = vshll.u32 %v4771_v15, 16  ;;  %v1916_v30 = vshll.u32 %v4772_v17, 16  ;;  %v5187_v10 = vld [vmem:[%s5360_s6 + $0x30] sm:$0xff] }
  0x73   : > { %v1900_v13 = vrot.slane %v1899_v8, 4  ;;  %v1166_v34 = vrot.slane %v1164_v18, 4  ;;  %v1167_v44 = vrot.slane %v5541_v45, 5  ;;  %v1909_v37 = vrot.slane %v1907_v24, 4  ;;  %v5165_v45 = vld [vmem:[%s5360_s6 + $0x24] sm:$0xff] }
  0x74   : > { %v1895_v19 = vsel %vm5372_vm2, %v1890_v12, %v1894_v3  ;;  %v1912_v38 = vrot.slane %v1910_v27, 5  ;;  %v1918_v39 = vrot.slane %v1916_v30, 5  ;;  %v1926_v50 = vshll.u32 %v4773_v42, 16  ;;  %v5166_v30 = vld [vmem:[%s5360_s6 + $0x30] sm:$0xff] }
  0x75   : > { %v1905_v20 = vsel %vm5372_vm2, %v1900_v13, %v1904_v14  ;;  %v2227_v35 = vunpack.c.l.b16 %v1895_v19  ;;  %v1171_v60 = vrot.slane %v5244_v1, 5  ;;  %v1931_v0 = vshrl.u32 %v4774_v53, 16 }
  0x76   : > { %4822 = vmatmul.msk.bf16.vlgmr.msrb.gmra.mxu0 %vm723_vm3, %v2255_v31  ;;  %v1920_v31 = vshrl.u32 %v4772_v17, 16  ;;  %v2228_v36 = vunpack.c.l.b16 %v1905_v20  ;;  %v1913_v48 = vor.u32 %v1912_v38, %v1909_v37  ;;  %v1928_v58 = vrot.slane %v1926_v50, 5  ;;  %v4776_v17 = vld [vmem:[%s5360_s6 + $0x44] sm:$0x1]  ;;  %v4777_v37 = vld [vmem:[%s5360_s6 + $0x48] sm:$0xf] }
  0x77   : > { %4579 = vmatmul.msk.bf16.gmra.mxu1 %vm723_vm3, %v5163_v33  ;;  %v4597_v33 = vrot.slane %v1093_v23, 9  ;;  %v1934_v3 = vshll.u32 %v4774_v53, 16  ;;  %v1940_v62 = vshll.u32 %v4775_v54, 16  ;;  %v1944_v4 = vshrl.u32 %v4775_v54, 16  ;;  %v4778_v38 = vld [vmem:[%s5360_s6 + $0x4c] sm:$0xf] }
  0x78   : > { %v1922_v41 = vrot.slane %v1920_v31, 4  ;;  %v2257_v61 = vpack.c.b16 %v2228_v36, %v2227_v35  ;;  %v1914_v55 = vrot.slane %v1913_v48, 4  ;;  %v4598_v7 = vrot.slane %v1094_v63, 9  ;;  %v5188_v53 = vld [vmem:[%s5360_s6 + $0x3c] sm:$0xff] }
  0x79   : > { %v1165_v43 = vsel %vm5567_vm6, %v4597_v33, %v1164_v18  ;;  %v1173_v8 = vrot.slane %v1171_v60, 4  ;;  %v1933_v11 = vrot.slane %v1931_v0, 4  ;;  %v1936_v12 = vrot.slane %v1934_v3, 5  ;;  %v4779_v3 = vld [vmem:[%s5360_s6 + $0x50] sm:$0x1] }
  0x7a   : > { %v1923_v49 = vor.u32 %v1922_v41, %v1918_v39  ;;  %v1264_v51 = vunpack.c.l.b16 %v1165_v43  ;;  %v1919_v5 = vsel %vm5372_vm2, %v1914_v55, %v1918_v39  ;;  %v1942_v13 = vrot.slane %v1940_v62, 5 }
  0x7b   : > { %v1946_v14 = vrot.slane %v1944_v4, 4  ;;  %v1172_v18 = vsel %vm5567_vm6, %v4598_v7, %v1171_v60  ;;  %v1937_v20 = vor.u32 %v1936_v12, %v1933_v11  ;;  %v1950_v24 = vshll.u32 %v4776_v17, 16 }
  0x7c   : > { %4623 = vmatmul.msk.bf16.gmra.mxu2 %vm723_vm3, %v1291_v47  ;;  %v1168_v47 = vsel %vm5567_vm6, %v1166_v34, %v1167_v44  ;;  %v1955_v48 = vshrl.u32 %v4777_v37, 16  ;;  %v1964_v50 = vshll.u32 %v4778_v38, 16 }
  0x7d   : > { %v1265_v52 = vunpack.c.l.b16 %v1168_v47  ;;  %v1947_v23 = vor.u32 %v1946_v14, %v1942_v13  ;;  %v1938_v44 = vrot.slane %v1937_v20, 4  ;;  %v1952_v36 = vrot.slane %v1950_v24, 5 }
  0x7e   : > { %v1966_v63 = vrot.slane %v1964_v50, 5  ;;  %v1185_v20 = vrot.slane %v5445_v40, 5 }
  0x7f   : > { %v1293_v59 = vpack.c.b16 %v1265_v52, %v1264_v51  ;;  %v1948_v35 = vrot.slane %v1947_v23, 4  ;;  %v1943_v42 = vsel %vm5372_vm2, %v1938_v44, %v1942_v13  ;;  %v1968_v51 = vshrl.u32 %v4778_v38, 16 }
  0x80   : > { %v2231_v52 = vunpack.c.l.b16 %v1943_v42  ;;  %v1187_v38 = vrot.slane %v1185_v20, 4 }
  0x81   : > { %4747 = vmatmul.msk.bf16.gmra.mxu3 %vm723_vm3, %v5185_v57  ;;  %v1924_v57 = vrot.slane %v1923_v49, 4  ;;  %v1953_v43 = vsel %vm5372_vm2, %v1948_v35, %v1952_v36  ;;  %v1958_v49 = vshll.u32 %v4777_v37, 16  ;;  %v1970_v0 = vrot.slane %v1968_v51, 4  ;;  %v5189_v36 = vld [vmem:[%s5360_s6 + $0x48] sm:$0xff]  ;;  %v4782_v51 = vld [vmem:[%s5360_s6 + $0x5c] sm:$0x1] }
  0x82   : > { %v2232_v54 = vunpack.c.l.b16 %v1953_v43 }
  0x83   : > { %v1960_v60 = vrot.slane %v1958_v49, 5  ;;  %v1971_v7 = vor.u32 %v1970_v0, %v1966_v63 }
  0x85   : > { %v1972_v13 = vrot.slane %v1971_v7, 4 }
  0x86   : > { %4823 = vmatmul.msk.bf16.gmra.mxu0 %vm723_vm3, %v2256_v6  ;;  %v1929_v6 = vsel %vm5372_vm2, %v1924_v57, %v1928_v58 }
  0x87   : > { %4580 = vmatmul.msk.bf16.gmra.mxu1 %vm723_vm3, %v5164_v9  ;;  %v1174_v9 = vrot.slane %v5245_v2, 5  ;;  %v2230_v15 = vunpack.c.l.b16 %v1929_v6 }
  0x89   : > { %v1175_v19 = vsel %vm5567_vm6, %v1173_v8, %v1174_v9  ;;  %v1974_v8 = vshll.u32 %v4779_v3, 16  ;;  %v5167_v9 = vld [vmem:[%s5360_s6 + $0x3c] sm:$0xff] }
  0x8a   : > { %v1267_v33 = vunpack.c.l.b16 %v1175_v19  ;;  %v4781_v19 = vld [vmem:[%s5360_s6 + $0x58] sm:$0xf]  ;;  %v4783_v3 = vld [vmem:[%s5360_s6 + $0x60] sm:$0xf] }
  0x8b   : > { %v1976_v14 = vrot.slane %v1974_v8, 5  ;;  %v1992_v44 = vshrl.u32 %v4781_v19, 16 }
  0x8c   : > { %4624 = vmatmul.msk.bf16.gmra.mxu2 %vm723_vm3, %v1292_v25  ;;  %v2229_v25 = vunpack.c.l.b16 %v1919_v5  ;;  %v2259_v5 = vpack.c.b16 %v2232_v54, %v2231_v52 }
  0x8d   : > { %v1977_v24 = vsel %vm5372_vm2, %v1972_v13, %v1976_v14  ;;  %v1994_v49 = vrot.slane %v1992_v44, 4 }
  0x8e   : > { %v2258_v27 = vpack.c.b16 %v2230_v15, %v2229_v25  ;;  %v2234_v43 = vunpack.c.l.b16 %v1977_v24 }
  0x91   : > { %4748 = vmatmul.msk.bf16.gmra.mxu3 %vm723_vm3, %v5186_v29  ;;  %v1266_v29 = vunpack.c.l.b16 %v1172_v18  ;;  %v4780_v18 = vld [vmem:[%s5360_s6 + $0x54] sm:$0xf] }
  0x93   : > { %v1294_v41 = vpack.c.b16 %v1267_v33, %v1266_v29  ;;  %v1982_v29 = vshll.u32 %v4780_v18, 16  ;;  %v1988_v33 = vshll.u32 %v4781_v19, 16 }
  0x96   : > { %4824 = vmatmul.msk.bf16.gmra.mxu0 %vm723_vm3, %v2257_v61  ;;  %v1178_v61 = vrot.slane %v5400_v16, 5  ;;  %v1957_v16 = vrot.slane %v1955_v48, 4  ;;  %v1990_v48 = vrot.slane %v1988_v33, 5  ;;  %v1195_v33 = vrot.slane %v5507_v28, 5 }
  0x97   : > { %4581 = vmatmul.msk.bf16.gmra.mxu1 %vm723_vm3, %v5165_v45  ;;  %v1095_v45 = vld [vmem:[%s5360_s6 + $0x3c] sm:$0xe] }
  0x98   : > { %v4599_v57 = vrot.slane %v1095_v45, 9  ;;  %v1180_v58 = vrot.slane %v1178_v61, 4  ;;  %v1984_v45 = vrot.slane %v1982_v29, 5 }
  0x9a   : > { %v1179_v62 = vsel %vm5567_vm6, %v4599_v57, %v1178_v61  ;;  %v5168_v57 = vld [vmem:[%s5360_s6 + $0x48] sm:$0xff] }
  0x9c   : > { %v5651_v46 = vpop.f32.mrf.mxu1  ;;  %4625 = vmatmul.msk.bf16.gmra.mxu2 %vm723_vm3, %v1293_v59  ;;  %v1181_v59 = vrot.slane %v5405_v21, 5  ;;  %v1961_v21 = vor.u32 %v1960_v60, %v1957_v16  ;;  %v1998_v16 = vshll.u32 %v4782_v51, 16  ;;  %v5169_v51 = vld [vmem:[%s5360_s6 + $0x54] sm:$0xff] }
  0x9e   : > { %v1182_v4 = vsel %vm5567_vm6, %v1180_v58, %v1181_v59  ;;  %v1962_v12 = vrot.slane %v1961_v21, 4  ;;  %v1995_v59 = vor.u32 %v1994_v49, %v1990_v48  ;;  %v2000_v7 = vrot.slane %v1998_v16, 5 }
  0x9f   : > { %v1269_v11 = vunpack.c.l.b16 %v1182_v4 }
  0xa0   : > { %v1967_v23 = vsel %vm5372_vm2, %v1962_v12, %v1966_v63  ;;  %v1996_v21 = vrot.slane %v1995_v59, 4  ;;  %v1192_v12 = vrot.slane %v5502_v22, 5 }
  0xa1   : > { %4749 = vmatmul.msk.bf16.gmra.mxu3 %vm723_vm3, %v5187_v10  ;;  %v1268_v10 = vunpack.c.l.b16 %v1179_v62  ;;  %v2233_v42 = vunpack.c.l.b16 %v1967_v23  ;;  %v4784_v62 = vld [vmem:[%s5360_s6 + $0x64] sm:$0xf] }
  0xa2   : > { %v2016_v13 = vshrl.u32 %v4784_v62, 16  ;;  %v2001_v19 = vsel %vm5372_vm2, %v1996_v21, %v2000_v7  ;;  %v1194_v29 = vrot.slane %v1192_v12, 4 }
  0xa3   : > { %v1295_v15 = vpack.c.b16 %v1269_v11, %v1268_v10  ;;  %v2260_v54 = vpack.c.b16 %v2234_v43, %v2233_v42  ;;  %v2006_v10 = vshll.u32 %v4783_v3, 16  ;;  %v2012_v11 = vshll.u32 %v4784_v62, 16  ;;  %v4786_v62 = vld [vmem:[%s5360_s6 + $0x6c] sm:$0xf] }
  0xa4   : > { %v5667_v31 = vpop.f32.mrf.mxu1  ;;  %v2018_v44 = vrot.slane %v2016_v13, 4  ;;  %v1098_v13 = vld [vmem:[%s5360_s6 + $0x60] sm:$0xe] }
  0xa5   : > { %v2008_v24 = vrot.slane %v2006_v10, 5  ;;  %v5246_v10 = vld [vmem:[%s5360_s6 + $0x64] sm:$0xf] }
  0xa6   : > { %v5669_v34 = vpop.f32.mrf.mxu2  ;;  %4825 = vmatmul.msk.bf16.gmra.mxu0 %vm723_vm3, %v2258_v27  ;;  %v1096_v27 = vld [vmem:[%s5360_s6 + $0x48] sm:$0xe] }
  0xa7   : > { %4582 = vmatmul.msk.bf16.gmra.mxu1 %vm723_vm3, %v5166_v30  ;;  %v1979_v30 = vshrl.u32 %v4780_v18, 16  ;;  %v4600_v40 = vrot.slane %v1096_v27, 9  ;;  %v2014_v27 = vrot.slane %v2012_v11, 5  ;;  %v1199_v11 = vrot.slane %v5246_v10, 5 }
  0xa9   : > { %v5675_v39 = vpop.f32.mrf.mxu0  ;;  %v1981_v61 = vrot.slane %v1979_v30, 4  ;;  %v5190_v30 = vld [vmem:[%s5360_s6 + $0x54] sm:$0xff] }
  0xaa   : > { %v5681_v47 = vpop.f32.mrf.mxu3 }
  0xab   : > { %v1985_v58 = vor.u32 %v1984_v45, %v1981_v61  ;;  %v1196_v45 = vsel %vm5567_vm6, %v1194_v29, %v1195_v33  ;;  %v5191_v29 = vld [vmem:[%s5360_s6 + $0x60] sm:$0xff] }
  0xac   : > { %4626 = vmatmul.msk.bf16.gmra.mxu2 %vm723_vm3, %v1294_v41  ;;  %v1188_v41 = vrot.slane %v5461_v56, 5 }
  0xae   : > { %v5687_v55 = vpop.f32.mrf.mxu1  ;;  %v5690_v1 = vpop.f32.mrf.mxu2  ;;  %v1189_v56 = vsel %vm5567_vm6, %v1187_v38, %v1188_v41  ;;  %v4785_v38 = vld [vmem:[%s5360_s6 + $0x68] sm:$0x1] }
  0xaf   : > { %v1271_v63 = vunpack.c.l.b16 %v1189_v56  ;;  %v2022_v49 = vshll.u32 %v4785_v38, 16 }
  0xb1   : > { %4750 = vmatmul.msk.bf16.gmra.mxu3 %vm723_vm3, %v5188_v53  ;;  %v5698_v6 = vpop.f32.mrf.mxu0  ;;  %v1186_v53 = vsel %vm5567_vm6, %v4600_v40, %v1185_v20  ;;  %v2236_v40 = vunpack.c.l.b16 %v2001_v19 }
  0xb2   : > { %v5700_v2 = vpop.f32.mrf.mxu3  ;;  %v1270_v60 = vunpack.c.l.b16 %v1186_v53  ;;  %v5222_v53 = vld [vmem:[%s6828_s2 + $0x60] sm:$0xff] }
  0xb3   : > { %3047 = vmatpush.bf16.msra.mxu2 %v5222_v53 }
  0xb4   : > { %v1296_v8 = vpack.c.b16 %v1271_v63, %v1270_v60  ;;  %v2024_v60 = vrot.slane %v2022_v49, 5  ;;  %v5224_v63 = vld [vmem:[%s6828_s2 + $0x70] sm:$0xff] }
  0xb5   : > { %3713 = vmatpush.bf16.msra.mxu3 %v5224_v63  ;;  %v4788_v49 = vld [vmem:[%s5360_s6 + $0x74] sm:$0x1] }
  0xb6   : > { %4826 = vmatmul.msk.bf16.gmra.mxu0 %vm723_vm3, %v2259_v5  ;;  %v5704_v25 = vpop.f32.mrf.mxu1  ;;  %v1986_v5 = vrot.slane %v1985_v58, 4 }
  0xb7   : > { %4583 = vmatmul.msk.bf16.gmra.mxu1 %vm723_vm3, %v5167_v9  ;;  %v2003_v9 = vshrl.u32 %v4783_v3, 16  ;;  %v5204_v3 = vld [vmem:[%s6828_s2 + $0x50] sm:$0xff] }
  0xb8   : > { %v1991_v18 = vsel %vm5372_vm2, %v1986_v5, %v1990_v48  ;;  %v2019_v48 = vor.u32 %v2018_v44, %v2014_v27  ;;  %v4787_v5 = vld [vmem:[%s5360_s6 + $0x70] sm:$0xf]  ;;  %2748 = vmatpush.bf16.msra.mxu1 %v5204_v3 }
  0xb9   : > { %v5707_v17 = vpop.f32.mrf.mxu2  ;;  %v2005_v23 = vrot.slane %v2003_v9, 4  ;;  %v2036_v19 = vshll.u32 %v4787_v5, 16 }
  0xba   : > { %v2020_v16 = vrot.slane %v2019_v48, 4 }
  0xbb   : > { %v2009_v43 = vor.u32 %v2008_v24, %v2005_v23  ;;  %v2040_v23 = vshrl.u32 %v4787_v5, 16  ;;  %v5226_v24 = vld [vmem:[%s6828_s2 + $0x80] sm:$0xff] }
  0xbc   : > { %4627 = vmatmul.msk.bf16.gmra.mxu2 %vm723_vm3, %v1295_v15  ;;  %v1097_v15 = vld [vmem:[%s5360_s6 + $0x54] sm:$0xe]  ;;  %v2025_v9 = vsel %vm5372_vm2, %v2020_v16, %v2024_v60  ;;  %4123 = vmatpush.bf16.msra.mxu0 %v5226_v24  ;;  %v5170_v60 = vld [vmem:[%s5360_s6 + $0x60] sm:$0xff] }
  0xbd   : > { %v5717_v35 = vpop.f32.mrf.mxu0  ;;  %v4601_v22 = vrot.slane %v1097_v15, 9  ;;  %v2010_v59 = vrot.slane %v2009_v43, 4  ;;  %v2027_v15 = vshrl.u32 %v4786_v62, 16  ;;  %v2238_v44 = vunpack.c.l.b16 %v2025_v9 }
  0xbe   : > { %v5721_v37 = vpop.f32.mrf.mxu3 }
  0xbf   : > { %v1193_v61 = vsel %vm5567_vm6, %v4601_v22, %v1192_v12  ;;  %v2029_v38 = vrot.slane %v2027_v15, 4  ;;  %v4789_v15 = vld [vmem:[%s5360_s6 + $0x78] sm:$0xf] }
  0xc0   : > { %v5724_v50 = vpop.f32.mrf.mxu1 }
  0xc1   : > { %4751 = vmatmul.msk.bf16.gmra.mxu3 %vm723_vm3, %v5189_v36  ;;  %v5728_v52 = vpop.f32.mrf.mxu2  ;;  %v2235_v36 = vunpack.c.l.b16 %v1991_v18  ;;  %v2030_v18 = vshll.u32 %v4786_v62, 16 }
  0xc3   : > { %v2261_v28 = vpack.c.b16 %v2236_v40, %v2235_v36  ;;  %v4602_v36 = vrot.slane %v1098_v13, 9  ;;  %v1201_v40 = vrot.slane %v1199_v11, 4  ;;  %v2032_v43 = vrot.slane %v2030_v18, 5  ;;  %v4790_v18 = vld [vmem:[%s5360_s6 + $0x7c] sm:$0xf] }
  0xc5   : > { %v5735_v0 = vpop.f32.mrf.mxu0 }
  0xc6   : > { %4827 = vmatmul.msk.bf16.gmra.mxu0 %vm723_vm3, %v2260_v54  ;;  %v5740_v4 = vpop.f32.mrf.mxu3  ;;  %v1272_v54 = vunpack.c.l.b16 %v1193_v61  ;;  %v2038_v61 = vrot.slane %v2036_v19, 5  ;;  %v5248_v19 = vld [vmem:[%s5360_s6 + $0x70] sm:$0xf] }
  0xc7   : > { %4584 = vmatmul.msk.bf16.gmra.mxu1 %vm723_vm3, %v5168_v57  ;;  %v1273_v57 = vunpack.c.l.b16 %v1196_v45  ;;  %v2042_v45 = vrot.slane %v2040_v23, 4  ;;  %v1206_v23 = vrot.slane %v5248_v19, 5 }
  0xc8   : > { %v5744_v14 = vpop.f32.mrf.mxu1 }
  0xc9   : > { %v1297_v21 = vpack.c.b16 %v1273_v57, %v1272_v54  ;;  %v2033_v54 = vor.u32 %v2032_v43, %v2029_v38  ;;  %v2043_v57 = vor.u32 %v2042_v45, %v2038_v61  ;;  %v5249_v43 = vld [vmem:[%s5360_s6 + $0x74] sm:$0x1] }
  0xca   : > { %v1209_v45 = vrot.slane %v5249_v43, 5 }
  0xcb   : > { %v2044_v9 = vrot.slane %v2043_v57, 4 }
  0xcc   : > { %v5751_v20 = vpop.f32.mrf.mxu2  ;;  %4628 = vmatmul.msk.bf16.gmra.mxu2 %vm723_vm3, %v1296_v8  ;;  %v2015_v8 = vsel %vm5372_vm2, %v2010_v59, %v2014_v27  ;;  %v2046_v59 = vshll.u32 %v4788_v49, 16  ;;  %v5192_v49 = vld [vmem:[%s5360_s6 + $0x6c] sm:$0xff] }
  0xcd   : > { %v2237_v33 = vunpack.c.l.b16 %v2015_v8  ;;  %v2034_v8 = vrot.slane %v2033_v54, 4 }
  0xce   : > { %v2048_v10 = vrot.slane %v2046_v59, 5 }
  0xcf   : > { %v5757_v41 = vpop.f32.mrf.mxu0  ;;  %v2262_v53 = vpack.c.b16 %v2238_v44, %v2237_v33  ;;  %v2039_v24 = vsel %vm5372_vm2, %v2034_v8, %v2038_v61  ;;  %v2054_v33 = vshll.u32 %v4789_v15, 16  ;;  %v2060_v44 = vshll.u32 %v4790_v18, 16  ;;  %v4791_v8 = vld [vmem:[%s5360_s6 + $0x80] sm:$0x1] }
  0xd0   : > { %v5759_v42 = vpop.f32.mrf.mxu3 }
  0xd1   : > { %4752 = vmatmul.msk.bf16.gmra.mxu3 %vm723_vm3, %v5190_v30  ;;  %v5247_v30 = vld [vmem:[%s5360_s6 + $0x68] sm:$0x1] }
  0xd2   : > { %v1202_v22 = vrot.slane %v5247_v30, 5  ;;  %v1099_v30 = vld [vmem:[%s5360_s6 + $0x6c] sm:$0xe] }
  0xd4   : > { %v5770_v56 = vpop.f32.mrf.mxu1  ;;  %v5772_v58 = vpop.f32.mrf.mxu2 }
  0xd6   : > { %4828 = vmatmul.msk.bf16.gmra.mxu0 %vm723_vm3, %v2261_v28  ;;  %v1200_v28 = vsel %vm5567_vm6, %v4602_v36, %v1199_v11  ;;  %v2064_v36 = vshrl.u32 %v4790_v18, 16 }
  0xd7   : > { %4585 = vmatmul.msk.bf16.gmra.mxu1 %vm723_vm3, %v5169_v51  ;;  %v5784_v7 = vpop.f32.mrf.mxu0  ;;  %v1203_v51 = vsel %vm5567_vm6, %v1201_v40, %v1202_v22  ;;  %v1274_v62 = vunpack.c.l.b16 %v1200_v28  ;;  %v4603_v28 = vrot.slane %v1099_v30, 9 }
  0xd8   : > { %v5791_v12 = vpop.f32.mrf.mxu3  ;;  %v1275_v5 = vunpack.c.l.b16 %v1203_v51  ;;  %v1208_v51 = vrot.slane %v1206_v23, 4 }
  0xda   : > { %v1298_v13 = vpack.c.b16 %v1275_v5, %v1274_v62  ;;  %v2066_v62 = vrot.slane %v2064_v36, 4 }
  0xdc   : > { %4629 = vmatmul.msk.bf16.gmra.mxu2 %vm723_vm3, %v1297_v21  ;;  %v5799_v27 = vpop.f32.mrf.mxu1 }
  0xdf   : > { %v5802_v48 = vpop.f32.mrf.mxu2 }
  0xe1   : > { %4753 = vmatmul.msk.bf16.gmra.mxu3 %vm723_vm3, %v5191_v29  ;;  %v2051_v29 = vshrl.u32 %v4789_v15, 16  ;;  %v5171_v15 = vld [vmem:[%s5360_s6 + $0x6c] sm:$0xff] }
  0xe3   : > { %v5810_v16 = vpop.f32.mrf.mxu0  ;;  %v2053_v59 = vrot.slane %v2051_v29, 4 }
  0xe4   : > { %v5813_v63 = vpop.f32.mrf.mxu3  ;;  %v1010_v3 = vpop.f32.mrf.mxu1 }
  0xe5   : > { %v1011_v21 = vadd.f32 %v1010_v3, %v5675_v39  ;;  %v2049_v39 = vsel %vm5372_vm2, %v2044_v9, %v2048_v10  ;;  %v2062_v3 = vrot.slane %v2060_v44, 5  ;;  %v1207_v9 = vsel %vm5567_vm6, %v4603_v28, %v1206_v23 }
  0xe6   : > { %4829 = vmatmul.msk.bf16.gmra.mxu0 %vm723_vm3, %v2262_v53  ;;  %v2239_v53 = vunpack.c.l.b16 %v2039_v24  ;;  %v2240_v54 = vunpack.c.l.b16 %v2049_v39  ;;  %v2070_v24 = vshll.u32 %v4791_v8, 16 }
  0xe7   : > { %v5817_v11 = vpop.f32.mrf.mxu2  ;;  %4586 = vmatmul.msk.bf16.gmra.mxu1 %vm723_vm3, %v5170_v60  ;;  %v2056_v60 = vrot.slane %v2054_v33, 5  ;;  %v2067_v19 = vor.u32 %v2066_v62, %v2062_v3 }
  0xe8   : > { %v2263_v10 = vpack.c.b16 %v2240_v54, %v2239_v53  ;;  %v2072_v43 = vrot.slane %v2070_v24, 5  ;;  %v4793_v53 = vld [vmem:[%s5360_s6 + $0x88] sm:$0xf]  ;;  %v5250_v54 = vld [vmem:[%s5360_s6 + $0x7c] sm:$0xf] }
  0xe9   : > { %v2057_v18 = vor.u32 %v2056_v60, %v2053_v59  ;;  %v1100_v59 = vld [vmem:[%s5360_s6 + $0x78] sm:$0xe] }
  0xeb   : > { %v5828_v22 = vpop.f32.mrf.mxu0  ;;  %v2058_v36 = vrot.slane %v2057_v18, 4 }
  0xec   : > { %v5830_v40 = vpop.f32.mrf.mxu3  ;;  %4630 = vmatmul.msk.bf16.gmra.mxu2 %vm723_vm3, %v1298_v13  ;;  %v1012_v38 = vpop.f32.mrf.mxu1 }
  0xed   : > { %v1013_v61 = vadd.f32 %v1012_v38, %v5698_v6  ;;  %v1210_v6 = vsel %vm5567_vm6, %v1208_v51, %v1209_v45  ;;  %v2068_v38 = vrot.slane %v2067_v19, 4  ;;  %v4792_v45 = vld [vmem:[%s5360_s6 + $0x84] sm:$0xf]  ;;  %v5193_v19 = vld [vmem:[%s5360_s6 + $0x78] sm:$0xff] }
  0xee   : > { %v1277_v29 = vunpack.c.l.b16 %v1210_v6  ;;  %v2078_v60 = vshll.u32 %v4792_v45, 16  ;;  %v2088_v6 = vshrl.u32 %v4793_v53, 16 }
  0xef   : > { %v1375_v57 = vpop.f32.mrf.mxu2  ;;  %v2073_v8 = vsel %vm5372_vm2, %v2068_v38, %v2072_v43 }
  0xf0   : > { %v1455_v5 = vadd.f32 %v1375_v57, %v1011_v21  ;;  %v1276_v21 = vunpack.c.l.b16 %v1207_v9  ;;  %v1213_v57 = vrot.slane %v5250_v54, 5  ;;  %v2084_v9 = vshll.u32 %v4793_v53, 16 }
  0xf1   : > { %4754 = vmatmul.msk.bf16.gmra.mxu3 %vm723_vm3, %v5192_v49  ;;  %v2090_v38 = vrot.slane %v2088_v6, 4 }
  0xf2   : > { %v1299_v51 = vpack.c.b16 %v1277_v29, %v1276_v21 }
  0xf3   : > { %v2340_v13 = vpop.f32.mrf.mxu0 }
  0xf4   : > { %v1674_v39 = vpop.f32.mrf.mxu3  ;;  %v1015_v30 = vpop.f32.mrf.mxu1 }
  0xf5   : > { %v1754_v33 = vadd.f32 %v1674_v39, %v1455_v5  ;;  %v1016_v23 = vadd.f32 %v1015_v30, %v5717_v35  ;;  %v2075_v35 = vshrl.u32 %v4792_v45, 16  ;;  %v2063_v5 = vsel %vm5372_vm2, %v2058_v36, %v2062_v3 }
  0xf6   : > { %4830 = vmatmul.msk.bf16.gmra.mxu0 %vm723_vm3, %v2263_v10  ;;  %v5251_v10 = vld [vmem:[%s5360_s6 + $0x80] sm:$0x1]  ;;  %v4604_v39 = vrot.slane %v1100_v59, 9  ;;  %v1215_v30 = vrot.slane %v1213_v57, 4  ;;  %v2241_v21 = vunpack.c.l.b16 %v2063_v5  ;;  %v2242_v3 = vunpack.c.l.b16 %v2073_v8 }
  0xf7   : > { %v1377_v44 = vpop.f32.mrf.mxu2  ;;  %4587 = vmatmul.msk.bf16.gmra.mxu1 %vm723_vm3, %v5171_v15  ;;  %v5847_v49 = vadd.f32 %v2340_v13, %v1754_v33  ;;  %v1216_v13 = vrot.slane %v5251_v10, 5  ;;  %v2077_v29 = vrot.slane %v2075_v35, 4  ;;  %v2080_v33 = vrot.slane %v2078_v60, 5  ;;  %v5172_v35 = vld [vmem:[%s5360_s6 + $0x78] sm:$0xff] }
  0xf8   : > { %v1456_v28 = vadd.f32 %v1377_v44, %v1013_v61  ;;  %v2086_v36 = vrot.slane %v2084_v9, 5  ;;  %v2264_v53 = vpack.c.b16 %v2242_v3, %v2241_v21  ;;  %v4796_v21 = vld [vmem:[%s5360_s6 + $0x94] sm:$0xf]  ;;  %v5252_v3 = vld [vmem:[%s5360_s6 + $0x88] sm:$0xf] }
  0xf9   : > { %v2081_v54 = vor.u32 %v2080_v33, %v2077_v29  ;;  %v1220_v29 = vrot.slane %v5252_v3, 5  ;;  %v1101_v33 = vld [vmem:[%s5360_s6 + $0x84] sm:$0xe] }
  0xfa   : > { %v2091_v60 = vor.u32 %v2090_v38, %v2086_v36 }
  0xfb   : > { %v2342_v62 = vpop.f32.mrf.mxu0  ;;  %v2082_v10 = vrot.slane %v2081_v54, 4 }
  0xfc   : > { %v1676_v61 = vpop.f32.mrf.mxu3  ;;  %4631 = vmatmul.msk.bf16.gmra.mxu2 %vm723_vm3, %v1299_v51  ;;  %v1017_v15 = vpop.f32.mrf.mxu1  ;;  %v4794_v51 = vld [vmem:[%s5360_s6 + $0x8c] sm:$0x1] }
  0xfd   : > { %v1755_v18 = vadd.f32 %v1676_v61, %v1456_v28  ;;  %v1018_v24 = vadd.f32 %v1017_v15, %v5735_v0  ;;  %v1214_v28 = vsel %vm5567_vm6, %v4604_v39, %v1213_v57  ;;  %v1217_v0 = vsel %vm5567_vm6, %v1215_v30, %v1216_v13 }
  0xfe   : > { %v2094_v5 = vshll.u32 %v4794_v51, 16  ;;  %v1279_v9 = vunpack.c.l.b16 %v1217_v0  ;;  %v2092_v61 = vrot.slane %v2091_v60, 4  ;;  %v2112_v0 = vshrl.u32 %v4796_v21, 16  ;;  %v5194_v60 = vld [vmem:[%s5360_s6 + $0x84] sm:$0xff] }
  0xff   : > { %v1380_v44 = vpop.f32.mrf.mxu2  ;;  %v5860_v43 = vadd.f32 %v2342_v62, %v1755_v18  ;;  %v4795_v18 = vld [vmem:[%s5360_s6 + $0x90] sm:$0xf] }
 0x100   : > { %v1457_v45 = vadd.f32 %v1380_v44, %v1016_v23  ;;  %v1278_v23 = vunpack.c.l.b16 %v1214_v28  ;;  %v2096_v15 = vrot.slane %v2094_v5, 5  ;;  %v2099_v44 = vshrl.u32 %v4795_v18, 16 }
 0x101   : > { %4755 = vmatmul.msk.bf16.gmra.mxu3 %vm723_vm3, %v5193_v19  ;;  %v2102_v51 = vshll.u32 %v4795_v18, 16  ;;  %v2108_v28 = vshll.u32 %v4796_v21, 16  ;;  %v4605_v5 = vrot.slane %v1101_v33, 9 }
 0x102   : > { %v1300_v30 = vpack.c.b16 %v1279_v9, %v1278_v23  ;;  %v2101_v9 = vrot.slane %v2099_v44, 4 }
 0x103   : > { %v2345_v59 = vpop.f32.mrf.mxu0 }
 0x104   : > { %v1679_v8 = vpop.f32.mrf.mxu3  ;;  %v1020_v62 = vpop.f32.mrf.mxu1 }
 0x105   : > { %v1756_v6 = vadd.f32 %v1679_v8, %v1457_v45  ;;  %v1021_v57 = vadd.f32 %v1020_v62, %v5757_v41  ;;  %v2087_v41 = vsel %vm5372_vm2, %v2082_v10, %v2086_v36  ;;  %v2097_v45 = vsel %vm5372_vm2, %v2092_v61, %v2096_v15 }
 0x106   : > { %4831 = vmatmul.msk.bf16.gmra.mxu0 %vm723_vm3, %v2264_v53  ;;  %v5253_v53 = vld [vmem:[%s5360_s6 + $0x8c] sm:$0x1]  ;;  %v1222_v8 = vrot.slane %v1220_v29, 4  ;;  %v2243_v62 = vunpack.c.l.b16 %v2087_v41  ;;  %v2244_v23 = vunpack.c.l.b16 %v2097_v45  ;;  %v2104_v10 = vrot.slane %v2102_v51, 5  ;;  %v5173_v41 = vld [vmem:[%s5360_s6 + $0x84] sm:$0xff] }
 0x107   : > { %v1382_v13 = vpop.f32.mrf.mxu2  ;;  %4588 = vmatmul.msk.bf16.gmra.mxu1 %vm723_vm3, %v5172_v35  ;;  %v5873_v19 = vadd.f32 %v2345_v59, %v1756_v6  ;;  %v1223_v54 = vrot.slane %v5253_v53, 5  ;;  %v2114_v61 = vrot.slane %v2112_v0, 4 }
 0x108   : > { %v1458_v39 = vadd.f32 %v1382_v13, %v1018_v24  ;;  %v2110_v13 = vrot.slane %v2108_v28, 5  ;;  %v2265_v21 = vpack.c.b16 %v2244_v23, %v2243_v62  ;;  %v2105_v33 = vor.u32 %v2104_v10, %v2101_v9  ;;  %v4799_v62 = vld [vmem:[%s5360_s6 + $0xa0] sm:$0xf]  ;;  %v5254_v23 = vld [vmem:[%s5360_s6 + $0x94] sm:$0xf] }
 0x109   : > { %v1227_v9 = vrot.slane %v5254_v23, 5 }
 0x10a   : > { %v2115_v44 = vor.u32 %v2114_v61, %v2110_v13 }
 0x10b   : > { %v2347_v38 = vpop.f32.mrf.mxu0 }
 0x10c   : > { %v1681_v24 = vpop.f32.mrf.mxu3  ;;  %4632 = vmatmul.msk.bf16.gmra.mxu2 %vm723_vm3, %v1300_v30  ;;  %v1022_v59 = vpop.f32.mrf.mxu1  ;;  %v4797_v30 = vld [vmem:[%s5360_s6 + $0x98] sm:$0x1] }
 0x10d   : > { %v1757_v35 = vadd.f32 %v1681_v24, %v1458_v39  ;;  %v1023_v36 = vadd.f32 %v1022_v59, %v5784_v7  ;;  %v1221_v39 = vsel %vm5567_vm6, %v4605_v5, %v1220_v29  ;;  %v1224_v7 = vsel %vm5567_vm6, %v1222_v8, %v1223_v54 }
 0x10e   : > { %v2118_v45 = vshll.u32 %v4797_v30, 16  ;;  %v1281_v28 = vunpack.c.l.b16 %v1224_v7  ;;  %v2106_v54 = vrot.slane %v2105_v33, 4  ;;  %v2116_v24 = vrot.slane %v2115_v44, 4  ;;  %v5195_v44 = vld [vmem:[%s5360_s6 + $0x90] sm:$0xff] }
 0x10f   : > { %v1385_v6 = vpop.f32.mrf.mxu2  ;;  %v5886_v15 = vadd.f32 %v2347_v38, %v1757_v35  ;;  %v4798_v35 = vld [vmem:[%s5360_s6 + $0x9c] sm:$0xf]  ;;  %v2136_v7 = vshrl.u32 %v4799_v62, 16 }
 0x110   : > { %v1459_v18 = vadd.f32 %v1385_v6, %v1021_v57  ;;  %v1280_v57 = vunpack.c.l.b16 %v1221_v39  ;;  %v2120_v59 = vrot.slane %v2118_v45, 5  ;;  %v1102_v6 = vld [vmem:[%s5360_s6 + $0x90] sm:$0xe]  ;;  %v2126_v10 = vshll.u32 %v4798_v35, 16 }
 0x111   : > { %4756 = vmatmul.msk.bf16.gmra.mxu3 %vm723_vm3, %v5194_v60  ;;  %v2132_v39 = vshll.u32 %v4799_v62, 16 }
 0x112   : > { %v1301_v8 = vpack.c.b16 %v1281_v28, %v1280_v57  ;;  %v2121_v30 = vsel %vm5372_vm2, %v2116_v24, %v2120_v59  ;;  %v2138_v24 = vrot.slane %v2136_v7, 4 }
 0x113   : > { %v2350_v3 = vpop.f32.mrf.mxu0 }
 0x114   : > { %v1684_v51 = vpop.f32.mrf.mxu3  ;;  %v1025_v38 = vpop.f32.mrf.mxu1 }
 0x115   : > { %v1758_v0 = vadd.f32 %v1684_v51, %v1459_v18  ;;  %v1026_v29 = vadd.f32 %v1025_v38, %v5810_v16  ;;  %v2123_v16 = vshrl.u32 %v4798_v35, 16  ;;  %v2111_v18 = vsel %vm5372_vm2, %v2106_v54, %v2110_v13 }
 0x116   : > { %4832 = vmatmul.msk.bf16.gmra.mxu0 %vm723_vm3, %v2265_v21  ;;  %v5255_v21 = vld [vmem:[%s5360_s6 + $0x98] sm:$0x1]  ;;  %v4606_v51 = vrot.slane %v1102_v6, 9  ;;  %v1229_v38 = vrot.slane %v1227_v9, 4  ;;  %v2245_v57 = vunpack.c.l.b16 %v2111_v18  ;;  %v2246_v13 = vunpack.c.l.b16 %v2121_v30 }
 0x117   : > { %v1387_v53 = vpop.f32.mrf.mxu2  ;;  %4589 = vmatmul.msk.bf16.gmra.mxu1 %vm723_vm3, %v5173_v41  ;;  %v5899_v60 = vadd.f32 %v2350_v3, %v1758_v0  ;;  %v1230_v3 = vrot.slane %v5255_v21, 5  ;;  %v2125_v28 = vrot.slane %v2123_v16, 4  ;;  %v2128_v0 = vrot.slane %v2126_v10, 5  ;;  %v5174_v16 = vld [vmem:[%s5360_s6 + $0x90] sm:$0xff] }
 0x118   : > { %v1460_v5 = vadd.f32 %v1387_v53, %v1023_v36  ;;  %v2134_v54 = vrot.slane %v2132_v39, 5  ;;  %v2266_v62 = vpack.c.b16 %v2246_v13, %v2245_v57  ;;  %v4802_v13 = vld [vmem:[%s5360_s6 + $0xac] sm:$0xf] }
 0x119   : > { %v2129_v23 = vor.u32 %v2128_v0, %v2125_v28  ;;  %v1103_v28 = vld [vmem:[%s5360_s6 + $0x9c] sm:$0xe] }
 0x11a   : > { %v2139_v10 = vor.u32 %v2138_v24, %v2134_v54 }
 0x11b   : > { %v2352_v61 = vpop.f32.mrf.mxu0 }
 0x11c   : > { %v1686_v36 = vpop.f32.mrf.mxu3  ;;  %4633 = vmatmul.msk.bf16.gmra.mxu2 %vm723_vm3, %v1301_v8  ;;  %v1027_v41 = vpop.f32.mrf.mxu1  ;;  %v4800_v8 = vld [vmem:[%s5360_s6 + $0xa4] sm:$0x1] }
 0x11d   : > { %v1759_v33 = vadd.f32 %v1686_v36, %v1460_v5  ;;  %v1028_v45 = vadd.f32 %v1027_v41, %v5828_v22  ;;  %v1228_v5 = vsel %vm5567_vm6, %v4606_v51, %v1227_v9  ;;  %v1231_v22 = vsel %vm5567_vm6, %v1229_v38, %v1230_v3  ;;  %v4801_v41 = vld [vmem:[%s5360_s6 + $0xa8] sm:$0xf]  ;;  %v5256_v38 = vld [vmem:[%s5360_s6 + $0xa0] sm:$0xf] }
 0x11e   : > { %v2142_v18 = vshll.u32 %v4800_v8, 16  ;;  %v1283_v39 = vunpack.c.l.b16 %v1231_v22  ;;  %v2130_v9 = vrot.slane %v2129_v23, 4  ;;  %v2140_v3 = vrot.slane %v2139_v10, 4 }
 0x11f   : > { %v1390_v53 = vpop.f32.mrf.mxu2  ;;  %v5912_v59 = vadd.f32 %v2352_v61, %v1759_v33  ;;  %v1234_v57 = vrot.slane %v5256_v38, 5  ;;  %v2150_v24 = vshll.u32 %v4801_v41, 16  ;;  %v2160_v22 = vshrl.u32 %v4802_v13, 16 }
 0x120   : > { %v1461_v35 = vadd.f32 %v1390_v53, %v1026_v29  ;;  %v1282_v29 = vunpack.c.l.b16 %v1228_v5  ;;  %v2144_v36 = vrot.slane %v2142_v18, 5  ;;  %v2135_v0 = vsel %vm5372_vm2, %v2130_v9, %v2134_v54 }
 0x121   : > { %4757 = vmatmul.msk.bf16.gmra.mxu3 %vm723_vm3, %v5195_v44  ;;  %v2147_v53 = vshrl.u32 %v4801_v41, 16  ;;  %v2156_v5 = vshll.u32 %v4802_v13, 16  ;;  %v1236_v10 = vrot.slane %v1234_v57, 4  ;;  %v2247_v54 = vunpack.c.l.b16 %v2135_v0  ;;  %v4803_v13 = vld [vmem:[%s5360_s6 + $0xb0] sm:$0x1]  ;;  %v5175_v0 = vld [vmem:[%s5360_s6 + $0x9c] sm:$0xff] }
 0x122   : > { %v1302_v51 = vpack.c.b16 %v1283_v39, %v1282_v29  ;;  %v2145_v8 = vsel %vm5372_vm2, %v2140_v3, %v2144_v36  ;;  %v2152_v9 = vrot.slane %v2150_v24, 5  ;;  %v2162_v36 = vrot.slane %v2160_v22, 4 }
 0x123   : > { %v2355_v6 = vpop.f32.mrf.mxu0  ;;  %v2248_v39 = vunpack.c.l.b16 %v2145_v8  ;;  %v2158_v3 = vrot.slane %v2156_v5, 5  ;;  %v2166_v8 = vshll.u32 %v4803_v13, 16 }
 0x124   : > { %v1689_v61 = vpop.f32.mrf.mxu3  ;;  %v1030_v30 = vpop.f32.mrf.mxu1 }
 0x125   : > { %v1760_v7 = vadd.f32 %v1689_v61, %v1461_v35  ;;  %v5196_v61 = vld [vmem:[%s5360_s6 + $0x9c] sm:$0xff]  ;;  %v1031_v29 = vadd.f32 %v1030_v30, %v5651_v46  ;;  %v2267_v46 = vpack.c.b16 %v2248_v39, %v2247_v54  ;;  %v2168_v54 = vrot.slane %v2166_v8, 5 }
 0x126   : > { %4833 = vmatmul.msk.bf16.gmra.mxu0 %vm723_vm3, %v2266_v62  ;;  %v5257_v62 = vld [vmem:[%s5360_s6 + $0xa4] sm:$0x1] }
 0x127   : > { %v1392_v21 = vpop.f32.mrf.mxu2  ;;  %4590 = vmatmul.msk.bf16.gmra.mxu1 %vm723_vm3, %v5174_v16  ;;  %v5924_v33 = vadd.f32 %v2355_v6, %v1760_v7  ;;  %v1237_v23 = vrot.slane %v5257_v62, 5  ;;  %v4607_v16 = vrot.slane %v1103_v28, 9  ;;  %v2149_v7 = vrot.slane %v2147_v53, 4 }
 0x128   : > { %v1462_v44 = vadd.f32 %v1392_v21, %v1028_v45 }
 0x129   : > { %v2153_v30 = vor.u32 %v2152_v9, %v2149_v7 }
 0x12b   : > { %v2357_v35 = vpop.f32.mrf.mxu0 }
 0x12c   : > { %v1691_v45 = vpop.f32.mrf.mxu3  ;;  %4634 = vmatmul.msk.bf16.gmra.mxu2 %vm723_vm3, %v1302_v51  ;;  %v1032_v6 = vpop.f32.mrf.mxu1  ;;  %v1235_v51 = vsel %vm5567_vm6, %v4607_v16, %v1234_v57  ;;  %v4804_v57 = vld [vmem:[%s5360_s6 + $0xb4] sm:$0xf]  ;;  %v2154_v16 = vrot.slane %v2153_v30, 4 }
 0x12d   : > { %v1761_v18 = vadd.f32 %v1691_v45, %v1462_v44  ;;  %v1238_v44 = vsel %vm5567_vm6, %v1236_v10, %v1237_v23  ;;  %v1284_v53 = vunpack.c.l.b16 %v1235_v51  ;;  %v4805_v45 = vld [vmem:[%s5360_s6 + $0xb8] sm:$0xf]  ;;  %v1033_v23 = vadd.f32 %v1032_v6, %v5667_v31 }
 0x12e   : > { %v1285_v24 = vunpack.c.l.b16 %v1238_v44  ;;  %v2171_v7 = vshrl.u32 %v4804_v57, 16  ;;  %v2174_v9 = vshll.u32 %v4804_v57, 16  ;;  %v2184_v51 = vshrl.u32 %v4805_v45, 16  ;;  %v1104_v44 = vld [vmem:[%s5360_s6 + $0xa8] sm:$0xe] }
 0x12f   : > { %v1395_v21 = vpop.f32.mrf.mxu2  ;;  %v5937_v41 = vadd.f32 %v2357_v35, %v1761_v18  ;;  %v2163_v35 = vor.u32 %v2162_v36, %v2158_v3  ;;  %v5258_v36 = vld [vmem:[%s5360_s6 + $0xac] sm:$0xf]  ;;  %v2159_v6 = vsel %vm5372_vm2, %v2154_v16, %v2158_v3 }
 0x130   : > { %v1463_v38 = vadd.f32 %v1395_v21, %v1031_v29  ;;  %v1303_v18 = vpack.c.b16 %v1285_v24, %v1284_v53  ;;  %v2180_v21 = vshll.u32 %v4805_v45, 16  ;;  %v2173_v53 = vrot.slane %v2171_v7, 4 }
 0x131   : > { %4758 = vmatmul.msk.bf16.gmra.mxu3 %vm723_vm3, %v5196_v61  ;;  %v2164_v61 = vrot.slane %v2163_v35, 4  ;;  %v2176_v24 = vrot.slane %v2174_v9, 5  ;;  %v2186_v45 = vrot.slane %v2184_v51, 4  ;;  %v5176_v51 = vld [vmem:[%s5360_s6 + $0xa8] sm:$0xff] }
 0x132   : > { %v2182_v35 = vrot.slane %v2180_v21, 5 }
 0x133   : > { %v2360_v28 = vpop.f32.mrf.mxu0  ;;  %v2169_v13 = vsel %vm5372_vm2, %v2164_v61, %v2168_v54 }
 0x134   : > { %v1694_v5 = vpop.f32.mrf.mxu3  ;;  %v1035_v22 = vpop.f32.mrf.mxu1  ;;  %v2250_v16 = vunpack.c.l.b16 %v2169_v13  ;;  %v2187_v9 = vor.u32 %v2186_v45, %v2182_v35 }
 0x135   : > { %v1762_v62 = vadd.f32 %v1694_v5, %v1463_v38  ;;  %v1241_v38 = vrot.slane %v5258_v36, 5  ;;  %v5197_v5 = vld [vmem:[%s5360_s6 + $0xa8] sm:$0xff]  ;;  %v1036_v3 = vadd.f32 %v1035_v22, %v5687_v55 }
 0x136   : > { %4834 = vmatmul.msk.bf16.gmra.mxu0 %vm723_vm3, %v2267_v46  ;;  %v5259_v46 = vld [vmem:[%s5360_s6 + $0xb0] sm:$0x1] }
 0x137   : > { %v1397_v10 = vpop.f32.mrf.mxu2  ;;  %4591 = vmatmul.msk.bf16.gmra.mxu1 %vm723_vm3, %v5175_v0  ;;  %v5951_v29 = vadd.f32 %v2360_v28, %v1762_v62  ;;  %v1244_v30 = vrot.slane %v5259_v46, 5  ;;  %v4608_v62 = vrot.slane %v1104_v44, 9  ;;  %v1243_v57 = vrot.slane %v1241_v38, 4 }
 0x138   : > { %v1464_v39 = vadd.f32 %v1397_v10, %v1033_v23  ;;  %v2249_v23 = vunpack.c.l.b16 %v2159_v6  ;;  %v4806_v10 = vld [vmem:[%s5360_s6 + $0xbc] sm:$0x1] }
 0x139   : > { %v1245_v7 = vsel %vm5567_vm6, %v1243_v57, %v1244_v30  ;;  %v2190_v55 = vshll.u32 %v4806_v10, 16  ;;  %v4808_v57 = vld [vmem:[%s5360_s6 + $0xc4] sm:$0xf] }
 0x13a   : > { %v2268_v22 = vpack.c.b16 %v2250_v16, %v2249_v23  ;;  %v1287_v13 = vunpack.c.l.b16 %v1245_v7  ;;  %v1105_v23 = vld [vmem:[%s5360_s6 + $0xb4] sm:$0xe]  ;;  %v5261_v16 = vld [vmem:[%s5360_s6 + $0xb8] sm:$0xf]  ;;  %v2208_v7 = vshrl.u32 %v4808_v57, 16 }
 0x13b   : > { %v2362_v31 = vpop.f32.mrf.mxu0  ;;  %v1248_v10 = vrot.slane %v5261_v16, 5 }
 0x13c   : > { %v1696_v28 = vpop.f32.mrf.mxu3  ;;  %4635 = vmatmul.msk.bf16.gmra.mxu2 %vm723_vm3, %v1303_v18  ;;  %v1037_v0 = vpop.f32.mrf.mxu1  ;;  %v2177_v18 = vor.u32 %v2176_v24, %v2173_v53  ;;  %v2192_v53 = vrot.slane %v2190_v55, 5  ;;  %v4807_v24 = vld [vmem:[%s5360_s6 + $0xc0] sm:$0xf]  ;;  %v5262_v55 = vld [vmem:[%s5360_s6 + $0x14] sm:$0x1] }
 0x13d   : > { %v1763_v8 = vadd.f32 %v1696_v28, %v1464_v39  ;;  %v1242_v39 = vsel %vm5567_vm6, %v4608_v62, %v1241_v38  ;;  %v2188_v38 = vrot.slane %v2187_v9, 4  ;;  %v1038_v30 = vadd.f32 %v1037_v0, %v5704_v25 }
 0x13e   : > { %v1286_v6 = vunpack.c.l.b16 %v1242_v39  ;;  %v2178_v28 = vrot.slane %v2177_v18, 4  ;;  %v2195_v0 = vshrl.u32 %v4807_v24, 16  ;;  %v2198_v18 = vshll.u32 %v4807_v24, 16  ;;  %v5198_v24 = vld [vmem:[%s5360_s6 + $0xb4] sm:$0xff] }
 0x13f   : > { %v1400_v61 = vpop.f32.mrf.mxu2  ;;  %v5964_v54 = vadd.f32 %v2362_v31, %v1763_v8  ;;  %v5260_v8 = vld [vmem:[%s5360_s6 + $0x10] sm:$0xf]  ;;  %v2193_v25 = vsel %vm5372_vm2, %v2188_v38, %v2192_v53  ;;  %v2204_v39 = vshll.u32 %v4808_v57, 16  ;;  %v1250_v38 = vrot.slane %v1248_v10, 4  ;;  %v4838_v53 = vld [vmem:[%s5360_s6 + $0xc] sm:$0xe] }
 0x140   : > { %v1465_v36 = vadd.f32 %v1400_v61, %v1036_v3  ;;  %v1304_v3 = vpack.c.b16 %v1287_v13, %v1286_v6  ;;  %v5263_v6 = vld [vmem:[%s5360_s6 + $0xbc] sm:$0x1]  ;;  %v4854_v57 = vrot.slane %v4838_v53, 9 }
 0x141   : > { %4759 = vmatmul.msk.bf16.gmra.mxu3 %vm723_vm3, %v5197_v5  ;;  %v2518_v5 = vrot.slane %v5260_v8, 5  ;;  %v2197_v8 = vrot.slane %v2195_v0, 4 }
 0x143   : > { %v2365_v21 = vpop.f32.mrf.mxu0  ;;  %v2520_v9 = vrot.slane %v2518_v5, 4 }
 0x144   : > { %v1699_v44 = vpop.f32.mrf.mxu3  ;;  %v1040_v31 = vpop.f32.mrf.mxu1 }
 0x145   : > { %v1764_v46 = vadd.f32 %v1699_v44, %v1465_v36  ;;  %v2183_v36 = vsel %vm5372_vm2, %v2178_v28, %v2182_v35  ;;  %v4609_v44 = vrot.slane %v1105_v23, 9  ;;  %v1041_v16 = vadd.f32 %v1040_v31, %v5724_v50 }
 0x146   : > { %4835 = vmatmul.msk.bf16.gmra.mxu0 %vm723_vm3, %v2268_v22  ;;  %v2521_v22 = vrot.slane %v5262_v55, 5  ;;  %v2251_v35 = vunpack.c.l.b16 %v2183_v36  ;;  %v2206_v23 = vrot.slane %v2204_v39, 5  ;;  %v2210_v55 = vrot.slane %v2208_v7, 4  ;;  %v4809_v36 = vld [vmem:[%s5360_s6 + $0xc8] sm:$0x1] }
 0x147   : > { %v1402_v62 = vpop.f32.mrf.mxu2  ;;  %4592 = vmatmul.msk.bf16.gmra.mxu1 %vm723_vm3, %v5176_v51  ;;  %v5980_v61 = vadd.f32 %v2365_v21, %v1764_v46  ;;  %v1251_v21 = vrot.slane %v5263_v6, 5  ;;  %v2252_v46 = vunpack.c.l.b16 %v2193_v25  ;;  %v2519_v25 = vsel %vm5567_vm6, %v4854_v57, %v2518_v5  ;;  %v5022_v39 = vld [vmem:[%s5360_s6 + $0x18] sm:$0xf] }
 0x148   : > { %v1466_v45 = vadd.f32 %v1402_v62, %v1038_v30  ;;  %v2200_v62 = vrot.slane %v2198_v18, 5  ;;  %v2633_v50 = vunpack.c.l.b16 %v2519_v25  ;;  %v2214_v53 = vshll.u32 %v4809_v36, 16 }
 0x149   : > { %v1252_v18 = vsel %vm5567_vm6, %v1250_v38, %v1251_v21  ;;  %v2269_v7 = vpack.c.b16 %v2252_v46, %v2251_v35  ;;  %v3210_v21 = vshrl.u32 %v5022_v39, 16  ;;  %v3213_v38 = vshll.u32 %v5022_v39, 16 }
 0x14b   : > { %v2367_v51 = vpop.f32.mrf.mxu0  ;;  %v3212_v36 = vrot.slane %v3210_v21, 4 }
 0x14c   : > { %v1701_v13 = vpop.f32.mrf.mxu3  ;;  %4636 = vmatmul.msk.bf16.gmra.mxu2 %vm723_vm3, %v1304_v3  ;;  %v1042_v28 = vpop.f32.mrf.mxu1  ;;  %v1249_v3 = vsel %vm5567_vm6, %v4609_v44, %v1248_v10  ;;  %v6004_v10 = vld [vmem:[%s5360_s6 + $0x1c] sm:$0xf]  ;;  %v2211_v44 = vor.u32 %v2210_v55, %v2206_v23 }
 0x14d   : > { %v1765_v30 = vadd.f32 %v1701_v13, %v1466_v45  ;;  %v2522_v45 = vsel %vm5567_vm6, %v2520_v9, %v2521_v22  ;;  %v2201_v13 = vor.u32 %v2200_v62, %v2197_v8  ;;  %v5177_v22 = vld [vmem:[%s5360_s6 + $0xb4] sm:$0xff]  ;;  %v3223_v35 = vshrl.u32 %v6004_v10, 16 }
 0x14e   : > { %v2634_v31 = vunpack.c.l.b16 %v2522_v45  ;;  %v1043_v8 = vadd.f32 %v1042_v28, %v5744_v14 }
 0x14f   : > { %v1405_v6 = vpop.f32.mrf.mxu2  ;;  %v6008_v57 = vadd.f32 %v2367_v51, %v1765_v30  ;;  %v2202_v51 = vrot.slane %v2201_v13, 4  ;;  %v2212_v30 = vrot.slane %v2211_v44, 4  ;;  %v3225_v39 = vrot.slane %v3223_v35, 4 }
 0x150   : > { %v1467_v0 = vadd.f32 %v1405_v6, %v1041_v16  ;;  %v6006_v5 = vpack.c.b16 %v2634_v31, %v2633_v50  ;;  %v1288_v16 = vunpack.c.l.b16 %v1249_v3  ;;  %v1289_v6 = vunpack.c.l.b16 %v1252_v18 }
 0x151   : > { %4760 = vmatmul.msk.bf16.gmra.mxu3 %vm723_vm3, %v5198_v24  ;;  %6835 = vst [vmem:[#allocation2_spill] sm:$0xff] %v6008_v57  ;;  %v3219_v24 = vshll.u32 %v6004_v10, 16  ;;  %v2216_v3 = vrot.slane %v2214_v53, 5  ;;  %v3215_v18 = vrot.slane %v3213_v38, 5  ;;  %v2207_v14 = vsel %vm5372_vm2, %v2202_v51, %v2206_v23  ;;  %v5098_v51 = vld [vmem:[%s5360_s6 + $0x18] sm:$0xe] }
 0x152   : > { %v1305_v55 = vpack.c.b16 %v1289_v6, %v1288_v16  ;;  %v5199_v6 = vld [vmem:[%s5360_s6 + $0xc0] sm:$0xff]  ;;  %v2253_v23 = vunpack.c.l.b16 %v2207_v14 }
 0x153   : > { %v2370_v9 = vpop.f32.mrf.mxu0  ;;  %v3221_v31 = vrot.slane %v3219_v24, 5  ;;  %v2217_v28 = vsel %vm5372_vm2, %v2212_v30, %v2216_v3  ;;  %v3216_v53 = vor.u32 %v3215_v18, %v3212_v36  ;;  %v5025_v30 = vld [vmem:[%s5360_s6 + $0x24] sm:$0xf]  ;;  %v6034_v3 = vld [vmem:[%s5360_s6 + $0x28] sm:$0xf] }
 0x154   : > { %v1704_v25 = vpop.f32.mrf.mxu3  ;;  %v1045_v45 = vpop.f32.mrf.mxu1  ;;  %v2254_v38 = vunpack.c.l.b16 %v2217_v28 }
 0x155   : > { %v1766_v46 = vadd.f32 %v1704_v25, %v1467_v0  ;;  %v6019_v0 = vld [vmem:[%s5360_s6 + $0x20] sm:$0x1]  ;;  %v1046_v21 = vadd.f32 %v1045_v45, %v5770_v56  ;;  %v3217_v35 = vrot.slane %v3216_v53, 4  ;;  %v5264_v45 = vld [vmem:[%s5360_s6 + $0x1c] sm:$0xf] }
 0x156   : > { %4836 = vmatmul.msk.bf16.gmra.mxu0 %vm723_vm3, %v2269_v7  ;;  %v2525_v18 = vrot.slane %v5264_v45, 5  ;;  %v4839_v53 = vld [vmem:[%s5360_s6 + $0x18] sm:$0xe] }
 0x157   : > { %v1407_v62 = vpop.f32.mrf.mxu2  ;;  %4593 = vmatmul.msk.bf16.gmra.mxu1 %vm723_vm3, %v5177_v22  ;;  %v6016_v57 = vadd.f32 %v2370_v9, %v1766_v46  ;;  %v3226_v22 = vor.u32 %v3225_v39, %v3221_v31  ;;  %v3229_v9 = vshll.u32 %v6019_v0, 16  ;;  %v3222_v14 = vsel %vm5372_vm2, %v3217_v35, %v3221_v31 }
 0x158   : > { %v1468_v50 = vadd.f32 %v1407_v62, %v1043_v8  ;;  %v2270_v62 = vpack.c.b16 %v2254_v38, %v2253_v23  ;;  %v3896_v31 = vrot.slane %v6019_v0, 5  ;;  %v5265_v23 = vld [vmem:[%s5360_s6 + $0x20] sm:$0x1]  ;;  %v4855_v35 = vrot.slane %v4839_v53, 9 }
 0x159   : > { %v3227_v46 = vrot.slane %v3226_v22, 4  ;;  %v3231_v8 = vrot.slane %v3229_v9, 5  ;;  %v3234_v22 = vshrl.u32 %v5025_v30, 16  ;;  %v3237_v9 = vshll.u32 %v5025_v30, 16 }
 0x15a   : > { %v2528_v38 = vrot.slane %v5265_v23, 5  ;;  %v2526_v53 = vsel %vm5567_vm6, %v4855_v35, %v2525_v18  ;;  %v5028_v35 = vld [vmem:[%s5360_s6 + $0x30] sm:$0xf] }
 0x15b   : > { %v2372_v7 = vpop.f32.mrf.mxu0  ;;  %v3232_v28 = vsel %vm5372_vm2, %v3227_v46, %v3231_v8  ;;  %v2527_v46 = vrot.slane %v2525_v18, 4  ;;  %v3239_v0 = vrot.slane %v3237_v9, 5 }
 0x15c   : > { %v1706_v13 = vpop.f32.mrf.mxu3  ;;  %4637 = vmatmul.msk.bf16.gmra.mxu2 %vm723_vm3, %v1305_v55  ;;  %v1047_v44 = vpop.f32.mrf.mxu1  ;;  %v3893_v55 = vrot.slane %v6004_v10, 5  ;;  %v3599_v30 = vunpack.c.l.b16 %v3232_v28 }
 0x15d   : > { %v1767_v16 = vadd.f32 %v1706_v13, %v1468_v50  ;;  %v5114_v13 = vrot.slane %v5098_v51, 9  ;;  %v5206_v51 = vld [vmem:[%s5360_s6 + $0x18] sm:$0xff]  ;;  %v2529_v28 = vsel %vm5567_vm6, %v2527_v46, %v2528_v38  ;;  %v6074_v46 = vld [vmem:[%s5360_s6 + $0x34] sm:$0xf] }
 0x15f   : > { %v1410_v25 = vpop.f32.mrf.mxu2  ;;  %v6036_v36 = vadd.f32 %v2372_v7, %v1767_v16  ;;  %v3243_v7 = vshll.u32 %v6034_v3, 16  ;;  %v3247_v16 = vshrl.u32 %v6034_v3, 16 }
 0x160   : > { %v1469_v24 = vadd.f32 %v1410_v25, %v1046_v21  ;;  %v3895_v21 = vrot.slane %v3893_v55, 4 }
 0x161   : > { %4761 = vmatmul.msk.bf16.gmra.mxu3 %vm723_vm3, %v5199_v6  ;;  %v1048_v6 = vadd.f32 %v1047_v44, %v5799_v27  ;;  %v3236_v44 = vrot.slane %v3234_v22, 4  ;;  %v6057_v45 = vrot.slane %v3243_v7, 5 }
 0x163   : > { %v2375_v56 = vpop.f32.mrf.mxu0  ;;  %v3240_v7 = vor.u32 %v3239_v0, %v3236_v44  ;;  %v5099_v44 = vld [vmem:[%s5360_s6 + $0x24] sm:$0xe] }
 0x164   : > { %v1709_v50 = vpop.f32.mrf.mxu3  ;;  %v1050_v39 = vpop.f32.mrf.mxu1 }
 0x165   : > { %v1768_v10 = vadd.f32 %v1709_v50, %v1469_v24  ;;  %v3598_v24 = vunpack.c.l.b16 %v3222_v14  ;;  %v3249_v50 = vrot.slane %v3247_v16, 4  ;;  %v1051_v18 = vadd.f32 %v1050_v39, %v5669_v34 }
 0x166   : > { %4837 = vmatmul.msk.bf16.gmra.mxu0 %vm723_vm3, %v2270_v62  ;;  %v3894_v62 = vsel %vm5567_vm6, %v5114_v13, %v3893_v55  ;;  %v3900_v34 = vrot.slane %v6034_v3, 5 }
 0x167   : > { %v1412_v25 = vpop.f32.mrf.mxu2  ;;  %4882 = vmatmul.msk.bf16.vlgmr.msra.gmra.mxu1 %vm723_vm3, %v6006_v5  ;;  %v6055_v27 = vadd.f32 %v2375_v56, %v1768_v10  ;;  %v3897_v5 = vsel %vm5567_vm6, %v3895_v21, %v3896_v31  ;;  %v3630_v56 = vpack.c.b16 %v3599_v30, %v3598_v24  ;;  %v4008_v13 = vunpack.c.l.b16 %v3894_v62 }
 0x168   : > { %v1470_v8 = vadd.f32 %v1412_v25, %v1048_v6  ;;  %v6066_v6 = vld [vmem:[%s5360_s6 + $0x2c] sm:$0x1]  ;;  %v4009_v9 = vunpack.c.l.b16 %v3897_v5  ;;  %v3250_v16 = vor.u32 %v3249_v50, %v6057_v45  ;;  %v2635_v21 = vunpack.c.l.b16 %v2526_v53 }
 0x169   : > { %v2636_v31 = vunpack.c.l.b16 %v2529_v28  ;;  %v3253_v23 = vshll.u32 %v6066_v6, 16  ;;  %v3258_v50 = vshrl.u32 %v5028_v35, 16  ;;  %v3261_v5 = vshll.u32 %v5028_v35, 16 }
 0x16a   : > { %v4040_v24 = vpack.c.b16 %v4009_v9, %v4008_v13  ;;  %v3267_v53 = vshll.u32 %v6074_v46, 16  ;;  %v3271_v28 = vshrl.u32 %v6074_v46, 16  ;;  %v5266_v13 = vld [vmem:[%s5360_s6 + $0x28] sm:$0xf]  ;;  %v3903_v3 = vrot.slane %v6066_v6, 5 }
 0x16b   : > { %v2377_v14 = vpop.f32.mrf.mxu0  ;;  %v2666_v30 = vpack.c.b16 %v2636_v31, %v2635_v21  ;;  %v3255_v62 = vrot.slane %v3253_v23, 5  ;;  %v2532_v9 = vrot.slane %v5266_v13, 5  ;;  %v5115_v21 = vrot.slane %v5099_v44, 9  ;;  %v5207_v13 = vld [vmem:[%s5360_s6 + $0x24] sm:$0xff] }
 0x16c   : > { %v1711_v55 = vpop.f32.mrf.mxu3  ;;  %5006 = vmatmul.msk.bf16.vlgmr.msra.gmra.mxu2 %vm723_vm3, %v5206_v51  ;;  %v1052_v22 = vpop.f32.mrf.mxu1  ;;  %v3251_v51 = vrot.slane %v3250_v16, 4  ;;  %v3263_v44 = vrot.slane %v3261_v5, 5  ;;  %v6095_v6 = vrot.slane %v3267_v53, 5 }
 0x16d   : > { %v1769_v10 = vadd.f32 %v1711_v55, %v1470_v8  ;;  %v3241_v8 = vrot.slane %v3240_v7, 4  ;;  %v5267_v7 = vld [vmem:[%s5360_s6 + $0x2c] sm:$0x1] }
 0x16e   : > { %v2535_v16 = vrot.slane %v5267_v7, 5  ;;  %v3256_v23 = vsel %vm5372_vm2, %v3251_v51, %v3255_v62  ;;  %v3901_v62 = vsel %vm5567_vm6, %v5115_v21, %v3900_v34 }
 0x16f   : > { %v1415_v38 = vpop.f32.mrf.mxu2  ;;  %v6079_v39 = vadd.f32 %v2377_v14, %v1769_v10  ;;  %v4840_v14 = vld [vmem:[%s5360_s6 + $0x24] sm:$0xe]  ;;  %v1053_v10 = vadd.f32 %v1052_v22, %v5690_v1  ;;  %v3246_v31 = vsel %vm5372_vm2, %v3241_v8, %v6057_v45  ;;  %v2534_v22 = vrot.slane %v2532_v9, 4 }
 0x170   : > { %v1471_v25 = vadd.f32 %v1415_v38, %v1051_v18  ;;  %v3902_v38 = vrot.slane %v3900_v34, 4  ;;  %v4856_v1 = vrot.slane %v4840_v14, 9  ;;  %v3600_v45 = vunpack.c.l.b16 %v3246_v31 }
 0x171   : > { %5082 = vmatmul.msk.bf16.vlgmr.msra.gmra.mxu3 %vm723_vm3, %v3630_v56  ;;  %6836 = vst [vmem:[#allocation3_spill] sm:$0xff] %v6079_v39  ;;  %v3601_v8 = vunpack.c.l.b16 %v3256_v23  ;;  %v6101_v39 = vld [vmem:[%s5360_s6 + $0x38] sm:$0x1] }
 0x172   : > { %v3277_v34 = vshll.u32 %v6101_v39, 16 }
 0x173   : > { %v2380_v0 = vpop.f32.mrf.mxu0  ;;  %v3631_v14 = vpack.c.b16 %v3601_v8, %v3600_v45  ;;  %v5268_v8 = vld [vmem:[%s5360_s6 + $0x34] sm:$0xf] }
 0x174   : > { %v1714_v55 = vpop.f32.mrf.mxu3  ;;  %v1055_v56 = vpop.f32.mrf.mxu1 }
 0x175   : > { %v1770_v18 = vadd.f32 %v1714_v55, %v1471_v25  ;;  %v3260_v25 = vrot.slane %v3258_v50, 4  ;;  %v3273_v55 = vrot.slane %v3271_v28, 4  ;;  %v2536_v28 = vsel %vm5567_vm6, %v2534_v22, %v2535_v16  ;;  %v6120_v22 = vld [vmem:[%s5360_s6 + $0x40] sm:$0xf] }
 0x176   : > { %5142 = vmatmul.msk.bf16.vlgmr.msra.gmra.mxu0 %vm723_vm3, %v4040_v24 }
 0x177   : > { %v1417_v35 = vpop.f32.mrf.mxu2  ;;  %4883 = vmatmul.msk.bf16.gmra.mxu1 %vm723_vm3, %v2666_v30  ;;  %v6098_v7 = vadd.f32 %v2380_v0, %v1770_v18  ;;  %v3904_v30 = vsel %vm5567_vm6, %v3902_v38, %v3903_v3  ;;  %v3264_v50 = vor.u32 %v3263_v44, %v3260_v25  ;;  %v2533_v0 = vsel %vm5567_vm6, %v4856_v1, %v2532_v9 }
 0x178   : > { %v1472_v24 = vadd.f32 %v1417_v35, %v1053_v10  ;;  %v3274_v18 = vor.u32 %v3273_v55, %v6095_v6  ;;  %v1056_v3 = vadd.f32 %v1055_v56, %v5707_v17  ;;  %v4010_v10 = vunpack.c.l.b16 %v3901_v62  ;;  %v5100_v55 = vld [vmem:[%s5360_s6 + $0x30] sm:$0xe] }
 0x179   : > { %v4011_v31 = vunpack.c.l.b16 %v3904_v30  ;;  %v2637_v38 = vunpack.c.l.b16 %v2533_v0  ;;  %v2638_v9 = vunpack.c.l.b16 %v2536_v28  ;;  %v3265_v25 = vrot.slane %v3264_v50, 4 }
 0x17a   : > { %v3275_v16 = vrot.slane %v3274_v18, 4  ;;  %v3279_v44 = vrot.slane %v3277_v34, 5  ;;  %v3907_v1 = vrot.slane %v6074_v46, 5  ;;  %v2539_v62 = vrot.slane %v5268_v8, 5  ;;  %v4841_v46 = vld [vmem:[%s5360_s6 + $0x30] sm:$0xe] }
 0x17b   : > { %v2382_v51 = vpop.f32.mrf.mxu0  ;;  %v2667_v45 = vpack.c.b16 %v2638_v9, %v2637_v38  ;;  %v5116_v28 = vrot.slane %v5100_v55, 9 }
 0x17c   : > { %v1716_v5 = vpop.f32.mrf.mxu3  ;;  %5007 = vmatmul.msk.bf16.gmra.mxu2 %vm723_vm3, %v5207_v13  ;;  %v1057_v53 = vpop.f32.mrf.mxu1  ;;  %v5031_v13 = vld [vmem:[%s5360_s6 + $0x3c] sm:$0xf]  ;;  %v3280_v0 = vsel %vm5372_vm2, %v3275_v16, %v3279_v44  ;;  %v5208_v44 = vld [vmem:[%s5360_s6 + $0x30] sm:$0xff] }
 0x17d   : > { %v1771_v21 = vadd.f32 %v1716_v5, %v1472_v24  ;;  %v4041_v24 = vpack.c.b16 %v4011_v31, %v4010_v10  ;;  %v3270_v5 = vsel %vm5372_vm2, %v3265_v25, %v6095_v6  ;;  %v3282_v18 = vshrl.u32 %v5031_v13, 16  ;;  %v5269_v31 = vld [vmem:[%s5360_s6 + $0x38] sm:$0x1] }
 0x17e   : > { %v3909_v10 = vrot.slane %v3907_v1, 4  ;;  %v3910_v6 = vrot.slane %v6101_v39, 5  ;;  %v3602_v9 = vunpack.c.l.b16 %v3270_v5  ;;  %v2541_v25 = vrot.slane %v2539_v62, 4 }
 0x17f   : > { %v1420_v23 = vpop.f32.mrf.mxu2  ;;  %v6122_v17 = vadd.f32 %v2382_v51, %v1771_v21  ;;  %v3285_v51 = vshll.u32 %v5031_v13, 16  ;;  %v3291_v21 = vshll.u32 %v6120_v22, 16  ;;  %v3603_v55 = vunpack.c.l.b16 %v3280_v0 }
 0x180   : > { %v1473_v35 = vadd.f32 %v1420_v23, %v1056_v3  ;;  %v1058_v3 = vadd.f32 %v1057_v53, %v5728_v52  ;;  %v2542_v23 = vrot.slane %v5269_v31, 5  ;;  %v3908_v13 = vsel %vm5567_vm6, %v5116_v28, %v3907_v1 }
 0x181   : > { %5083 = vmatmul.msk.bf16.gmra.mxu3 %vm723_vm3, %v3631_v14  ;;  %v3295_v14 = vshrl.u32 %v6120_v22, 16  ;;  %v3284_v52 = vrot.slane %v3282_v18, 4  ;;  %v3287_v53 = vrot.slane %v3285_v51, 5  ;;  %v6143_v39 = vrot.slane %v3291_v21, 5 }
 0x182   : > { %v2543_v0 = vsel %vm5567_vm6, %v2541_v25, %v2542_v23  ;;  %v4012_v28 = vunpack.c.l.b16 %v3908_v13  ;;  %v5101_v13 = vld [vmem:[%s5360_s6 + $0x3c] sm:$0xe] }
 0x183   : > { %v2385_v56 = vpop.f32.mrf.mxu0  ;;  %v3297_v8 = vrot.slane %v3295_v14, 4  ;;  %v3288_v21 = vor.u32 %v3287_v53, %v3284_v52 }
 0x184   : > { %v1719_v30 = vpop.f32.mrf.mxu3  ;;  %v1060_v50 = vpop.f32.mrf.mxu1 }
 0x185   : > { %v1772_v34 = vadd.f32 %v1719_v30, %v1473_v35  ;;  %v4857_v35 = vrot.slane %v4841_v46, 9  ;;  %v6152_v46 = vld [vmem:[%s5360_s6 + $0x44] sm:$0x1]  ;;  %v3298_v14 = vor.u32 %v3297_v8, %v6143_v39  ;;  %v3289_v25 = vrot.slane %v3288_v21, 4 }
 0x186   : > { %5143 = vmatmul.msk.bf16.gmra.mxu0 %vm723_vm3, %v4041_v24 }
 0x187   : > { %v1422_v38 = vpop.f32.mrf.mxu2  ;;  %4884 = vmatmul.msk.bf16.gmra.mxu1 %vm723_vm3, %v2667_v45  ;;  %v6141_v24 = vadd.f32 %v2385_v56, %v1772_v34  ;;  %v3911_v45 = vsel %vm5567_vm6, %v3909_v10, %v3910_v6  ;;  %v2540_v5 = vsel %vm5567_vm6, %v4857_v35, %v2539_v62  ;;  %v3632_v56 = vpack.c.b16 %v3603_v55, %v3602_v9  ;;  %v6160_v35 = vld [vmem:[%s5360_s6 + $0x4c] sm:$0xf] }
 0x188   : > { %v1474_v16 = vadd.f32 %v1422_v38, %v1058_v3  ;;  %v4013_v51 = vunpack.c.l.b16 %v3911_v45  ;;  %v1061_v62 = vadd.f32 %v1060_v50, %v5751_v20  ;;  %v2639_v3 = vunpack.c.l.b16 %v2540_v5  ;;  %v5034_v38 = vld [vmem:[%s5360_s6 + $0x48] sm:$0xf] }
 0x189   : > { %v2640_v10 = vunpack.c.l.b16 %v2543_v0  ;;  %v3301_v6 = vshll.u32 %v6152_v46, 16  ;;  %v3914_v20 = vrot.slane %v6120_v22, 5  ;;  %v3306_v53 = vshrl.u32 %v5034_v38, 16 }
 0x18a   : > { %v4042_v9 = vpack.c.b16 %v4013_v51, %v4012_v28  ;;  %v3309_v8 = vshll.u32 %v5034_v38, 16  ;;  %v3315_v45 = vshll.u32 %v6160_v35, 16  ;;  %v3319_v5 = vshrl.u32 %v6160_v35, 16  ;;  %v5271_v51 = vld [vmem:[%s5360_s6 + $0x44] sm:$0x1] }
 0x18b   : > { %v2387_v30 = vpop.f32.mrf.mxu0  ;;  %v3303_v55 = vrot.slane %v3301_v6, 5  ;;  %v2549_v21 = vrot.slane %v5271_v51, 5  ;;  %v3917_v22 = vrot.slane %v6152_v46, 5  ;;  %v3916_v6 = vrot.slane %v3914_v20, 4  ;;  %v6187_v51 = vld [vmem:[%s5360_s6 + $0x50] sm:$0x1] }
 0x18c   : > { %v1721_v1 = vpop.f32.mrf.mxu3  ;;  %5008 = vmatmul.msk.bf16.gmra.mxu2 %vm723_vm3, %v5208_v44  ;;  %v1062_v18 = vpop.f32.mrf.mxu1  ;;  %v2668_v44 = vpack.c.b16 %v2640_v10, %v2639_v3  ;;  %v3294_v3 = vsel %vm5372_vm2, %v3289_v25, %v6143_v39  ;;  %v3311_v38 = vrot.slane %v3309_v8, 5  ;;  %v6181_v46 = vrot.slane %v3315_v45, 5 }
 0x18d   : > { %v1773_v34 = vadd.f32 %v1721_v1, %v1474_v16  ;;  %v3299_v16 = vrot.slane %v3298_v14, 4  ;;  %v3604_v39 = vunpack.c.l.b16 %v3294_v3 }
 0x18f   : > { %v1425_v31 = vpop.f32.mrf.mxu2  ;;  %v6165_v50 = vadd.f32 %v2387_v30, %v1773_v34  ;;  %v4842_v30 = vld [vmem:[%s5360_s6 + $0x3c] sm:$0xe]  ;;  %v1063_v34 = vadd.f32 %v1062_v18, %v5772_v58  ;;  %v3304_v10 = vsel %vm5372_vm2, %v3299_v16, %v3303_v55 }
 0x190   : > { %v1475_v23 = vadd.f32 %v1425_v31, %v1061_v62  ;;  %v5117_v62 = vrot.slane %v5101_v13, 9  ;;  %v3321_v13 = vrot.slane %v3319_v5, 4  ;;  %v4858_v58 = vrot.slane %v4842_v30, 9 }
 0x191   : > { %5084 = vmatmul.msk.bf16.gmra.mxu3 %vm723_vm3, %v3632_v56  ;;  %v5270_v56 = vld [vmem:[%s5360_s6 + $0x40] sm:$0xf]  ;;  %v3605_v25 = vunpack.c.l.b16 %v3304_v10 }
 0x192   : > { %v2546_v28 = vrot.slane %v5270_v56, 5  ;;  %v3915_v55 = vsel %vm5567_vm6, %v5117_v62, %v3914_v20  ;;  %v3325_v20 = vshll.u32 %v6187_v51, 16 }
 0x193   : > { %v2390_v52 = vpop.f32.mrf.mxu0  ;;  %v3633_v30 = vpack.c.b16 %v3605_v25, %v3604_v39  ;;  %v5272_v25 = vld [vmem:[%s5360_s6 + $0x4c] sm:$0xf] }
 0x194   : > { %v1724_v0 = vpop.f32.mrf.mxu3  ;;  %v1065_v1 = vpop.f32.mrf.mxu1  ;;  %v2548_v18 = vrot.slane %v2546_v28, 4 }
 0x195   : > { %v1774_v14 = vadd.f32 %v1724_v0, %v1475_v23  ;;  %v3308_v23 = vrot.slane %v3306_v53, 4  ;;  %v5209_v0 = vld [vmem:[%s5360_s6 + $0x3c] sm:$0xff] }
 0x196   : > { %5144 = vmatmul.msk.bf16.gmra.mxu0 %vm723_vm3, %v4042_v9  ;;  %v2550_v5 = vsel %vm5567_vm6, %v2548_v18, %v2549_v21  ;;  %v6206_v18 = vld [vmem:[%s5360_s6 + $0x58] sm:$0xf] }
 0x197   : > { %v1427_v31 = vpop.f32.mrf.mxu2  ;;  %4885 = vmatmul.msk.bf16.gmra.mxu1 %vm723_vm3, %v2668_v44  ;;  %v6184_v56 = vadd.f32 %v2390_v52, %v1774_v14  ;;  %v3918_v44 = vsel %vm5567_vm6, %v3916_v6, %v3917_v22  ;;  %v3312_v53 = vor.u32 %v3311_v38, %v3308_v23  ;;  %v2547_v52 = vsel %vm5567_vm6, %v4858_v58, %v2546_v28 }
 0x198   : > { %v1476_v9 = vadd.f32 %v1427_v31, %v1063_v34  ;;  %v3322_v14 = vor.u32 %v3321_v13, %v6181_v46  ;;  %v1066_v22 = vadd.f32 %v1065_v1, %v5802_v48  ;;  %v4014_v34 = vunpack.c.l.b16 %v3915_v55  ;;  %v5102_v13 = vld [vmem:[%s5360_s6 + $0x48] sm:$0xe] }
 0x199   : > { %v4015_v3 = vunpack.c.l.b16 %v3918_v44  ;;  %v2641_v6 = vunpack.c.l.b16 %v2547_v52  ;;  %v2642_v28 = vunpack.c.l.b16 %v2550_v5  ;;  %v3313_v23 = vrot.slane %v3312_v53, 4 }
 0x19a   : > { %v3323_v21 = vrot.slane %v3322_v14, 4  ;;  %v3327_v38 = vrot.slane %v3325_v20, 5  ;;  %v3921_v58 = vrot.slane %v6160_v35, 5  ;;  %v2553_v55 = vrot.slane %v5272_v25, 5  ;;  %v4843_v35 = vld [vmem:[%s5360_s6 + $0x48] sm:$0xe] }
 0x19b   : > { %v2392_v16 = vpop.f32.mrf.mxu0  ;;  %v2669_v39 = vpack.c.b16 %v2642_v28, %v2641_v6  ;;  %v5118_v5 = vrot.slane %v5102_v13, 9 }
 0x19c   : > { %v1726_v8 = vpop.f32.mrf.mxu3  ;;  %5009 = vmatmul.msk.bf16.gmra.mxu2 %vm723_vm3, %v5209_v0  ;;  %v1067_v45 = vpop.f32.mrf.mxu1  ;;  %v5037_v0 = vld [vmem:[%s5360_s6 + $0x54] sm:$0xf]  ;;  %v3328_v52 = vsel %vm5372_vm2, %v3323_v21, %v3327_v38  ;;  %v5210_v38 = vld [vmem:[%s5360_s6 + $0x48] sm:$0xff] }
 0x19d   : > { %v1775_v62 = vadd.f32 %v1726_v8, %v1476_v9  ;;  %v4043_v9 = vpack.c.b16 %v4015_v3, %v4014_v34  ;;  %v3318_v8 = vsel %vm5372_vm2, %v3313_v23, %v6181_v46  ;;  %v3330_v14 = vshrl.u32 %v5037_v0, 16  ;;  %v5273_v3 = vld [vmem:[%s5360_s6 + $0x50] sm:$0x1] }
 0x19e   : > { %v3923_v34 = vrot.slane %v3921_v58, 4  ;;  %v3924_v46 = vrot.slane %v6187_v51, 5  ;;  %v3606_v28 = vunpack.c.l.b16 %v3318_v8  ;;  %v2555_v23 = vrot.slane %v2553_v55, 4 }
 0x19f   : > { %v1430_v10 = vpop.f32.mrf.mxu2  ;;  %v6208_v48 = vadd.f32 %v2392_v16, %v1775_v62  ;;  %v3333_v16 = vshll.u32 %v5037_v0, 16  ;;  %v3339_v62 = vshll.u32 %v6206_v18, 16  ;;  %v3607_v13 = vunpack.c.l.b16 %v3328_v52 }
 0x1a0   : > { %v1477_v31 = vadd.f32 %v1430_v10, %v1066_v22  ;;  %v1068_v22 = vadd.f32 %v1067_v45, %v5817_v11  ;;  %v2556_v10 = vrot.slane %v5273_v3, 5  ;;  %v3922_v0 = vsel %vm5567_vm6, %v5118_v5, %v3921_v58 }
 0x1a1   : > { %5085 = vmatmul.msk.bf16.gmra.mxu3 %vm723_vm3, %v3633_v30  ;;  %v3343_v30 = vshrl.u32 %v6206_v18, 16  ;;  %v3332_v11 = vrot.slane %v3330_v14, 4  ;;  %v3335_v45 = vrot.slane %v3333_v16, 5  ;;  %v6229_v51 = vrot.slane %v3339_v62, 5 }
 0x1a2   : > { %v2557_v52 = vsel %vm5567_vm6, %v2555_v23, %v2556_v10  ;;  %v4016_v5 = vunpack.c.l.b16 %v3922_v0  ;;  %v5103_v0 = vld [vmem:[%s5360_s6 + $0x54] sm:$0xe] }
 0x1a3   : > { %v2395_v1 = vpop.f32.mrf.mxu0  ;;  %v3345_v25 = vrot.slane %v3343_v30, 4  ;;  %v3336_v62 = vor.u32 %v3335_v45, %v3332_v11 }
 0x1a4   : > { %v1729_v44 = vpop.f32.mrf.mxu3  ;;  %v1070_v53 = vpop.f32.mrf.mxu1 }
 0x1a5   : > { %v1776_v20 = vadd.f32 %v1729_v44, %v1477_v31  ;;  %v4859_v31 = vrot.slane %v4843_v35, 9  ;;  %v6238_v35 = vld [vmem:[%s5360_s6 + $0x5c] sm:$0x1]  ;;  %v3346_v30 = vor.u32 %v3345_v25, %v6229_v51  ;;  %v3337_v23 = vrot.slane %v3336_v62, 4 }
 0x1a6   : > { %5145 = vmatmul.msk.bf16.gmra.mxu0 %vm723_vm3, %v4043_v9 }
 0x1a7   : > { %v1432_v6 = vpop.f32.mrf.mxu2  ;;  %4886 = vmatmul.msk.bf16.gmra.mxu1 %vm723_vm3, %v2669_v39  ;;  %v6227_v9 = vadd.f32 %v2395_v1, %v1776_v20  ;;  %v3925_v39 = vsel %vm5567_vm6, %v3923_v34, %v3924_v46  ;;  %v2554_v8 = vsel %vm5567_vm6, %v4859_v31, %v2553_v55  ;;  %v3634_v1 = vpack.c.b16 %v3607_v13, %v3606_v28  ;;  %v6246_v31 = vld [vmem:[%s5360_s6 + $0x64] sm:$0xf] }
 0x1a8   : > { %v1478_v21 = vadd.f32 %v1432_v6, %v1068_v22  ;;  %v4017_v16 = vunpack.c.l.b16 %v3925_v39  ;;  %v1071_v55 = vadd.f32 %v1070_v53, %v5681_v47  ;;  %v2643_v22 = vunpack.c.l.b16 %v2554_v8  ;;  %v5040_v6 = vld [vmem:[%s5360_s6 + $0x60] sm:$0xf] }
 0x1a9   : > { %v2644_v34 = vunpack.c.l.b16 %v2557_v52  ;;  %v3349_v46 = vshll.u32 %v6238_v35, 16  ;;  %v3928_v47 = vrot.slane %v6206_v18, 5  ;;  %v3354_v45 = vshrl.u32 %v5040_v6, 16 }
 0x1aa   : > { %v4044_v28 = vpack.c.b16 %v4017_v16, %v4016_v5  ;;  %v3357_v25 = vshll.u32 %v5040_v6, 16  ;;  %v3363_v39 = vshll.u32 %v6246_v31, 16  ;;  %v3367_v8 = vshrl.u32 %v6246_v31, 16  ;;  %v5275_v16 = vld [vmem:[%s5360_s6 + $0x5c] sm:$0x1] }
 0x1ab   : > { %v2397_v44 = vpop.f32.mrf.mxu0  ;;  %v3351_v13 = vrot.slane %v3349_v46, 5  ;;  %v2563_v62 = vrot.slane %v5275_v16, 5  ;;  %v3931_v18 = vrot.slane %v6238_v35, 5  ;;  %v3930_v46 = vrot.slane %v3928_v47, 4 }
 0x1ac   : > { %v1731_v58 = vpop.f32.mrf.mxu3  ;;  %5010 = vmatmul.msk.bf16.gmra.mxu2 %vm723_vm3, %v5210_v38  ;;  %v1072_v14 = vpop.f32.mrf.mxu1  ;;  %v2670_v38 = vpack.c.b16 %v2644_v34, %v2643_v22  ;;  %v3342_v22 = vsel %vm5372_vm2, %v3337_v23, %v6229_v51  ;;  %v3359_v6 = vrot.slane %v3357_v25, 5  ;;  %v3365_v35 = vrot.slane %v3363_v39, 5  ;;  %v6271_v23 = vld [vmem:[%s5360_s6 + $0x68] sm:$0x1] }
 0x1ad   : > { %v1777_v20 = vadd.f32 %v1731_v58, %v1478_v21  ;;  %v3347_v21 = vrot.slane %v3346_v30, 4  ;;  %v3608_v16 = vunpack.c.l.b16 %v3342_v22 }
 0x1af   : > { %v1435_v3 = vpop.f32.mrf.mxu2  ;;  %v6251_v53 = vadd.f32 %v2397_v44, %v1777_v20  ;;  %v4844_v44 = vld [vmem:[%s5360_s6 + $0x54] sm:$0xe]  ;;  %v1073_v20 = vadd.f32 %v1072_v14, %v5700_v2  ;;  %v3352_v34 = vsel %vm5372_vm2, %v3347_v21, %v3351_v13 }
 0x1b0   : > { %v1479_v10 = vadd.f32 %v1435_v3, %v1071_v55  ;;  %v5119_v55 = vrot.slane %v5103_v0, 9  ;;  %v3369_v0 = vrot.slane %v3367_v8, 4  ;;  %v3609_v51 = vunpack.c.l.b16 %v3352_v34 }
 0x1b1   : > { %5086 = vmatmul.msk.bf16.gmra.mxu3 %vm723_vm3, %v3634_v1  ;;  %6837 = vst [vmem:[#allocation4_spill] sm:$0xff] %v6251_v53  ;;  %v5274_v1 = vld [vmem:[%s5360_s6 + $0x58] sm:$0xf] }
 0x1b2   : > { %v2560_v5 = vrot.slane %v5274_v1, 5  ;;  %v4860_v1 = vrot.slane %v4844_v44, 9  ;;  %v3929_v21 = vsel %vm5567_vm6, %v5119_v55, %v3928_v47  ;;  %v3370_v8 = vor.u32 %v3369_v0, %v3365_v35 }
 0x1b3   : > { %v2400_v11 = vpop.f32.mrf.mxu0  ;;  %v3635_v55 = vpack.c.b16 %v3609_v51, %v3608_v16  ;;  %v4018_v44 = vunpack.c.l.b16 %v3929_v21 }
 0x1b4   : > { %v1734_v52 = vpop.f32.mrf.mxu3  ;;  %v1075_v58 = vpop.f32.mrf.mxu1  ;;  %v2562_v2 = vrot.slane %v2560_v5, 4 }
 0x1b5   : > { %v1778_v30 = vadd.f32 %v1734_v52, %v1479_v10  ;;  %v3356_v10 = vrot.slane %v3354_v45, 4 }
 0x1b6   : > { %5146 = vmatmul.msk.bf16.gmra.mxu0 %vm723_vm3, %v4044_v28  ;;  %v5211_v28 = vld [vmem:[%s5360_s6 + $0x54] sm:$0xff]  ;;  %v2564_v39 = vsel %vm5567_vm6, %v2562_v2, %v2563_v62  ;;  %v3935_v2 = vrot.slane %v6246_v31, 5  ;;  %v5277_v31 = vld [vmem:[%s5360_s6 + $0x68] sm:$0x1] }
 0x1b7   : > { %v1437_v3 = vpop.f32.mrf.mxu2  ;;  %4887 = vmatmul.msk.bf16.gmra.mxu1 %vm723_vm3, %v2670_v38  ;;  %v6268_v14 = vadd.f32 %v2400_v11, %v1778_v30  ;;  %v3932_v38 = vsel %vm5567_vm6, %v3930_v46, %v3931_v18  ;;  %v3360_v13 = vor.u32 %v3359_v6, %v3356_v10  ;;  %v2561_v11 = vsel %vm5567_vm6, %v4860_v1, %v2560_v5  ;;  %v5043_v6 = vld [vmem:[%s5360_s6 + $0x6c] sm:$0xf]  ;;  %v5104_v1 = vld [vmem:[%s5360_s6 + $0x60] sm:$0xe] }
 0x1b8   : > { %v1480_v52 = vadd.f32 %v1437_v3, %v1073_v20  ;;  %v3373_v30 = vshll.u32 %v6271_v23, 16  ;;  %v1076_v18 = vadd.f32 %v1075_v58, %v5721_v37  ;;  %v4019_v20 = vunpack.c.l.b16 %v3932_v38 }
 0x1b9   : > { %v2645_v34 = vunpack.c.l.b16 %v2561_v11  ;;  %v2646_v46 = vunpack.c.l.b16 %v2564_v39  ;;  %v3361_v5 = vrot.slane %v3360_v13, 4  ;;  %v3371_v10 = vrot.slane %v3370_v8, 4  ;;  %v5276_v13 = vld [vmem:[%s5360_s6 + $0x64] sm:$0xf] }
 0x1ba   : > { %v3375_v62 = vrot.slane %v3373_v30, 5  ;;  %v4045_v0 = vpack.c.b16 %v4019_v20, %v4018_v44  ;;  %v3378_v11 = vshrl.u32 %v5043_v6, 16  ;;  %v3381_v8 = vshll.u32 %v5043_v6, 16 }
 0x1bb   : > { %v2402_v53 = vpop.f32.mrf.mxu0  ;;  %v2671_v58 = vpack.c.b16 %v2646_v46, %v2645_v34  ;;  %v3366_v21 = vsel %vm5372_vm2, %v3361_v5, %v3365_v35  ;;  %v3937_v34 = vrot.slane %v3935_v2, 4  ;;  %v3938_v46 = vrot.slane %v6271_v23, 5  ;;  %v5212_v5 = vld [vmem:[%s5360_s6 + $0x60] sm:$0xff] }
 0x1bc   : > { %v1736_v45 = vpop.f32.mrf.mxu3  ;;  %5011 = vmatmul.msk.bf16.gmra.mxu2 %vm723_vm3, %v5211_v28  ;;  %v1077_v25 = vpop.f32.mrf.mxu1  ;;  %v3376_v38 = vsel %vm5372_vm2, %v3371_v10, %v3375_v62  ;;  %v3610_v20 = vunpack.c.l.b16 %v3366_v21 }
 0x1bd   : > { %v1779_v47 = vadd.f32 %v1736_v45, %v1480_v52  ;;  %v6287_v52 = vld [vmem:[%s5360_s6 + $0x70] sm:$0xf]  ;;  %v2567_v45 = vrot.slane %v5276_v13, 5  ;;  %v1078_v35 = vadd.f32 %v1077_v25, %v5740_v4  ;;  %v6312_v25 = vld [vmem:[%s5360_s6 + $0x74] sm:$0x1]  ;;  %v3939_v23 = vsel %vm5567_vm6, %v3937_v34, %v3938_v46 }
 0x1be   : > { %v3387_v30 = vshll.u32 %v6287_v52, 16 }
 0x1bf   : > { %v1440_v22 = vpop.f32.mrf.mxu2  ;;  %v6289_v28 = vadd.f32 %v2402_v53, %v1779_v47  ;;  %v4845_v53 = vld [vmem:[%s5360_s6 + $0x60] sm:$0xe]  ;;  %v3391_v47 = vshrl.u32 %v6287_v52, 16  ;;  %v2569_v62 = vrot.slane %v2567_v45, 4 }
 0x1c0   : > { %v1481_v3 = vadd.f32 %v1440_v22, %v1076_v18  ;;  %v5120_v18 = vrot.slane %v5104_v1, 9  ;;  %v3611_v22 = vunpack.c.l.b16 %v3376_v38  ;;  %v4861_v10 = vrot.slane %v4845_v53, 9 }
 0x1c1   : > { %5087 = vmatmul.msk.bf16.gmra.mxu3 %vm723_vm3, %v3635_v55  ;;  %v2570_v55 = vrot.slane %v5277_v31, 5  ;;  %v6309_v13 = vrot.slane %v3387_v30, 5  ;;  %v3393_v4 = vrot.slane %v3391_v47, 4  ;;  %v3397_v30 = vshll.u32 %v6312_v25, 16 }
 0x1c3   : > { %v2405_v37 = vpop.f32.mrf.mxu0  ;;  %v3399_v46 = vrot.slane %v3397_v30, 5 }
 0x1c4   : > { %v1739_v16 = vpop.f32.mrf.mxu3  ;;  %v1080_v51 = vpop.f32.mrf.mxu1 }
 0x1c5   : > { %v1780_v39 = vadd.f32 %v1739_v16, %v1481_v3  ;;  %v3380_v16 = vrot.slane %v3378_v11, 4  ;;  %v2568_v11 = vsel %vm5567_vm6, %v4861_v10, %v2567_v45  ;;  %v1081_v47 = vadd.f32 %v1080_v51, %v5759_v42  ;;  %v5046_v45 = vld [vmem:[%s5360_s6 + $0x78] sm:$0xf] }
 0x1c6   : > { %5147 = vmatmul.msk.bf16.gmra.mxu0 %vm723_vm3, %v4045_v0  ;;  %v3383_v0 = vrot.slane %v3381_v8, 5  ;;  %v3942_v10 = vrot.slane %v6287_v52, 5 }
 0x1c7   : > { %v1442_v44 = vpop.f32.mrf.mxu2  ;;  %4888 = vmatmul.msk.bf16.gmra.mxu1 %vm723_vm3, %v2671_v58  ;;  %v6307_v6 = vadd.f32 %v2405_v37, %v1780_v39  ;;  %v3936_v58 = vsel %vm5567_vm6, %v5120_v18, %v3935_v2  ;;  %v3636_v37 = vpack.c.b16 %v3611_v22, %v3610_v20  ;;  %v2571_v39 = vsel %vm5567_vm6, %v2569_v62, %v2570_v55 }
 0x1c8   : > { %v1482_v3 = vadd.f32 %v1442_v44, %v1078_v35  ;;  %v3384_v8 = vor.u32 %v3383_v0, %v3380_v16  ;;  %v3394_v2 = vor.u32 %v3393_v4, %v6309_v13  ;;  %v4020_v31 = vunpack.c.l.b16 %v3936_v58  ;;  %v6333_v16 = vld [vmem:[%s5360_s6 + $0x7c] sm:$0xf] }
 0x1c9   : > { %v4021_v35 = vunpack.c.l.b16 %v3939_v23  ;;  %v2647_v44 = vunpack.c.l.b16 %v2568_v11  ;;  %v2648_v20 = vunpack.c.l.b16 %v2571_v39  ;;  %v3402_v0 = vshrl.u32 %v5046_v45, 16  ;;  %v5278_v11 = vld [vmem:[%s5360_s6 + $0x70] sm:$0xf] }
 0x1ca   : > { %v3385_v55 = vrot.slane %v3384_v8, 4  ;;  %v3395_v34 = vrot.slane %v3394_v2, 4  ;;  %v3405_v4 = vshll.u32 %v5046_v45, 16  ;;  %v2574_v39 = vrot.slane %v5278_v11, 5 }
 0x1cb   : > { %v2407_v1 = vpop.f32.mrf.mxu0  ;;  %v2672_v62 = vpack.c.b16 %v2648_v20, %v2647_v44  ;;  %v3944_v30 = vrot.slane %v3942_v10, 4 }
 0x1cc   : > { %v1741_v21 = vpop.f32.mrf.mxu3  ;;  %5012 = vmatmul.msk.bf16.gmra.mxu2 %vm723_vm3, %v5212_v5  ;;  %v1082_v38 = vpop.f32.mrf.mxu1  ;;  %v4046_v5 = vpack.c.b16 %v4021_v35, %v4020_v31  ;;  %v3390_v52 = vsel %vm5372_vm2, %v3385_v55, %v6309_v13  ;;  %v3415_v31 = vshrl.u32 %v6333_v16, 16  ;;  %v3404_v13 = vrot.slane %v3402_v0, 4  ;;  %v6357_v0 = vld [vmem:[%s5360_s6 + $0x80] sm:$0x1] }
 0x1cd   : > { %v1781_v53 = vadd.f32 %v1741_v21, %v1482_v3  ;;  %v5105_v3 = vld [vmem:[%s5360_s6 + $0x6c] sm:$0xe]  ;;  %v1083_v2 = vadd.f32 %v1082_v38, %v5791_v12  ;;  %v3407_v44 = vrot.slane %v3405_v4, 5  ;;  %v2576_v45 = vrot.slane %v2574_v39, 4 }
 0x1ce   : > { %v5121_v21 = vrot.slane %v5105_v3, 9  ;;  %v3612_v12 = vunpack.c.l.b16 %v3390_v52 }
 0x1cf   : > { %v1445_v18 = vpop.f32.mrf.mxu2  ;;  %v6330_v42 = vadd.f32 %v2407_v1, %v1781_v53  ;;  %v3400_v1 = vsel %vm5372_vm2, %v3395_v34, %v3399_v46  ;;  %v3945_v53 = vrot.slane %v6312_v25, 5  ;;  %v5279_v25 = vld [vmem:[%s5360_s6 + $0x74] sm:$0x1]  ;;  %v3408_v4 = vor.u32 %v3407_v44, %v3404_v13  ;;  %v5106_v44 = vld [vmem:[%s5360_s6 + $0x78] sm:$0xe] }
 0x1d0   : > { %v1483_v22 = vadd.f32 %v1445_v18, %v1081_v47  ;;  %v3411_v47 = vshll.u32 %v6333_v16, 16  ;;  %v2577_v55 = vrot.slane %v5279_v25, 5  ;;  %v3613_v38 = vunpack.c.l.b16 %v3400_v1  ;;  %v6371_v25 = vld [vmem:[%s5360_s6 + $0x88] sm:$0xf] }
 0x1d1   : > { %5088 = vmatmul.msk.bf16.gmra.mxu3 %vm723_vm3, %v3636_v37  ;;  %v4846_v37 = vld [vmem:[%s5360_s6 + $0x6c] sm:$0xe]  ;;  %v3943_v46 = vsel %vm5567_vm6, %v5121_v21, %v3942_v10  ;;  %v3946_v3 = vsel %vm5567_vm6, %v3944_v30, %v3945_v53  ;;  %v3421_v30 = vshll.u32 %v6357_v0, 16  ;;  %v3409_v13 = vrot.slane %v3408_v4, 4 }
 0x1d2   : > { %v4862_v18 = vrot.slane %v4846_v37, 9  ;;  %v2578_v10 = vsel %vm5567_vm6, %v2576_v45, %v2577_v55  ;;  %v4022_v52 = vunpack.c.l.b16 %v3943_v46  ;;  %v4023_v1 = vunpack.c.l.b16 %v3946_v3 }
 0x1d3   : > { %v2410_v51 = vpop.f32.mrf.mxu0 }
 0x1d4   : > { %v1744_v58 = vpop.f32.mrf.mxu3  ;;  %v1085_v23 = vpop.f32.mrf.mxu1  ;;  %v2575_v11 = vsel %vm5567_vm6, %v4862_v18, %v2574_v39  ;;  %v5049_v39 = vld [vmem:[%s5360_s6 + $0x84] sm:$0xf]  ;;  %v4047_v18 = vpack.c.b16 %v4023_v1, %v4022_v52 }
 0x1d5   : > { %v1782_v8 = vadd.f32 %v1744_v58, %v1483_v22  ;;  %v5213_v22 = vld [vmem:[%s5360_s6 + $0x6c] sm:$0xff]  ;;  %v1086_v53 = vadd.f32 %v1085_v23, %v5813_v63  ;;  %v3423_v63 = vrot.slane %v3421_v30, 5  ;;  %v5122_v23 = vrot.slane %v5106_v44, 9  ;;  %v5214_v44 = vld [vmem:[%s5360_s6 + $0x78] sm:$0xff] }
 0x1d6   : > { %5148 = vmatmul.msk.bf16.gmra.mxu0 %vm723_vm3, %v4046_v5  ;;  %v3413_v5 = vrot.slane %v3411_v47, 5  ;;  %v3426_v3 = vshrl.u32 %v5049_v39, 16 }
 0x1d7   : > { %v1447_v35 = vpop.f32.mrf.mxu2  ;;  %4889 = vmatmul.msk.bf16.gmra.mxu1 %vm723_vm3, %v2672_v62  ;;  %v6350_v34 = vadd.f32 %v2410_v51, %v1782_v8  ;;  %v3417_v62 = vrot.slane %v3415_v31, 4  ;;  %v3637_v8 = vpack.c.b16 %v3613_v38, %v3612_v12  ;;  %v2649_v31 = vunpack.c.l.b16 %v2575_v11 }
 0x1d8   : > { %v1484_v20 = vadd.f32 %v1447_v35, %v1083_v2  ;;  %v2650_v35 = vunpack.c.l.b16 %v2578_v10  ;;  %v3414_v46 = vsel %vm5372_vm2, %v3409_v13, %v3413_v5  ;;  %v3952_v11 = vrot.slane %v6357_v0, 5  ;;  %v4847_v10 = vld [vmem:[%s5360_s6 + $0x78] sm:$0xe] }
 0x1d9   : > { %v3418_v2 = vor.u32 %v3417_v62, %v3413_v5  ;;  %v3429_v62 = vshll.u32 %v5049_v39, 16  ;;  %v5281_v39 = vld [vmem:[%s5360_s6 + $0x80] sm:$0x1] }
 0x1da   : > { %v2673_v38 = vpack.c.b16 %v2650_v35, %v2649_v31  ;;  %v3428_v31 = vrot.slane %v3426_v3, 4 }
 0x1db   : > { %v2412_v58 = vpop.f32.mrf.mxu0  ;;  %v3419_v45 = vrot.slane %v3418_v2, 4  ;;  %v3614_v2 = vunpack.c.l.b16 %v3414_v46  ;;  %v3431_v35 = vrot.slane %v3429_v62, 5  ;;  %v5051_v46 = vld [vmem:[%s5360_s6 + $0x8c] sm:$0x1] }
 0x1dc   : > { %v1746_v37 = vpop.f32.mrf.mxu3  ;;  %5013 = vmatmul.msk.bf16.gmra.mxu2 %vm723_vm3, %v5213_v22  ;;  %v1087_v51 = vpop.f32.mrf.mxu1 }
 0x1dd   : > { %v1783_v21 = vadd.f32 %v1746_v37, %v1484_v20  ;;  %v3949_v20 = vrot.slane %v6333_v16, 5  ;;  %v5280_v16 = vld [vmem:[%s5360_s6 + $0x7c] sm:$0xf]  ;;  %v1088_v5 = vadd.f32 %v1087_v51, %v5830_v40 }
 0x1df   : > { %v1450_v47 = vpop.f32.mrf.mxu2  ;;  %v6373_v55 = vadd.f32 %v2412_v58, %v1783_v21  ;;  %v3951_v1 = vrot.slane %v3949_v20, 4  ;;  %v3435_v58 = vshll.u32 %v6371_v25, 16  ;;  %v3439_v21 = vshrl.u32 %v6371_v25, 16 }
 0x1e0   : > { %v1485_v22 = vadd.f32 %v1450_v47, %v1086_v53  ;;  %v3424_v53 = vsel %vm5372_vm2, %v3419_v45, %v3423_v63  ;;  %v3950_v30 = vsel %vm5567_vm6, %v5122_v23, %v3949_v20  ;;  %v4863_v47 = vrot.slane %v4847_v10, 9 }
 0x1e1   : > { %5089 = vmatmul.msk.bf16.gmra.mxu3 %vm723_vm3, %v3637_v8  ;;  %v2581_v8 = vrot.slane %v5280_v16, 5  ;;  %v3615_v51 = vunpack.c.l.b16 %v3424_v53  ;;  %v3953_v45 = vsel %vm5567_vm6, %v3951_v1, %v3952_v11  ;;  %v6395_v63 = vrot.slane %v3435_v58, 5 }
 0x1e2   : > { %v4024_v23 = vunpack.c.l.b16 %v3950_v30  ;;  %v4025_v62 = vunpack.c.l.b16 %v3953_v45  ;;  %v3432_v10 = vor.u32 %v3431_v35, %v3428_v31  ;;  %v3445_v58 = vshll.u32 %v5051_v46, 16  ;;  %v6409_v45 = vld [vmem:[%s5360_s6 + $0x94] sm:$0xf] }
 0x1e3   : > { %v2415_v12 = vpop.f32.mrf.mxu0 }
 0x1e4   : > { %v1749_v4 = vpop.f32.mrf.mxu3  ;;  %v2750_v37 = vpop.f32.mrf.mxu1  ;;  %v3447_v35 = vrot.slane %v3445_v58, 5 }
 0x1e5   : > { %v1784_v52 = vadd.f32 %v1749_v4, %v1485_v22  ;;  %v2583_v22 = vrot.slane %v2581_v8, 4  ;;  %v2830_v53 = vadd.f32 %v2750_v37, %v5847_v49 }
 0x1e6   : > { %5149 = vmatmul.msk.bf16.gmra.mxu0 %vm723_vm3, %v4047_v18  ;;  %v2584_v18 = vrot.slane %v5281_v39, 5  ;;  %v3433_v39 = vrot.slane %v3432_v10, 4  ;;  %v3463_v10 = vshrl.u32 %v6409_v45, 16 }
 0x1e7   : > { %v1452_v0 = vpop.f32.mrf.mxu2  ;;  %4890 = vmatmul.msk.bf16.gmra.mxu1 %vm723_vm3, %v2673_v38  ;;  %v6391_v40 = vadd.f32 %v2415_v12, %v1784_v52  ;;  %v3441_v38 = vrot.slane %v3439_v21, 4  ;;  %v2582_v12 = vsel %vm5567_vm6, %v4863_v47, %v2581_v8  ;;  %v3638_v52 = vpack.c.b16 %v3615_v51, %v3614_v2  ;;  %v5107_v21 = vld [vmem:[%s5360_s6 + $0x84] sm:$0xe]  ;;  %v5052_v8 = vld [vmem:[%s5360_s6 + $0x90] sm:$0xf] }
 0x1e8   : > { %v1486_v13 = vadd.f32 %v1452_v0, %v1088_v5  ;;  %v2585_v11 = vsel %vm5567_vm6, %v2583_v22, %v2584_v18  ;;  %v3956_v5 = vrot.slane %v6371_v25, 5  ;;  %v2651_v30 = vunpack.c.l.b16 %v2582_v12  ;;  %v5282_v12 = vld [vmem:[%s5360_s6 + $0x88] sm:$0xf] }
 0x1e9   : > { %v3442_v1 = vor.u32 %v3441_v38, %v6395_v63  ;;  %v4048_v47 = vpack.c.b16 %v4025_v62, %v4024_v23  ;;  %v3959_v22 = vrot.slane %v5051_v46, 5  ;;  %v3450_v49 = vshrl.u32 %v5052_v8, 16 }
 0x1ea   : > { %v3958_v25 = vrot.slane %v3956_v5, 4  ;;  %v3453_v38 = vshll.u32 %v5052_v8, 16  ;;  %v3459_v23 = vshll.u32 %v6409_v45, 16 }
 0x1eb   : > { %v2417_v20 = vpop.f32.mrf.mxu0  ;;  %v3443_v31 = vrot.slane %v3442_v1, 4 }
 0x1ec   : > { %v1751_v3 = vpop.f32.mrf.mxu3  ;;  %5014 = vmatmul.msk.bf16.gmra.mxu2 %vm723_vm3, %v5214_v44  ;;  %v2752_v4 = vpop.f32.mrf.mxu1  ;;  %v2652_v44 = vunpack.c.l.b16 %v2585_v11  ;;  %v2588_v11 = vrot.slane %v5282_v12, 5  ;;  %v6443_v8 = vrot.slane %v3459_v23, 5 }
 0x1ed   : > { %v1785_v16 = vadd.f32 %v1751_v3, %v1486_v13  ;;  %v5123_v13 = vrot.slane %v5107_v21, 9  ;;  %v3448_v1 = vsel %vm5372_vm2, %v3443_v31, %v3447_v35  ;;  %v3960_v21 = vsel %vm5567_vm6, %v3958_v25, %v3959_v22 }
 0x1ee   : > { %v2674_v51 = vpack.c.b16 %v2652_v44, %v2651_v30  ;;  %v2831_v30 = vadd.f32 %v2752_v4, %v5860_v43  ;;  %v2590_v31 = vrot.slane %v2588_v11, 4  ;;  %v3617_v43 = vunpack.c.l.b16 %v3448_v1  ;;  %v6450_v4 = vld [vmem:[%s5360_s6 + $0x98] sm:$0x1] }
 0x1ef   : > { %v3049_v0 = vpop.f32.mrf.mxu2  ;;  %v6413_v37 = vadd.f32 %v2417_v20, %v1785_v16  ;;  %v6428_v20 = vld [vmem:[%s6829_s3] ss:$0 sm:$0xff]  ;;  %v3438_v16 = vsel %vm5372_vm2, %v3433_v39, %v6395_v63  ;;  %v3957_v58 = vsel %vm5567_vm6, %v5123_v13, %v3956_v5  ;;  %v3455_v63 = vrot.slane %v3453_v38, 5  ;;  %v5215_v39 = vld [vmem:[%s5360_s6 + $0x84] sm:$0xff]  ;;  %v5283_v5 = vld [vmem:[%s5360_s6 + $0x8c] sm:$0x1] }
 0x1f0   : > { %v3129_v2 = vadd.f32 %v3049_v0, %v2830_v53  ;;  %v3452_v53 = vrot.slane %v3450_v49, 4  ;;  %v2591_v35 = vrot.slane %v5283_v5, 5  ;;  %v3465_v13 = vrot.slane %v3463_v10, 4  ;;  %v6471_v5 = vld [vmem:[%s5360_s6 + $0xa0] sm:$0xf] }
 0x1f1   : > { %5090 = vmatmul.msk.bf16.gmra.mxu3 %vm723_vm3, %v3638_v52  ;;  %v4848_v52 = vld [vmem:[%s5360_s6 + $0x84] sm:$0xe]  ;;  %v3616_v49 = vunpack.c.l.b16 %v3438_v16  ;;  %v4026_v38 = vunpack.c.l.b16 %v3957_v58  ;;  %v4027_v23 = vunpack.c.l.b16 %v3960_v21 }
 0x1f2   : > { %v3456_v16 = vor.u32 %v3455_v63, %v3452_v53  ;;  %v4274_v53 = vld [vmem:[%s6423_s11 + $0x8] sm:$0xff] }
 0x1f3   : > { %v4125_v18 = vpop.f32.mrf.mxu0  ;;  %v3639_v21 = vpack.c.b16 %v3617_v43, %v3616_v49  ;;  %v4049_v63 = vpack.c.b16 %v4027_v23, %v4026_v38  ;;  %v5108_v49 = vld [vmem:[%s5360_s6 + $0x90] sm:$0xe] }
 0x1f4   : > { %v3715_v3 = vpop.f32.mrf.mxu3  ;;  %v2755_v62 = vpop.f32.mrf.mxu1 }
 0x1f5   : > { %v3795_v46 = vadd.f32 %v3715_v3, %v3129_v2  ;;  %v4864_v2 = vrot.slane %v4848_v52, 9  ;;  %v3466_v52 = vor.u32 %v3465_v13, %v6443_v8 }
 0x1f6   : > { %5150 = vmatmul.msk.bf16.gmra.mxu0 %vm723_vm3, %v4048_v47  ;;  %v4273_v47 = vld [vmem:[%s6423_s11] sm:$0xff] }
 0x1f7   : > { %v4205_v0 = vadd.f32 %v4125_v18, %v3795_v46  ;;  %v3051_v44 = vpop.f32.mrf.mxu2  ;;  %4891 = vmatmul.msk.bf16.gmra.mxu1 %vm723_vm3, %v2674_v51  ;;  %v2589_v10 = vsel %vm5567_vm6, %v4864_v2, %v2588_v11  ;;  %v2592_v46 = vsel %vm5567_vm6, %v2590_v31, %v2591_v35  ;;  %v5055_v2 = vld [vmem:[%s5360_s6 + $0x9c] sm:$0xf]  ;;  %v3457_v31 = vrot.slane %v3456_v16, 4 }
 0x1f8   : > { %v3130_v22 = vadd.f32 %v3051_v44, %v2831_v30  ;;  %v2832_v44 = vadd.f32 %v2755_v62, %v5873_v19  ;;  %v2653_v11 = vunpack.c.l.b16 %v2589_v10  ;;  %v3467_v35 = vrot.slane %v3466_v52, 4 }
 0x1f9   : > { %v4241_v25 = vadd.f32 %v6428_v20, %v4205_v0  ;;  %v3469_v0 = vshll.u32 %v6450_v4, 16  ;;  %v3963_v19 = vrot.slane %v6409_v45, 5  ;;  %v3474_v62 = vshrl.u32 %v5055_v2, 16  ;;  %v4849_v45 = vld [vmem:[%s5360_s6 + $0x90] sm:$0xe] }
 0x1fa   : > { %v3477_v43 = vshll.u32 %v5055_v2, 16  ;;  %v3462_v16 = vsel %vm5372_vm2, %v3457_v31, %v6443_v8  ;;  %v5124_v52 = vrot.slane %v5108_v49, 9 }
 0x1fb   : > { %v4305_v18 = vadd.f32 %v4273_v47, %v4241_v25  ;;  %v4127_v51 = vpop.f32.mrf.mxu0 }
 0x1fc   : > { %v3717_v3 = vpop.f32.mrf.mxu3  ;;  %5015 = vmatmul.msk.bf16.gmra.mxu2 %vm723_vm3, %v5215_v39  ;;  %v2757_v12 = vpop.f32.mrf.mxu1  ;;  %v2654_v39 = vunpack.c.l.b16 %v2592_v46  ;;  %v3479_v8 = vrot.slane %v3477_v43, 5 }
 0x1fd   : > { %v4337_v1 = vmax.f32 %v4305_v18, 0.0  ;;  %v3796_v58 = vadd.f32 %v3717_v3, %v3130_v22  ;;  %v3471_v22 = vrot.slane %v3469_v0, 5  ;;  %v3483_v18 = vshll.u32 %v6471_v5, 16 }
 0x1fe   : > { %v2675_v3 = vpack.c.b16 %v2654_v39, %v2653_v11  ;;  %v3476_v11 = vrot.slane %v3474_v62, 4  ;;  %v5285_v62 = vld [vmem:[%s5360_s6 + $0x98] sm:$0x1] }
 0x1ff   : > { %4369 = vst.msk [vmem:[%s6457_s18] sm:$0xff] %vm723_vm3, %v4337_v1  ;;  %v4206_v30 = vadd.f32 %v4127_v51, %v3796_v58  ;;  %v3054_v47 = vpop.f32.mrf.mxu2  ;;  %v3487_v51 = vshrl.u32 %v6471_v5, 16  ;;  %v3966_v1 = vrot.slane %v6450_v4, 5  ;;  %v5284_v58 = vld [vmem:[%s5360_s6 + $0x94] sm:$0xf]  ;;  %v6489_v39 = vrot.slane %v3483_v18, 5 }
 0x200   : > { %v3131_v25 = vadd.f32 %v3054_v47, %v2832_v44  ;;  %v3472_v44 = vsel %vm5372_vm2, %v3467_v35, %v3471_v22  ;;  %v3965_v47 = vrot.slane %v3963_v19, 4  ;;  %v4275_v35 = vld [vmem:[%s6423_s11 + $0x10] sm:$0xff]  ;;  %v2598_v43 = vrot.slane %v5285_v62, 5  ;;  %v4276_v62 = vld [vmem:[%s6423_s11 + $0x18] sm:$0xff] }
 0x201   : > { %v4242_v13 = vadd.f32 %v6428_v20, %v4206_v30  ;;  %5091 = vmatmul.msk.bf16.gmra.mxu3 %vm723_vm3, %v3639_v21  ;;  %v2595_v21 = vrot.slane %v5284_v58, 5  ;;  %v3489_v4 = vrot.slane %v3487_v51, 4  ;;  %v5216_v22 = vld [vmem:[%s5360_s6 + $0x90] sm:$0xff] }
 0x203   : > { %v4306_v38 = vadd.f32 %v4274_v53, %v4242_v13  ;;  %v4130_v23 = vpop.f32.mrf.mxu0  ;;  %v2833_v53 = vadd.f32 %v2757_v12, %v5886_v15  ;;  %v4865_v13 = vrot.slane %v4849_v45, 9  ;;  %v2597_v49 = vrot.slane %v2595_v21, 4 }
 0x204   : > { %v3720_v10 = vpop.f32.mrf.mxu3  ;;  %v2760_v46 = vpop.f32.mrf.mxu1  ;;  %v3967_v15 = vsel %vm5567_vm6, %v3965_v47, %v3966_v1  ;;  %v3480_v12 = vor.u32 %v3479_v8, %v3476_v11 }
 0x205   : > { %v4338_v0 = vmax.f32 %v4306_v38, 0.0  ;;  %v3797_v30 = vadd.f32 %v3720_v10, %v3131_v25  ;;  %v6496_v25 = vld [vmem:[%s5360_s6 + $0xa4] sm:$0x1]  ;;  %v3619_v38 = vunpack.c.l.b16 %v3472_v44  ;;  %v2596_v58 = vsel %vm5567_vm6, %v4865_v13, %v2595_v21 }
 0x206   : > { %5151 = vmatmul.msk.bf16.gmra.mxu0 %vm723_vm3, %v4049_v63  ;;  %v3618_v63 = vunpack.c.l.b16 %v3462_v16  ;;  %v3493_v10 = vshll.u32 %v6496_v25, 16  ;;  %v4029_v11 = vunpack.c.l.b16 %v3967_v15  ;;  %v2655_v8 = vunpack.c.l.b16 %v2596_v58 }
 0x207   : > { %4370 = vst.msk [vmem:[%s6457_s18 + $0x8] sm:$0xff] %vm723_vm3, %v4338_v0  ;;  %v4207_v2 = vadd.f32 %v4130_v23, %v3797_v30  ;;  %v3056_v31 = vpop.f32.mrf.mxu2  ;;  %4892 = vmatmul.msk.bf16.gmra.mxu1 %vm723_vm3, %v2675_v3  ;;  %v3964_v23 = vsel %vm5567_vm6, %v5124_v52, %v3963_v19  ;;  %v3490_v3 = vor.u32 %v3489_v4, %v6489_v39  ;;  %v3481_v4 = vrot.slane %v3480_v12, 4 }
 0x208   : > { %v3132_v51 = vadd.f32 %v3056_v31, %v2833_v53  ;;  %v4028_v30 = vunpack.c.l.b16 %v3964_v23  ;;  %v2599_v52 = vsel %vm5567_vm6, %v2597_v49, %v2598_v43  ;;  %v3640_v47 = vpack.c.b16 %v3619_v38, %v3618_v63  ;;  %v5058_v43 = vld [vmem:[%s5360_s6 + $0xa8] sm:$0xf]  ;;  %v6529_v23 = vld [vmem:[%s5360_s6 + $0xac] sm:$0xf] }
 0x209   : > { %v4243_v18 = vadd.f32 %v6428_v20, %v4207_v2  ;;  %v3491_v2 = vrot.slane %v3490_v3, 4  ;;  %v3495_v53 = vrot.slane %v3493_v10, 5  ;;  %v2834_v31 = vadd.f32 %v2760_v46, %v5899_v60 }
 0x20a   : > { %v3970_v49 = vrot.slane %v6471_v5, 5  ;;  %v3486_v38 = vsel %vm5372_vm2, %v3481_v4, %v6489_v39  ;;  %v3973_v5 = vrot.slane %v6496_v25, 5  ;;  %v3501_v39 = vshll.u32 %v5058_v43, 16 }
 0x20b   : > { %v4307_v45 = vadd.f32 %v4275_v35, %v4243_v18  ;;  %v4132_v16 = vpop.f32.mrf.mxu0  ;;  %v2656_v35 = vunpack.c.l.b16 %v2599_v52  ;;  %v4050_v18 = vpack.c.b16 %v4029_v11, %v4028_v30  ;;  %v3496_v60 = vsel %vm5372_vm2, %v3491_v2, %v3495_v53 }
 0x20c   : > { %v3722_v0 = vpop.f32.mrf.mxu3  ;;  %5016 = vmatmul.msk.bf16.gmra.mxu2 %vm723_vm3, %v5216_v22  ;;  %v2762_v19 = vpop.f32.mrf.mxu1  ;;  %v5109_v22 = vld [vmem:[%s5360_s6 + $0x9c] sm:$0xe]  ;;  %v3972_v10 = vrot.slane %v3970_v49, 4  ;;  %v3507_v25 = vshll.u32 %v6529_v23, 16  ;;  %v3620_v11 = vunpack.c.l.b16 %v3486_v38 }
 0x20d   : > { %v4339_v1 = vmax.f32 %v4307_v45, 0.0  ;;  %v3798_v44 = vadd.f32 %v3722_v0, %v3132_v51  ;;  %v5125_v46 = vrot.slane %v5109_v22, 9  ;;  %v2676_v3 = vpack.c.b16 %v2656_v35, %v2655_v8  ;;  %v5286_v0 = vld [vmem:[%s5360_s6 + $0xa0] sm:$0xf] }
 0x20e   : > { %v3498_v45 = vshrl.u32 %v5058_v43, 16  ;;  %v2602_v30 = vrot.slane %v5286_v0, 5  ;;  %v3621_v8 = vunpack.c.l.b16 %v3496_v60  ;;  %v2835_v53 = vadd.f32 %v2762_v19, %v5912_v59  ;;  %v4277_v35 = vld [vmem:[%s6423_s11 + $0x20] sm:$0xff]  ;;  %v6551_v19 = vld [vmem:[%s5360_s6 + $0xb0] sm:$0x1] }
 0x20f   : > { %4371 = vst.msk [vmem:[%s6457_s18 + $0x10] sm:$0xff] %vm723_vm3, %v4339_v1  ;;  %v4208_v21 = vadd.f32 %v4132_v16, %v3798_v44  ;;  %v3059_v13 = vpop.f32.mrf.mxu2  ;;  %v4850_v44 = vld [vmem:[%s5360_s6 + $0x9c] sm:$0xe]  ;;  %v3971_v4 = vsel %vm5567_vm6, %v5125_v46, %v3970_v49  ;;  %v3503_v49 = vrot.slane %v3501_v39, 5  ;;  %v6548_v60 = vrot.slane %v3507_v25, 5 }
 0x210   : > { %v3133_v51 = vadd.f32 %v3059_v13, %v2834_v31  ;;  %v3974_v31 = vsel %vm5567_vm6, %v3972_v10, %v3973_v5  ;;  %v3500_v13 = vrot.slane %v3498_v45, 4  ;;  %v5217_v22 = vld [vmem:[%s5360_s6 + $0x9c] sm:$0xff]  ;;  %v2604_v43 = vrot.slane %v2602_v30, 4 }
 0x211   : > { %v4244_v63 = vadd.f32 %v6428_v20, %v4208_v21  ;;  %5092 = vmatmul.msk.bf16.gmra.mxu3 %vm723_vm3, %v3640_v47  ;;  %v3511_v47 = vshrl.u32 %v6529_v23, 16  ;;  %v3641_v5 = vpack.c.b16 %v3621_v8, %v3620_v11  ;;  %v4031_v10 = vunpack.c.l.b16 %v3974_v31 }
 0x212   : > { %v3504_v39 = vor.u32 %v3503_v49, %v3500_v13  ;;  %v3517_v25 = vshll.u32 %v6551_v19, 16 }
 0x213   : > { %v4308_v15 = vadd.f32 %v4276_v62, %v4244_v63  ;;  %v4135_v12 = vpop.f32.mrf.mxu0  ;;  %v4866_v62 = vrot.slane %v4850_v44, 9  ;;  %v5287_v63 = vld [vmem:[%s5360_s6 + $0xa4] sm:$0x1]  ;;  %v3513_v59 = vrot.slane %v3511_v47, 4 }
 0x214   : > { %v3725_v16 = vpop.f32.mrf.mxu3  ;;  %v2765_v58 = vpop.f32.mrf.mxu1  ;;  %v3505_v13 = vrot.slane %v3504_v39, 4 }
 0x215   : > { %v4340_v52 = vmax.f32 %v4308_v15, 0.0  ;;  %v3799_v1 = vadd.f32 %v3725_v16, %v3133_v51  ;;  %v2603_v16 = vsel %vm5567_vm6, %v4866_v62, %v2602_v30  ;;  %v3514_v44 = vor.u32 %v3513_v59, %v6548_v60  ;;  %v5061_v30 = vld [vmem:[%s5360_s6 + $0xb4] sm:$0xf] }
 0x216   : > { %5152 = vmatmul.msk.bf16.gmra.mxu0 %vm723_vm3, %v4050_v18  ;;  %v2605_v18 = vrot.slane %v5287_v63, 5  ;;  %v2836_v11 = vadd.f32 %v2765_v58, %v5924_v33  ;;  %v5110_v63 = vld [vmem:[%s5360_s6 + $0xa8] sm:$0xe]  ;;  %v3525_v33 = vshll.u32 %v5061_v30, 16  ;;  %v3510_v39 = vsel %vm5372_vm2, %v3505_v13, %v6548_v60 }
 0x217   : > { %4372 = vst.msk [vmem:[%s6457_s18 + $0x18] sm:$0xff] %vm723_vm3, %v4340_v52  ;;  %v4209_v2 = vadd.f32 %v4135_v12, %v3799_v1  ;;  %v3061_v21 = vpop.f32.mrf.mxu2  ;;  %4893 = vmatmul.msk.bf16.gmra.mxu1 %vm723_vm3, %v2676_v3  ;;  %v4030_v12 = vunpack.c.l.b16 %v3971_v4  ;;  %v2657_v4 = vunpack.c.l.b16 %v2603_v16  ;;  %v3515_v62 = vrot.slane %v3514_v44, 4 }
 0x218   : > { %v3134_v38 = vadd.f32 %v3061_v21, %v2835_v53  ;;  %v2606_v0 = vsel %vm5567_vm6, %v2604_v43, %v2605_v18  ;;  %v6565_v53 = vld [vmem:[%s5360_s6 + $0xb8] sm:$0xf]  ;;  %v4278_v21 = vld [vmem:[%s6423_s11 + $0x28] sm:$0xff]  ;;  %v3519_v43 = vrot.slane %v3517_v25, 5  ;;  %v3522_v18 = vshrl.u32 %v5061_v30, 16 }
 0x219   : > { %v4245_v51 = vadd.f32 %v6428_v20, %v4209_v2  ;;  %v2658_v2 = vunpack.c.l.b16 %v2606_v0  ;;  %v4051_v31 = vpack.c.b16 %v4031_v10, %v4030_v12  ;;  %v3531_v58 = vshll.u32 %v6565_v53, 16  ;;  %v6590_v30 = vld [vmem:[%s5360_s6 + $0xbc] sm:$0x1] }
 0x21a   : > { %v3535_v49 = vshrl.u32 %v6565_v53, 16  ;;  %v5126_v12 = vrot.slane %v5110_v63, 9  ;;  %v3527_v44 = vrot.slane %v3525_v33, 5 }
 0x21b   : > { %v4309_v46 = vadd.f32 %v4277_v35, %v4245_v51  ;;  %v4137_v15 = vpop.f32.mrf.mxu0  ;;  %v2677_v59 = vpack.c.b16 %v2658_v2, %v2657_v4  ;;  %v6582_v25 = vrot.slane %v3531_v58, 5  ;;  %v3980_v2 = vrot.slane %v6551_v19, 5 }
 0x21c   : > { %v3727_v3 = vpop.f32.mrf.mxu3  ;;  %5017 = vmatmul.msk.bf16.gmra.mxu2 %vm723_vm3, %v5217_v22  ;;  %v2767_v45 = vpop.f32.mrf.mxu1  ;;  %v3541_v19 = vshll.u32 %v6590_v30, 16 }
 0x21d   : > { %v4341_v52 = vmax.f32 %v4309_v46, 0.0  ;;  %v3800_v1 = vadd.f32 %v3727_v3, %v3134_v38  ;;  %v3977_v46 = vrot.slane %v6529_v23, 5  ;;  %v5288_v3 = vld [vmem:[%s5360_s6 + $0xac] sm:$0xf]  ;;  %v3524_v23 = vrot.slane %v3522_v18, 4 }
 0x21e   : > { %v2609_v10 = vrot.slane %v5288_v3, 5  ;;  %v3622_v18 = vunpack.c.l.b16 %v3510_v39 }
 0x21f   : > { %4373 = vst.msk [vmem:[%s6457_s18 + $0x20] sm:$0xff] %vm723_vm3, %v4341_v52  ;;  %v4210_v47 = vadd.f32 %v4137_v15, %v3800_v1  ;;  %v3064_v8 = vpop.f32.mrf.mxu2  ;;  %v3520_v52 = vsel %vm5372_vm2, %v3515_v62, %v3519_v43  ;;  %v4851_v1 = vld [vmem:[%s5360_s6 + $0xa8] sm:$0xe]  ;;  %v3979_v4 = vrot.slane %v3977_v46, 4 }
 0x220   : > { %v3135_v22 = vadd.f32 %v3064_v8, %v2836_v11  ;;  %v2837_v8 = vadd.f32 %v2767_v45, %v5937_v41  ;;  %v4867_v13 = vrot.slane %v4851_v1, 9  ;;  %v3623_v33 = vunpack.c.l.b16 %v3520_v52 }
 0x221   : > { %v4246_v35 = vadd.f32 %v6428_v20, %v4210_v47  ;;  %5093 = vmatmul.msk.bf16.gmra.mxu3 %vm723_vm3, %v3641_v5  ;;  %v3537_v47 = vrot.slane %v3535_v49, 4  ;;  %v3978_v41 = vsel %vm5567_vm6, %v5126_v12, %v3977_v46  ;;  %v3528_v45 = vor.u32 %v3527_v44, %v3524_v23 }
 0x222   : > { %v2610_v3 = vsel %vm5567_vm6, %v4867_v13, %v2609_v10  ;;  %v4032_v39 = vunpack.c.l.b16 %v3978_v41  ;;  %v3543_v44 = vrot.slane %v3541_v19, 5 }
 0x223   : > { %v4310_v51 = vadd.f32 %v4278_v21, %v4246_v35  ;;  %v4140_v38 = vpop.f32.mrf.mxu0  ;;  %v4279_v21 = vld [vmem:[%s6423_s11 + $0x30] sm:$0xff]  ;;  %v2611_v35 = vrot.slane %v2609_v10, 4  ;;  %v3538_v58 = vor.u32 %v3537_v47, %v6582_v25  ;;  %v3529_v1 = vrot.slane %v3528_v45, 4 }
 0x224   : > { %v3730_v15 = vpop.f32.mrf.mxu3  ;;  %v2770_v5 = vpop.f32.mrf.mxu1 }
 0x225   : > { %v4342_v16 = vmax.f32 %v4310_v51, 0.0  ;;  %v3801_v0 = vadd.f32 %v3730_v15, %v3135_v22  ;;  %v5289_v22 = vld [vmem:[%s5360_s6 + $0xb0] sm:$0x1]  ;;  %v3539_v23 = vrot.slane %v3538_v58, 4  ;;  %v5290_v58 = vld [vmem:[%s5360_s6 + $0xb8] sm:$0xf] }
 0x226   : > { %5153 = vmatmul.msk.bf16.gmra.mxu0 %vm723_vm3, %v4051_v31  ;;  %v5218_v31 = vld [vmem:[%s5360_s6 + $0xa8] sm:$0xff]  ;;  %v2612_v62 = vrot.slane %v5289_v22, 5  ;;  %v2616_v19 = vrot.slane %v5290_v58, 5 }
 0x227   : > { %4374 = vst.msk [vmem:[%s6457_s18 + $0x28] sm:$0xff] %vm723_vm3, %v4342_v16  ;;  %v4211_v11 = vadd.f32 %v4140_v38, %v3801_v0  ;;  %v3066_v60 = vpop.f32.mrf.mxu2  ;;  %4894 = vmatmul.msk.bf16.gmra.mxu1 %vm723_vm3, %v2677_v59  ;;  %v3981_v38 = vsel %vm5567_vm6, %v3979_v4, %v3980_v2  ;;  %v3642_v0 = vpack.c.b16 %v3623_v33, %v3622_v18  ;;  %v4280_v4 = vld [vmem:[%s6423_s11 + $0x38] sm:$0xff]  ;;  %v5064_v2 = vld [vmem:[%s5360_s6 + $0xc0] sm:$0xf]  ;;  %v3984_v18 = vrot.slane %v6565_v53, 5 }
 0x228   : > { %v3136_v63 = vadd.f32 %v3066_v60, %v2837_v8  ;;  %v2613_v46 = vsel %vm5567_vm6, %v2611_v35, %v2612_v62  ;;  %v4033_v52 = vunpack.c.l.b16 %v3981_v38  ;;  %v2659_v8 = vunpack.c.l.b16 %v2610_v3  ;;  %v4852_v38 = vld [vmem:[%s5360_s6 + $0xb4] sm:$0xe] }
 0x229   : > { %v4247_v43 = vadd.f32 %v6428_v20, %v4211_v11  ;;  %v2838_v11 = vadd.f32 %v2770_v5, %v5951_v29  ;;  %v2660_v60 = vunpack.c.l.b16 %v2613_v46  ;;  %v3534_v35 = vsel %vm5372_vm2, %v3529_v1, %v6582_v25  ;;  %v6620_v5 = vld [vmem:[%s5360_s6 + $0xc4] sm:$0xf] }
 0x22a   : > { %v4052_v13 = vpack.c.b16 %v4033_v52, %v4032_v39  ;;  %v3544_v29 = vsel %vm5372_vm2, %v3539_v23, %v3543_v44  ;;  %v3546_v33 = vshrl.u32 %v5064_v2, 16  ;;  %v3559_v3 = vshrl.u32 %v6620_v5, 16  ;;  %v4281_v44 = vld [vmem:[%s6423_s11 + $0x40] sm:$0xff] }
 0x22b   : > { %v4311_v49 = vadd.f32 %v4279_v21, %v4247_v43  ;;  %v4142_v51 = vpop.f32.mrf.mxu0  ;;  %v2678_v43 = vpack.c.b16 %v2660_v60, %v2659_v8  ;;  %v3624_v53 = vunpack.c.l.b16 %v3534_v35  ;;  %v3625_v46 = vunpack.c.l.b16 %v3544_v29  ;;  %v5291_v8 = vld [vmem:[%s5360_s6 + $0xbc] sm:$0x1] }
 0x22c   : > { %v3732_v59 = vpop.f32.mrf.mxu3  ;;  %5018 = vmatmul.msk.bf16.gmra.mxu2 %vm723_vm3, %v5218_v31  ;;  %v2772_v15 = vpop.f32.mrf.mxu1  ;;  %v3986_v1 = vrot.slane %v3984_v18, 4  ;;  %v3548_v23 = vrot.slane %v3546_v33, 4  ;;  %v2619_v60 = vrot.slane %v5291_v8, 5  ;;  %v6664_v8 = vld [vmem:[%s5360_s6 + $0xd0] sm:$0xf] }
 0x22d   : > { %v4343_v12 = vmax.f32 %v4311_v49, 0.0  ;;  %v3802_v16 = vadd.f32 %v3732_v59, %v3136_v63  ;;  %v5111_v63 = vld [vmem:[%s5360_s6 + $0xb4] sm:$0xe]  ;;  %v3549_v49 = vshll.u32 %v5064_v2, 16  ;;  %v3555_v59 = vshll.u32 %v6620_v5, 16 }
 0x22e   : > { %v2839_v39 = vadd.f32 %v2772_v15, %v5964_v54  ;;  %v6641_v54 = vld [vmem:[%s5360_s6 + $0xc8] sm:$0x1] }
 0x22f   : > { %4375 = vst.msk [vmem:[%s6457_s18 + $0x30] sm:$0xff] %vm723_vm3, %v4343_v12  ;;  %v4212_v47 = vadd.f32 %v4142_v51, %v3802_v16  ;;  %v3069_v10 = vpop.f32.mrf.mxu2  ;;  %v5127_v12 = vrot.slane %v5111_v63, 9  ;;  %v3987_v16 = vrot.slane %v6590_v30, 5 }
 0x230   : > { %v3137_v31 = vadd.f32 %v3069_v10, %v2838_v11  ;;  %v4868_v11 = vrot.slane %v4852_v38, 9  ;;  %v2618_v10 = vrot.slane %v2616_v19, 4 }
 0x231   : > { %v4248_v21 = vadd.f32 %v6428_v20, %v4212_v47  ;;  %5094 = vmatmul.msk.bf16.gmra.mxu3 %vm723_vm3, %v3642_v0  ;;  %v5219_v47 = vld [vmem:[%s5360_s6 + $0xb4] sm:$0xff]  ;;  %v3985_v35 = vsel %vm5567_vm6, %v5127_v12, %v3984_v18  ;;  %v3988_v29 = vsel %vm5567_vm6, %v3986_v1, %v3987_v16  ;;  %v4282_v12 = vld [vmem:[%s6423_s11 + $0x48] sm:$0xff] }
 0x232   : > { %v2617_v63 = vsel %vm5567_vm6, %v4868_v11, %v2616_v19  ;;  %v2620_v33 = vsel %vm5567_vm6, %v2618_v10, %v2619_v60  ;;  %v4035_v38 = vunpack.c.l.b16 %v3988_v29  ;;  %v3991_v11 = vrot.slane %v6620_v5, 5  ;;  %v5067_v10 = vld [vmem:[%s5360_s6 + $0xcc] sm:$0xf]  ;;  %v4853_v29 = vld [vmem:[%s5360_s6 + $0xc0] sm:$0xe] }
 0x233   : > { %v4312_v22 = vadd.f32 %v4280_v4, %v4248_v21  ;;  %v4145_v62 = vpop.f32.mrf.mxu0  ;;  %v3551_v4 = vrot.slane %v3549_v49, 5  ;;  %v6638_v21 = vrot.slane %v3555_v59, 5  ;;  %v2661_v19 = vunpack.c.l.b16 %v2617_v63 }
 0x234   : > { %v3735_v41 = vpop.f32.mrf.mxu3  ;;  %v2775_v45 = vpop.f32.mrf.mxu1  ;;  %v3579_v63 = vshll.u32 %v6664_v8, 16 }
 0x235   : > { %v4344_v25 = vmax.f32 %v4312_v22, 0.0  ;;  %v3803_v51 = vadd.f32 %v3735_v41, %v3137_v31  ;;  %v3561_v31 = vrot.slane %v3559_v3, 4  ;;  %v3552_v41 = vor.u32 %v3551_v4, %v3548_v23  ;;  %v5112_v23 = vld [vmem:[%s5360_s6 + $0xc0] sm:$0xe] }
 0x236   : > { %5154 = vmatmul.msk.bf16.gmra.mxu0 %vm723_vm3, %v4052_v13  ;;  %v2840_v3 = vadd.f32 %v2775_v45, %v5980_v61 }
 0x237   : > { %4376 = vst.msk [vmem:[%s6457_s18 + $0x38] sm:$0xff] %vm723_vm3, %v4344_v25  ;;  %v4213_v0 = vadd.f32 %v4145_v62, %v3803_v51  ;;  %v3071_v52 = vpop.f32.mrf.mxu2  ;;  %4895 = vmatmul.msk.bf16.gmra.mxu1 %vm723_vm3, %v2678_v43  ;;  %v3643_v62 = vpack.c.b16 %v3625_v46, %v3624_v53  ;;  %v3562_v18 = vor.u32 %v3561_v31, %v6638_v21  ;;  %v3565_v25 = vshll.u32 %v6641_v54, 16 }
 0x238   : > { %v3138_v2 = vadd.f32 %v3071_v52, %v2839_v39  ;;  %v4034_v51 = vunpack.c.l.b16 %v3985_v35  ;;  %v2662_v46 = vunpack.c.l.b16 %v2620_v33  ;;  %v3553_v16 = vrot.slane %v3552_v41, 4 }
 0x239   : > { %v4249_v30 = vadd.f32 %v6428_v20, %v4213_v0  ;;  %v3563_v52 = vrot.slane %v3562_v18, 4  ;;  %v3567_v1 = vrot.slane %v3565_v25, 5  ;;  %v3583_v33 = vshrl.u32 %v6664_v8, 16 }
 0x23a   : > { %v2679_v45 = vpack.c.b16 %v2662_v46, %v2661_v19  ;;  %v3558_v35 = vsel %vm5372_vm2, %v3553_v16, %v6638_v21  ;;  %v3993_v18 = vrot.slane %v3991_v11, 4  ;;  %v3994_v25 = vrot.slane %v6641_v54, 5  ;;  %v5293_v19 = vld [vmem:[%s5360_s6 + $0xc8] sm:$0x1] }
 0x23b   : > { %v4313_v15 = vadd.f32 %v4281_v44, %v4249_v30  ;;  %v4147_v13 = vpop.f32.mrf.mxu0  ;;  %v4053_v44 = vpack.c.b16 %v4035_v38, %v4034_v51  ;;  %v5128_v30 = vrot.slane %v5112_v23, 9  ;;  %v3568_v5 = vsel %vm5372_vm2, %v3563_v52, %v3567_v1  ;;  %v4283_v51 = vld [vmem:[%s6423_s11 + $0x50] sm:$0xff]  ;;  %v5220_v38 = vld [vmem:[%s5360_s6 + $0xc0] sm:$0xff] }
 0x23c   : > { %v3737_v22 = vpop.f32.mrf.mxu3  ;;  %5019 = vmatmul.msk.bf16.gmra.mxu2 %vm723_vm3, %v5219_v47  ;;  %v2777_v43 = vpop.f32.mrf.mxu1  ;;  %v2626_v46 = vrot.slane %v5293_v19, 5  ;;  %v3581_v1 = vrot.slane %v3579_v63, 5  ;;  %v3585_v23 = vrot.slane %v3583_v33, 4  ;;  %v5113_v19 = vld [vmem:[%s5360_s6 + $0xcc] sm:$0xe] }
 0x23d   : > { %v4345_v58 = vmax.f32 %v4313_v15, 0.0  ;;  %v3804_v49 = vadd.f32 %v3737_v22, %v3138_v2  ;;  %v5292_v2 = vld [vmem:[%s5360_s6 + $0xc4] sm:$0xf]  ;;  %v3570_v22 = vshrl.u32 %v5067_v10, 16 }
 0x23e   : > { %v2623_v31 = vrot.slane %v5292_v2, 5 }
 0x23f   : > { %4377 = vst.msk [vmem:[%s6457_s18 + $0x40] sm:$0xff] %vm723_vm3, %v4345_v58  ;;  %v4214_v59 = vadd.f32 %v4147_v13, %v3804_v49  ;;  %v3074_v53 = vpop.f32.mrf.mxu2  ;;  %v6838_v58 = vld [vmem:[#allocation2_spill] sm:$0xff] }
 0x240   : > { %v3139_v39 = vadd.f32 %v3074_v53, %v2840_v3  ;;  %v2841_v49 = vadd.f32 %v2777_v43, %v6838_v58  ;;  %v4869_v3 = vrot.slane %v4853_v29, 9  ;;  %v2625_v53 = vrot.slane %v2623_v31, 4  ;;  %v4284_v58 = vld [vmem:[%s6423_s11 + $0x58] sm:$0xff] }
 0x241   : > { %v4250_v0 = vadd.f32 %v6428_v20, %v4214_v59  ;;  %5095 = vmatmul.msk.bf16.gmra.mxu3 %vm723_vm3, %v3643_v62  ;;  %v3573_v62 = vshll.u32 %v5067_v10, 16  ;;  %v3626_v59 = vunpack.c.l.b16 %v3558_v35  ;;  %v3992_v43 = vsel %vm5567_vm6, %v5128_v30, %v3991_v11 }
 0x242   : > { %v2627_v11 = vsel %vm5567_vm6, %v2625_v53, %v2626_v46  ;;  %v3586_v29 = vor.u32 %v3585_v23, %v3581_v1 }
 0x243   : > { %v4314_v47 = vadd.f32 %v4282_v12, %v4250_v0  ;;  %v4150_v61 = vpop.f32.mrf.mxu0  ;;  %v3627_v0 = vunpack.c.l.b16 %v3568_v5  ;;  %v3575_v52 = vrot.slane %v3573_v62, 5 }
 0x244   : > { %v3740_v60 = vpop.f32.mrf.mxu3  ;;  %v2780_v4 = vpop.f32.mrf.mxu1 }
 0x245   : > { %v4346_v15 = vmax.f32 %v4314_v47, 0.0  ;;  %v3805_v13 = vadd.f32 %v3740_v60, %v3139_v39  ;;  %v3572_v39 = vrot.slane %v3570_v22, 4  ;;  %v3995_v47 = vsel %vm5567_vm6, %v3993_v18, %v3994_v25 }
 0x246   : > { %5155 = vmatmul.msk.bf16.gmra.mxu0 %vm723_vm3, %v4053_v44  ;;  %v2624_v60 = vsel %vm5567_vm6, %v4869_v3, %v2623_v31  ;;  %v4037_v35 = vunpack.c.l.b16 %v3995_v47  ;;  %v2842_v63 = vadd.f32 %v2780_v4, %v6016_v57  ;;  %v3998_v57 = vrot.slane %v6664_v8, 5  ;;  %v4285_v47 = vld [vmem:[%s6423_s11 + $0x60] sm:$0xff] }
 0x247   : > { %4378 = vst.msk [vmem:[%s6457_s18 + $0x48] sm:$0xff] %vm723_vm3, %v4346_v15  ;;  %v4215_v41 = vadd.f32 %v4150_v61, %v3805_v13  ;;  %v3076_v21 = vpop.f32.mrf.mxu2  ;;  %4896 = vmatmul.msk.bf16.gmra.mxu1 %vm723_vm3, %v2679_v45  ;;  %v5069_v61 = vld [vmem:[%s5360_s6 + $0xd4] sm:$0x1]  ;;  %v3644_v15 = vpack.c.b16 %v3627_v0, %v3626_v59  ;;  %v4036_v13 = vunpack.c.l.b16 %v3992_v43  ;;  %v3576_v5 = vor.u32 %v3575_v52, %v3572_v39 }
 0x248   : > { %v3140_v16 = vadd.f32 %v3076_v21, %v2841_v49  ;;  %v3589_v22 = vshll.u32 %v5069_v61, 16  ;;  %v2663_v31 = vunpack.c.l.b16 %v2624_v60  ;;  %v5129_v39 = vrot.slane %v5113_v19, 9  ;;  %v4287_v19 = vld [vmem:[%s6423_s11 + $0x70] sm:$0xff] }
 0x249   : > { %v4251_v12 = vadd.f32 %v6428_v20, %v4215_v41  ;;  %v2664_v41 = vunpack.c.l.b16 %v2627_v11  ;;  %v4054_v18 = vpack.c.b16 %v4037_v35, %v4036_v13  ;;  %v3577_v25 = vrot.slane %v3576_v5, 4 }
 0x24b   : > { %v4315_v54 = vadd.f32 %v4283_v51, %v4251_v12  ;;  %v4152_v44 = vpop.f32.mrf.mxu0  ;;  %v3587_v51 = vrot.slane %v3586_v29, 4  ;;  %v2680_v53 = vpack.c.b16 %v2664_v41, %v2663_v31  ;;  %v3582_v0 = vsel %vm5372_vm2, %v3577_v25, %v3581_v1  ;;  %v4286_v31 = vld [vmem:[%s6423_s11 + $0x68] sm:$0xff] }
 0x24c   : > { %v3742_v45 = vpop.f32.mrf.mxu3  ;;  %5020 = vmatmul.msk.bf16.gmra.mxu2 %vm723_vm3, %v5220_v38  ;;  %v2782_v10 = vpop.f32.mrf.mxu1  ;;  %v3591_v38 = vrot.slane %v3589_v22, 5  ;;  %v3628_v11 = vunpack.c.l.b16 %v3582_v0 }
 0x24d   : > { %v4347_v30 = vmax.f32 %v4315_v54, 0.0  ;;  %v3806_v2 = vadd.f32 %v3742_v45, %v3140_v16  ;;  %v2843_v8 = vadd.f32 %v2782_v10, %v6036_v36  ;;  %v4000_v54 = vrot.slane %v3998_v57, 4  ;;  %v5221_v45 = vld [vmem:[%s5360_s6 + $0xcc] sm:$0xff] }
 0x24e   : > { %v3592_v43 = vsel %vm5372_vm2, %v3587_v51, %v3591_v38 }
 0x24f   : > { %4379 = vst.msk [vmem:[%s6457_s18 + $0x50] sm:$0xff] %vm723_vm3, %v4347_v30  ;;  %v4216_v62 = vadd.f32 %v4152_v44, %v3806_v2  ;;  %v3079_v33 = vpop.f32.mrf.mxu2  ;;  %v4001_v44 = vrot.slane %v5069_v61, 5  ;;  %v3629_v32 = vunpack.c.l.b16 %v3592_v43 }
 0x250   : > { %v3141_v21 = vadd.f32 %v3079_v33, %v2842_v63 }
 0x251   : > { %v4252_v49 = vadd.f32 %v6428_v20, %v4216_v62  ;;  %5096 = vmatmul.msk.bf16.gmra.mxu3 %vm723_vm3, %v3644_v15  ;;  %v3999_v15 = vsel %vm5567_vm6, %v5129_v39, %v3998_v57  ;;  %v4002_v36 = vsel %vm5567_vm6, %v4000_v54, %v4001_v44  ;;  %v3645_v5 = vpack.c.b16 %v3629_v32, %v3628_v11  ;;  %v4288_v54 = vld [vmem:[%s6423_s11 + $0x78] sm:$0xff] }
 0x252   : > { %v4038_v29 = vunpack.c.l.b16 %v3999_v15  ;;  %v4039_v22 = vunpack.c.l.b16 %v4002_v36 }
 0x253   : > { %v4316_v59 = vadd.f32 %v4284_v58, %v4252_v49  ;;  %v4155_v3 = vpop.f32.mrf.mxu0 }
 0x254   : > { %v3745_v4 = vpop.f32.mrf.mxu3  ;;  %v2785_v46 = vpop.f32.mrf.mxu1  ;;  %v4055_v58 = vpack.c.b16 %v4039_v22, %v4038_v29 }
 0x255   : > { %v4348_v12 = vmax.f32 %v4316_v59, 0.0  ;;  %v3807_v16 = vadd.f32 %v3745_v4, %v3141_v21  ;;  %v2844_v63 = vadd.f32 %v2785_v46, %v6055_v27  ;;  %v6839_v59 = vld [vmem:[#allocation3_spill] sm:$0xff] }
 0x256   : > { %5156 = vmatmul.msk.bf16.gmra.mxu0 %vm723_vm3, %v4054_v18 }
 0x257   : > { %4380 = vst.msk [vmem:[%s6457_s18 + $0x58] sm:$0xff] %vm723_vm3, %v4348_v12  ;;  %v4217_v52 = vadd.f32 %v4155_v3, %v3807_v16  ;;  %v3081_v23 = vpop.f32.mrf.mxu2  ;;  %4897 = vmatmul.msk.bf16.gmra.mxu1 %vm723_vm3, %v2680_v53 }
 0x258   : > { %v3142_v1 = vadd.f32 %v3081_v23, %v2843_v8 }
 0x259   : > { %v4253_v60 = vadd.f32 %v6428_v20, %v4217_v52 }
 0x25b   : > { %v4317_v30 = vadd.f32 %v4285_v47, %v4253_v60  ;;  %v4157_v2 = vpop.f32.mrf.mxu0 }
 0x25c   : > { %v3747_v10 = vpop.f32.mrf.mxu3  ;;  %5021 = vmatmul.msk.bf16.gmra.mxu2 %vm723_vm3, %v5221_v45  ;;  %v2787_v61 = vpop.f32.mrf.mxu1 }
 0x25d   : > { %v4349_v13 = vmax.f32 %v4317_v30, 0.0  ;;  %v3808_v35 = vadd.f32 %v3747_v10, %v3142_v1  ;;  %v2845_v3 = vadd.f32 %v2787_v61, %v6839_v59  ;;  %v4291_v59 = vld [vmem:[%s6423_s11 + $0x90] sm:$0xff] }
 0x25f   : > { %4381 = vst.msk [vmem:[%s6457_s18 + $0x60] sm:$0xff] %vm723_vm3, %v4349_v13  ;;  %v4218_v62 = vadd.f32 %v4157_v2, %v3808_v35  ;;  %v3084_v33 = vpop.f32.mrf.mxu2 }
 0x260   : > { %v3143_v41 = vadd.f32 %v3084_v33, %v2844_v63 }
 0x261   : > { %v4254_v26 = vadd.f32 %v6428_v20, %v4218_v62  ;;  %5097 = vmatmul.msk.bf16.gmra.mxu3 %vm723_vm3, %v3645_v5 }
 0x263   : > { %v4318_v49 = vadd.f32 %v4286_v31, %v4254_v26  ;;  %v4160_v21 = vpop.f32.mrf.mxu0 }
 0x264   : > { %v3750_v18 = vpop.f32.mrf.mxu3  ;;  %v2790_v25 = vpop.f32.mrf.mxu1 }
 0x265   : > { %v4350_v51 = vmax.f32 %v4318_v49, 0.0  ;;  %v3809_v38 = vadd.f32 %v3750_v18, %v3143_v41  ;;  %v2846_v8 = vadd.f32 %v2790_v25, %v6098_v7  ;;  %v4289_v7 = vld [vmem:[%s6423_s11 + $0x80] sm:$0xff] }
 0x266   : > { %5157 = vmatmul.msk.bf16.gmra.mxu0 %vm723_vm3, %v4055_v58 }
 0x267   : > { %4382 = vst.msk [vmem:[%s6457_s18 + $0x68] sm:$0xff] %vm723_vm3, %v4350_v51  ;;  %v4219_v27 = vadd.f32 %v4160_v21, %v3809_v38  ;;  %v3086_v53 = vpop.f32.mrf.mxu2 }
 0x268   : > { %v3144_v4 = vadd.f32 %v3086_v53, %v2845_v3 }
 0x269   : > { %v4255_v57 = vadd.f32 %v6428_v20, %v4219_v27 }
 0x26b   : > { %v4319_v46 = vadd.f32 %v4287_v19, %v4255_v57  ;;  %v4162_v12 = vpop.f32.mrf.mxu0 }
 0x26c   : > { %v3752_v16 = vpop.f32.mrf.mxu3  ;;  %v2792_v0 = vpop.f32.mrf.mxu1 }
 0x26d   : > { %v4351_v43 = vmax.f32 %v4319_v46, 0.0  ;;  %v3810_v39 = vadd.f32 %v3752_v16, %v3144_v4  ;;  %v2847_v15 = vadd.f32 %v2792_v0, %v6122_v17  ;;  %v4290_v17 = vld [vmem:[%s6423_s11 + $0x88] sm:$0xff] }
 0x26f   : > { %4383 = vst.msk [vmem:[%s6457_s18 + $0x70] sm:$0xff] %vm723_vm3, %v4351_v43  ;;  %v4220_v52 = vadd.f32 %v4162_v12, %v3810_v39  ;;  %v3089_v23 = vpop.f32.mrf.mxu2 }
 0x270   : > { %v3145_v47 = vadd.f32 %v3089_v23, %v2846_v8 }
 0x271   : > { %v4256_v44 = vadd.f32 %v6428_v20, %v4220_v52 }
 0x273   : > { %v4320_v45 = vadd.f32 %v4288_v54, %v4256_v44  ;;  %v4165_v60 = vpop.f32.mrf.mxu0 }
 0x274   : > { %v3755_v1 = vpop.f32.mrf.mxu3  ;;  %v2795_v11 = vpop.f32.mrf.mxu1 }
 0x275   : > { %v4352_v32 = vmax.f32 %v4320_v45, 0.0  ;;  %v3811_v30 = vadd.f32 %v3755_v1, %v3145_v47  ;;  %v2848_v33 = vadd.f32 %v2795_v11, %v6141_v24 }
 0x277   : > { %4384 = vst.msk [vmem:[%s6457_s18 + $0x78] sm:$0xff] %vm723_vm3, %v4352_v32  ;;  %v4221_v2 = vadd.f32 %v4165_v60, %v3811_v30  ;;  %v3091_v36 = vpop.f32.mrf.mxu2 }
 0x278   : > { %v3146_v61 = vadd.f32 %v3091_v36, %v2847_v15 }
 0x279   : > { %v4257_v10 = vadd.f32 %v6428_v20, %v4221_v2  ;;  %v6749_v20 = vld [vmem:[%s6829_s3] ss:$0 sm:$0xff] }
 0x27b   : > { %v4321_v13 = vadd.f32 %v4289_v7, %v4257_v10  ;;  %v4167_v35 = vpop.f32.mrf.mxu0 }
 0x27c   : > { %v3757_v5 = vpop.f32.mrf.mxu3  ;;  %v2797_v29 = vpop.f32.mrf.mxu1 }
 0x27d   : > { %v4353_v22 = vmax.f32 %v4321_v13, 0.0  ;;  %v3812_v62 = vadd.f32 %v3757_v5, %v3146_v61  ;;  %v2849_v38 = vadd.f32 %v2797_v29, %v6165_v50  ;;  %v4292_v50 = vld [vmem:[%s6423_s11 + $0x98] sm:$0xff] }
 0x27f   : > { %4385 = vst.msk [vmem:[%s6457_s18 + $0x80] sm:$0xff] %vm723_vm3, %v4353_v22  ;;  %v4222_v63 = vadd.f32 %v4167_v35, %v3812_v62  ;;  %v3094_v31 = vpop.f32.mrf.mxu2 }
 0x280   : > { %v3147_v41 = vadd.f32 %v3094_v31, %v2848_v33 }
 0x281   : > { %v4258_v26 = vadd.f32 %v6749_v20, %v4222_v63 }
 0x283   : > { %v4322_v58 = vadd.f32 %v4290_v17, %v4258_v26  ;;  %v4170_v49 = vpop.f32.mrf.mxu0 }
 0x284   : > { %v3760_v21 = vpop.f32.mrf.mxu3  ;;  %v2800_v18 = vpop.f32.mrf.mxu1 }
 0x285   : > { %v4354_v25 = vmax.f32 %v4322_v58, 0.0  ;;  %v3813_v51 = vadd.f32 %v3760_v21, %v3147_v41  ;;  %v2850_v43 = vadd.f32 %v2800_v18, %v6184_v56  ;;  %v4293_v56 = vld [vmem:[%s6423_s11 + $0xa0] sm:$0xff] }
 0x287   : > { %4386 = vst.msk [vmem:[%s6457_s18 + $0x88] sm:$0xff] %vm723_vm3, %v4354_v25  ;;  %v4223_v24 = vadd.f32 %v4170_v49, %v3813_v51  ;;  %v3096_v27 = vpop.f32.mrf.mxu2  ;;  %v6840_v49 = vld [vmem:[#allocation4_spill] sm:$0xff] }
 0x288   : > { %v3148_v53 = vadd.f32 %v3096_v27, %v2849_v38 }
 0x289   : > { %v4259_v3 = vadd.f32 %v6749_v20, %v4223_v24 }
 0x28b   : > { %v4323_v19 = vadd.f32 %v4291_v59, %v4259_v3  ;;  %v4172_v57 = vpop.f32.mrf.mxu0 }
 0x28c   : > { %v3762_v4 = vpop.f32.mrf.mxu3  ;;  %v2802_v46 = vpop.f32.mrf.mxu1 }
 0x28d   : > { %v4355_v12 = vmax.f32 %v4323_v19, 0.0  ;;  %v3814_v16 = vadd.f32 %v3762_v4, %v3148_v53  ;;  %v2851_v11 = vadd.f32 %v2802_v46, %v6208_v48  ;;  %v4294_v48 = vld [vmem:[%s6423_s11 + $0xa8] sm:$0xff]  ;;  %v4296_v46 = vld [vmem:[%s6423_s11 + $0xb8] sm:$0xff] }
 0x28f   : > { %4387 = vst.msk [vmem:[%s6457_s18 + $0x90] sm:$0xff] %vm723_vm3, %v4355_v12  ;;  %v4224_v0 = vadd.f32 %v4172_v57, %v3814_v16  ;;  %v3099_v39 = vpop.f32.mrf.mxu2 }
 0x290   : > { %v3149_v8 = vadd.f32 %v3099_v39, %v2850_v43 }
 0x291   : > { %v4260_v52 = vadd.f32 %v6749_v20, %v4224_v0 }
 0x293   : > { %v4324_v23 = vadd.f32 %v4292_v50, %v4260_v52  ;;  %v4175_v54 = vpop.f32.mrf.mxu0 }
 0x294   : > { %v3765_v44 = vpop.f32.mrf.mxu3  ;;  %v2805_v47 = vpop.f32.mrf.mxu1 }
 0x295   : > { %v4356_v45 = vmax.f32 %v4324_v23, 0.0  ;;  %v3815_v60 = vadd.f32 %v3765_v44, %v3149_v8  ;;  %v2852_v5 = vadd.f32 %v2805_v47, %v6227_v9  ;;  %v4295_v9 = vld [vmem:[%s6423_s11 + $0xb0] sm:$0xff] }
 0x297   : > { %4388 = vst.msk [vmem:[%s6457_s18 + $0x98] sm:$0xff] %vm723_vm3, %v4356_v45  ;;  %v4225_v1 = vadd.f32 %v4175_v54, %v3815_v60  ;;  %v3101_v32 = vpop.f32.mrf.mxu2 }
 0x298   : > { %v3150_v2 = vadd.f32 %v3101_v32, %v2851_v11 }
 0x299   : > { %v4261_v30 = vadd.f32 %v6749_v20, %v4225_v1 }
 0x29b   : > { %v4325_v15 = vadd.f32 %v4293_v56, %v4261_v30  ;;  %v4177_v36 = vpop.f32.mrf.mxu0 }
 0x29c   : > { %v3767_v7 = vpop.f32.mrf.mxu3  ;;  %v2807_v10 = vpop.f32.mrf.mxu1 }
 0x29d   : > { %v4357_v61 = vmax.f32 %v4325_v15, 0.0  ;;  %v3816_v13 = vadd.f32 %v3767_v7, %v3150_v2  ;;  %v2853_v21 = vadd.f32 %v2807_v10, %v6840_v49 }
 0x29f   : > { %4389 = vst.msk [vmem:[%s6457_s18 + $0xa0] sm:$0xff] %vm723_vm3, %v4357_v61  ;;  %v4226_v35 = vadd.f32 %v4177_v36, %v3816_v13  ;;  %v3104_v29 = vpop.f32.mrf.mxu2 }
 0x2a0   : > { %v3151_v62 = vadd.f32 %v3104_v29, %v2852_v5 }
 0x2a1   : > { %v4262_v22 = vadd.f32 %v6749_v20, %v4226_v35 }
 0x2a3   : > { %v4326_v63 = vadd.f32 %v4294_v48, %v4262_v22  ;;  %v4180_v33 = vpop.f32.mrf.mxu0 }
 0x2a4   : > { %v3770_v31 = vpop.f32.mrf.mxu3  ;;  %v2810_v17 = vpop.f32.mrf.mxu1 }
 0x2a5   : > { %v4358_v26 = vmax.f32 %v4326_v63, 0.0  ;;  %v3817_v41 = vadd.f32 %v3770_v31, %v3151_v62  ;;  %v2854_v57 = vadd.f32 %v2810_v17, %v6268_v14  ;;  %v4297_v14 = vld [vmem:[%s6423_s11 + $0xc0] sm:$0xff] }
 0x2a7   : > { %4390 = vst.msk [vmem:[%s6457_s18 + $0xa8] sm:$0xff] %vm723_vm3, %v4358_v26  ;;  %v4227_v58 = vadd.f32 %v4180_v33, %v3817_v41  ;;  %v3106_v18 = vpop.f32.mrf.mxu2 }
 0x2a8   : > { %v3152_v51 = vadd.f32 %v3106_v18, %v2853_v21 }
 0x2a9   : > { %v4263_v25 = vadd.f32 %v6749_v20, %v4227_v58 }
 0x2ab   : > { %v4327_v24 = vadd.f32 %v4295_v9, %v4263_v25  ;;  %v4182_v38 = vpop.f32.mrf.mxu0 }
 0x2ac   : > { %v3772_v27 = vpop.f32.mrf.mxu3  ;;  %v2812_v59 = vpop.f32.mrf.mxu1 }
 0x2ad   : > { %v4359_v3 = vmax.f32 %v4327_v24, 0.0  ;;  %v3818_v53 = vadd.f32 %v3772_v27, %v3152_v51  ;;  %v2855_v54 = vadd.f32 %v2812_v59, %v6289_v28  ;;  %v4298_v28 = vld [vmem:[%s6423_s11 + $0xc8] sm:$0xff] }
 0x2af   : > { %4391 = vst.msk [vmem:[%s6457_s18 + $0xb0] sm:$0xff] %vm723_vm3, %v4359_v3  ;;  %v4228_v19 = vadd.f32 %v4182_v38, %v3818_v53  ;;  %v3109_v4 = vpop.f32.mrf.mxu2 }
 0x2b0   : > { %v3153_v16 = vadd.f32 %v3109_v4, %v2854_v57 }
 0x2b1   : > { %v4264_v12 = vadd.f32 %v6749_v20, %v4228_v19 }
 0x2b3   : > { %v4328_v0 = vadd.f32 %v4296_v46, %v4264_v12  ;;  %v4185_v43 = vpop.f32.mrf.mxu0 }
 0x2b4   : > { %v3775_v39 = vpop.f32.mrf.mxu3  ;;  %v2815_v50 = vpop.f32.mrf.mxu1 }
 0x2b5   : > { %v4360_v52 = vmax.f32 %v4328_v0, 0.0  ;;  %v3819_v8 = vadd.f32 %v3775_v39, %v3153_v16  ;;  %v2856_v15 = vadd.f32 %v2815_v50, %v6307_v6  ;;  %v4299_v6 = vld [vmem:[%s6423_s11 + $0xd0] sm:$0xff] }
 0x2b7   : > { %4392 = vst.msk [vmem:[%s6457_s18 + $0xb8] sm:$0xff] %vm723_vm3, %v4360_v52  ;;  %v4229_v23 = vadd.f32 %v4185_v43, %v3819_v8  ;;  %v3111_v44 = vpop.f32.mrf.mxu2 }
 0x2b8   : > { %v3154_v45 = vadd.f32 %v3111_v44, %v2855_v54 }
 0x2b9   : > { %v4265_v47 = vadd.f32 %v6749_v20, %v4229_v23 }
 0x2bb   : > { %v4329_v60 = vadd.f32 %v4297_v14, %v4265_v47  ;;  %v4187_v1 = vpop.f32.mrf.mxu0 }
 0x2bc   : > { %v3777_v11 = vpop.f32.mrf.mxu3  ;;  %v2817_v32 = vpop.f32.mrf.mxu1 }
 0x2bd   : > { %v4361_v56 = vmax.f32 %v4329_v60, 0.0  ;;  %v3820_v30 = vadd.f32 %v3777_v11, %v3154_v45  ;;  %v2857_v62 = vadd.f32 %v2817_v32, %v6330_v42  ;;  %v4300_v42 = vld [vmem:[%s6423_s11 + $0xd8] sm:$0xff] }
 0x2bf   : > { %4393 = vst.msk [vmem:[%s6457_s18 + $0xc0] sm:$0xff] %vm723_vm3, %v4361_v56  ;;  %v4230_v2 = vadd.f32 %v4187_v1, %v3820_v30  ;;  %v3114_v36 = vpop.f32.mrf.mxu2 }
 0x2c0   : > { %v3155_v10 = vadd.f32 %v3114_v36, %v2856_v15 }
 0x2c1   : > { %v4266_v7 = vadd.f32 %v6749_v20, %v4230_v2  ;;  %v4303_v2 = vld [vmem:[%s6423_s11 + $0xf0] sm:$0xff] }
 0x2c3   : > { %v4330_v61 = vadd.f32 %v4298_v28, %v4266_v7  ;;  %v4190_v13 = vpop.f32.mrf.mxu0 }
 0x2c4   : > { %v3780_v35 = vpop.f32.mrf.mxu3  ;;  %v2820_v48 = vpop.f32.mrf.mxu1 }
 0x2c5   : > { %v4362_v5 = vmax.f32 %v4330_v61, 0.0  ;;  %v3821_v29 = vadd.f32 %v3780_v35, %v3155_v10  ;;  %v2858_v18 = vadd.f32 %v2820_v48, %v6350_v34  ;;  %v4301_v34 = vld [vmem:[%s6423_s11 + $0xe0] sm:$0xff] }
 0x2c7   : > { %4394 = vst.msk [vmem:[%s6457_s18 + $0xc8] sm:$0xff] %vm723_vm3, %v4362_v5  ;;  %v4231_v22 = vadd.f32 %v4190_v13, %v3821_v29  ;;  %v3116_v63 = vpop.f32.mrf.mxu2  ;;  %v4304_v5 = vld [vmem:[%s6423_s11 + $0xf8] sm:$0xff] }
 0x2c8   : > { %v3156_v31 = vadd.f32 %v3116_v63, %v2857_v62 }
 0x2c9   : > { %v4267_v33 = vadd.f32 %v6749_v20, %v4231_v22 }
 0x2cb   : > { %v4331_v17 = vadd.f32 %v4299_v6, %v4267_v33  ;;  %v4192_v26 = vpop.f32.mrf.mxu0 }
 0x2cc   : > { %v3782_v41 = vpop.f32.mrf.mxu3  ;;  %v2822_v25 = vpop.f32.mrf.mxu1 }
 0x2cd   : > { %v4363_v58 = vmax.f32 %v4331_v17, 0.0  ;;  %v3822_v49 = vadd.f32 %v3782_v41, %v3156_v31  ;;  %v2859_v57 = vadd.f32 %v2822_v25, %v6373_v55  ;;  %v4302_v55 = vld [vmem:[%s6423_s11 + $0xe8] sm:$0xff] }
 0x2cf   : > { %4395 = vst.msk [vmem:[%s6457_s18 + $0xd0] sm:$0xff] %vm723_vm3, %v4363_v58  ;;  %v4232_v21 = vadd.f32 %v4192_v26, %v3822_v49  ;;  %v3119_v9 = vpop.f32.mrf.mxu2 }
 0x2d0   : > { %v3157_v24 = vadd.f32 %v3119_v9, %v2858_v18 }
 0x2d1   : > { %v4268_v51 = vadd.f32 %v6749_v20, %v4232_v21 }
 0x2d3   : > { %v4332_v38 = vadd.f32 %v4300_v42, %v4268_v51  ;;  %v4195_v27 = vpop.f32.mrf.mxu0 }
 0x2d4   : > { %v3785_v59 = vpop.f32.mrf.mxu3  ;;  %v2825_v16 = vpop.f32.mrf.mxu1 }
 0x2d5   : > { %v4364_v3 = vmax.f32 %v4332_v38, 0.0  ;;  %v3823_v53 = vadd.f32 %v3785_v59, %v3157_v24  ;;  %v2860_v23 = vadd.f32 %v2825_v16, %v6391_v40 }
 0x2d7   : > { %4396 = vst.msk [vmem:[%s6457_s18 + $0xd8] sm:$0xff] %vm723_vm3, %v4364_v3  ;;  %v4233_v19 = vadd.f32 %v4195_v27, %v3823_v53  ;;  %v3121_v4 = vpop.f32.mrf.mxu2 }
 0x2d8   : > { %v3158_v12 = vadd.f32 %v3121_v4, %v2859_v57 }
 0x2d9   : > { %v4269_v46 = vadd.f32 %v6749_v20, %v4233_v19 }
 0x2db   : > { %v4333_v0 = vadd.f32 %v4301_v34, %v4269_v46  ;;  %v4197_v43 = vpop.f32.mrf.mxu0 }
 0x2dc   : > { %v3787_v39 = vpop.f32.mrf.mxu3  ;;  %v2827_v45 = vpop.f32.mrf.mxu1 }
 0x2dd   : > { %v4365_v50 = vmax.f32 %v4333_v0, 0.0  ;;  %v3824_v52 = vadd.f32 %v3787_v39, %v3158_v12  ;;  %v2861_v30 = vadd.f32 %v2827_v45, %v6413_v37 }
 0x2df   : > { %4397 = vst.msk [vmem:[%s6457_s18 + $0xe0] sm:$0xff] %vm723_vm3, %v4365_v50  ;;  %v4234_v8 = vadd.f32 %v4197_v43, %v3824_v52  ;;  %v3124_v54 = vpop.f32.mrf.mxu2 }
 0x2e0   : > { %v3159_v14 = vadd.f32 %v3124_v54, %v2860_v23 }
 0x2e1   : > { %v4270_v44 = vadd.f32 %v6749_v20, %v4234_v8 }
 0x2e3   : > { %v4334_v47 = vadd.f32 %v4302_v55, %v4270_v44  ;;  %v4200_v60 = vpop.f32.mrf.mxu0 }
 0x2e4   : > { %v3790_v1 = vpop.f32.mrf.mxu3 }
 0x2e5   : > { %v4366_v11 = vmax.f32 %v4334_v47, 0.0  ;;  %v3825_v32 = vadd.f32 %v3790_v1, %v3159_v14 }
 0x2e7   : > { %4398 = vst.msk [vmem:[%s6457_s18 + $0xe8] sm:$0xff] %vm723_vm3, %v4366_v11  ;;  %v4235_v56 = vadd.f32 %v4200_v60, %v3825_v32  ;;  %v3126_v40 = vpop.f32.mrf.mxu2 }
 0x2e8   : > { %v3160_v36 = vadd.f32 %v3126_v40, %v2861_v30 }
 0x2e9   : > { %v4271_v15 = vadd.f32 %v6749_v20, %v4235_v56 }
 0x2eb   : > { %v4335_v28 = vadd.f32 %v4303_v2, %v4271_v15  ;;  %v4202_v13 = vpop.f32.mrf.mxu0 }
 0x2ec   : > { %v3792_v7 = vpop.f32.mrf.mxu3 }
 0x2ed   : > { %v4367_v10 = vmax.f32 %v4335_v28, 0.0  ;;  %v3826_v61 = vadd.f32 %v3792_v7, %v3160_v36 }
 0x2ef   : > { %4399 = vst.msk [vmem:[%s6457_s18 + $0xf0] sm:$0xff] %vm723_vm3, %v4367_v10  ;;  %v4236_v35 = vadd.f32 %v4202_v13, %v3826_v61 }
 0x2f1   : > { %v4272_v29 = vadd.f32 %v6749_v20, %v4236_v35 }
 0x2f3   : > { %v4336_v48 = vadd.f32 %v4304_v5, %v4272_v29 }
 0x2f5   : > { %v4368_v22 = vmax.f32 %v4336_v48, 0.0 }
 0x2f7   : > { %4400 = vst.msk [vmem:[%s6457_s18 + $0xf8] sm:$0xff] %vm723_vm3, %v4368_v22 }
 0x2f8 PF: > { %s14_s15 = sadd.s32 1, %s5301_s15  }
 0x2f9   : > { %p11_p4 = scmp.ge.s32.totalorder %s14_s15, 4  }
 0x2fb   :  { %13 = sbr.rel (!%p11_p4) target bundleno = 1 (0x1), region = 79 }

</bundles_post_ra>
